<compile_context>
chip_gen: v5e
topology: v5e:2x2
jax: 0.10.0
libtpu: 0.0.40
codegen_flags: <defaults>
</compile_context>

<pallas_src>
import functools

import jax
import jax.numpy as jnp
from jax import lax
from jax.experimental import pallas as pl
from jax.experimental.pallas import tpu as pltpu


def _round_up(x, m):
    return (x + m - 1) // m * m


def _brnn_kernel(x_ref,                           # (T*Bp, nin)
                 wih_f_ref, whh_f_ref, b_f_ref,   # (nin,4Hp), (Hp,4Hp), (1,4Hp)
                 wih_b_ref, whh_b_ref, b_b_ref,   # reverse direction
                 wcf_ref, wcb_ref, bc_ref,        # (Hp,Np), (Hp,Np), (1,Np)
                 y_ref,                           # (T*Bp, Np)
                 gxf_ref, gxb_ref,                # scratch (T*Bp, 4Hp)
                 hf_ref, hb_ref,                  # scratch (T*Bp, Hp)
                 *, T, Bp, Hp):
    f32 = jnp.float32

    # ---- hoisted input projections: one big MXU matmul per direction -------
    x2d = x_ref[...]
    gxf_ref[...] = (jnp.dot(x2d, wih_f_ref[...], preferred_element_type=f32)
                    + b_f_ref[...])
    gxb_ref[...] = (jnp.dot(x2d, wih_b_ref[...], preferred_element_type=f32)
                    + b_b_ref[...])

    # Recurrent weights loaded once (loop constants).
    whh_f = whh_f_ref[...]
    whh_b = whh_b_ref[...]

    def gates(g, c):
        # PyTorch gate order: i, f, g, o; each slice is exactly Hp=128 lanes.
        i = jax.nn.sigmoid(g[:, 0 * Hp:1 * Hp])
        f = jax.nn.sigmoid(g[:, 1 * Hp:2 * Hp])
        gg = jnp.tanh(g[:, 2 * Hp:3 * Hp])
        o = jax.nn.sigmoid(g[:, 3 * Hp:4 * Hp])
        c_new = f * c + i * gg
        h_new = o * jnp.tanh(c_new)
        return h_new, c_new

    zeros = jnp.zeros((Bp, Hp), f32)

    # ---- interleaved fwd/bwd recurrence (two independent serial chains) ----
    # (On v7x the two directions could instead be split across the two
    # TensorCores; interleaving is the single-TC-friendly equivalent.)
    def step(t, carry):
        hf, cf, hb, cb = carry
        of = pl.multiple_of(t * Bp, Bp)                # fwd timestep t
        ob = pl.multiple_of((T - 1 - t) * Bp, Bp)      # bwd timestep T-1-t
        gf = gxf_ref[pl.ds(of, Bp), :] + jnp.dot(
            hf, whh_f, preferred_element_type=f32)
        gb = gxb_ref[pl.ds(ob, Bp), :] + jnp.dot(
            hb, whh_b, preferred_element_type=f32)
        hf, cf = gates(gf, cf)
        hb, cb = gates(gb, cb)
        hf_ref[pl.ds(of, Bp), :] = hf
        hb_ref[pl.ds(ob, Bp), :] = hb
        return hf, cf, hb, cb

    lax.fori_loop(0, T, step, (zeros, zeros, zeros, zeros), unroll=True)

    # ---- fused 1x1 conv: two matmuls + one contiguous lane-dense store -----
    y_ref[...] = (jnp.dot(hf_ref[...], wcf_ref[...], preferred_element_type=f32)
                  + jnp.dot(hb_ref[...], wcb_ref[...], preferred_element_type=f32)
                  + bc_ref[...])


def brnnin_forward(x_bct, params):
    """x_bct: (B, nin, T) float32.  Returns (B, nout, T) float32."""
    (wih_f, whh_f, bih_f, bhh_f,
     wih_b, whh_b, bih_b, bhh_b,
     wc, bc) = params                       # torch-shaped parameters

    B, nin, T = x_bct.shape
    H = whh_f.shape[1]                      # LSTM hidden size (= nout here)
    nout = wc.shape[0]

    Hp = _round_up(H, 128)                  # vreg-aligned hidden width
    Np = _round_up(nout, 128)               # lane-dense output width
    Bp = _round_up(B, 8)                    # sublane-aligned batch

    # ---- weight prep: transpose + zero-pad per gate so padded hidden lanes
    #      stay exactly zero through the recurrence ----
    def pad_ih(w):                          # (4H, nin) -> (nin, 4Hp)
        w4 = jnp.pad(w.reshape(4, H, nin), ((0, 0), (0, Hp - H), (0, 0)))
        return w4.reshape(4 * Hp, nin).T

    def pad_hh(w):                          # (4H, H) -> (Hp, 4Hp)
        w4 = jnp.pad(w.reshape(4, H, H), ((0, 0), (0, Hp - H), (0, Hp - H)))
        return w4.reshape(4 * Hp, Hp).T

    def pad_bias(b):                        # (4H,) -> (1, 4Hp)
        return jnp.pad(b.reshape(4, H), ((0, 0), (0, Hp - H))).reshape(1, 4 * Hp)

    wih_f_t = pad_ih(wih_f); whh_f_t = pad_hh(whh_f); b_f = pad_bias(bih_f + bhh_f)
    wih_b_t = pad_ih(wih_b); whh_b_t = pad_hh(whh_b); b_b = pad_bias(bih_b + bhh_b)

    w2 = jnp.squeeze(wc, axis=-1)                               # (nout, 2H)
    wcf = jnp.pad(w2[:, :H].T, ((0, Hp - H), (0, Np - nout)))   # (Hp, Np)
    wcb = jnp.pad(w2[:, H:].T, ((0, Hp - H), (0, Np - nout)))   # (Hp, Np)
    bc2 = jnp.pad(bc, (0, Np - nout)).reshape(1, Np)            # (1, Np)

    # ---- input: (B, nin, T) -> (T, Bp, nin) -> (T*Bp, nin) ----
    x_tbc = jnp.transpose(x_bct, (2, 0, 1)).astype(jnp.float32)
    x_tbc = jnp.pad(x_tbc, ((0, 0), (0, Bp - B), (0, 0)))
    x2d = x_tbc.reshape(T * Bp, nin)

    vmem = pl.BlockSpec(memory_space=pltpu.MemorySpace.VMEM)
    kernel = functools.partial(_brnn_kernel, T=T, Bp=Bp, Hp=Hp)

    # Whole problem is VMEM-resident (<2 MiB here); no grid needed.
    # TODO(synk): if T/B/H grow, add a grid over T-chunks (carry h/c in scratch)
    # instead of full-array residency, especially for v7x's 64 MiB VMEM.
    y2d = pl.pallas_call(
        kernel,
        out_shape=jax.ShapeDtypeStruct((T * Bp, Np), jnp.float32),
        in_specs=[vmem] * 10,
        out_specs=vmem,
        scratch_shapes=[pltpu.VMEM((T * Bp, 4 * Hp), jnp.float32),
                        pltpu.VMEM((T * Bp, 4 * Hp), jnp.float32),
                        pltpu.VMEM((T * Bp, Hp), jnp.float32),
                        pltpu.VMEM((T * Bp, Hp), jnp.float32)],
    )(x2d, wih_f_t, whh_f_t, b_f, wih_b_t, whh_b_t, b_b, wcf, wcb, bc2)

    y = y2d.reshape(T, Bp, Np)[:, :B, :nout]     # drop batch/lane padding
    return jnp.transpose(y, (1, 2, 0))           # (B, nout, T)


def brnnin_reference(x_bct, params):
    """Pure-JAX reference matching torch.nn.LSTM(bidirectional) + Conv1d(k=1)."""
    (wih_f, whh_f, bih_f, bhh_f,
     wih_b, whh_b, bih_b, bhh_b,
     wc, bc) = params
    B, nin, T = x_bct.shape
    H = whh_f.shape[1]
    x_tbc = jnp.transpose(x_bct, (2, 0, 1)).astype(jnp.float32)

    def make_step(wih, whh, b):
        def step(carry, xt):
            h, c = carry
            g = xt @ wih.T + h @ whh.T + b
            i = jax.nn.sigmoid(g[:, :H])
            f = jax.nn.sigmoid(g[:, H:2 * H])
            gg = jnp.tanh(g[:, 2 * H:3 * H])
            o = jax.nn.sigmoid(g[:, 3 * H:])
            c = f * c + i * gg
            h = o * jnp.tanh(c)
            return (h, c), h
        return step

    h0 = jnp.zeros((B, H), jnp.float32)
    c0 = jnp.zeros((B, H), jnp.float32)
    _, hf = lax.scan(make_step(wih_f, whh_f, bih_f + bhh_f), (h0, c0), x_tbc)
    _, hb = lax.scan(make_step(wih_b, whh_b, bih_b + bhh_b), (h0, c0),
                     x_tbc[::-1])
    hb = hb[::-1]
    h_cat = jnp.concatenate([hf, hb], axis=-1)          # (T, B, 2H)
    w = jnp.squeeze(wc, axis=-1)                        # (nout, 2H)
    y = jnp.einsum("tbc,nc->tbn", h_cat, w) + bc        # (T, B, nout)
    return jnp.transpose(y, (1, 2, 0))                  # (B, nout, T)


def init_params(key, nin, nout):
    H = nout
    k = 1.0 / jnp.sqrt(jnp.float32(H))
    keys = jax.random.split(key, 10)
    u = lambda kk, shape: jax.random.uniform(kk, shape, jnp.float32, -k, k)
    wih_f = u(keys[0], (4 * H, nin))
    whh_f = u(keys[1], (4 * H, H))
    bih_f = u(keys[2], (4 * H,))
    bhh_f = u(keys[3], (4 * H,))
    wih_b = u(keys[4], (4 * H, nin))
    whh_b = u(keys[5], (4 * H, H))
    bih_b = u(keys[6], (4 * H,))
    bhh_b = u(keys[7], (4 * H,))
    wc = u(keys[8], (nout, 2 * H, 1))
    bc = u(keys[9], (nout,))
    return (wih_f, whh_f, bih_f, bhh_f,
            wih_b, whh_b, bih_b, bhh_b,
            wc, bc)


if __name__ == "__main__":
    nin, nout = 64, 96
    B, T = 2, 8

    key = jax.random.PRNGKey(0)
    k_x, k_p = jax.random.split(key)
    x = jax.random.normal(k_x, (B, nin, T), jnp.float32)
    params = init_params(k_p, nin, nout)

    y = brnnin_forward(x, params)
    y = jax.block_until_ready(y)

    y_ref = jax.block_until_ready(brnnin_reference(x, params))
    assert y.shape == (B, nout, T), y.shape
    assert jnp.allclose(y, y_ref, atol=1e-4, rtol=1e-4), (
        float(jnp.max(jnp.abs(y - y_ref))))

    print("KERNEL_OK")
</pallas_src>

<mosaic_0001>
module attributes {stable_mosaic.version = 11 : i64} {
  func.func @_brnn_kernel(%arg0: memref<64x64xf32, #tpu.memory_space<vmem>>, %arg1: memref<64x512xf32, #tpu.memory_space<vmem>>, %arg2: memref<128x512xf32, #tpu.memory_space<vmem>>, %arg3: memref<1x512xf32, #tpu.memory_space<vmem>>, %arg4: memref<64x512xf32, #tpu.memory_space<vmem>>, %arg5: memref<128x512xf32, #tpu.memory_space<vmem>>, %arg6: memref<1x512xf32, #tpu.memory_space<vmem>>, %arg7: memref<128x128xf32, #tpu.memory_space<vmem>>, %arg8: memref<128x128xf32, #tpu.memory_space<vmem>>, %arg9: memref<1x128xf32, #tpu.memory_space<vmem>>, %arg10: memref<64x128xf32, #tpu.memory_space<vmem>>, %arg11: memref<64x512xf32, #tpu.memory_space<vmem>>, %arg12: memref<64x512xf32, #tpu.memory_space<vmem>>, %arg13: memref<64x128xf32, #tpu.memory_space<vmem>>, %arg14: memref<64x128xf32, #tpu.memory_space<vmem>>) attributes {dimension_semantics = [], scalar_prefetch = 0 : i64, scratch_operands = 4 : i64, tpu.core_type = #tpu.core_type<tc>} {
    %c0 = arith.constant 0 : index
    %c0_0 = arith.constant 0 : index
    %0 = vector.load %arg0[%c0, %c0_0] : memref<64x64xf32, #tpu.memory_space<vmem>>, vector<64x64xf32>
    %c0_1 = arith.constant 0 : index
    %c0_2 = arith.constant 0 : index
    %1 = vector.load %arg1[%c0_1, %c0_2] : memref<64x512xf32, #tpu.memory_space<vmem>>, vector<64x512xf32>
    %cst = arith.constant dense<0.000000e+00> : vector<64x512xf32>
    %2 = tpu.matmul %0, %1, %cst {dimension_numbers = #tpu.dot_dimension_numbers<[1], [0], [0], [1], [0, 0, 1, 1], [], []>} : vector<64x64xf32>, vector<64x512xf32>, vector<64x512xf32> -> vector<64x512xf32>
    %c0_3 = arith.constant 0 : index
    %c0_4 = arith.constant 0 : index
    %3 = vector.load %arg3[%c0_3, %c0_4] : memref<1x512xf32, #tpu.memory_space<vmem>>, vector<1x512xf32>
    %4 = vector.broadcast %3 : vector<1x512xf32> to vector<64x512xf32>
    %5 = arith.addf %2, %4 : vector<64x512xf32>
    %c0_5 = arith.constant 0 : index
    %c0_6 = arith.constant 0 : index
    %6 = vector.load %arg11[%c0_5, %c0_6] : memref<64x512xf32, #tpu.memory_space<vmem>>, vector<64x512xf32>
    tpu.vector_store %arg11[%c0_5, %c0_6], %5 {strides = array<i32>} : memref<64x512xf32, #tpu.memory_space<vmem>>, vector<64x512xf32>,
    %c0_7 = arith.constant 0 : index
    %c0_8 = arith.constant 0 : index
    %7 = vector.load %arg4[%c0_7, %c0_8] : memref<64x512xf32, #tpu.memory_space<vmem>>, vector<64x512xf32>
    %cst_9 = arith.constant dense<0.000000e+00> : vector<64x512xf32>
    %8 = tpu.matmul %0, %7, %cst_9 {dimension_numbers = #tpu.dot_dimension_numbers<[1], [0], [0], [1], [0, 0, 1, 1], [], []>} : vector<64x64xf32>, vector<64x512xf32>, vector<64x512xf32> -> vector<64x512xf32>
    %c0_10 = arith.constant 0 : index
    %c0_11 = arith.constant 0 : index
    %9 = vector.load %arg6[%c0_10, %c0_11] : memref<1x512xf32, #tpu.memory_space<vmem>>, vector<1x512xf32>
    %10 = vector.broadcast %9 : vector<1x512xf32> to vector<64x512xf32>
    %11 = arith.addf %8, %10 : vector<64x512xf32>
    %c0_12 = arith.constant 0 : index
    %c0_13 = arith.constant 0 : index
    %12 = vector.load %arg12[%c0_12, %c0_13] : memref<64x512xf32, #tpu.memory_space<vmem>>, vector<64x512xf32>
    tpu.vector_store %arg12[%c0_12, %c0_13], %11 {strides = array<i32>} : memref<64x512xf32, #tpu.memory_space<vmem>>, vector<64x512xf32>,
    %c0_14 = arith.constant 0 : index
    %c0_15 = arith.constant 0 : index
    %13 = vector.load %arg2[%c0_14, %c0_15] : memref<128x512xf32, #tpu.memory_space<vmem>>, vector<128x512xf32>
    %c0_16 = arith.constant 0 : index
    %c0_17 = arith.constant 0 : index
    %14 = vector.load %arg5[%c0_16, %c0_17] : memref<128x512xf32, #tpu.memory_space<vmem>>, vector<128x512xf32>
    %cst_18 = arith.constant 0.000000e+00 : f32
    %15 = vector.broadcast %cst_18 : f32 to vector<8x128xf32>
    %c0_i32 = arith.constant 0 : i32
    %c8_i32 = arith.constant 8 : i32
    %16 = arith.muli %c0_i32, %c8_i32 : i32
    %17 = tpu.assume_multiple %16, 8 : i32
    %c7_i32 = arith.constant 7 : i32
    %18 = arith.subi %c7_i32, %c0_i32 : i32
    %c8_i32_19 = arith.constant 8 : i32
    %19 = arith.muli %18, %c8_i32_19 : i32
    %20 = tpu.assume_multiple %19, 8 : i32
    %21 = arith.index_cast %17 : i32 to index
    %c0_20 = arith.constant 0 : index
    %22 = vector.load %arg11[%21, %c0_20] : memref<64x512xf32, #tpu.memory_space<vmem>>, vector<8x512xf32>
    %cst_21 = arith.constant dense<0.000000e+00> : vector<8x512xf32>
    %23 = tpu.matmul %15, %13, %cst_21 {dimension_numbers = #tpu.dot_dimension_numbers<[1], [0], [0], [1], [0, 0, 1, 1], [], []>} : vector<8x128xf32>, vector<128x512xf32>, vector<8x512xf32> -> vector<8x512xf32>
    %24 = arith.addf %22, %23 : vector<8x512xf32>
    %25 = arith.index_cast %20 : i32 to index
    %c0_22 = arith.constant 0 : index
    %26 = vector.load %arg12[%25, %c0_22] : memref<64x512xf32, #tpu.memory_space<vmem>>, vector<8x512xf32>
    %cst_23 = arith.constant dense<0.000000e+00> : vector<8x512xf32>
    %27 = tpu.matmul %15, %14, %cst_23 {dimension_numbers = #tpu.dot_dimension_numbers<[1], [0], [0], [1], [0, 0, 1, 1], [], []>} : vector<8x128xf32>, vector<128x512xf32>, vector<8x512xf32> -> vector<8x512xf32>
    %28 = arith.addf %26, %27 : vector<8x512xf32>
    %29 = vector.extract_strided_slice %24 {offsets = [0, 0], sizes = [8, 128], strides = [1, 1]} : vector<8x512xf32> to vector<8x128xf32>
    %30 = arith.negf %29 : vector<8x128xf32>
    %31 = math.exp %30 : vector<8x128xf32>
    %cst_24 = arith.constant 1.000000e+00 : f32
    %32 = vector.broadcast %cst_24 : f32 to vector<8x128xf32>
    %33 = arith.addf %32, %31 : vector<8x128xf32>
    %34 = arith.divf %32, %33 : vector<8x128xf32>
    %35 = vector.extract_strided_slice %24 {offsets = [0, 128], sizes = [8, 128], strides = [1, 1]} : vector<8x512xf32> to vector<8x128xf32>
    %36 = arith.negf %35 : vector<8x128xf32>
    %37 = math.exp %36 : vector<8x128xf32>
    %cst_25 = arith.constant 1.000000e+00 : f32
    %38 = vector.broadcast %cst_25 : f32 to vector<8x128xf32>
    %39 = arith.addf %38, %37 : vector<8x128xf32>
    %40 = arith.divf %38, %39 : vector<8x128xf32>
    %41 = vector.extract_strided_slice %24 {offsets = [0, 256], sizes = [8, 128], strides = [1, 1]} : vector<8x512xf32> to vector<8x128xf32>
    %42 = math.tanh %41 : vector<8x128xf32>
    %43 = vector.extract_strided_slice %24 {offsets = [0, 384], sizes = [8, 128], strides = [1, 1]} : vector<8x512xf32> to vector<8x128xf32>
    %44 = arith.negf %43 : vector<8x128xf32>
    %45 = math.exp %44 : vector<8x128xf32>
    %cst_26 = arith.constant 1.000000e+00 : f32
    %46 = vector.broadcast %cst_26 : f32 to vector<8x128xf32>
    %47 = arith.addf %46, %45 : vector<8x128xf32>
    %48 = arith.divf %46, %47 : vector<8x128xf32>
    %49 = arith.mulf %40, %15 : vector<8x128xf32>
    %50 = arith.mulf %34, %42 : vector<8x128xf32>
    %51 = arith.addf %49, %50 : vector<8x128xf32>
    %52 = math.tanh %51 : vector<8x128xf32>
    %53 = arith.mulf %48, %52 : vector<8x128xf32>
    %54 = vector.extract_strided_slice %28 {offsets = [0, 0], sizes = [8, 128], strides = [1, 1]} : vector<8x512xf32> to vector<8x128xf32>
    %55 = arith.negf %54 : vector<8x128xf32>
    %56 = math.exp %55 : vector<8x128xf32>
    %cst_27 = arith.constant 1.000000e+00 : f32
    %57 = vector.broadcast %cst_27 : f32 to vector<8x128xf32>
    %58 = arith.addf %57, %56 : vector<8x128xf32>
    %59 = arith.divf %57, %58 : vector<8x128xf32>
    %60 = vector.extract_strided_slice %28 {offsets = [0, 128], sizes = [8, 128], strides = [1, 1]} : vector<8x512xf32> to vector<8x128xf32>
    %61 = arith.negf %60 : vector<8x128xf32>
    %62 = math.exp %61 : vector<8x128xf32>
    %cst_28 = arith.constant 1.000000e+00 : f32
    %63 = vector.broadcast %cst_28 : f32 to vector<8x128xf32>
    %64 = arith.addf %63, %62 : vector<8x128xf32>
    %65 = arith.divf %63, %64 : vector<8x128xf32>
    %66 = vector.extract_strided_slice %28 {offsets = [0, 256], sizes = [8, 128], strides = [1, 1]} : vector<8x512xf32> to vector<8x128xf32>
    %67 = math.tanh %66 : vector<8x128xf32>
    %68 = vector.extract_strided_slice %28 {offsets = [0, 384], sizes = [8, 128], strides = [1, 1]} : vector<8x512xf32> to vector<8x128xf32>
    %69 = arith.negf %68 : vector<8x128xf32>
    %70 = math.exp %69 : vector<8x128xf32>
    %cst_29 = arith.constant 1.000000e+00 : f32
    %71 = vector.broadcast %cst_29 : f32 to vector<8x128xf32>
    %72 = arith.addf %71, %70 : vector<8x128xf32>
    %73 = arith.divf %71, %72 : vector<8x128xf32>
    %74 = arith.mulf %65, %15 : vector<8x128xf32>
    %75 = arith.mulf %59, %67 : vector<8x128xf32>
    %76 = arith.addf %74, %75 : vector<8x128xf32>
    %77 = math.tanh %76 : vector<8x128xf32>
    %78 = arith.mulf %73, %77 : vector<8x128xf32>
    %79 = arith.index_cast %17 : i32 to index
    %c0_30 = arith.constant 0 : index
    %80 = vector.load %arg13[%79, %c0_30] : memref<64x128xf32, #tpu.memory_space<vmem>>, vector<8x128xf32>
    tpu.vector_store %arg13[%79, %c0_30], %53 {strides = array<i32>} : memref<64x128xf32, #tpu.memory_space<vmem>>, vector<8x128xf32>,
    %81 = arith.index_cast %20 : i32 to index
    %c0_31 = arith.constant 0 : index
    %82 = vector.load %arg14[%81, %c0_31] : memref<64x128xf32, #tpu.memory_space<vmem>>, vector<8x128xf32>
    tpu.vector_store %arg14[%81, %c0_31], %78 {strides = array<i32>} : memref<64x128xf32, #tpu.memory_space<vmem>>, vector<8x128xf32>,
    %c1_i32 = arith.constant 1 : i32
    %c8_i32_32 = arith.constant 8 : i32
    %83 = arith.muli %c1_i32, %c8_i32_32 : i32
    %84 = tpu.assume_multiple %83, 8 : i32
    %c7_i32_33 = arith.constant 7 : i32
    %85 = arith.subi %c7_i32_33, %c1_i32 : i32
    %c8_i32_34 = arith.constant 8 : i32
    %86 = arith.muli %85, %c8_i32_34 : i32
    %87 = tpu.assume_multiple %86, 8 : i32
    %88 = arith.index_cast %84 : i32 to index
    %c0_35 = arith.constant 0 : index
    %89 = vector.load %arg11[%88, %c0_35] : memref<64x512xf32, #tpu.memory_space<vmem>>, vector<8x512xf32>
    %cst_36 = arith.constant dense<0.000000e+00> : vector<8x512xf32>
    %90 = tpu.matmul %53, %13, %cst_36 {dimension_numbers = #tpu.dot_dimension_numbers<[1], [0], [0], [1], [0, 0, 1, 1], [], []>} : vector<8x128xf32>, vector<128x512xf32>, vector<8x512xf32> -> vector<8x512xf32>
    %91 = arith.addf %89, %90 : vector<8x512xf32>
    %92 = arith.index_cast %87 : i32 to index
    %c0_37 = arith.constant 0 : index
    %93 = vector.load %arg12[%92, %c0_37] : memref<64x512xf32, #tpu.memory_space<vmem>>, vector<8x512xf32>
    %cst_38 = arith.constant dense<0.000000e+00> : vector<8x512xf32>
    %94 = tpu.matmul %78, %14, %cst_38 {dimension_numbers = #tpu.dot_dimension_numbers<[1], [0], [0], [1], [0, 0, 1, 1], [], []>} : vector<8x128xf32>, vector<128x512xf32>, vector<8x512xf32> -> vector<8x512xf32>
    %95 = arith.addf %93, %94 : vector<8x512xf32>
    %96 = vector.extract_strided_slice %91 {offsets = [0, 0], sizes = [8, 128], strides = [1, 1]} : vector<8x512xf32> to vector<8x128xf32>
    %97 = arith.negf %96 : vector<8x128xf32>
    %98 = math.exp %97 : vector<8x128xf32>
    %cst_39 = arith.constant 1.000000e+00 : f32
    %99 = vector.broadcast %cst_39 : f32 to vector<8x128xf32>
    %100 = arith.addf %99, %98 : vector<8x128xf32>
    %101 = arith.divf %99, %100 : vector<8x128xf32>
    %102 = vector.extract_strided_slice %91 {offsets = [0, 128], sizes = [8, 128], strides = [1, 1]} : vector<8x512xf32> to vector<8x128xf32>
    %103 = arith.negf %102 : vector<8x128xf32>
    %104 = math.exp %103 : vector<8x128xf32>
    %cst_40 = arith.constant 1.000000e+00 : f32
    %105 = vector.broadcast %cst_40 : f32 to vector<8x128xf32>
    %106 = arith.addf %105, %104 : vector<8x128xf32>
    %107 = arith.divf %105, %106 : vector<8x128xf32>
    %108 = vector.extract_strided_slice %91 {offsets = [0, 256], sizes = [8, 128], strides = [1, 1]} : vector<8x512xf32> to vector<8x128xf32>
    %109 = math.tanh %108 : vector<8x128xf32>
    %110 = vector.extract_strided_slice %91 {offsets = [0, 384], sizes = [8, 128], strides = [1, 1]} : vector<8x512xf32> to vector<8x128xf32>
    %111 = arith.negf %110 : vector<8x128xf32>
    %112 = math.exp %111 : vector<8x128xf32>
    %cst_41 = arith.constant 1.000000e+00 : f32
    %113 = vector.broadcast %cst_41 : f32 to vector<8x128xf32>
    %114 = arith.addf %113, %112 : vector<8x128xf32>
    %115 = arith.divf %113, %114 : vector<8x128xf32>
    %116 = arith.mulf %107, %51 : vector<8x128xf32>
    %117 = arith.mulf %101, %109 : vector<8x128xf32>
    %118 = arith.addf %116, %117 : vector<8x128xf32>
    %119 = math.tanh %118 : vector<8x128xf32>
    %120 = arith.mulf %115, %119 : vector<8x128xf32>
    %121 = vector.extract_strided_slice %95 {offsets = [0, 0], sizes = [8, 128], strides = [1, 1]} : vector<8x512xf32> to vector<8x128xf32>
    %122 = arith.negf %121 : vector<8x128xf32>
    %123 = math.exp %122 : vector<8x128xf32>
    %cst_42 = arith.constant 1.000000e+00 : f32
    %124 = vector.broadcast %cst_42 : f32 to vector<8x128xf32>
    %125 = arith.addf %124, %123 : vector<8x128xf32>
    %126 = arith.divf %124, %125 : vector<8x128xf32>
    %127 = vector.extract_strided_slice %95 {offsets = [0, 128], sizes = [8, 128], strides = [1, 1]} : vector<8x512xf32> to vector<8x128xf32>
    %128 = arith.negf %127 : vector<8x128xf32>
    %129 = math.exp %128 : vector<8x128xf32>
    %cst_43 = arith.constant 1.000000e+00 : f32
    %130 = vector.broadcast %cst_43 : f32 to vector<8x128xf32>
    %131 = arith.addf %130, %129 : vector<8x128xf32>
    %132 = arith.divf %130, %131 : vector<8x128xf32>
    %133 = vector.extract_strided_slice %95 {offsets = [0, 256], sizes = [8, 128], strides = [1, 1]} : vector<8x512xf32> to vector<8x128xf32>
    %134 = math.tanh %133 : vector<8x128xf32>
    %135 = vector.extract_strided_slice %95 {offsets = [0, 384], sizes = [8, 128], strides = [1, 1]} : vector<8x512xf32> to vector<8x128xf32>
    %136 = arith.negf %135 : vector<8x128xf32>
    %137 = math.exp %136 : vector<8x128xf32>
    %cst_44 = arith.constant 1.000000e+00 : f32
    %138 = vector.broadcast %cst_44 : f32 to vector<8x128xf32>
    %139 = arith.addf %138, %137 : vector<8x128xf32>
    %140 = arith.divf %138, %139 : vector<8x128xf32>
    %141 = arith.mulf %132, %76 : vector<8x128xf32>
    %142 = arith.mulf %126, %134 : vector<8x128xf32>
    %143 = arith.addf %141, %142 : vector<8x128xf32>
    %144 = math.tanh %143 : vector<8x128xf32>
    %145 = arith.mulf %140, %144 : vector<8x128xf32>
    %146 = arith.index_cast %84 : i32 to index
    %c0_45 = arith.constant 0 : index
    %147 = vector.load %arg13[%146, %c0_45] : memref<64x128xf32, #tpu.memory_space<vmem>>, vector<8x128xf32>
    tpu.vector_store %arg13[%146, %c0_45], %120 {strides = array<i32>} : memref<64x128xf32, #tpu.memory_space<vmem>>, vector<8x128xf32>,
    %148 = arith.index_cast %87 : i32 to index
    %c0_46 = arith.constant 0 : index
    %149 = vector.load %arg14[%148, %c0_46] : memref<64x128xf32, #tpu.memory_space<vmem>>, vector<8x128xf32>
    tpu.vector_store %arg14[%148, %c0_46], %145 {strides = array<i32>} : memref<64x128xf32, #tpu.memory_space<vmem>>, vector<8x128xf32>,
    %c2_i32 = arith.constant 2 : i32
    %c8_i32_47 = arith.constant 8 : i32
    %150 = arith.muli %c2_i32, %c8_i32_47 : i32
    %151 = tpu.assume_multiple %150, 8 : i32
    %c7_i32_48 = arith.constant 7 : i32
    %152 = arith.subi %c7_i32_48, %c2_i32 : i32
    %c8_i32_49 = arith.constant 8 : i32
    %153 = arith.muli %152, %c8_i32_49 : i32
    %154 = tpu.assume_multiple %153, 8 : i32
    %155 = arith.index_cast %151 : i32 to index
    %c0_50 = arith.constant 0 : index
    %156 = vector.load %arg11[%155, %c0_50] : memref<64x512xf32, #tpu.memory_space<vmem>>, vector<8x512xf32>
    %cst_51 = arith.constant dense<0.000000e+00> : vector<8x512xf32>
    %157 = tpu.matmul %120, %13, %cst_51 {dimension_numbers = #tpu.dot_dimension_numbers<[1], [0], [0], [1], [0, 0, 1, 1], [], []>} : vector<8x128xf32>, vector<128x512xf32>, vector<8x512xf32> -> vector<8x512xf32>
    %158 = arith.addf %156, %157 : vector<8x512xf32>
    %159 = arith.index_cast %154 : i32 to index
    %c0_52 = arith.constant 0 : index
    %160 = vector.load %arg12[%159, %c0_52] : memref<64x512xf32, #tpu.memory_space<vmem>>, vector<8x512xf32>
    %cst_53 = arith.constant dense<0.000000e+00> : vector<8x512xf32>
    %161 = tpu.matmul %145, %14, %cst_53 {dimension_numbers = #tpu.dot_dimension_numbers<[1], [0], [0], [1], [0, 0, 1, 1], [], []>} : vector<8x128xf32>, vector<128x512xf32>, vector<8x512xf32> -> vector<8x512xf32>
    %162 = arith.addf %160, %161 : vector<8x512xf32>
    %163 = vector.extract_strided_slice %158 {offsets = [0, 0], sizes = [8, 128], strides = [1, 1]} : vector<8x512xf32> to vector<8x128xf32>
    %164 = arith.negf %163 : vector<8x128xf32>
    %165 = math.exp %164 : vector<8x128xf32>
    %cst_54 = arith.constant 1.000000e+00 : f32
    %166 = vector.broadcast %cst_54 : f32 to vector<8x128xf32>
    %167 = arith.addf %166, %165 : vector<8x128xf32>
    %168 = arith.divf %166, %167 : vector<8x128xf32>
    %169 = vector.extract_strided_slice %158 {offsets = [0, 128], sizes = [8, 128], strides = [1, 1]} : vector<8x512xf32> to vector<8x128xf32>
    %170 = arith.negf %169 : vector<8x128xf32>
    %171 = math.exp %170 : vector<8x128xf32>
    %cst_55 = arith.constant 1.000000e+00 : f32
    %172 = vector.broadcast %cst_55 : f32 to vector<8x128xf32>
    %173 = arith.addf %172, %171 : vector<8x128xf32>
    %174 = arith.divf %172, %173 : vector<8x128xf32>
    %175 = vector.extract_strided_slice %158 {offsets = [0, 256], sizes = [8, 128], strides = [1, 1]} : vector<8x512xf32> to vector<8x128xf32>
    %176 = math.tanh %175 : vector<8x128xf32>
    %177 = vector.extract_strided_slice %158 {offsets = [0, 384], sizes = [8, 128], strides = [1, 1]} : vector<8x512xf32> to vector<8x128xf32>
    %178 = arith.negf %177 : vector<8x128xf32>
    %179 = math.exp %178 : vector<8x128xf32>
    %cst_56 = arith.constant 1.000000e+00 : f32
    %180 = vector.broadcast %cst_56 : f32 to vector<8x128xf32>
    %181 = arith.addf %180, %179 : vector<8x128xf32>
    %182 = arith.divf %180, %181 : vector<8x128xf32>
    %183 = arith.mulf %174, %118 : vector<8x128xf32>
    %184 = arith.mulf %168, %176 : vector<8x128xf32>
    %185 = arith.addf %183, %184 : vector<8x128xf32>
    %186 = math.tanh %185 : vector<8x128xf32>
    %187 = arith.mulf %182, %186 : vector<8x128xf32>
    %188 = vector.extract_strided_slice %162 {offsets = [0, 0], sizes = [8, 128], strides = [1, 1]} : vector<8x512xf32> to vector<8x128xf32>
    %189 = arith.negf %188 : vector<8x128xf32>
    %190 = math.exp %189 : vector<8x128xf32>
    %cst_57 = arith.constant 1.000000e+00 : f32
    %191 = vector.broadcast %cst_57 : f32 to vector<8x128xf32>
    %192 = arith.addf %191, %190 : vector<8x128xf32>
    %193 = arith.divf %191, %192 : vector<8x128xf32>
    %194 = vector.extract_strided_slice %162 {offsets = [0, 128], sizes = [8, 128], strides = [1, 1]} : vector<8x512xf32> to vector<8x128xf32>
    %195 = arith.negf %194 : vector<8x128xf32>
    %196 = math.exp %195 : vector<8x128xf32>
    %cst_58 = arith.constant 1.000000e+00 : f32
    %197 = vector.broadcast %cst_58 : f32 to vector<8x128xf32>
    %198 = arith.addf %197, %196 : vector<8x128xf32>
    %199 = arith.divf %197, %198 : vector<8x128xf32>
    %200 = vector.extract_strided_slice %162 {offsets = [0, 256], sizes = [8, 128], strides = [1, 1]} : vector<8x512xf32> to vector<8x128xf32>
    %201 = math.tanh %200 : vector<8x128xf32>
    %202 = vector.extract_strided_slice %162 {offsets = [0, 384], sizes = [8, 128], strides = [1, 1]} : vector<8x512xf32> to vector<8x128xf32>
    %203 = arith.negf %202 : vector<8x128xf32>
    %204 = math.exp %203 : vector<8x128xf32>
    %cst_59 = arith.constant 1.000000e+00 : f32
    %205 = vector.broadcast %cst_59 : f32 to vector<8x128xf32>
    %206 = arith.addf %205, %204 : vector<8x128xf32>
    %207 = arith.divf %205, %206 : vector<8x128xf32>
    %208 = arith.mulf %199, %143 : vector<8x128xf32>
    %209 = arith.mulf %193, %201 : vector<8x128xf32>
    %210 = arith.addf %208, %209 : vector<8x128xf32>
    %211 = math.tanh %210 : vector<8x128xf32>
    %212 = arith.mulf %207, %211 : vector<8x128xf32>
    %213 = arith.index_cast %151 : i32 to index
    %c0_60 = arith.constant 0 : index
    %214 = vector.load %arg13[%213, %c0_60] : memref<64x128xf32, #tpu.memory_space<vmem>>, vector<8x128xf32>
    tpu.vector_store %arg13[%213, %c0_60], %187 {strides = array<i32>} : memref<64x128xf32, #tpu.memory_space<vmem>>, vector<8x128xf32>,
    %215 = arith.index_cast %154 : i32 to index
    %c0_61 = arith.constant 0 : index
    %216 = vector.load %arg14[%215, %c0_61] : memref<64x128xf32, #tpu.memory_space<vmem>>, vector<8x128xf32>
    tpu.vector_store %arg14[%215, %c0_61], %212 {strides = array<i32>} : memref<64x128xf32, #tpu.memory_space<vmem>>, vector<8x128xf32>,
    %c3_i32 = arith.constant 3 : i32
    %c8_i32_62 = arith.constant 8 : i32
    %217 = arith.muli %c3_i32, %c8_i32_62 : i32
    %218 = tpu.assume_multiple %217, 8 : i32
    %c7_i32_63 = arith.constant 7 : i32
    %219 = arith.subi %c7_i32_63, %c3_i32 : i32
    %c8_i32_64 = arith.constant 8 : i32
    %220 = arith.muli %219, %c8_i32_64 : i32
    %221 = tpu.assume_multiple %220, 8 : i32
    %222 = arith.index_cast %218 : i32 to index
    %c0_65 = arith.constant 0 : index
    %223 = vector.load %arg11[%222, %c0_65] : memref<64x512xf32, #tpu.memory_space<vmem>>, vector<8x512xf32>
    %cst_66 = arith.constant dense<0.000000e+00> : vector<8x512xf32>
    %224 = tpu.matmul %187, %13, %cst_66 {dimension_numbers = #tpu.dot_dimension_numbers<[1], [0], [0], [1], [0, 0, 1, 1], [], []>} : vector<8x128xf32>, vector<128x512xf32>, vector<8x512xf32> -> vector<8x512xf32>
    %225 = arith.addf %223, %224 : vector<8x512xf32>
    %226 = arith.index_cast %221 : i32 to index
    %c0_67 = arith.constant 0 : index
    %227 = vector.load %arg12[%226, %c0_67] : memref<64x512xf32, #tpu.memory_space<vmem>>, vector<8x512xf32>
    %cst_68 = arith.constant dense<0.000000e+00> : vector<8x512xf32>
    %228 = tpu.matmul %212, %14, %cst_68 {dimension_numbers = #tpu.dot_dimension_numbers<[1], [0], [0], [1], [0, 0, 1, 1], [], []>} : vector<8x128xf32>, vector<128x512xf32>, vector<8x512xf32> -> vector<8x512xf32>
    %229 = arith.addf %227, %228 : vector<8x512xf32>
    %230 = vector.extract_strided_slice %225 {offsets = [0, 0], sizes = [8, 128], strides = [1, 1]} : vector<8x512xf32> to vector<8x128xf32>
    %231 = arith.negf %230 : vector<8x128xf32>
    %232 = math.exp %231 : vector<8x128xf32>
    %cst_69 = arith.constant 1.000000e+00 : f32
    %233 = vector.broadcast %cst_69 : f32 to vector<8x128xf32>
    %234 = arith.addf %233, %232 : vector<8x128xf32>
    %235 = arith.divf %233, %234 : vector<8x128xf32>
    %236 = vector.extract_strided_slice %225 {offsets = [0, 128], sizes = [8, 128], strides = [1, 1]} : vector<8x512xf32> to vector<8x128xf32>
    %237 = arith.negf %236 : vector<8x128xf32>
    %238 = math.exp %237 : vector<8x128xf32>
    %cst_70 = arith.constant 1.000000e+00 : f32
    %239 = vector.broadcast %cst_70 : f32 to vector<8x128xf32>
    %240 = arith.addf %239, %238 : vector<8x128xf32>
    %241 = arith.divf %239, %240 : vector<8x128xf32>
    %242 = vector.extract_strided_slice %225 {offsets = [0, 256], sizes = [8, 128], strides = [1, 1]} : vector<8x512xf32> to vector<8x128xf32>
    %243 = math.tanh %242 : vector<8x128xf32>
    %244 = vector.extract_strided_slice %225 {offsets = [0, 384], sizes = [8, 128], strides = [1, 1]} : vector<8x512xf32> to vector<8x128xf32>
    %245 = arith.negf %244 : vector<8x128xf32>
    %246 = math.exp %245 : vector<8x128xf32>
    %cst_71 = arith.constant 1.000000e+00 : f32
    %247 = vector.broadcast %cst_71 : f32 to vector<8x128xf32>
    %248 = arith.addf %247, %246 : vector<8x128xf32>
    %249 = arith.divf %247, %248 : vector<8x128xf32>
    %250 = arith.mulf %241, %185 : vector<8x128xf32>
    %251 = arith.mulf %235, %243 : vector<8x128xf32>
    %252 = arith.addf %250, %251 : vector<8x128xf32>
    %253 = math.tanh %252 : vector<8x128xf32>
    %254 = arith.mulf %249, %253 : vector<8x128xf32>
    %255 = vector.extract_strided_slice %229 {offsets = [0, 0], sizes = [8, 128], strides = [1, 1]} : vector<8x512xf32> to vector<8x128xf32>
    %256 = arith.negf %255 : vector<8x128xf32>
    %257 = math.exp %256 : vector<8x128xf32>
    %cst_72 = arith.constant 1.000000e+00 : f32
    %258 = vector.broadcast %cst_72 : f32 to vector<8x128xf32>
    %259 = arith.addf %258, %257 : vector<8x128xf32>
    %260 = arith.divf %258, %259 : vector<8x128xf32>
    %261 = vector.extract_strided_slice %229 {offsets = [0, 128], sizes = [8, 128], strides = [1, 1]} : vector<8x512xf32> to vector<8x128xf32>
    %262 = arith.negf %261 : vector<8x128xf32>
    %263 = math.exp %262 : vector<8x128xf32>
    %cst_73 = arith.constant 1.000000e+00 : f32
    %264 = vector.broadcast %cst_73 : f32 to vector<8x128xf32>
    %265 = arith.addf %264, %263 : vector<8x128xf32>
    %266 = arith.divf %264, %265 : vector<8x128xf32>
    %267 = vector.extract_strided_slice %229 {offsets = [0, 256], sizes = [8, 128], strides = [1, 1]} : vector<8x512xf32> to vector<8x128xf32>
    %268 = math.tanh %267 : vector<8x128xf32>
    %269 = vector.extract_strided_slice %229 {offsets = [0, 384], sizes = [8, 128], strides = [1, 1]} : vector<8x512xf32> to vector<8x128xf32>
    %270 = arith.negf %269 : vector<8x128xf32>
    %271 = math.exp %270 : vector<8x128xf32>
    %cst_74 = arith.constant 1.000000e+00 : f32
    %272 = vector.broadcast %cst_74 : f32 to vector<8x128xf32>
    %273 = arith.addf %272, %271 : vector<8x128xf32>
    %274 = arith.divf %272, %273 : vector<8x128xf32>
    %275 = arith.mulf %266, %210 : vector<8x128xf32>
    %276 = arith.mulf %260, %268 : vector<8x128xf32>
    %277 = arith.addf %275, %276 : vector<8x128xf32>
    %278 = math.tanh %277 : vector<8x128xf32>
    %279 = arith.mulf %274, %278 : vector<8x128xf32>
    %280 = arith.index_cast %218 : i32 to index
    %c0_75 = arith.constant 0 : index
    %281 = vector.load %arg13[%280, %c0_75] : memref<64x128xf32, #tpu.memory_space<vmem>>, vector<8x128xf32>
    tpu.vector_store %arg13[%280, %c0_75], %254 {strides = array<i32>} : memref<64x128xf32, #tpu.memory_space<vmem>>, vector<8x128xf32>,
    %282 = arith.index_cast %221 : i32 to index
    %c0_76 = arith.constant 0 : index
    %283 = vector.load %arg14[%282, %c0_76] : memref<64x128xf32, #tpu.memory_space<vmem>>, vector<8x128xf32>
    tpu.vector_store %arg14[%282, %c0_76], %279 {strides = array<i32>} : memref<64x128xf32, #tpu.memory_space<vmem>>, vector<8x128xf32>,
    %c4_i32 = arith.constant 4 : i32
    %c8_i32_77 = arith.constant 8 : i32
    %284 = arith.muli %c4_i32, %c8_i32_77 : i32
    %285 = tpu.assume_multiple %284, 8 : i32
    %c7_i32_78 = arith.constant 7 : i32
    %286 = arith.subi %c7_i32_78, %c4_i32 : i32
    %c8_i32_79 = arith.constant 8 : i32
    %287 = arith.muli %286, %c8_i32_79 : i32
    %288 = tpu.assume_multiple %287, 8 : i32
    %289 = arith.index_cast %285 : i32 to index
    %c0_80 = arith.constant 0 : index
    %290 = vector.load %arg11[%289, %c0_80] : memref<64x512xf32, #tpu.memory_space<vmem>>, vector<8x512xf32>
    %cst_81 = arith.constant dense<0.000000e+00> : vector<8x512xf32>
    %291 = tpu.matmul %254, %13, %cst_81 {dimension_numbers = #tpu.dot_dimension_numbers<[1], [0], [0], [1], [0, 0, 1, 1], [], []>} : vector<8x128xf32>, vector<128x512xf32>, vector<8x512xf32> -> vector<8x512xf32>
    %292 = arith.addf %290, %291 : vector<8x512xf32>
    %293 = arith.index_cast %288 : i32 to index
    %c0_82 = arith.constant 0 : index
    %294 = vector.load %arg12[%293, %c0_82] : memref<64x512xf32, #tpu.memory_space<vmem>>, vector<8x512xf32>
    %cst_83 = arith.constant dense<0.000000e+00> : vector<8x512xf32>
    %295 = tpu.matmul %279, %14, %cst_83 {dimension_numbers = #tpu.dot_dimension_numbers<[1], [0], [0], [1], [0, 0, 1, 1], [], []>} : vector<8x128xf32>, vector<128x512xf32>, vector<8x512xf32> -> vector<8x512xf32>
    %296 = arith.addf %294, %295 : vector<8x512xf32>
    %297 = vector.extract_strided_slice %292 {offsets = [0, 0], sizes = [8, 128], strides = [1, 1]} : vector<8x512xf32> to vector<8x128xf32>
    %298 = arith.negf %297 : vector<8x128xf32>
    %299 = math.exp %298 : vector<8x128xf32>
    %cst_84 = arith.constant 1.000000e+00 : f32
    %300 = vector.broadcast %cst_84 : f32 to vector<8x128xf32>
    %301 = arith.addf %300, %299 : vector<8x128xf32>
    %302 = arith.divf %300, %301 : vector<8x128xf32>
    %303 = vector.extract_strided_slice %292 {offsets = [0, 128], sizes = [8, 128], strides = [1, 1]} : vector<8x512xf32> to vector<8x128xf32>
    %304 = arith.negf %303 : vector<8x128xf32>
    %305 = math.exp %304 : vector<8x128xf32>
    %cst_85 = arith.constant 1.000000e+00 : f32
    %306 = vector.broadcast %cst_85 : f32 to vector<8x128xf32>
    %307 = arith.addf %306, %305 : vector<8x128xf32>
    %308 = arith.divf %306, %307 : vector<8x128xf32>
    %309 = vector.extract_strided_slice %292 {offsets = [0, 256], sizes = [8, 128], strides = [1, 1]} : vector<8x512xf32> to vector<8x128xf32>
    %310 = math.tanh %309 : vector<8x128xf32>
    %311 = vector.extract_strided_slice %292 {offsets = [0, 384], sizes = [8, 128], strides = [1, 1]} : vector<8x512xf32> to vector<8x128xf32>
    %312 = arith.negf %311 : vector<8x128xf32>
    %313 = math.exp %312 : vector<8x128xf32>
    %cst_86 = arith.constant 1.000000e+00 : f32
    %314 = vector.broadcast %cst_86 : f32 to vector<8x128xf32>
    %315 = arith.addf %314, %313 : vector<8x128xf32>
    %316 = arith.divf %314, %315 : vector<8x128xf32>
    %317 = arith.mulf %308, %252 : vector<8x128xf32>
    %318 = arith.mulf %302, %310 : vector<8x128xf32>
    %319 = arith.addf %317, %318 : vector<8x128xf32>
    %320 = math.tanh %319 : vector<8x128xf32>
    %321 = arith.mulf %316, %320 : vector<8x128xf32>
    %322 = vector.extract_strided_slice %296 {offsets = [0, 0], sizes = [8, 128], strides = [1, 1]} : vector<8x512xf32> to vector<8x128xf32>
    %323 = arith.negf %322 : vector<8x128xf32>
    %324 = math.exp %323 : vector<8x128xf32>
    %cst_87 = arith.constant 1.000000e+00 : f32
    %325 = vector.broadcast %cst_87 : f32 to vector<8x128xf32>
    %326 = arith.addf %325, %324 : vector<8x128xf32>
    %327 = arith.divf %325, %326 : vector<8x128xf32>
    %328 = vector.extract_strided_slice %296 {offsets = [0, 128], sizes = [8, 128], strides = [1, 1]} : vector<8x512xf32> to vector<8x128xf32>
    %329 = arith.negf %328 : vector<8x128xf32>
    %330 = math.exp %329 : vector<8x128xf32>
    %cst_88 = arith.constant 1.000000e+00 : f32
    %331 = vector.broadcast %cst_88 : f32 to vector<8x128xf32>
    %332 = arith.addf %331, %330 : vector<8x128xf32>
    %333 = arith.divf %331, %332 : vector<8x128xf32>
    %334 = vector.extract_strided_slice %296 {offsets = [0, 256], sizes = [8, 128], strides = [1, 1]} : vector<8x512xf32> to vector<8x128xf32>
    %335 = math.tanh %334 : vector<8x128xf32>
    %336 = vector.extract_strided_slice %296 {offsets = [0, 384], sizes = [8, 128], strides = [1, 1]} : vector<8x512xf32> to vector<8x128xf32>
    %337 = arith.negf %336 : vector<8x128xf32>
    %338 = math.exp %337 : vector<8x128xf32>
    %cst_89 = arith.constant 1.000000e+00 : f32
    %339 = vector.broadcast %cst_89 : f32 to vector<8x128xf32>
    %340 = arith.addf %339, %338 : vector<8x128xf32>
    %341 = arith.divf %339, %340 : vector<8x128xf32>
    %342 = arith.mulf %333, %277 : vector<8x128xf32>
    %343 = arith.mulf %327, %335 : vector<8x128xf32>
    %344 = arith.addf %342, %343 : vector<8x128xf32>
    %345 = math.tanh %344 : vector<8x128xf32>
    %346 = arith.mulf %341, %345 : vector<8x128xf32>
    %347 = arith.index_cast %285 : i32 to index
    %c0_90 = arith.constant 0 : index
    %348 = vector.load %arg13[%347, %c0_90] : memref<64x128xf32, #tpu.memory_space<vmem>>, vector<8x128xf32>
    tpu.vector_store %arg13[%347, %c0_90], %321 {strides = array<i32>} : memref<64x128xf32, #tpu.memory_space<vmem>>, vector<8x128xf32>,
    %349 = arith.index_cast %288 : i32 to index
    %c0_91 = arith.constant 0 : index
    %350 = vector.load %arg14[%349, %c0_91] : memref<64x128xf32, #tpu.memory_space<vmem>>, vector<8x128xf32>
    tpu.vector_store %arg14[%349, %c0_91], %346 {strides = array<i32>} : memref<64x128xf32, #tpu.memory_space<vmem>>, vector<8x128xf32>,
    %c5_i32 = arith.constant 5 : i32
    %c8_i32_92 = arith.constant 8 : i32
    %351 = arith.muli %c5_i32, %c8_i32_92 : i32
    %352 = tpu.assume_multiple %351, 8 : i32
    %c7_i32_93 = arith.constant 7 : i32
    %353 = arith.subi %c7_i32_93, %c5_i32 : i32
    %c8_i32_94 = arith.constant 8 : i32
    %354 = arith.muli %353, %c8_i32_94 : i32
    %355 = tpu.assume_multiple %354, 8 : i32
    %356 = arith.index_cast %352 : i32 to index
    %c0_95 = arith.constant 0 : index
    %357 = vector.load %arg11[%356, %c0_95] : memref<64x512xf32, #tpu.memory_space<vmem>>, vector<8x512xf32>
    %cst_96 = arith.constant dense<0.000000e+00> : vector<8x512xf32>
    %358 = tpu.matmul %321, %13, %cst_96 {dimension_numbers = #tpu.dot_dimension_numbers<[1], [0], [0], [1], [0, 0, 1, 1], [], []>} : vector<8x128xf32>, vector<128x512xf32>, vector<8x512xf32> -> vector<8x512xf32>
    %359 = arith.addf %357, %358 : vector<8x512xf32>
    %360 = arith.index_cast %355 : i32 to index
    %c0_97 = arith.constant 0 : index
    %361 = vector.load %arg12[%360, %c0_97] : memref<64x512xf32, #tpu.memory_space<vmem>>, vector<8x512xf32>
    %cst_98 = arith.constant dense<0.000000e+00> : vector<8x512xf32>
    %362 = tpu.matmul %346, %14, %cst_98 {dimension_numbers = #tpu.dot_dimension_numbers<[1], [0], [0], [1], [0, 0, 1, 1], [], []>} : vector<8x128xf32>, vector<128x512xf32>, vector<8x512xf32> -> vector<8x512xf32>
    %363 = arith.addf %361, %362 : vector<8x512xf32>
    %364 = vector.extract_strided_slice %359 {offsets = [0, 0], sizes = [8, 128], strides = [1, 1]} : vector<8x512xf32> to vector<8x128xf32>
    %365 = arith.negf %364 : vector<8x128xf32>
    %366 = math.exp %365 : vector<8x128xf32>
    %cst_99 = arith.constant 1.000000e+00 : f32
    %367 = vector.broadcast %cst_99 : f32 to vector<8x128xf32>
    %368 = arith.addf %367, %366 : vector<8x128xf32>
    %369 = arith.divf %367, %368 : vector<8x128xf32>
    %370 = vector.extract_strided_slice %359 {offsets = [0, 128], sizes = [8, 128], strides = [1, 1]} : vector<8x512xf32> to vector<8x128xf32>
    %371 = arith.negf %370 : vector<8x128xf32>
    %372 = math.exp %371 : vector<8x128xf32>
    %cst_100 = arith.constant 1.000000e+00 : f32
    %373 = vector.broadcast %cst_100 : f32 to vector<8x128xf32>
    %374 = arith.addf %373, %372 : vector<8x128xf32>
    %375 = arith.divf %373, %374 : vector<8x128xf32>
    %376 = vector.extract_strided_slice %359 {offsets = [0, 256], sizes = [8, 128], strides = [1, 1]} : vector<8x512xf32> to vector<8x128xf32>
    %377 = math.tanh %376 : vector<8x128xf32>
    %378 = vector.extract_strided_slice %359 {offsets = [0, 384], sizes = [8, 128], strides = [1, 1]} : vector<8x512xf32> to vector<8x128xf32>
    %379 = arith.negf %378 : vector<8x128xf32>
    %380 = math.exp %379 : vector<8x128xf32>
    %cst_101 = arith.constant 1.000000e+00 : f32
    %381 = vector.broadcast %cst_101 : f32 to vector<8x128xf32>
    %382 = arith.addf %381, %380 : vector<8x128xf32>
    %383 = arith.divf %381, %382 : vector<8x128xf32>
    %384 = arith.mulf %375, %319 : vector<8x128xf32>
    %385 = arith.mulf %369, %377 : vector<8x128xf32>
    %386 = arith.addf %384, %385 : vector<8x128xf32>
    %387 = math.tanh %386 : vector<8x128xf32>
    %388 = arith.mulf %383, %387 : vector<8x128xf32>
    %389 = vector.extract_strided_slice %363 {offsets = [0, 0], sizes = [8, 128], strides = [1, 1]} : vector<8x512xf32> to vector<8x128xf32>
    %390 = arith.negf %389 : vector<8x128xf32>
    %391 = math.exp %390 : vector<8x128xf32>
    %cst_102 = arith.constant 1.000000e+00 : f32
    %392 = vector.broadcast %cst_102 : f32 to vector<8x128xf32>
    %393 = arith.addf %392, %391 : vector<8x128xf32>
    %394 = arith.divf %392, %393 : vector<8x128xf32>
    %395 = vector.extract_strided_slice %363 {offsets = [0, 128], sizes = [8, 128], strides = [1, 1]} : vector<8x512xf32> to vector<8x128xf32>
    %396 = arith.negf %395 : vector<8x128xf32>
    %397 = math.exp %396 : vector<8x128xf32>
    %cst_103 = arith.constant 1.000000e+00 : f32
    %398 = vector.broadcast %cst_103 : f32 to vector<8x128xf32>
    %399 = arith.addf %398, %397 : vector<8x128xf32>
    %400 = arith.divf %398, %399 : vector<8x128xf32>
    %401 = vector.extract_strided_slice %363 {offsets = [0, 256], sizes = [8, 128], strides = [1, 1]} : vector<8x512xf32> to vector<8x128xf32>
    %402 = math.tanh %401 : vector<8x128xf32>
    %403 = vector.extract_strided_slice %363 {offsets = [0, 384], sizes = [8, 128], strides = [1, 1]} : vector<8x512xf32> to vector<8x128xf32>
    %404 = arith.negf %403 : vector<8x128xf32>
    %405 = math.exp %404 : vector<8x128xf32>
    %cst_104 = arith.constant 1.000000e+00 : f32
    %406 = vector.broadcast %cst_104 : f32 to vector<8x128xf32>
    %407 = arith.addf %406, %405 : vector<8x128xf32>
    %408 = arith.divf %406, %407 : vector<8x128xf32>
    %409 = arith.mulf %400, %344 : vector<8x128xf32>
    %410 = arith.mulf %394, %402 : vector<8x128xf32>
    %411 = arith.addf %409, %410 : vector<8x128xf32>
    %412 = math.tanh %411 : vector<8x128xf32>
    %413 = arith.mulf %408, %412 : vector<8x128xf32>
    %414 = arith.index_cast %352 : i32 to index
    %c0_105 = arith.constant 0 : index
    %415 = vector.load %arg13[%414, %c0_105] : memref<64x128xf32, #tpu.memory_space<vmem>>, vector<8x128xf32>
    tpu.vector_store %arg13[%414, %c0_105], %388 {strides = array<i32>} : memref<64x128xf32, #tpu.memory_space<vmem>>, vector<8x128xf32>,
    %416 = arith.index_cast %355 : i32 to index
    %c0_106 = arith.constant 0 : index
    %417 = vector.load %arg14[%416, %c0_106] : memref<64x128xf32, #tpu.memory_space<vmem>>, vector<8x128xf32>
    tpu.vector_store %arg14[%416, %c0_106], %413 {strides = array<i32>} : memref<64x128xf32, #tpu.memory_space<vmem>>, vector<8x128xf32>,
    %c6_i32 = arith.constant 6 : i32
    %c8_i32_107 = arith.constant 8 : i32
    %418 = arith.muli %c6_i32, %c8_i32_107 : i32
    %419 = tpu.assume_multiple %418, 8 : i32
    %c7_i32_108 = arith.constant 7 : i32
    %420 = arith.subi %c7_i32_108, %c6_i32 : i32
    %c8_i32_109 = arith.constant 8 : i32
    %421 = arith.muli %420, %c8_i32_109 : i32
    %422 = tpu.assume_multiple %421, 8 : i32
    %423 = arith.index_cast %419 : i32 to index
    %c0_110 = arith.constant 0 : index
    %424 = vector.load %arg11[%423, %c0_110] : memref<64x512xf32, #tpu.memory_space<vmem>>, vector<8x512xf32>
    %cst_111 = arith.constant dense<0.000000e+00> : vector<8x512xf32>
    %425 = tpu.matmul %388, %13, %cst_111 {dimension_numbers = #tpu.dot_dimension_numbers<[1], [0], [0], [1], [0, 0, 1, 1], [], []>} : vector<8x128xf32>, vector<128x512xf32>, vector<8x512xf32> -> vector<8x512xf32>
    %426 = arith.addf %424, %425 : vector<8x512xf32>
    %427 = arith.index_cast %422 : i32 to index
    %c0_112 = arith.constant 0 : index
    %428 = vector.load %arg12[%427, %c0_112] : memref<64x512xf32, #tpu.memory_space<vmem>>, vector<8x512xf32>
    %cst_113 = arith.constant dense<0.000000e+00> : vector<8x512xf32>
    %429 = tpu.matmul %413, %14, %cst_113 {dimension_numbers = #tpu.dot_dimension_numbers<[1], [0], [0], [1], [0, 0, 1, 1], [], []>} : vector<8x128xf32>, vector<128x512xf32>, vector<8x512xf32> -> vector<8x512xf32>
    %430 = arith.addf %428, %429 : vector<8x512xf32>
    %431 = vector.extract_strided_slice %426 {offsets = [0, 0], sizes = [8, 128], strides = [1, 1]} : vector<8x512xf32> to vector<8x128xf32>
    %432 = arith.negf %431 : vector<8x128xf32>
    %433 = math.exp %432 : vector<8x128xf32>
    %cst_114 = arith.constant 1.000000e+00 : f32
    %434 = vector.broadcast %cst_114 : f32 to vector<8x128xf32>
    %435 = arith.addf %434, %433 : vector<8x128xf32>
    %436 = arith.divf %434, %435 : vector<8x128xf32>
    %437 = vector.extract_strided_slice %426 {offsets = [0, 128], sizes = [8, 128], strides = [1, 1]} : vector<8x512xf32> to vector<8x128xf32>
    %438 = arith.negf %437 : vector<8x128xf32>
    %439 = math.exp %438 : vector<8x128xf32>
    %cst_115 = arith.constant 1.000000e+00 : f32
    %440 = vector.broadcast %cst_115 : f32 to vector<8x128xf32>
    %441 = arith.addf %440, %439 : vector<8x128xf32>
    %442 = arith.divf %440, %441 : vector<8x128xf32>
    %443 = vector.extract_strided_slice %426 {offsets = [0, 256], sizes = [8, 128], strides = [1, 1]} : vector<8x512xf32> to vector<8x128xf32>
    %444 = math.tanh %443 : vector<8x128xf32>
    %445 = vector.extract_strided_slice %426 {offsets = [0, 384], sizes = [8, 128], strides = [1, 1]} : vector<8x512xf32> to vector<8x128xf32>
    %446 = arith.negf %445 : vector<8x128xf32>
    %447 = math.exp %446 : vector<8x128xf32>
    %cst_116 = arith.constant 1.000000e+00 : f32
    %448 = vector.broadcast %cst_116 : f32 to vector<8x128xf32>
    %449 = arith.addf %448, %447 : vector<8x128xf32>
    %450 = arith.divf %448, %449 : vector<8x128xf32>
    %451 = arith.mulf %442, %386 : vector<8x128xf32>
    %452 = arith.mulf %436, %444 : vector<8x128xf32>
    %453 = arith.addf %451, %452 : vector<8x128xf32>
    %454 = math.tanh %453 : vector<8x128xf32>
    %455 = arith.mulf %450, %454 : vector<8x128xf32>
    %456 = vector.extract_strided_slice %430 {offsets = [0, 0], sizes = [8, 128], strides = [1, 1]} : vector<8x512xf32> to vector<8x128xf32>
    %457 = arith.negf %456 : vector<8x128xf32>
    %458 = math.exp %457 : vector<8x128xf32>
    %cst_117 = arith.constant 1.000000e+00 : f32
    %459 = vector.broadcast %cst_117 : f32 to vector<8x128xf32>
    %460 = arith.addf %459, %458 : vector<8x128xf32>
    %461 = arith.divf %459, %460 : vector<8x128xf32>
    %462 = vector.extract_strided_slice %430 {offsets = [0, 128], sizes = [8, 128], strides = [1, 1]} : vector<8x512xf32> to vector<8x128xf32>
    %463 = arith.negf %462 : vector<8x128xf32>
    %464 = math.exp %463 : vector<8x128xf32>
    %cst_118 = arith.constant 1.000000e+00 : f32
    %465 = vector.broadcast %cst_118 : f32 to vector<8x128xf32>
    %466 = arith.addf %465, %464 : vector<8x128xf32>
    %467 = arith.divf %465, %466 : vector<8x128xf32>
    %468 = vector.extract_strided_slice %430 {offsets = [0, 256], sizes = [8, 128], strides = [1, 1]} : vector<8x512xf32> to vector<8x128xf32>
    %469 = math.tanh %468 : vector<8x128xf32>
    %470 = vector.extract_strided_slice %430 {offsets = [0, 384], sizes = [8, 128], strides = [1, 1]} : vector<8x512xf32> to vector<8x128xf32>
    %471 = arith.negf %470 : vector<8x128xf32>
    %472 = math.exp %471 : vector<8x128xf32>
    %cst_119 = arith.constant 1.000000e+00 : f32
    %473 = vector.broadcast %cst_119 : f32 to vector<8x128xf32>
    %474 = arith.addf %473, %472 : vector<8x128xf32>
    %475 = arith.divf %473, %474 : vector<8x128xf32>
    %476 = arith.mulf %467, %411 : vector<8x128xf32>
    %477 = arith.mulf %461, %469 : vector<8x128xf32>
    %478 = arith.addf %476, %477 : vector<8x128xf32>
    %479 = math.tanh %478 : vector<8x128xf32>
    %480 = arith.mulf %475, %479 : vector<8x128xf32>
    %481 = arith.index_cast %419 : i32 to index
    %c0_120 = arith.constant 0 : index
    %482 = vector.load %arg13[%481, %c0_120] : memref<64x128xf32, #tpu.memory_space<vmem>>, vector<8x128xf32>
    tpu.vector_store %arg13[%481, %c0_120], %455 {strides = array<i32>} : memref<64x128xf32, #tpu.memory_space<vmem>>, vector<8x128xf32>,
    %483 = arith.index_cast %422 : i32 to index
    %c0_121 = arith.constant 0 : index
    %484 = vector.load %arg14[%483, %c0_121] : memref<64x128xf32, #tpu.memory_space<vmem>>, vector<8x128xf32>
    tpu.vector_store %arg14[%483, %c0_121], %480 {strides = array<i32>} : memref<64x128xf32, #tpu.memory_space<vmem>>, vector<8x128xf32>,
    %c7_i32_122 = arith.constant 7 : i32
    %c8_i32_123 = arith.constant 8 : i32
    %485 = arith.muli %c7_i32_122, %c8_i32_123 : i32
    %486 = tpu.assume_multiple %485, 8 : i32
    %c7_i32_124 = arith.constant 7 : i32
    %487 = arith.subi %c7_i32_124, %c7_i32_122 : i32
    %c8_i32_125 = arith.constant 8 : i32
    %488 = arith.muli %487, %c8_i32_125 : i32
    %489 = tpu.assume_multiple %488, 8 : i32
    %490 = arith.index_cast %486 : i32 to index
    %c0_126 = arith.constant 0 : index
    %491 = vector.load %arg11[%490, %c0_126] : memref<64x512xf32, #tpu.memory_space<vmem>>, vector<8x512xf32>
    %cst_127 = arith.constant dense<0.000000e+00> : vector<8x512xf32>
    %492 = tpu.matmul %455, %13, %cst_127 {dimension_numbers = #tpu.dot_dimension_numbers<[1], [0], [0], [1], [0, 0, 1, 1], [], []>} : vector<8x128xf32>, vector<128x512xf32>, vector<8x512xf32> -> vector<8x512xf32>
    %493 = arith.addf %491, %492 : vector<8x512xf32>
    %494 = arith.index_cast %489 : i32 to index
    %c0_128 = arith.constant 0 : index
    %495 = vector.load %arg12[%494, %c0_128] : memref<64x512xf32, #tpu.memory_space<vmem>>, vector<8x512xf32>
    %cst_129 = arith.constant dense<0.000000e+00> : vector<8x512xf32>
    %496 = tpu.matmul %480, %14, %cst_129 {dimension_numbers = #tpu.dot_dimension_numbers<[1], [0], [0], [1], [0, 0, 1, 1], [], []>} : vector<8x128xf32>, vector<128x512xf32>, vector<8x512xf32> -> vector<8x512xf32>
    %497 = arith.addf %495, %496 : vector<8x512xf32>
    %498 = vector.extract_strided_slice %493 {offsets = [0, 0], sizes = [8, 128], strides = [1, 1]} : vector<8x512xf32> to vector<8x128xf32>
    %499 = arith.negf %498 : vector<8x128xf32>
    %500 = math.exp %499 : vector<8x128xf32>
    %cst_130 = arith.constant 1.000000e+00 : f32
    %501 = vector.broadcast %cst_130 : f32 to vector<8x128xf32>
    %502 = arith.addf %501, %500 : vector<8x128xf32>
    %503 = arith.divf %501, %502 : vector<8x128xf32>
    %504 = vector.extract_strided_slice %493 {offsets = [0, 128], sizes = [8, 128], strides = [1, 1]} : vector<8x512xf32> to vector<8x128xf32>
    %505 = arith.negf %504 : vector<8x128xf32>
    %506 = math.exp %505 : vector<8x128xf32>
    %cst_131 = arith.constant 1.000000e+00 : f32
    %507 = vector.broadcast %cst_131 : f32 to vector<8x128xf32>
    %508 = arith.addf %507, %506 : vector<8x128xf32>
    %509 = arith.divf %507, %508 : vector<8x128xf32>
    %510 = vector.extract_strided_slice %493 {offsets = [0, 256], sizes = [8, 128], strides = [1, 1]} : vector<8x512xf32> to vector<8x128xf32>
    %511 = math.tanh %510 : vector<8x128xf32>
    %512 = vector.extract_strided_slice %493 {offsets = [0, 384], sizes = [8, 128], strides = [1, 1]} : vector<8x512xf32> to vector<8x128xf32>
    %513 = arith.negf %512 : vector<8x128xf32>
    %514 = math.exp %513 : vector<8x128xf32>
    %cst_132 = arith.constant 1.000000e+00 : f32
    %515 = vector.broadcast %cst_132 : f32 to vector<8x128xf32>
    %516 = arith.addf %515, %514 : vector<8x128xf32>
    %517 = arith.divf %515, %516 : vector<8x128xf32>
    %518 = arith.mulf %509, %453 : vector<8x128xf32>
    %519 = arith.mulf %503, %511 : vector<8x128xf32>
    %520 = arith.addf %518, %519 : vector<8x128xf32>
    %521 = math.tanh %520 : vector<8x128xf32>
    %522 = arith.mulf %517, %521 : vector<8x128xf32>
    %523 = vector.extract_strided_slice %497 {offsets = [0, 0], sizes = [8, 128], strides = [1, 1]} : vector<8x512xf32> to vector<8x128xf32>
    %524 = arith.negf %523 : vector<8x128xf32>
    %525 = math.exp %524 : vector<8x128xf32>
    %cst_133 = arith.constant 1.000000e+00 : f32
    %526 = vector.broadcast %cst_133 : f32 to vector<8x128xf32>
    %527 = arith.addf %526, %525 : vector<8x128xf32>
    %528 = arith.divf %526, %527 : vector<8x128xf32>
    %529 = vector.extract_strided_slice %497 {offsets = [0, 128], sizes = [8, 128], strides = [1, 1]} : vector<8x512xf32> to vector<8x128xf32>
    %530 = arith.negf %529 : vector<8x128xf32>
    %531 = math.exp %530 : vector<8x128xf32>
    %cst_134 = arith.constant 1.000000e+00 : f32
    %532 = vector.broadcast %cst_134 : f32 to vector<8x128xf32>
    %533 = arith.addf %532, %531 : vector<8x128xf32>
    %534 = arith.divf %532, %533 : vector<8x128xf32>
    %535 = vector.extract_strided_slice %497 {offsets = [0, 256], sizes = [8, 128], strides = [1, 1]} : vector<8x512xf32> to vector<8x128xf32>
    %536 = math.tanh %535 : vector<8x128xf32>
    %537 = vector.extract_strided_slice %497 {offsets = [0, 384], sizes = [8, 128], strides = [1, 1]} : vector<8x512xf32> to vector<8x128xf32>
    %538 = arith.negf %537 : vector<8x128xf32>
    %539 = math.exp %538 : vector<8x128xf32>
    %cst_135 = arith.constant 1.000000e+00 : f32
    %540 = vector.broadcast %cst_135 : f32 to vector<8x128xf32>
    %541 = arith.addf %540, %539 : vector<8x128xf32>
    %542 = arith.divf %540, %541 : vector<8x128xf32>
    %543 = arith.mulf %534, %478 : vector<8x128xf32>
    %544 = arith.mulf %528, %536 : vector<8x128xf32>
    %545 = arith.addf %543, %544 : vector<8x128xf32>
    %546 = math.tanh %545 : vector<8x128xf32>
    %547 = arith.mulf %542, %546 : vector<8x128xf32>
    %548 = arith.index_cast %486 : i32 to index
    %c0_136 = arith.constant 0 : index
    %549 = vector.load %arg13[%548, %c0_136] : memref<64x128xf32, #tpu.memory_space<vmem>>, vector<8x128xf32>
    tpu.vector_store %arg13[%548, %c0_136], %522 {strides = array<i32>} : memref<64x128xf32, #tpu.memory_space<vmem>>, vector<8x128xf32>,
    %550 = arith.index_cast %489 : i32 to index
    %c0_137 = arith.constant 0 : index
    %551 = vector.load %arg14[%550, %c0_137] : memref<64x128xf32, #tpu.memory_space<vmem>>, vector<8x128xf32>
    tpu.vector_store %arg14[%550, %c0_137], %547 {strides = array<i32>} : memref<64x128xf32, #tpu.memory_space<vmem>>, vector<8x128xf32>,
    %c8_i32_138 = arith.constant 8 : i32
    %c0_139 = arith.constant 0 : index
    %c0_140 = arith.constant 0 : index
    %552 = vector.load %arg13[%c0_139, %c0_140] : memref<64x128xf32, #tpu.memory_space<vmem>>, vector<64x128xf32>
    %c0_141 = arith.constant 0 : index
    %c0_142 = arith.constant 0 : index
    %553 = vector.load %arg7[%c0_141, %c0_142] : memref<128x128xf32, #tpu.memory_space<vmem>>, vector<128x128xf32>
    %cst_143 = arith.constant dense<0.000000e+00> : vector<64x128xf32>
    %554 = tpu.matmul %552, %553, %cst_143 {dimension_numbers = #tpu.dot_dimension_numbers<[1], [0], [0], [1], [0, 0, 1, 1], [], []>} : vector<64x128xf32>, vector<128x128xf32>, vector<64x128xf32> -> vector<64x128xf32>
    %c0_144 = arith.constant 0 : index
    %c0_145 = arith.constant 0 : index
    %555 = vector.load %arg14[%c0_144, %c0_145] : memref<64x128xf32, #tpu.memory_space<vmem>>, vector<64x128xf32>
    %c0_146 = arith.constant 0 : index
    %c0_147 = arith.constant 0 : index
    %556 = vector.load %arg8[%c0_146, %c0_147] : memref<128x128xf32, #tpu.memory_space<vmem>>, vector<128x128xf32>
    %cst_148 = arith.constant dense<0.000000e+00> : vector<64x128xf32>
    %557 = tpu.matmul %555, %556, %cst_148 {dimension_numbers = #tpu.dot_dimension_numbers<[1], [0], [0], [1], [0, 0, 1, 1], [], []>} : vector<64x128xf32>, vector<128x128xf32>, vector<64x128xf32> -> vector<64x128xf32>
    %558 = arith.addf %554, %557 : vector<64x128xf32>
    %c0_149 = arith.constant 0 : index
    %c0_150 = arith.constant 0 : index
    %559 = vector.load %arg9[%c0_149, %c0_150] : memref<1x128xf32, #tpu.memory_space<vmem>>, vector<1x128xf32>
    %560 = vector.broadcast %559 : vector<1x128xf32> to vector<64x128xf32>
    %561 = arith.addf %558, %560 : vector<64x128xf32>
    %c0_151 = arith.constant 0 : index
    %c0_152 = arith.constant 0 : index
    %562 = vector.load %arg10[%c0_151, %c0_152] : memref<64x128xf32, #tpu.memory_space<vmem>>, vector<64x128xf32>
    tpu.vector_store %arg10[%c0_151, %c0_152], %561 {strides = array<i32>} : memref<64x128xf32, #tpu.memory_space<vmem>>, vector<64x128xf32>,
    return
  }
}

</mosaic_0001>

<bundles_post_ra>
// kernel: tpu_custom_call.1
= control target key start
LH: loop header
LB: loop body
LE: loop exit
PB: predicated region body
PF: predicated region fallthrough
CT: control target
= control target key end

     0   :  { %15 = vsyncpa [#allocation7], 0  ;;  %s7505_s0 = inlined_call_operand.hbm [shape: f32[64,64], index: 0, kind: input, shape index: {}]   ;;  %s7506_s1 = inlined_call_operand.hbm [shape: f32[64,512], index: 1, kind: input, shape index: {}]   ;;  %s7507_s2 = inlined_call_operand.hbm [shape: f32[128,512], index: 2, kind: input, shape index: {}]   ;;  %s7508_s3 = inlined_call_operand.hbm [shape: f32[1,512], index: 3, kind: input, shape index: {}]   ;;  %s7509_s4 = inlined_call_operand.hbm [shape: f32[64,512], index: 4, kind: input, shape index: {}]   ;;  %s7510_s5 = inlined_call_operand.hbm [shape: f32[128,512], index: 5, kind: input, shape index: {}]   ;;  %s7511_s6 = inlined_call_operand.vmem [shape: f32[1,512], index: 6, kind: input, shape index: {}]   ;;  %s7512_s7 = inlined_call_operand.hbm [shape: f32[128,128], index: 7, kind: input, shape index: {}]   ;;  %s7513_s8 = inlined_call_operand.hbm [shape: f32[128,128], index: 8, kind: input, shape index: {}]   ;;  %s7514_s9 = inlined_call_operand.vmem [shape: f32[1,128], index: 9, kind: input, shape index: {}]   ;;  %s7515_s10 = inlined_call_operand.hbm [shape: f32[64,128], index: 10, kind: output, shape index: {}]  }
   0x1   :  { %16 = vsyncpa [#allocation10], 0 }
   0x2   :  { %17 = vsyncpa [#allocation13], 0 }
   0x3   :  { %18 = vsyncpa [#allocation16], 0 }
   0x4   :  { %19 = vsyncpa [#allocation19], 0  ;;  %s38_s15 = sshll.u32 %s7506_s1, 4  ;;  %s39_s15 = int_to_ptr.hbm [resolvable:$true] %s38_s15 }
   0x5   :  { %20 = vsyncpa [#allocation8], 0  ;;  %s4480_s16 = smov [#allocation9]   ;;  %s65_s20 = sshll.u32 %s7508_s3, 4  ;;  %s66_s20 = int_to_ptr.hbm [resolvable:$true] %s65_s20 }
   0x6   :  { %s40_s17 = sshll.u32 %s4480_s16, 4  ;;  %s4481_s21 = smov 512   ;;  %s41_s17 = int_to_ptr.vmem [resolvable:$true] %s40_s17 }
   0x7   :  { %s4482_s22 = smov 32   ;;  %s4483_s23 = smov [#allocation12]  }
   0x8   :  { %46 = dma.hbm_to_vmem [thread:$0]  %s39_s15, 4096, %s41_s17, [#allocation10], %s4481_s21, %s4481_s21, %s4482_s22  }
   0x9   :  { %s67_s24 = sshll.u32 %s4483_s23, 4  ;;  %s88_s26 = sshll.u32 %s7510_s5, 4  ;;  %s68_s24 = int_to_ptr.vmem [resolvable:$true] %s67_s24  ;;  %s89_s26 = int_to_ptr.hbm [resolvable:$true] %s88_s26 }
   0xa   :  { %70 = dma.hbm_to_vmem [thread:$0]  %s66_s20, 64, %s68_s24, [#allocation13]  }
   0xb   :  { %s25_s3 = sshll.u32 %s7505_s0, 4  ;;  %s4484_s29 = smov [#allocation15]   ;;  %s26_s3 = int_to_ptr.hbm [resolvable:$true] %s25_s3 }
   0xc   :  { %s90_s30 = sshll.u32 %s4484_s29, 4  ;;  %s4485_s11 = smov [#allocation6]   ;;  %s91_s30 = int_to_ptr.vmem [resolvable:$true] %s90_s30 }
   0xd   :  { %96 = dma.hbm_to_vmem [thread:$0]  %s89_s26, 8192, %s91_s30, [#allocation16], %s4481_s21, %s4481_s21, %s4482_s22  }
   0xe   :  { %s27_s12 = sshll.u32 %s4485_s11, 4  ;;  %s4486_s13 = smov 128   ;;  %s28_s12 = int_to_ptr.vmem [resolvable:$true] %s27_s12 }
   0xf   :  { %s4487_s5 = smov 8   ;;  %s51_s0 = sshll.u32 %s7507_s2, 4  ;;  %s52_s0 = int_to_ptr.hbm [resolvable:$true] %s51_s0 }
  0x10   :  { %33 = dma.hbm_to_vmem [thread:$0]  %s26_s3, 1024, %s28_s12, [#allocation7], %s4486_s13, %s4486_s13, %s4487_s5  }
  0x11   :  { %s4488_s16 = smov [#allocation11]   ;;  %s75_s20 = sshll.u32 %s7509_s4, 4  ;;  %s76_s20 = int_to_ptr.hbm [resolvable:$true] %s75_s20 }
  0x12   :  { %s53_s17 = sshll.u32 %s4488_s16, 4  ;;  %s4489_s23 = smov [#allocation14]   ;;  %s54_s17 = int_to_ptr.vmem [resolvable:$true] %s53_s17 }
  0x13   :  { %59 = dma.hbm_to_vmem [thread:$0]  %s52_s0, 8192, %s54_s17, [#allocation10], %s4481_s21, %s4481_s21, %s4482_s22  }
  0x14   :  { %s77_s24 = sshll.u32 %s4489_s23, 4  ;;  %s103_s26 = sshll.u32 %s7512_s7, 4  ;;  %s78_s24 = int_to_ptr.vmem [resolvable:$true] %s77_s24  ;;  %s104_s26 = int_to_ptr.hbm [resolvable:$true] %s103_s26 }
  0x15   :  { %83 = dma.hbm_to_vmem [thread:$0]  %s76_s20, 4096, %s78_s24, [#allocation13], %s4481_s21, %s4481_s21, %s4482_s22  }
  0x16   :  { %s116_s4 = sshll.u32 %s7513_s8, 4  ;;  %s4490_s28 = smov [#allocation17]   ;;  %s117_s4 = int_to_ptr.hbm [resolvable:$true] %s116_s4 }
  0x17   :  { %s105_s3 = sshll.u32 %s4490_s28, 4  ;;  %s4491_s29 = smov [#allocation18]   ;;  %s106_s3 = int_to_ptr.vmem [resolvable:$true] %s105_s3 }
  0x18   :  { %111 = dma.hbm_to_vmem [thread:$0]  %s104_s26, 2048, %s106_s3, [#allocation16], %s4486_s13, %s4486_s13, %s4487_s5  }
  0x19   :  { %s118_s7 = sshll.u32 %s4491_s29, 4  ;;  %s119_s7 = int_to_ptr.vmem [resolvable:$true] %s118_s7 }
  0x1a   :  { %124 = dma.hbm_to_vmem [thread:$0]  %s117_s4, 2048, %s119_s7, [#allocation19], %s4486_s13, %s4486_s13, %s4487_s5  }
  0x1b   :  { %4468 = dma.done.wait [#allocation7], 1024  }
  0x1c   :  { %4469 = vsyncadd [#allocation7], 4294966272 }
  0x1d   :  { %4470 = dma.done.wait [#allocation10], 12288  }
  0x1e   :  { %4471 = vsyncadd [#allocation10], 4294955008 }
  0x1f   :  { %4472 = dma.done.wait [#allocation13], 4160  }
  0x20   :  { %4473 = vsyncadd [#allocation13], 4294963136 }
  0x21   :  { %4474 = dma.done.wait [#allocation16], 10240  }
  0x22   :  { %4475 = vsyncadd [#allocation16], 4294957056 }
  0x23   :  { %4476 = dma.done.wait [#allocation19], 2048  }
  0x24   :  { %4477 = vsyncadd [#allocation19], 4294965248  ;;  %v195_v0 = vld [vmem:[#allocation9 + $0xe0] sm:$0xff]  ;;  %v196_v1 = vld [vmem:[#allocation9 + $0xe8] sm:$0xff]  ;;  %vm209_vm0 = vcmask 523264   ;;  %s3438_s14 = sshll.u32 %s7515_s10, 4  ;;  %s3439_s14 = int_to_ptr.hbm [resolvable:$true] %s3438_s14 }
  0x25   :  { %v191_v2 = vld [vmem:[#allocation9 + $0xc0] sm:$0xff]  ;;  %242 = vmatpush.msra.mxu0 %v195_v0  ;;  %3581 = vmatpush.msra.mxu2 %v195_v0  ;;  %v192_v3 = vld [vmem:[#allocation9 + $0xc8] sm:$0xff]  ;;  %v4596_v17 = vld [vmem:[#allocation6 + $0x10] sm:$0xff] }
  0x26   :  { %283 = vmatpush.msra.mxu1 %v196_v1  ;;  %3589 = vmatpush.msra.mxu3 %v196_v1  ;;  %v187_v4 = vld [vmem:[#allocation9 + $0xa0] sm:$0xff]  ;;  %v188_v5 = vld [vmem:[#allocation9 + $0xa8] sm:$0xff]  ;;  %v198_v18 = vld [vmem:[#allocation9 + $0xf8] sm:$0xff] }
  0x27   :  { %243 = vmatpush.msra.mxu0 %v191_v2  ;;  %3582 = vmatpush.msra.mxu2 %v191_v2  ;;  %v183_v6 = vld [vmem:[#allocation9 + $0x80] sm:$0xff]  ;;  %v184_v7 = vld [vmem:[#allocation9 + $0x88] sm:$0xff]  ;;  %v197_v21 = vld [vmem:[#allocation9 + $0xf0] sm:$0xff] }
  0x28   :  { %284 = vmatpush.msra.mxu1 %v192_v3  ;;  %3590 = vmatpush.msra.mxu3 %v192_v3  ;;  %v179_v8 = vld [vmem:[#allocation9 + $0x60] sm:$0xff]  ;;  %v180_v9 = vld [vmem:[#allocation9 + $0x68] sm:$0xff]  ;;  %v194_v23 = vld [vmem:[#allocation9 + $0xd8] sm:$0xff] }
  0x29   :  { %244 = vmatpush.msra.mxu0 %v187_v4  ;;  %3583 = vmatpush.msra.mxu2 %v187_v4  ;;  %v175_v10 = vld [vmem:[#allocation9 + $0x40] sm:$0xff]  ;;  %v176_v11 = vld [vmem:[#allocation9 + $0x48] sm:$0xff]  ;;  %v193_v25 = vld [vmem:[#allocation9 + $0xd0] sm:$0xff] }
  0x2a   :  { %285 = vmatpush.msra.mxu1 %v188_v5  ;;  %3591 = vmatpush.msra.mxu3 %v188_v5  ;;  %v171_v12 = vld [vmem:[#allocation9 + $0x20] sm:$0xff]  ;;  %v172_v13 = vld [vmem:[#allocation9 + $0x28] sm:$0xff]  ;;  %v190_v27 = vld [vmem:[#allocation9 + $0xb8] sm:$0xff] }
  0x2b   :  { %245 = vmatpush.msra.mxu0 %v183_v6  ;;  %3584 = vmatpush.msra.mxu2 %v183_v6  ;;  %v167_v14 = vld [vmem:[#allocation9] sm:$0xff]  ;;  %v168_v15 = vld [vmem:[#allocation9 + $0x8] sm:$0xff]  ;;  %v189_v29 = vld [vmem:[#allocation9 + $0xb0] sm:$0xff] }
  0x2c   :  { %286 = vmatpush.msra.mxu1 %v184_v7  ;;  %3592 = vmatpush.msra.mxu3 %v184_v7  ;;  %v4594_v16 = vld [vmem:[#allocation6] sm:$0xff]  ;;  %v459_v20 = vld [vmem:[#allocation14 + $0xe8] sm:$0xff]  ;;  %v4606_v31 = vld [vmem:[#allocation6 + $0x18] sm:$0xff] }
  0x2d   :  { %246 = vmatpush.msra.mxu0 %v179_v8  ;;  %3585 = vmatpush.msra.mxu2 %v179_v8  ;;  %v458_v19 = vld [vmem:[#allocation14 + $0xe0] sm:$0xff]  ;;  %v455_v24 = vld [vmem:[#allocation14 + $0xc8] sm:$0xff]  ;;  %v186_v36 = vld [vmem:[#allocation9 + $0x98] sm:$0xff] }
  0x2e   :  { %287 = vmatpush.msra.mxu1 %v180_v9  ;;  %3593 = vmatpush.msra.mxu3 %v180_v9  ;;  %v454_v22 = vld [vmem:[#allocation14 + $0xc0] sm:$0xff]  ;;  %v451_v28 = vld [vmem:[#allocation14 + $0xa8] sm:$0xff]  ;;  %v182_v40 = vld [vmem:[#allocation9 + $0x78] sm:$0xff] }
  0x2f   :  { %247 = vmatpush.msra.mxu0 %v175_v10  ;;  %3586 = vmatpush.msra.mxu2 %v175_v10  ;;  %v450_v26 = vld [vmem:[#allocation14 + $0xa0] sm:$0xff]  ;;  %v447_v32 = vld [vmem:[#allocation14 + $0x88] sm:$0xff]  ;;  %v178_v45 = vld [vmem:[#allocation9 + $0x58] sm:$0xff] }
  0x30   :  { %288 = vmatpush.msra.mxu1 %v176_v11  ;;  %3594 = vmatpush.msra.mxu3 %v176_v11  ;;  %v446_v30 = vld [vmem:[#allocation14 + $0x80] sm:$0xff]  ;;  %v443_v35 = vld [vmem:[#allocation14 + $0x68] sm:$0xff]  ;;  %v174_v48 = vld [vmem:[#allocation9 + $0x38] sm:$0xff] }
  0x31   :  { %248 = vmatpush.msra.mxu0 %v171_v12  ;;  %3587 = vmatpush.msra.mxu2 %v171_v12  ;;  %v4608_v33 = vld [vmem:[#allocation6 + $0x8] sm:$0xff]  ;;  %v185_v37 = vld [vmem:[#allocation9 + $0x90] sm:$0xff]  ;;  %v4618_v44 = vld [vmem:[#allocation6 + $0x20] sm:$0xff] }
  0x32   :  { %289 = vmatpush.msra.mxu1 %v172_v13  ;;  %3595 = vmatpush.msra.mxu3 %v172_v13  ;;  %v442_v34 = vld [vmem:[#allocation14 + $0x60] sm:$0xff]  ;;  %v439_v39 = vld [vmem:[#allocation14 + $0x48] sm:$0xff]  ;;  %v170_v50 = vld [vmem:[#allocation9 + $0x18] sm:$0xff] }
  0x33   :  { %249 = vmatpush.msra.mxu0 %v167_v14  ;;  %3588 = vmatpush.msra.mxu2 %v167_v14  ;;  %v438_v38 = vld [vmem:[#allocation14 + $0x40] sm:$0xff]  ;;  %v181_v41 = vld [vmem:[#allocation9 + $0x70] sm:$0xff]  ;;  %v461_v52 = vld [vmem:[#allocation14 + $0xf8] sm:$0xff] }
  0x34   :  { %290 = vmatpush.msra.mxu1 %v168_v15  ;;  %3596 = vmatpush.msra.mxu3 %v168_v15  ;;  %v434_v42 = vld [vmem:[#allocation14 + $0x20] sm:$0xff]  ;;  %v435_v43 = vld [vmem:[#allocation14 + $0x28] sm:$0xff]  ;;  %v457_v63 = vld [vmem:[#allocation14 + $0xd8] sm:$0xff] }
  0x35   :  { %3469 = vmatmul.msk.f32.vlgmr.msra.gmra.mxu0 %vm209_vm0, %v4594_v16  ;;  %3471 = vmatmul.msk.f32.vlgmr.msra.gmra.mxu2 %vm209_vm0, %v4596_v17  ;;  %v430_v46 = vld [vmem:[#allocation14] sm:$0xff]  ;;  %v431_v47 = vld [vmem:[#allocation14 + $0x8] sm:$0xff]  ;;  %v460_v1 = vld [vmem:[#allocation14 + $0xf0] sm:$0xff] }
  0x36   :  { %3477 = vmatmul.msk.f32.vlgmr.msra.gmra.mxu1 %vm209_vm0, %v4594_v16  ;;  %3479 = vmatmul.msk.f32.vlgmr.msra.gmra.mxu3 %vm209_vm0, %v4596_v17  ;;  %v177_v49 = vld [vmem:[#allocation9 + $0x50] sm:$0xff]  ;;  %v4628_v53 = vld [vmem:[#allocation11 + $0x1e0] sm:$0xff]  ;;  %v4630_v54 = vld [vmem:[#allocation11 + $0x1e8] sm:$0xff] }
  0x37   :  { %365 = vmatpush.msrb.mxu3 %v198_v18  ;;  %480 = vmatpush.msrb.mxu0 %v458_v19  ;;  %v173_v51 = vld [vmem:[#allocation9 + $0x30] sm:$0xff]  ;;  %v4633_v55 = vld [vmem:[#allocation11 + $0x1c0] sm:$0xff]  ;;  %v4635_v56 = vld [vmem:[#allocation11 + $0x1c8] sm:$0xff] }
  0x38   :  { %521 = vmatpush.msrb.mxu1 %v459_v20  ;;  %324 = vmatpush.msrb.mxu2 %v197_v21  ;;  %v4637_v57 = vld [vmem:[#allocation6 + $0x28] sm:$0xff]  ;;  %v169_v58 = vld [vmem:[#allocation9 + $0x10] sm:$0xff]  ;;  %v4640_v59 = vld [vmem:[#allocation11 + $0x1a0] sm:$0xff] }
  0x39   :  { %481 = vmatpush.msrb.mxu0 %v454_v22  ;;  %366 = vmatpush.msrb.mxu3 %v194_v23  ;;  %v4646_v60 = vld [vmem:[#allocation11 + $0x180] sm:$0xff]  ;;  %v4649_v61 = vld [vmem:[#allocation11 + $0x1a8] sm:$0xff]  ;;  %v4665_v3 = vld [vmem:[#allocation6 + $0x30] sm:$0xff] }
  0x3a   :  { %522 = vmatpush.msrb.mxu1 %v455_v24  ;;  %325 = vmatpush.msrb.mxu2 %v193_v25  ;;  %v4658_v62 = vld [vmem:[#allocation11 + $0x188] sm:$0xff]  ;;  %v4660_v0 = vld [vmem:[#allocation11 + $0x160] sm:$0xff]  ;;  %v456_v11 = vld [vmem:[#allocation14 + $0xd0] sm:$0xff] }
  0x3b   :  { %482 = vmatpush.msrb.mxu0 %v450_v26  ;;  %367 = vmatpush.msrb.mxu3 %v190_v27  ;;  %v4663_v2 = vld [vmem:[#allocation11 + $0x140] sm:$0xff]  ;;  %v4668_v4 = vld [vmem:[#allocation11 + $0x168] sm:$0xff]  ;;  %v4696_v13 = vld [vmem:[#allocation6 + $0x38] sm:$0xff] }
  0x3c   :  { %523 = vmatpush.msrb.mxu1 %v451_v28  ;;  %326 = vmatpush.msrb.mxu2 %v189_v29  ;;  %v4671_v5 = vld [vmem:[#allocation11 + $0x120] sm:$0xff]  ;;  %v4679_v7 = vld [vmem:[#allocation11 + $0x148] sm:$0xff]  ;;  %v452_v23 = vld [vmem:[#allocation14 + $0xb0] sm:$0xff] }
  0x3d   :  { %483 = vmatpush.msrb.mxu0 %v446_v30  ;;  %3472 = vmatmul.msk.f32.gmra.mxu2 %vm209_vm0, %v4606_v31  ;;  %v4677_v6 = vld [vmem:[#allocation11 + $0x100] sm:$0xff]  ;;  %v4688_v8 = vld [vmem:[#allocation11 + $0x128] sm:$0xff] }
  0x3e   :  { %524 = vmatpush.msrb.mxu1 %v447_v32  ;;  %3470 = vmatmul.msk.f32.gmra.mxu0 %vm209_vm0, %v4608_v33  ;;  %v453_v9 = vld [vmem:[#allocation14 + $0xb8] sm:$0xff]  ;;  %v4698_v14 = vld [vmem:[#allocation11 + $0x108] sm:$0xff]  ;;  %v448_v32 = vld [vmem:[#allocation14 + $0x90] sm:$0xff] }
  0x3f   :  { %3478 = vmatmul.msk.f32.gmra.mxu1 %vm209_vm0, %v4608_v33  ;;  %3480 = vmatmul.msk.f32.gmra.mxu3 %vm209_vm0, %v4606_v31  ;;  %v4691_v10 = vld [vmem:[#allocation11 + $0xe0] sm:$0xff]  ;;  %v4710_v19 = vld [vmem:[#allocation11 + $0xe8] sm:$0xff] }
  0x40   :  { %484 = vmatpush.msrb.mxu0 %v442_v34  ;;  %525 = vmatpush.msrb.mxu1 %v443_v35  ;;  %v4694_v12 = vld [vmem:[#allocation11 + $0xc0] sm:$0xff]  ;;  %v4719_v20 = vld [vmem:[#allocation11 + $0xc8] sm:$0xff] }
  0x41   :  { %368 = vmatpush.msrb.mxu3 %v186_v36  ;;  %327 = vmatpush.msrb.mxu2 %v185_v37  ;;  %v4702_v15 = vld [vmem:[#allocation11 + $0xa0] sm:$0xff]  ;;  %v4727_v25 = vld [vmem:[#allocation11 + $0xa8] sm:$0xff]  ;;  %v444_v37 = vld [vmem:[#allocation14 + $0x70] sm:$0xff] }
  0x42   :  { %485 = vmatpush.msrb.mxu0 %v438_v38  ;;  %526 = vmatpush.msrb.mxu1 %v439_v39  ;;  %v4708_v18 = vld [vmem:[#allocation11 + $0x80] sm:$0xff]  ;;  %v4739_v28 = vld [vmem:[#allocation11 + $0x88] sm:$0xff] }
  0x43   :  { %369 = vmatpush.msrb.mxu3 %v182_v40  ;;  %328 = vmatpush.msrb.mxu2 %v181_v41  ;;  %v449_v21 = vld [vmem:[#allocation14 + $0x98] sm:$0xff]  ;;  %v4748_v30 = vld [vmem:[#allocation11 + $0x68] sm:$0xff]  ;;  %v440_v40 = vld [vmem:[#allocation14 + $0x50] sm:$0xff] }
  0x44   :  { %486 = vmatpush.msrb.mxu0 %v434_v42  ;;  %527 = vmatpush.msrb.mxu1 %v435_v43  ;;  %v4722_v22 = vld [vmem:[#allocation11 + $0x60] sm:$0xff]  ;;  %v4752_v34 = vld [vmem:[#allocation11 + $0x48] sm:$0xff]  ;;  %v436_v42 = vld [vmem:[#allocation14 + $0x30] sm:$0xff] }
  0x45   :  { %3473 = vmatmul.msk.f32.gmra.mxu2 %vm209_vm0, %v4618_v44  ;;  %370 = vmatpush.msrb.mxu3 %v178_v45  ;;  %v4725_v24 = vld [vmem:[#allocation11 + $0x40] sm:$0xff]  ;;  %v4758_v35 = vld [vmem:[#allocation11 + $0x28] sm:$0xff]  ;;  %v432_v43 = vld [vmem:[#allocation14 + $0x10] sm:$0xff]  ;;  %v7516_v45 = vmov 0.0  }
  0x46   :  { %487 = vmatpush.msrb.mxu0 %v430_v46  ;;  %528 = vmatpush.msrb.mxu1 %v431_v47  ;;  %v4731_v26 = vld [vmem:[#allocation11 + $0x20] sm:$0xff]  ;;  %v4766_v38 = vld [vmem:[#allocation11 + $0x8] sm:$0xff]  ;;  %v4791_v46 = vld [vmem:[#allocation11 + $0x1f8] sm:$0xff] }
  0x47   :  { %3481 = vmatmul.msk.f32.gmra.mxu3 %vm209_vm0, %v4618_v44  ;;  %3501 = vmatmul.msk.f32.vlgmr.msrb.gmra.mxu0 %vm209_vm0, %v4594_v16  ;;  %v4737_v27 = vld [vmem:[#allocation11] sm:$0xff]  ;;  %v4793_v47 = vld [vmem:[#allocation11 + $0x1d8] sm:$0xff] }
  0x48   :  { %3509 = vmatmul.msk.f32.vlgmr.msrb.gmra.mxu1 %vm209_vm0, %v4594_v16  ;;  %371 = vmatpush.msrb.mxu3 %v174_v48  ;;  %v445_v29 = vld [vmem:[#allocation14 + $0x78] sm:$0xff]  ;;  %7839 = vst [vmem:[#allocation27_spill] sm:$0xff] %v4793_v47 }
  0x49   :  { %329 = vmatpush.msrb.mxu2 %v177_v49  ;;  %803 = vmatpush.msra.mxu0 %v4628_v53  ;;  %v441_v36 = vld [vmem:[#allocation14 + $0x58] sm:$0xff]  ;;  %v4804_v49 = vld [vmem:[#allocation15 + $0x1e0] sm:$0xff] }
  0x4a   :  { %372 = vmatpush.msrb.mxu3 %v170_v50  ;;  %823 = vmatpush.msra.mxu1 %v4630_v54  ;;  %v437_v39 = vld [vmem:[#allocation14 + $0x38] sm:$0xff]  ;;  %v4806_v50 = vld [vmem:[#allocation15 + $0x1e8] sm:$0xff] }
  0x4b   :  { %330 = vmatpush.msrb.mxu2 %v173_v51  ;;  %804 = vmatpush.msra.mxu0 %v4633_v55  ;;  %v433_v41 = vld [vmem:[#allocation14 + $0x18] sm:$0xff]  ;;  %v4810_v51 = vld [vmem:[#allocation11 + $0x1f0] sm:$0xff] }
  0x4c   :  { %603 = vmatpush.msra.mxu3 %v461_v52  ;;  %824 = vmatpush.msra.mxu1 %v4635_v56  ;;  %v4802_v48 = vld [vmem:[#allocation11 + $0x1b8] sm:$0xff]  ;;  %v4812_v52 = vld [vmem:[#allocation15 + $0x1c0] sm:$0xff] }
  0x4d   :  { %3474 = vmatmul.msk.f32.gmra.mxu2 %vm209_vm0, %v4637_v57  ;;  %805 = vmatpush.msra.mxu0 %v4640_v59  ;;  %7840 = vst [vmem:[#allocation28_spill] sm:$0xff] %v4802_v48 }
  0x4e   :  { %331 = vmatpush.msrb.mxu2 %v169_v58  ;;  %825 = vmatpush.msra.mxu1 %v4649_v61  ;;  %v4814_v58 = vld [vmem:[#allocation15 + $0x1c8] sm:$0xff] }
  0x4f   :  { %3482 = vmatmul.msk.f32.gmra.mxu3 %vm209_vm0, %v4637_v57  ;;  %3502 = vmatmul.msk.f32.gmra.mxu0 %vm209_vm0, %v4608_v33 }
  0x50   :  { %3510 = vmatmul.msk.f32.gmra.mxu1 %vm209_vm0, %v4608_v33  ;;  %806 = vmatpush.msra.mxu0 %v4646_v60 }
  0x51   :  { %604 = vmatpush.msra.mxu3 %v457_v63  ;;  %562 = vmatpush.msra.mxu2 %v460_v1  ;;  %v4818_v63 = vld [vmem:[#allocation11 + $0x1d0] sm:$0xff]  ;;  %v4820_v1 = vld [vmem:[#allocation11 + $0x198] sm:$0xff] }
  0x52   :  { %807 = vmatpush.msra.mxu0 %v4660_v0  ;;  %826 = vmatpush.msra.mxu1 %v4658_v62  ;;  %7841 = vst [vmem:[#allocation29_spill] sm:$0xff] %v4820_v1 }
  0x53   :  { %605 = vmatpush.msra.mxu3 %v453_v9  ;;  %563 = vmatpush.msra.mxu2 %v456_v11  ;;  %v4826_v9 = vld [vmem:[#allocation15 + $0x1a0] sm:$0xff]  ;;  %v4828_v11 = vld [vmem:[#allocation15 + $0x1a8] sm:$0xff] }
  0x54   :  { %808 = vmatpush.msra.mxu0 %v4663_v2  ;;  %827 = vmatpush.msra.mxu1 %v4668_v4 }
  0x55   :  { %3475 = vmatmul.msk.f32.gmra.mxu2 %vm209_vm0, %v4665_v3  ;;  %606 = vmatpush.msra.mxu3 %v449_v21  ;;  %v4830_v21 = vld [vmem:[#allocation11 + $0x1b0] sm:$0xff] }
  0x56   :  { %809 = vmatpush.msra.mxu0 %v4671_v5  ;;  %828 = vmatpush.msra.mxu1 %v4679_v7  ;;  %7842 = vst [vmem:[#allocation30_spill] sm:$0xff] %v4830_v21 }
  0x57   :  { %3483 = vmatmul.msk.f32.gmra.mxu3 %vm209_vm0, %v4665_v3  ;;  %3503 = vmatmul.msk.f32.gmra.mxu0 %vm209_vm0, %v4596_v17 }
  0x58   :  { %3511 = vmatmul.msk.f32.gmra.mxu1 %vm209_vm0, %v4596_v17  ;;  %810 = vmatpush.msra.mxu0 %v4677_v6 }
  0x59   :  { %829 = vmatpush.msra.mxu1 %v4688_v8  ;;  %564 = vmatpush.msra.mxu2 %v452_v23  ;;  %v4835_v23 = vld [vmem:[#allocation15 + $0x180] sm:$0xff] }
  0x5a   :  { %811 = vmatpush.msra.mxu0 %v4691_v10  ;;  %607 = vmatpush.msra.mxu3 %v445_v29  ;;  %v4837_v29 = vld [vmem:[#allocation15 + $0x188] sm:$0xff] }
  0x5b   :  { %830 = vmatpush.msra.mxu1 %v4698_v14  ;;  %565 = vmatpush.msra.mxu2 %v448_v32  ;;  %v4844_v32 = vld [vmem:[#allocation11 + $0x190] sm:$0xff] }
  0x5c   :  { %812 = vmatpush.msra.mxu0 %v4694_v12  ;;  %608 = vmatpush.msra.mxu3 %v441_v36  ;;  %7843 = vst [vmem:[#allocation31_spill] sm:$0xff] %v4844_v32  ;;  %v4846_v36 = vld [vmem:[#allocation11 + $0x178] sm:$0xff] }
  0x5d   :  { %3476 = vmatmul.msk.f32.gmra.mxu2 %vm209_vm0, %v4696_v13  ;;  %831 = vmatpush.msra.mxu1 %v4710_v19  ;;  %7844 = vst [vmem:[#allocation32_spill] sm:$0xff] %v4846_v36 }
  0x5e   :  { %813 = vmatpush.msra.mxu0 %v4702_v15  ;;  %566 = vmatpush.msra.mxu2 %v444_v37  ;;  %v4848_v37 = vld [vmem:[#allocation15 + $0x160] sm:$0xff] }
  0x5f   :  { %3484 = vmatmul.msk.f32.gmra.mxu3 %vm209_vm0, %v4696_v13  ;;  %3504 = vmatmul.msk.f32.gmra.mxu0 %vm209_vm0, %v4606_v31 }
  0x60   :  { %3512 = vmatmul.msk.f32.gmra.mxu1 %vm209_vm0, %v4606_v31  ;;  %814 = vmatpush.msra.mxu0 %v4708_v18 }
  0x61   :  { %832 = vmatpush.msra.mxu1 %v4719_v20  ;;  %609 = vmatpush.msra.mxu3 %v437_v39  ;;  %v4852_v39 = vld [vmem:[#allocation15 + $0x168] sm:$0xff] }
  0x62   :  { %815 = vmatpush.msra.mxu0 %v4722_v22  ;;  %567 = vmatpush.msra.mxu2 %v440_v40  ;;  %v4854_v40 = vld [vmem:[#allocation11 + $0x170] sm:$0xff] }
  0x63   :  { %833 = vmatpush.msra.mxu1 %v4727_v25  ;;  %610 = vmatpush.msra.mxu3 %v433_v41  ;;  %7845 = vst [vmem:[#allocation33_spill] sm:$0xff] %v4854_v40  ;;  %v4860_v41 = vld [vmem:[#allocation15 + $0x140] sm:$0xff] }
  0x64   :  { %816 = vmatpush.msra.mxu0 %v4725_v24  ;;  %568 = vmatpush.msra.mxu2 %v436_v42  ;;  %7846 = vst [vmem:[#allocation34_spill] sm:$0xff] %v4860_v41  ;;  %v4862_v42 = vld [vmem:[#allocation15 + $0x148] sm:$0xff] }
  0x65   :  { %3485 = vmatmul.msk.f32.vlgmr.msrb.gmra.mxu2 %vm209_vm0, %v4594_v16  ;;  %834 = vmatpush.msra.mxu1 %v4739_v28  ;;  %7847 = vst [vmem:[#allocation35_spill] sm:$0xff] %v4862_v42 }
  0x66   :  { %817 = vmatpush.msra.mxu0 %v4731_v26  ;;  %569 = vmatpush.msra.mxu2 %v432_v43  ;;  %v4864_v43 = vld [vmem:[#allocation11 + $0x150] sm:$0xff] }
  0x67   :  { %3493 = vmatmul.msk.f32.vlgmr.msrb.gmra.mxu3 %vm209_vm0, %v4594_v16  ;;  %3505 = vmatmul.msk.f32.gmra.mxu0 %vm209_vm0, %v4618_v44  ;;  %7848 = vst [vmem:[#allocation36_spill] sm:$0xff] %v4864_v43 }
  0x68   :  { %3513 = vmatmul.msk.f32.gmra.mxu1 %vm209_vm0, %v4618_v44  ;;  %818 = vmatpush.msra.mxu0 %v4737_v27 }
  0x69   :  { %835 = vmatpush.msra.mxu1 %v4748_v30  ;;  %863 = vmatpush.msrb.mxu3 %v4791_v46 }
  0x6a   :  { %894 = vmatpush.msrb.mxu0 %v4804_v49  ;;  %843 = vmatpush.msrb.mxu2 %v4810_v51 }
  0x6b   :  { %836 = vmatpush.msra.mxu1 %v4752_v34  ;;  %864 = vmatpush.msrb.mxu3 %v4793_v47  ;;  %v4895_v47 = vld [vmem:[#allocation15 + $0xe0] sm:$0xff] }
  0x6c   :  { %895 = vmatpush.msrb.mxu0 %v4812_v52  ;;  %844 = vmatpush.msrb.mxu2 %v4818_v63  ;;  %7857 = vst [vmem:[#allocation45_spill] sm:$0xff] %v4895_v47 }
  0x6d   :  { %3486 = vmatmul.msk.f32.gmra.mxu2 %vm209_vm0, %v4608_v33  ;;  %837 = vmatpush.msra.mxu1 %v4758_v35 }
  0x6e   :  { %865 = vmatpush.msrb.mxu3 %v4802_v48  ;;  %896 = vmatpush.msrb.mxu0 %v4826_v9  ;;  %v4882_v48 = vld [vmem:[#allocation15 + $0x100] sm:$0xff] }
  0x6f   :  { %3494 = vmatmul.msk.f32.gmra.mxu3 %vm209_vm0, %v4608_v33  ;;  %3506 = vmatmul.msk.f32.gmra.mxu0 %vm209_vm0, %v4637_v57  ;;  %7854 = vst [vmem:[#allocation42_spill] sm:$0xff] %v4882_v48 }
  0x70   :  { %3514 = vmatmul.msk.f32.gmra.mxu1 %vm209_vm0, %v4637_v57  ;;  %866 = vmatpush.msrb.mxu3 %v4820_v1  ;;  %v4873_v1 = vld [vmem:[#allocation15 + $0x128] sm:$0xff] }
  0x71   :  { %838 = vmatpush.msra.mxu1 %v4766_v38  ;;  %845 = vmatpush.msrb.mxu2 %v4830_v21  ;;  %7851 = vst [vmem:[#allocation39_spill] sm:$0xff] %v4873_v1  ;;  %v4891_v21 = vld [vmem:[#allocation11 + $0x110] sm:$0xff] }
  0x72   :  { %897 = vmatpush.msrb.mxu0 %v4835_v23  ;;  %867 = vmatpush.msrb.mxu3 %v4846_v36  ;;  %v4871_v36 = vld [vmem:[#allocation15 + $0x120] sm:$0xff]  ;;  %7855 = vst [vmem:[#allocation43_spill] sm:$0xff] %v4891_v21 }
  0x73   :  { %914 = vmatpush.msrb.mxu1 %v4806_v50  ;;  %846 = vmatpush.msrb.mxu2 %v4844_v32  ;;  %7850 = vst [vmem:[#allocation38_spill] sm:$0xff] %v4871_v36  ;;  %v4880_v32 = vld [vmem:[#allocation11 + $0x138] sm:$0xff] }
  0x74   :  { %898 = vmatpush.msrb.mxu0 %v4848_v37  ;;  %7853 = vst [vmem:[#allocation41_spill] sm:$0xff] %v4880_v32 }
  0x75   :  { %3487 = vmatmul.msk.f32.gmra.mxu2 %vm209_vm0, %v4596_v17  ;;  %915 = vmatpush.msrb.mxu1 %v4814_v58 }
  0x76   :  { %847 = vmatpush.msrb.mxu2 %v4854_v40  ;;  %899 = vmatpush.msrb.mxu0 %v4860_v41  ;;  %v4878_v40 = vld [vmem:[#allocation11 + $0x130] sm:$0xff] }
  0x77   :  { %3495 = vmatmul.msk.f32.gmra.mxu3 %vm209_vm0, %v4596_v17  ;;  %3507 = vmatmul.msk.f32.gmra.mxu0 %vm209_vm0, %v4665_v3  ;;  %7852 = vst [vmem:[#allocation40_spill] sm:$0xff] %v4878_v40  ;;  %v4911_v41 = vld [vmem:[#allocation15 + $0xc8] sm:$0xff] }
  0x78   :  { %3515 = vmatmul.msk.f32.gmra.mxu1 %vm209_vm0, %v4665_v3  ;;  %848 = vmatpush.msrb.mxu2 %v4864_v43  ;;  %v4886_v43 = vld [vmem:[#allocation15 + $0x108] sm:$0xff]  ;;  %7862 = vst [vmem:[#allocation50_spill] sm:$0xff] %v4911_v41 }
  0x79   :  { %916 = vmatpush.msrb.mxu1 %v4828_v11  ;;  %900 = vmatpush.msrb.mxu0 %v4871_v36  ;;  %v4899_v36 = vld [vmem:[#allocation15 + $0xe8] sm:$0xff] }
  0x7a   :  { %849 = vmatpush.msrb.mxu2 %v4878_v40  ;;  %7858 = vst [vmem:[#allocation46_spill] sm:$0xff] %v4899_v36  ;;  %v4909_v40 = vld [vmem:[#allocation15 + $0xc0] sm:$0xff] }
  0x7b   :  { %917 = vmatpush.msrb.mxu1 %v4837_v29  ;;  %901 = vmatpush.msrb.mxu0 %v4882_v48  ;;  %7861 = vst [vmem:[#allocation49_spill] sm:$0xff] %v4909_v40  ;;  %v4917_v48 = vld [vmem:[#allocation11 + $0xd8] sm:$0xff] }
  0x7c   :  { %850 = vmatpush.msrb.mxu2 %v4891_v21  ;;  %7864 = vst [vmem:[#allocation52_spill] sm:$0xff] %v4917_v48  ;;  %v4921_v21 = vld [vmem:[#allocation15 + $0xa0] sm:$0xff] }
  0x7d   :  { %3488 = vmatmul.msk.f32.gmra.mxu2 %vm209_vm0, %v4606_v31  ;;  %918 = vmatpush.msrb.mxu1 %v4852_v39  ;;  %7865 = vst [vmem:[#allocation53_spill] sm:$0xff] %v4921_v21 }
  0x7e   :  { %902 = vmatpush.msrb.mxu0 %v4895_v47  ;;  %v4951_v47 = vld [vmem:[#allocation15 + $0x68] sm:$0xff] }
  0x7f   :  { %3496 = vmatmul.msk.f32.gmra.mxu3 %vm209_vm0, %v4606_v31  ;;  %3508 = vmatmul.msk.f32.gmra.mxu0 %vm209_vm0, %v4696_v13  ;;  %7873 = vst [vmem:[#allocation61_spill] sm:$0xff] %v4951_v47 }
  0x80   :  { %3516 = vmatmul.msk.f32.gmra.mxu1 %vm209_vm0, %v4696_v13  ;;  %903 = vmatpush.msrb.mxu0 %v4909_v40  ;;  %v4939_v40 = vld [vmem:[#allocation15 + $0x88] sm:$0xff] }
  0x81   :  { %919 = vmatpush.msrb.mxu1 %v4862_v42  ;;  %v4905_v42 = vld [vmem:[#allocation11 + $0xf8] sm:$0xff]  ;;  %7869 = vst [vmem:[#allocation57_spill] sm:$0xff] %v4939_v40 }
  0x82   :  { %7860 = vst [vmem:[#allocation48_spill] sm:$0xff] %v4905_v42  ;;  %904 = vmatpush.msrb.mxu0 %v4921_v21  ;;  %v4957_v21 = vld [vmem:[#allocation11 + $0x78] sm:$0xff] }
  0x83   :  { %920 = vmatpush.msrb.mxu1 %v4873_v1  ;;  %v4901_v1 = vld [vmem:[#allocation11 + $0xf0] sm:$0xff]  ;;  %7875 = vst [vmem:[#allocation63_spill] sm:$0xff] %v4957_v21 }
  0x84   :  { %7859 = vst [vmem:[#allocation47_spill] sm:$0xff] %v4901_v1  ;;  %851 = vmatpush.msrb.mxu2 %v4901_v1  ;;  %v4932_v1 = vld [vmem:[#allocation11 + $0xb8] sm:$0xff] }
  0x85   :  { %3489 = vmatmul.msk.f32.gmra.mxu2 %vm209_vm0, %v4618_v44  ;;  %921 = vmatpush.msrb.mxu1 %v4886_v43  ;;  %7868 = vst [vmem:[#allocation56_spill] sm:$0xff] %v4932_v1 }
  0x87   :  { %3497 = vmatmul.msk.f32.gmra.mxu3 %vm209_vm0, %v4618_v44  ;;  %819 = vmatmul.f32.vlgmr.msra.gmra.mxu0 %v7516_v45 }
  0x88   :  { %839 = vmatmul.f32.vlgmr.msra.gmra.mxu1 %v7516_v45  ;;  %v4867_v45 = vld [vmem:[#allocation11 + $0x158] sm:$0xff] }
  0x89   :  { %7849 = vst [vmem:[#allocation37_spill] sm:$0xff] %v4867_v45  ;;  %868 = vmatpush.msrb.mxu3 %v4867_v45  ;;  %v4893_v45 = vld [vmem:[#allocation11 + $0x118] sm:$0xff]  ;;  %922 = vmatpush.msrb.mxu1 %v4899_v36  ;;  %v4928_v36 = vld [vmem:[#allocation11 + $0xb0] sm:$0xff] }
  0x8a   :  { %7856 = vst [vmem:[#allocation44_spill] sm:$0xff] %v4893_v45 }
  0x8b   :  { %869 = vmatpush.msrb.mxu3 %v4880_v32  ;;  %v4915_v32 = vld [vmem:[#allocation11 + $0xd0] sm:$0xff]  ;;  %923 = vmatpush.msrb.mxu1 %v4911_v41  ;;  %7867 = vst [vmem:[#allocation55_spill] sm:$0xff] %v4928_v36 }
  0x8c   :  { %7863 = vst [vmem:[#allocation51_spill] sm:$0xff] %v4915_v32  ;;  %852 = vmatpush.msrb.mxu2 %v4915_v32  ;;  %v4941_v41 = vld [vmem:[#allocation11 + $0x90] sm:$0xff]  ;;  %v4945_v32 = vld [vmem:[#allocation11 + $0x98] sm:$0xff] }
  0x8d   :  { %3490 = vmatmul.msk.f32.gmra.mxu2 %vm209_vm0, %v4637_v57  ;;  %870 = vmatpush.msrb.mxu3 %v4893_v45  ;;  %v4926_v45 = vld [vmem:[#allocation15 + $0xa8] sm:$0xff]  ;;  %7870 = vst [vmem:[#allocation58_spill] sm:$0xff] %v4941_v41 }
  0x8e   :  { %7866 = vst [vmem:[#allocation54_spill] sm:$0xff] %v4926_v45  ;;  %924 = vmatpush.msrb.mxu1 %v4926_v45  ;;  %853 = vmatpush.msrb.mxu2 %v4928_v36  ;;  %v4961_v36 = vld [vmem:[#allocation15 + $0x40] sm:$0xff]  ;;  %v4963_v45 = vld [vmem:[#allocation15 + $0x48] sm:$0xff] }
  0x8f   :  { %3498 = vmatmul.msk.f32.gmra.mxu3 %vm209_vm0, %v4637_v57  ;;  %7871 = vst [vmem:[#allocation59_spill] sm:$0xff] %v4945_v32 }
  0x90   :  { %871 = vmatpush.msrb.mxu3 %v4905_v42  ;;  %v4934_v42 = vld [vmem:[#allocation15 + $0x80] sm:$0xff]  ;;  %925 = vmatpush.msrb.mxu1 %v4939_v40  ;;  %7876 = vst [vmem:[#allocation64_spill] sm:$0xff] %v4961_v36  ;;  %v4997_v40 = vld [vmem:[#allocation11 + $0x18] sm:$0xff] }
  0x91   :  { %905 = vmatpush.msrb.mxu0 %v4934_v42  ;;  %854 = vmatpush.msrb.mxu2 %v4941_v41  ;;  %7877 = vst [vmem:[#allocation65_spill] sm:$0xff] %v4963_v45  ;;  %v4972_v41 = vld [vmem:[#allocation11 + $0x58] sm:$0xff] }
  0x92   :  { %872 = vmatpush.msrb.mxu3 %v4917_v48  ;;  %v4947_v48 = vld [vmem:[#allocation15 + $0x60] sm:$0xff]  ;;  %926 = vmatpush.msrb.mxu1 %v4951_v47  ;;  %7879 = vst [vmem:[#allocation67_spill] sm:$0xff] %v4972_v41  ;;  %v4980_v47 = vld [vmem:[#allocation11 + $0x30] sm:$0xff] }
  0x93   :  { %7872 = vst [vmem:[#allocation60_spill] sm:$0xff] %v4947_v48  ;;  %906 = vmatpush.msrb.mxu0 %v4947_v48  ;;  %v4978_v48 = vld [vmem:[#allocation15 + $0x28] sm:$0xff] }
  0x94   :  { %873 = vmatpush.msrb.mxu3 %v4932_v1  ;;  %v4967_v1 = vld [vmem:[#allocation11 + $0x50] sm:$0xff]  ;;  %927 = vmatpush.msrb.mxu1 %v4963_v45  ;;  %7880 = vst [vmem:[#allocation68_spill] sm:$0xff] %v4980_v47 }
  0x95   :  { %3491 = vmatmul.msk.f32.gmra.mxu2 %vm209_vm0, %v4665_v3  ;;  %7878 = vst [vmem:[#allocation66_spill] sm:$0xff] %v4967_v1  ;;  %907 = vmatpush.msrb.mxu0 %v4961_v36  ;;  %v4991_v36 = vld [vmem:[#allocation15 + $0x8] sm:$0xff] }
  0x96   :  { %874 = vmatpush.msrb.mxu3 %v4945_v32  ;;  %v4974_v32 = vld [vmem:[#allocation15 + $0x20] sm:$0xff]  ;;  %7883 = vst [vmem:[#allocation71_spill] sm:$0xff] %v4991_v36  ;;  %v4993_v45 = vld [vmem:[#allocation11 + $0x10] sm:$0xff]  ;;  %928 = vmatpush.msrb.mxu1 %v4978_v48 }
  0x97   :  { %3499 = vmatmul.msk.f32.gmra.mxu3 %vm209_vm0, %v4665_v3  ;;  %908 = vmatpush.msrb.mxu0 %v4974_v32  ;;  %7884 = vst [vmem:[#allocation72_spill] sm:$0xff] %v4993_v45 }
  0x98   :  { %875 = vmatpush.msrb.mxu3 %v4957_v21  ;;  %v4987_v21 = vld [vmem:[#allocation15] sm:$0xff]  ;;  %7885 = vst [vmem:[#allocation73_spill] sm:$0xff] %v4997_v40  ;;  %929 = vmatpush.msrb.mxu1 %v4991_v36 }
  0x99   :  { %7882 = vst [vmem:[#allocation70_spill] sm:$0xff] %v4987_v21  ;;  %909 = vmatpush.msrb.mxu0 %v4987_v21 }
  0x9a   :  { %876 = vmatpush.msrb.mxu3 %v4972_v41  ;;  %v5005_v41 = vld [vmem:[#allocation15 + $0x1f8] sm:$0xff]  ;;  %1134 = vmatpush.msra.mxu1 %v4630_v54  ;;  %v5049_v54 = vld [vmem:[#allocation15 + $0x150] sm:$0xff] }
  0x9b   :  { %7887 = vst [vmem:[#allocation75_spill] sm:$0xff] %v5005_v41  ;;  %1114 = vmatpush.msra.mxu0 %v4628_v53  ;;  %v5041_v53 = vld [vmem:[#allocation15 + $0x178] sm:$0xff] }
  0x9c   :  { %1135 = vmatpush.msra.mxu1 %v4635_v56  ;;  %v5058_v56 = vld [vmem:[#allocation15 + $0x130] sm:$0xff] }
  0x9d   :  { %3492 = vmatmul.msk.f32.gmra.mxu2 %vm209_vm0, %v4696_v13  ;;  %1115 = vmatpush.msra.mxu0 %v4633_v55  ;;  %v5051_v55 = vld [vmem:[#allocation15 + $0x158] sm:$0xff] }
  0x9e   :  { %1136 = vmatpush.msra.mxu1 %v4649_v61  ;;  %v5067_v61 = vld [vmem:[#allocation15 + $0x110] sm:$0xff] }
  0x9f   :  { %3500 = vmatmul.msk.f32.gmra.mxu3 %vm209_vm0, %v4696_v13  ;;  %1116 = vmatpush.msra.mxu0 %v4640_v59  ;;  %v5060_v59 = vld [vmem:[#allocation15 + $0x138] sm:$0xff] }
  0xa0   :  { %1137 = vmatpush.msra.mxu1 %v4658_v62  ;;  %v5087_v62 = vld [vmem:[#allocation15 + $0xd0] sm:$0xff] }
  0xa1   :  { %1117 = vmatpush.msra.mxu0 %v4646_v60  ;;  %v5077_v60 = vld [vmem:[#allocation15 + $0xf0] sm:$0xff] }
  0xa2   :  { %7893 = vst [vmem:[#allocation80_spill] sm:$0xff] %v5077_v60  ;;  %1138 = vmatpush.msra.mxu1 %v4668_v4  ;;  %v5098_v4 = vld [vmem:[#allocation15 + $0xb8] sm:$0xff] }
  0xa3   :  { %1118 = vmatpush.msra.mxu0 %v4660_v0  ;;  %v5089_v0 = vld [vmem:[#allocation15 + $0xd8] sm:$0xff] }
  0xa4   :  { %1139 = vmatpush.msra.mxu1 %v4679_v7  ;;  %v5105_v7 = vld [vmem:[#allocation15 + $0x90] sm:$0xff] }
  0xa5   :  { %3517 = vmatmul.msk.f32.vlgmr.msra.gmra.mxu2 %vm209_vm0, %v4594_v16  ;;  %1119 = vmatpush.msra.mxu0 %v4663_v2  ;;  %v5096_v2 = vld [vmem:[#allocation15 + $0xb0] sm:$0xff] }
  0xa6   :  { %1140 = vmatpush.msra.mxu1 %v4688_v8  ;;  %v5127_v8 = vld [vmem:[#allocation15 + $0x58] sm:$0xff] }
  0xa7   :  { %3525 = vmatmul.msk.f32.vlgmr.msra.gmra.mxu3 %vm209_vm0, %v4594_v16  ;;  %v4953_v16 = vld [vmem:[#allocation11 + $0x70] sm:$0xff]  ;;  %1120 = vmatpush.msra.mxu0 %v4671_v5 }
  0xa8   :  { %7874 = vst [vmem:[#allocation62_spill] sm:$0xff] %v4953_v16  ;;  %855 = vmatpush.msrb.mxu2 %v4953_v16  ;;  %v4985_v16 = vld [vmem:[#allocation11 + $0x38] sm:$0xff]  ;;  %1141 = vmatpush.msra.mxu1 %v4698_v14 }
  0xa9   :  { %7881 = vst [vmem:[#allocation69_spill] sm:$0xff] %v4985_v16  ;;  %877 = vmatpush.msrb.mxu3 %v4985_v16  ;;  %v5012_v16 = vld [vmem:[#allocation15 + $0x1d0] sm:$0xff]  ;;  %1121 = vmatpush.msra.mxu0 %v4677_v6  ;;  %v5136_v14 = vld [vmem:[#allocation15 + $0x38] sm:$0xff] }
  0xaa   :  { %856 = vmatpush.msrb.mxu2 %v4967_v1  ;;  %v7888_v1 = vmov 0.0   ;;  %v5115_v5 = vld [vmem:[#allocation15 + $0x70] sm:$0xff]  ;;  %1142 = vmatpush.msra.mxu1 %v4710_v19 }
  0xab   :  { %878 = vmatpush.msrb.mxu3 %v4997_v40  ;;  %910 = vmatmul.f32.vlgmr.msrb.gmra.mxu0 %v7888_v1  ;;  %v5022_v40 = vld [vmem:[#allocation15 + $0x1b8] sm:$0xff]  ;;  %7896 = vst [vmem:[#allocation83_spill] sm:$0xff] %v5115_v5  ;;  %v5125_v6 = vld [vmem:[#allocation15 + $0x50] sm:$0xff] }
  0xac   :  { %857 = vmatpush.msrb.mxu2 %v4980_v47  ;;  %930 = vmatmul.f32.vlgmr.msrb.gmra.mxu1 %v7888_v1  ;;  %v5014_v47 = vld [vmem:[#allocation15 + $0x1d8] sm:$0xff]  ;;  %v5143_v19 = vld [vmem:[#allocation15 + $0x10] sm:$0xff] }
  0xad   :  { %3518 = vmatmul.msk.f32.gmra.mxu2 %vm209_vm0, %v4608_v33  ;;  %954 = vmatpush.msra.mxu3 %v5005_v41  ;;  %v5033_v41 = vld [vmem:[#allocation15 + $0x198] sm:$0xff] }
  0xae   :  { %858 = vmatpush.msrb.mxu2 %v4993_v45  ;;  %v5020_v45 = vld [vmem:[#allocation15 + $0x1b0] sm:$0xff]  ;;  %1122 = vmatpush.msra.mxu0 %v4691_v10 }
  0xaf   :  { %3526 = vmatmul.msk.f32.gmra.mxu3 %vm209_vm0, %v4608_v33  ;;  %v5003_v33 = vld [vmem:[#allocation15 + $0x1f0] sm:$0xff]  ;;  %1143 = vmatpush.msra.mxu1 %v4719_v20 }
  0xb0   :  { %7886 = vst [vmem:[#allocation74_spill] sm:$0xff] %v5003_v33  ;;  %934 = vmatpush.msra.mxu2 %v5003_v33  ;;  %955 = vmatpush.msra.mxu3 %v5014_v47  ;;  %v5031_v33 = vld [vmem:[#allocation15 + $0x190] sm:$0xff] }
  0xb1   :  { %v5134_v10 = vld [vmem:[#allocation15 + $0x30] sm:$0xff]  ;;  %1123 = vmatpush.msra.mxu0 %v4694_v12  ;;  %1144 = vmatpush.msra.mxu1 %v4727_v25 }
  0xb2   :  { %935 = vmatpush.msra.mxu2 %v5012_v16  ;;  %956 = vmatpush.msra.mxu3 %v5022_v40 }
  0xb3   :  { %1124 = vmatpush.msra.mxu0 %v4702_v15  ;;  %1145 = vmatpush.msra.mxu1 %v4739_v28 }
  0xb4   :  { %936 = vmatpush.msra.mxu2 %v5020_v45  ;;  %957 = vmatpush.msra.mxu3 %v5033_v41 }
  0xb5   :  { %3519 = vmatmul.msk.f32.gmra.mxu2 %vm209_vm0, %v4596_v17  ;;  %1125 = vmatpush.msra.mxu0 %v4708_v18  ;;  %v5180_v18 = vpop.f32.mrf.mxu1 }
  0xb6   :  { %937 = vmatpush.msra.mxu2 %v5031_v33  ;;  %958 = vmatpush.msra.mxu3 %v5041_v53 }
  0xb7   :  { %3527 = vmatmul.msk.f32.gmra.mxu3 %vm209_vm0, %v4596_v17  ;;  %v5039_v17 = vld [vmem:[#allocation15 + $0x170] sm:$0xff]  ;;  %1126 = vmatpush.msra.mxu0 %v4722_v22 }
  0xb8   :  { %v5025_v36 = vpop.f32.mrf.mxu2  ;;  %938 = vmatpush.msra.mxu2 %v5039_v17  ;;  %959 = vmatpush.msra.mxu3 %v5051_v55 }
  0xb9   :  { %7889 = vst [vmem:[#allocation76_spill] sm:$0xff] %v5025_v36  ;;  %v5029_v21 = vpop.f32.mrf.mxu3  ;;  %v5069_v36 = vld [vmem:[#allocation15 + $0x118] sm:$0xff]  ;;  %1146 = vmatpush.msra.mxu1 %v4748_v30  ;;  %1127 = vmatpush.msra.mxu0 %v4725_v24  ;;  %v7905_v30 = vld [vmem:[#allocation27_spill] sm:$0xff] }
  0xba   :  { %7890 = vst [vmem:[#allocation77_spill] sm:$0xff] %v5029_v21  ;;  %939 = vmatpush.msra.mxu2 %v5049_v54  ;;  %960 = vmatpush.msra.mxu3 %v5060_v59 }
  0xbb   :  { %1147 = vmatpush.msra.mxu1 %v4752_v34  ;;  %1128 = vmatpush.msra.mxu0 %v4731_v26  ;;  %v7903_v26 = vld [vmem:[#allocation34_spill] sm:$0xff] }
  0xbc   :  { %940 = vmatpush.msra.mxu2 %v5058_v56  ;;  %961 = vmatpush.msra.mxu3 %v5069_v36  ;;  %v7906_v34 = vld [vmem:[#allocation30_spill] sm:$0xff] }
  0xbd   :  { %3520 = vmatmul.msk.f32.gmra.mxu2 %vm209_vm0, %v4606_v31  ;;  %1148 = vmatpush.msra.mxu1 %v4758_v35  ;;  %v5205_v25 = vpop.f32.mrf.mxu1  ;;  %v7907_v35 = vld [vmem:[#allocation38_spill] sm:$0xff] }
  0xbe   :  { %941 = vmatpush.msra.mxu2 %v5067_v61  ;;  %1129 = vmatpush.msra.mxu0 %v4737_v27  ;;  %v7904_v27 = vld [vmem:[#allocation35_spill] sm:$0xff] }
  0xbf   :  { %3528 = vmatmul.msk.f32.gmra.mxu3 %vm209_vm0, %v4606_v31  ;;  %1149 = vmatpush.msra.mxu1 %v4766_v38  ;;  %v7908_v38 = vld [vmem:[#allocation39_spill] sm:$0xff] }
  0xc0   :  { %v5063_v21 = vpop.f32.mrf.mxu2  ;;  %942 = vmatpush.msra.mxu2 %v5077_v60  ;;  %v5107_v60 = vld [vmem:[#allocation15 + $0x98] sm:$0xff]  ;;  %1205 = vmatpush.msrb.mxu0 %v4804_v49  ;;  %v7909_v49 = vld [vmem:[#allocation28_spill] sm:$0xff] }
  0xc1   :  { %7891 = vst [vmem:[#allocation78_spill] sm:$0xff] %v5063_v21  ;;  %v5079_v21 = vld [vmem:[#allocation15 + $0xf8] sm:$0xff]  ;;  %1225 = vmatpush.msrb.mxu1 %v4806_v50 }
  0xc2   :  { %v5073_v31 = vpop.f32.mrf.mxu3  ;;  %962 = vmatpush.msra.mxu3 %v5079_v21  ;;  %943 = vmatpush.msra.mxu2 %v5087_v62  ;;  %v7911_v50 = vld [vmem:[#allocation42_spill] sm:$0xff] }
  0xc3   :  { %7892 = vst [vmem:[#allocation79_spill] sm:$0xff] %v5073_v31  ;;  %1206 = vmatpush.msrb.mxu0 %v4812_v52  ;;  %1226 = vmatpush.msrb.mxu1 %v4814_v58  ;;  %v7913_v52 = vld [vmem:[#allocation33_spill] sm:$0xff] }
  0xc4   :  { %963 = vmatpush.msra.mxu3 %v5089_v0  ;;  %944 = vmatpush.msra.mxu2 %v5096_v2 }
  0xc5   :  { %3521 = vmatmul.msk.f32.gmra.mxu2 %vm209_vm0, %v4618_v44  ;;  %1207 = vmatpush.msrb.mxu0 %v4826_v9  ;;  %v7915_v9 = vld [vmem:[#allocation36_spill] sm:$0xff] }
  0xc6   :  { %964 = vmatpush.msra.mxu3 %v5098_v4  ;;  %945 = vmatpush.msra.mxu2 %v5105_v7 }
  0xc7   :  { %3529 = vmatmul.msk.f32.gmra.mxu3 %vm209_vm0, %v4618_v44  ;;  %1227 = vmatpush.msrb.mxu1 %v4828_v11  ;;  %v7916_v11 = vld [vmem:[#allocation45_spill] sm:$0xff] }
  0xc8   :  { %v5101_v31 = vpop.f32.mrf.mxu2  ;;  %965 = vmatpush.msra.mxu3 %v5107_v60  ;;  %946 = vmatpush.msra.mxu2 %v5115_v5  ;;  %v5145_v5 = vld [vmem:[#allocation15 + $0x18] sm:$0xff] }
  0xc9   :  { %7894 = vst [vmem:[#allocation81_spill] sm:$0xff] %v5101_v31  ;;  %v5117_v31 = vld [vmem:[#allocation15 + $0x78] sm:$0xff]  ;;  %1208 = vmatpush.msrb.mxu0 %v4835_v23  ;;  %1228 = vmatpush.msrb.mxu1 %v4837_v29 }
  0xca   :  { %v5111_v44 = vpop.f32.mrf.mxu3  ;;  %966 = vmatpush.msra.mxu3 %v5117_v31  ;;  %947 = vmatpush.msra.mxu2 %v5125_v6  ;;  %v7917_v23 = vld [vmem:[#allocation46_spill] sm:$0xff] }
  0xcb   :  { %7895 = vst [vmem:[#allocation82_spill] sm:$0xff] %v5111_v44  ;;  %1209 = vmatpush.msrb.mxu0 %v4848_v37  ;;  %1229 = vmatpush.msrb.mxu1 %v4852_v39  ;;  %v7919_v39 = vld [vmem:[#allocation37_spill] sm:$0xff] }
  0xcc   :  { %967 = vmatpush.msra.mxu3 %v5127_v8  ;;  %948 = vmatpush.msra.mxu2 %v5134_v10 }
  0xcd   :  { %3522 = vmatmul.msk.f32.gmra.mxu2 %vm209_vm0, %v4637_v57  ;;  %1210 = vmatpush.msrb.mxu0 %v7903_v26  ;;  %v7920_v26 = vld [vmem:[#allocation40_spill] sm:$0xff] }
  0xce   :  { %968 = vmatpush.msra.mxu3 %v5136_v14  ;;  %949 = vmatpush.msra.mxu2 %v5143_v19 }
  0xcf   :  { %3530 = vmatmul.msk.f32.gmra.mxu3 %vm209_vm0, %v4637_v57  ;;  %1230 = vmatpush.msrb.mxu1 %v7904_v27  ;;  %v7923_v27 = vld [vmem:[#allocation50_spill] sm:$0xff] }
  0xd0   :  { %v5139_v44 = vpop.f32.mrf.mxu2  ;;  %969 = vmatpush.msra.mxu3 %v5145_v5  ;;  %1211 = vmatpush.msrb.mxu0 %v7907_v35  ;;  %v7926_v35 = vld [vmem:[#allocation53_spill] sm:$0xff] }
  0xd1   :  { %7897 = vst [vmem:[#allocation84_spill] sm:$0xff] %v5139_v44  ;;  %1231 = vmatpush.msrb.mxu1 %v7908_v38  ;;  %v7927_v38 = vld [vmem:[#allocation54_spill] sm:$0xff] }
  0xd2   :  { %v5149_v57 = vpop.f32.mrf.mxu3  ;;  %1212 = vmatpush.msrb.mxu0 %v7911_v50  ;;  %v7930_v50 = vld [vmem:[#allocation57_spill] sm:$0xff] }
  0xd3   :  { %7898 = vst [vmem:[#allocation85_spill] sm:$0xff] %v5149_v57  ;;  %1232 = vmatpush.msrb.mxu1 %v4886_v43  ;;  %v7922_v43 = vld [vmem:[#allocation49_spill] sm:$0xff] }
  0xd4   :  { %1213 = vmatpush.msrb.mxu0 %v7916_v11  ;;  %v7935_v11 = vld [vmem:[#allocation61_spill] sm:$0xff] }
  0xd5   :  { %3523 = vmatmul.msk.f32.gmra.mxu2 %vm209_vm0, %v4665_v3  ;;  %1233 = vmatpush.msrb.mxu1 %v7917_v23 }
  0xd6   :  { %1214 = vmatpush.msrb.mxu0 %v7922_v43  ;;  %v7939_v43 = vld [vmem:[#allocation64_spill] sm:$0xff] }
  0xd7   :  { %3531 = vmatmul.msk.f32.gmra.mxu3 %vm209_vm0, %v4665_v3  ;;  %v5176_v3 = vpop.f32.mrf.mxu0  ;;  %1234 = vmatpush.msrb.mxu1 %v7923_v27 }
  0xd8   :  { %v5164_v12 = vpop.f32.mrf.mxu2  ;;  %1215 = vmatpush.msrb.mxu0 %v7926_v35 }
  0xd9   :  { %7899 = vst [vmem:[#allocation86_spill] sm:$0xff] %v5164_v12  ;;  %1235 = vmatpush.msrb.mxu1 %v7927_v38  ;;  %v7945_v38 = vld [vmem:[#allocation59_spill] sm:$0xff] }
  0xda   :  { %v5168_v15 = vpop.f32.mrf.mxu3  ;;  %1216 = vmatpush.msrb.mxu0 %v4934_v42  ;;  %v7940_v42 = vld [vmem:[#allocation65_spill] sm:$0xff] }
  0xdb   :  { %7900 = vst [vmem:[#allocation87_spill] sm:$0xff] %v5168_v15  ;;  %1236 = vmatpush.msrb.mxu1 %v7930_v50  ;;  %v7948_v50 = vld [vmem:[#allocation71_spill] sm:$0xff] }
  0xdd   :  { %3524 = vmatmul.msk.f32.gmra.mxu2 %vm209_vm0, %v4696_v13  ;;  %1237 = vmatpush.msrb.mxu1 %v7935_v11 }
  0xdf   :  { %3532 = vmatmul.msk.f32.gmra.mxu3 %vm209_vm0, %v4696_v13  ;;  %v5199_v13 = vpop.f32.mrf.mxu0  ;;  %1238 = vmatpush.msrb.mxu1 %v7940_v42 }
  0xe0   :  { %v5184_v20 = vpop.f32.mrf.mxu2 }
  0xe1   :  { %7901 = vst [vmem:[#allocation88_spill] sm:$0xff] %v5184_v20  ;;  %1239 = vmatpush.msrb.mxu1 %v4978_v48  ;;  %v7955_v48 = vld [vmem:[#allocation69_spill] sm:$0xff]  ;;  %v199_v20 = vld [vmem:[#allocation12] sm:$0xf] }
  0xe2   :  { %v5188_v22 = vpop.f32.mrf.mxu3 }
  0xe3   :  { %7902 = vst [vmem:[#allocation89_spill] sm:$0xff] %v5188_v22  ;;  %1240 = vmatpush.msrb.mxu1 %v7948_v50 }
  0xe5   :  { %859 = vmatmul.f32.vlgmr.msrb.gmra.mxu2 %v7888_v1 }
  0xe6   :  { %1154 = vmatpush.msrb.mxu2 %v4810_v51  ;;  %v7912_v51 = vld [vmem:[#allocation29_spill] sm:$0xff] }
  0xe7   :  { %879 = vmatmul.f32.vlgmr.msrb.gmra.mxu3 %v7888_v1  ;;  %v5229_v29 = vpop.f32.mrf.mxu0 }
  0xe8   :  { %v5201_v24 = vpop.f32.mrf.mxu2  ;;  %1174 = vmatpush.msrb.mxu3 %v4791_v46  ;;  %1155 = vmatpush.msrb.mxu2 %v4818_v63  ;;  %v7910_v46 = vld [vmem:[#allocation31_spill] sm:$0xff]  ;;  %v7914_v63 = vld [vmem:[#allocation32_spill] sm:$0xff]  ;;  %7918 = vst [vmem:[#allocation34_spill] sm:$0xff] %v5229_v29 }
  0xea   :  { %v5209_v28 = vpop.f32.mrf.mxu3  ;;  %1175 = vmatpush.msrb.mxu3 %v7905_v30  ;;  %1156 = vmatpush.msrb.mxu2 %v7906_v34  ;;  %v7924_v30 = vld [vmem:[#allocation41_spill] sm:$0xff]  ;;  %v7925_v34 = vld [vmem:[#allocation43_spill] sm:$0xff] }
  0xec   :  { %1176 = vmatpush.msrb.mxu3 %v7909_v49  ;;  %1157 = vmatpush.msrb.mxu2 %v7910_v46  ;;  %v7928_v49 = vld [vmem:[#allocation44_spill] sm:$0xff]  ;;  %v7929_v46 = vld [vmem:[#allocation47_spill] sm:$0xff] }
  0xed   :  { %950 = vmatmul.f32.vlgmr.msra.gmra.mxu2 %v7888_v1 }
  0xee   :  { %1177 = vmatpush.msrb.mxu3 %v7912_v51  ;;  %1158 = vmatpush.msrb.mxu2 %v7913_v52  ;;  %v7932_v52 = vld [vmem:[#allocation48_spill] sm:$0xff] }
  0xef   :  { %970 = vmatmul.f32.vlgmr.msra.gmra.mxu3 %v7888_v1  ;;  %v5235_v1 = vpop.f32.mrf.mxu1  ;;  %v5259_v27 = vpop.f32.mrf.mxu0 }
  0xf0   :  { %v5223_v58 = vpop.f32.mrf.mxu2  ;;  %1178 = vmatpush.msrb.mxu3 %v7914_v63  ;;  %1159 = vmatpush.msrb.mxu2 %v7915_v9  ;;  %7921 = vst [vmem:[#allocation35_spill] sm:$0xff] %v5235_v1  ;;  %v7933_v63 = vld [vmem:[#allocation51_spill] sm:$0xff]  ;;  %v7934_v9 = vld [vmem:[#allocation60_spill] sm:$0xff] }
  0xf1   :  { %1217 = vmatpush.msrb.mxu0 %v7934_v9  ;;  %7941 = vst [vmem:[#allocation38_spill] sm:$0xff] %v5259_v27  ;;  %v7951_v9 = vld [vmem:[#allocation66_spill] sm:$0xff] }
  0xf2   :  { %v5231_v37 = vpop.f32.mrf.mxu3  ;;  %1179 = vmatpush.msrb.mxu3 %v7919_v39  ;;  %1160 = vmatpush.msrb.mxu2 %v7920_v26  ;;  %v7937_v39 = vld [vmem:[#allocation52_spill] sm:$0xff]  ;;  %v7938_v26 = vld [vmem:[#allocation55_spill] sm:$0xff] }
  0xf3   :  { %1218 = vmatpush.msrb.mxu0 %v7939_v43  ;;  %v7957_v43 = vld [vmem:[#allocation74_spill] sm:$0xff] }
  0xf4   :  { %1180 = vmatpush.msrb.mxu3 %v7924_v30  ;;  %1161 = vmatpush.msrb.mxu2 %v7925_v34  ;;  %v7942_v30 = vld [vmem:[#allocation56_spill] sm:$0xff]  ;;  %v7943_v34 = vld [vmem:[#allocation58_spill] sm:$0xff] }
  0xf5   :  { %1219 = vmatpush.msrb.mxu0 %v4974_v32  ;;  %v7954_v32 = vld [vmem:[#allocation68_spill] sm:$0xff] }
  0xf6   :  { %1181 = vmatpush.msrb.mxu3 %v7928_v49  ;;  %1162 = vmatpush.msrb.mxu2 %v7929_v46  ;;  %v7946_v49 = vld [vmem:[#allocation62_spill] sm:$0xff] }
  0xf7   :  { %v5263_v35 = vpop.f32.mrf.mxu1  ;;  %v7947_v46 = vld [vmem:[#allocation70_spill] sm:$0xff]  ;;  %v5282_v42 = vpop.f32.mrf.mxu0 }
  0xf8   :  { %v5247_v51 = vpop.f32.mrf.mxu2  ;;  %1182 = vmatpush.msrb.mxu3 %v7932_v52  ;;  %1163 = vmatpush.msrb.mxu2 %v7933_v63  ;;  %7944 = vst [vmem:[#allocation39_spill] sm:$0xff] %v5263_v35  ;;  %v7950_v63 = vld [vmem:[#allocation63_spill] sm:$0xff]  ;;  %v5377_v35 = vperm.slane %v199_v20, 1 }
  0xf9   :  { %7931 = vst [vmem:[#allocation27_spill] sm:$0xff] %v5247_v51  ;;  %1220 = vmatpush.msrb.mxu0 %v7947_v46 }
  0xfa   :  { %v5253_v23 = vpop.f32.mrf.mxu3  ;;  %1183 = vmatpush.msrb.mxu3 %v7937_v39  ;;  %1164 = vmatpush.msrb.mxu2 %v7938_v26  ;;  %v7953_v39 = vld [vmem:[#allocation67_spill] sm:$0xff]  ;;  %v7956_v26 = vld [vmem:[#allocation72_spill] sm:$0xff]  ;;  %7958 = vst [vmem:[#allocation42_spill] sm:$0xff] %v5282_v42 }
  0xfb   :  { %7936 = vst [vmem:[#allocation30_spill] sm:$0xff] %v5253_v23  ;;  %v5593_v23 = vld [vmem:[#allocation11 + $0x118] sm:$0xff] }
  0xfc   :  { %1184 = vmatpush.msrb.mxu3 %v7942_v30  ;;  %1165 = vmatpush.msrb.mxu2 %v7943_v34  ;;  %v7959_v30 = vld [vmem:[#allocation73_spill] sm:$0xff]  ;;  %7985 = vst [vmem:[#allocation55_spill] sm:$0xff] %v5377_v35 }
  0xfe   :  { %1185 = vmatpush.msrb.mxu3 %v7945_v38  ;;  %1166 = vmatpush.msrb.mxu2 %v7946_v49  ;;  %v7961_v38 = vld [vmem:[#allocation75_spill] sm:$0xff] }
  0xff   :  { %v5285_v34 = vpop.f32.mrf.mxu1 }
 0x100   :  { %v5271_v52 = vpop.f32.mrf.mxu2  ;;  %1186 = vmatpush.msrb.mxu3 %v7950_v63  ;;  %1167 = vmatpush.msrb.mxu2 %v7951_v9  ;;  %7960 = vst [vmem:[#allocation29_spill] sm:$0xff] %v5285_v34 }
 0x101   :  { %7949 = vst [vmem:[#allocation28_spill] sm:$0xff] %v5271_v52 }
 0x102   :  { %v5275_v11 = vpop.f32.mrf.mxu3  ;;  %1187 = vmatpush.msrb.mxu3 %v7953_v39  ;;  %1168 = vmatpush.msrb.mxu2 %v7954_v32 }
 0x103   :  { %7952 = vst [vmem:[#allocation31_spill] sm:$0xff] %v5275_v11 }
 0x104   :  { %1188 = vmatpush.msrb.mxu3 %v7955_v48  ;;  %1169 = vmatpush.msrb.mxu2 %v7956_v26 }
 0x106   :  { %1245 = vmatpush.msra.mxu2 %v7957_v43  ;;  %1189 = vmatpush.msrb.mxu3 %v7959_v30 }
 0x108   :  { %1265 = vmatpush.msra.mxu3 %v7961_v38  ;;  %1246 = vmatpush.msra.mxu2 %v5012_v16  ;;  %v5289_v49 = vpop.f32.mrf.mxu2  ;;  %v5301_v16 = vpop.f32.mrf.mxu0 }
 0x109   :  { %7962 = vst [vmem:[#allocation33_spill] sm:$0xff] %v5289_v49 }
 0x10a   :  { %1266 = vmatpush.msra.mxu3 %v5014_v47  ;;  %1247 = vmatpush.msra.mxu2 %v5020_v45  ;;  %v5293_v46 = vpop.f32.mrf.mxu3  ;;  %7964 = vst [vmem:[#allocation36_spill] sm:$0xff] %v5301_v16  ;;  %v5305_v47 = vpop.f32.mrf.mxu1 }
 0x10b   :  { %7963 = vst [vmem:[#allocation32_spill] sm:$0xff] %v5293_v46 }
 0x10c   :  { %1267 = vmatpush.msra.mxu3 %v5022_v40  ;;  %1248 = vmatpush.msra.mxu2 %v5031_v33  ;;  %7966 = vst [vmem:[#allocation46_spill] sm:$0xff] %v5305_v47  ;;  %v7968_v40 = vld [vmem:[#allocation80_spill] sm:$0xff] }
 0x10d   :  { %8011 = vst [vmem:[#allocation80_spill] sm:$0xff] %v5593_v23 }
 0x10e   :  { %1268 = vmatpush.msra.mxu3 %v5033_v41  ;;  %1249 = vmatpush.msra.mxu2 %v5039_v17 }
 0x110   :  { %1269 = vmatpush.msra.mxu3 %v5041_v53  ;;  %1250 = vmatpush.msra.mxu2 %v5049_v54  ;;  %v5303_v50 = vpop.f32.mrf.mxu2  ;;  %v5321_v33 = vpop.f32.mrf.mxu0 }
 0x111   :  { %7965 = vst [vmem:[#allocation45_spill] sm:$0xff] %v5303_v50 }
 0x112   :  { %1270 = vmatpush.msra.mxu3 %v5051_v55  ;;  %1251 = vmatpush.msra.mxu2 %v5058_v56  ;;  %v5309_v45 = vpop.f32.mrf.mxu3  ;;  %7970 = vst [vmem:[#allocation49_spill] sm:$0xff] %v5321_v33  ;;  %v5325_v53 = vpop.f32.mrf.mxu1  ;;  %v462_v56 = vld [vmem:[%s7511_s6] sm:$0xf] }
 0x113   :  { %7967 = vst [vmem:[#allocation37_spill] sm:$0xff] %v5309_v45  ;;  %v5348_v63 = vperm.slane %v462_v56, 2  ;;  %v5351_v9 = vperm.slane %v462_v56, 3 }
 0x114   :  { %1271 = vmatpush.msra.mxu3 %v5060_v59  ;;  %1252 = vmatpush.msra.mxu2 %v5067_v61  ;;  %7972 = vst [vmem:[#allocation41_spill] sm:$0xff] %v5325_v53 }
 0x116   :  { %1272 = vmatpush.msra.mxu3 %v5069_v36  ;;  %1253 = vmatpush.msra.mxu2 %v7968_v40  ;;  %v7973_v36 = vld [vmem:[#allocation83_spill] sm:$0xff] }
 0x118   :  { %1273 = vmatpush.msra.mxu3 %v5079_v21  ;;  %1254 = vmatpush.msra.mxu2 %v5087_v62  ;;  %v5317_v41 = vpop.f32.mrf.mxu2  ;;  %v5344_v59 = vpop.f32.mrf.mxu0 }
 0x119   :  { %7969 = vst [vmem:[#allocation40_spill] sm:$0xff] %v5317_v41  ;;  %v5375_v41 = vperm.slane %v199_v20, 0 }
 0x11a   :  { %1274 = vmatpush.msra.mxu3 %v5089_v0  ;;  %1255 = vmatpush.msra.mxu2 %v5096_v2  ;;  %v5323_v17 = vpop.f32.mrf.mxu3  ;;  %7976 = vst [vmem:[#allocation54_spill] sm:$0xff] %v5344_v59  ;;  %v5346_v61 = vpop.f32.mrf.mxu1 }
 0x11b   :  { %7971 = vst [vmem:[#allocation50_spill] sm:$0xff] %v5323_v17 }
 0x11c   :  { %1275 = vmatpush.msra.mxu3 %v5098_v4  ;;  %1256 = vmatpush.msra.mxu2 %v5105_v7  ;;  %7977 = vst [vmem:[#allocation44_spill] sm:$0xff] %v5346_v61 }
 0x11d   :  { %7984 = vst [vmem:[#allocation52_spill] sm:$0xff] %v5375_v41 }
 0x11e   :  { %1276 = vmatpush.msra.mxu3 %v5107_v60  ;;  %1257 = vmatpush.msra.mxu2 %v7973_v36 }
 0x120   :  { %1277 = vmatpush.msra.mxu3 %v5117_v31  ;;  %1258 = vmatpush.msra.mxu2 %v5125_v6  ;;  %v5333_v54 = vpop.f32.mrf.mxu2  ;;  %v5359_v43 = vpop.f32.mrf.mxu0 }
 0x121   :  { %7974 = vst [vmem:[#allocation43_spill] sm:$0xff] %v5333_v54 }
 0x122   :  { %1278 = vmatpush.msra.mxu3 %v5127_v8  ;;  %1259 = vmatpush.msra.mxu2 %v5134_v10  ;;  %v5337_v55 = vpop.f32.mrf.mxu3  ;;  %v5361_v30 = vpop.f32.mrf.mxu1 }
 0x123   :  { %7975 = vst [vmem:[#allocation53_spill] sm:$0xff] %v5337_v55 }
 0x124   :  { %1279 = vmatpush.msra.mxu3 %v5136_v14  ;;  %1260 = vmatpush.msra.mxu2 %v5143_v19 }
 0x126   :  { %1280 = vmatpush.msra.mxu3 %v5145_v5 }
 0x128   :  { %v571_v39 = vpop.f32.mrf.mxu2  ;;  %v510_v55 = vpop.f32.mrf.mxu0 }
 0x129   :  { %v5354_v32 = vadd.f32 %v571_v39, %v5348_v63 }
 0x12a   :  { %v612_v48 = vpop.f32.mrf.mxu3  ;;  %v551_v39 = vpop.f32.mrf.mxu1 }
 0x12b   :  { %7978 = vst [vmem:[#allocation47_spill] sm:$0xff] %v5354_v32  ;;  %v5357_v26 = vadd.f32 %v612_v48, %v5351_v9 }
 0x12d   :  { %7979 = vst [vmem:[#allocation57_spill] sm:$0xff] %v5357_v26 }
 0x130   :  { %v574_v38 = vpop.f32.mrf.mxu2 }
 0x131   :  { %v5364_v54 = vadd.f32 %v574_v38, %v5348_v63 }
 0x132   :  { %v615_v1 = vpop.f32.mrf.mxu3  ;;  %v840_v17 = vpop.f32.mrf.mxu1 }
 0x133   :  { %7980 = vst [vmem:[#allocation48_spill] sm:$0xff] %v5364_v54  ;;  %v5367_v29 = vadd.f32 %v615_v1, %v5351_v9  ;;  %v252_v1 = vadd.f32 %v5176_v3, %v5375_v41 }
 0x135   :  { %7981 = vst [vmem:[#allocation51_spill] sm:$0xff] %v5367_v29  ;;  %v820_v29 = vpop.f32.mrf.mxu0 }
 0x136   :  { %v883_v15 = vadd.f32 %v820_v29, %v252_v1 }
 0x138   :  { %v577_v22 = vpop.f32.mrf.mxu2  ;;  %v3533_v50 = vmul.f32 -1.442695, %v883_v15 }
 0x139   :  { %v5370_v32 = vadd.f32 %v577_v22, %v5348_v63  ;;  %v293_v22 = vadd.f32 %v5180_v18, %v5377_v35 }
 0x13a   :  { %v618_v48 = vpop.f32.mrf.mxu3  ;;  %3612 = vpow2.f32 %v3533_v50 }
 0x13b   :  { %7982 = vst [vmem:[#allocation60_spill] sm:$0xff] %v5370_v32  ;;  %v5373_v26 = vadd.f32 %v618_v48, %v5351_v9  ;;  %v884_v12 = vadd.f32 %v840_v17, %v293_v22  ;;  %v931_v17 = vpop.f32.mrf.mxu1 }
 0x13d   :  { %7983 = vst [vmem:[#allocation61_spill] sm:$0xff] %v5373_v26  ;;  %v5389_v26 = vperm.slane %v462_v56, 0  ;;  %v3534_v34 = vmul.f32 -1.442695, %v884_v12  ;;  %v911_v29 = vpop.f32.mrf.mxu0 }
 0x13f   :  { %7988 = vst [vmem:[#allocation56_spill] sm:$0xff] %v5389_v26  ;;  %v511_v18 = vadd.f32 %v510_v55, %v5389_v26  ;;  %3614 = vpow2.f32 %v3534_v34 }
 0x140   :  { %v580_v38 = vpop.f32.mrf.mxu2  ;;  %v3613_v12 = vpop.eup %3612 }
 0x141   :  { %v5382_v54 = vadd.f32 %v580_v38, %v5348_v63  ;;  %v5394_v38 = vperm.slane %v462_v56, 1  ;;  %v974_v1 = vadd.f32 %v911_v29, %v511_v18 }
 0x142   :  { %v621_v27 = vpop.f32.mrf.mxu3 }
 0x143   :  { %7986 = vst [vmem:[#allocation64_spill] sm:$0xff] %v5382_v54  ;;  %v5387_v48 = vadd.f32 %v621_v27, %v5351_v9  ;;  %v552_v27 = vadd.f32 %v551_v39, %v5394_v38  ;;  %v3536_v57 = vmul.f32 -1.442695, %v974_v1  ;;  %v981_v54 = vadd.f32 1.0, %v3613_v12 }
 0x144   :  { %7990 = vst [vmem:[#allocation59_spill] sm:$0xff] %v5394_v38 }
 0x145   :  { %7987 = vst [vmem:[#allocation65_spill] sm:$0xff] %v5387_v48  ;;  %v975_v15 = vadd.f32 %v931_v17, %v552_v27  ;;  %3616 = vpow2.f32 %v3536_v57  ;;  %vm987_vm1 = vweird.f32 %v981_v54 }
 0x147   :  { %v3537_v44 = vmul.f32 -1.442695, %v975_v15 }
 0x148   :  { %v583_v32 = vpop.f32.mrf.mxu2 }
 0x149   :  { %v5392_v3 = vadd.f32 %v583_v32, %v5348_v63  ;;  %3618 = vpow2.f32 %v3537_v44 }
 0x14a   :  { %v624_v42 = vpop.f32.mrf.mxu3  ;;  %3620 = vrcp.f32 %v981_v54 }
 0x14b   :  { %7989 = vst [vmem:[#allocation58_spill] sm:$0xff] %v5392_v3  ;;  %v5398_v45 = vadd.f32 %v624_v42, %v5351_v9  ;;  %v3615_v42 = vpop.eup %3614 }
 0x14c   :  { %v5407_v39 = vadd.f32 1.0, %v3615_v42  ;;  %v3617_v29 = vpop.eup %3616 }
 0x14d   :  { %7991 = vst [vmem:[#allocation62_spill] sm:$0xff] %v5398_v45  ;;  %v5416_v15 = vadd.f32 1.0, %v3617_v29 }
 0x14e   :  { %3622 = vrcp.f32 %v5407_v39  ;;  %vm1006_vm3 = vweird.f32 %v5407_v39 }
 0x14f   :  { %v3619_v17 = vpop.eup %3618  ;;  %3624 = vrcp.f32 %v5416_v15  ;;  %vm1050_vm9 = vweird.f32 %v5416_v15 }
 0x150   :  { %v586_v22 = vpop.f32.mrf.mxu2  ;;  %v3621_v1 = vpop.eup %3620  ;;  %v5418_v57 = vadd.f32 1.0, %v3619_v17 }
 0x151   :  { %v5402_v32 = vadd.f32 %v586_v22, %v5348_v63  ;;  %v983_v12 = vmul.f32 %v3621_v1, %v981_v54  ;;  %vm988_vm2 = vweird.f32 %v3621_v1 }
 0x152   :  { %v627_v56 = vpop.f32.mrf.mxu3  ;;  %3626 = vrcp.f32 %v5418_v57  ;;  %vm5441_vm5 = vmor %vm987_vm1, %vm988_vm2  ;;  %vm1069_vm11 = vweird.f32 %v5418_v57 }
 0x153   :  { %7992 = vst [vmem:[#allocation70_spill] sm:$0xff] %v5402_v32  ;;  %v5405_v55 = vadd.f32 %v627_v56, %v5351_v9  ;;  %v984_v48 = vsub.f32 1.0, %v983_v12  ;;  %v993_v12 = vand.u32 2147483648, %v981_v54 }
 0x154   :  { %v3623_v56 = vpop.eup %3622 }
 0x155   :  { %7993 = vst [vmem:[#allocation71_spill] sm:$0xff] %v5405_v55  ;;  %v1002_v42 = vmul.f32 %v3623_v56, %v5407_v39  ;;  %v5429_v17 = vpop.eup %3624  ;;  %v985_v45 = vmul.f32 %v3621_v1, %v984_v48  ;;  %vm1007_vm4 = vweird.f32 %v3623_v56  ;;  %v994_v32 = vor.u32 1.1754944e-38, %v993_v12 }
 0x156   :  { %vm5447_vm6 = vmor %vm1006_vm3, %vm1007_vm4  ;;  %vm1051_vm10 = vweird.f32 %v5429_v17 }
 0x157   :  { %v1003_v49 = vsub.f32 1.0, %v1002_v42  ;;  %v986_v48 = vadd.f32 %v3621_v1, %v985_v45  ;;  %vm5467_vm13 = vmor %vm1050_vm9, %vm1051_vm10 }
 0x158   :  { %v589_v34 = vpop.f32.mrf.mxu2  ;;  %v5431_v46 = vpop.eup %3626 }
 0x159   :  { %v5410_v50 = vadd.f32 %v589_v34, %v5348_v63  ;;  %v5422_v34 = vperm.slane %v199_v20, 3  ;;  %v1004_v53 = vmul.f32 %v3623_v56, %v1003_v49  ;;  %v1065_v11 = vmul.f32 %v5431_v46, %v5418_v57 }
 0x15a   :  { %v630_v18 = vpop.f32.mrf.mxu3  ;;  %vm1070_vm12 = vweird.f32 %v5431_v46 }
 0x15b   :  { %v5414_v27 = vadd.f32 %v630_v18, %v5351_v9  ;;  %7994 = vst [vmem:[#allocation63_spill] sm:$0xff] %v5422_v34  ;;  %v5425_v18 = vperm.slane %v199_v20, 2  ;;  %v375_v47 = vadd.f32 %v5209_v28, %v5422_v34  ;;  %v991_v20 = vand.u32 2147483647, %v981_v54  ;;  %vm5472_vm14 = vmor %vm1069_vm11, %vm1070_vm12 }
 0x15c   :  { %v1046_v28 = vmul.f32 %v5429_v17, %v5416_v15 }
 0x15d   :  { %7995 = vst [vmem:[#allocation66_spill] sm:$0xff] %v5425_v18  ;;  %v334_v3 = vadd.f32 %v5201_v24, %v5425_v18  ;;  %v1012_v24 = vand.u32 2147483648, %v5407_v39  ;;  %vm992_vm7 = vcmp.eq.f32.partialorder %v991_v20, 8.507059e+37 }
 0x15f   :  { %v1013_v55 = vor.u32 1.1754944e-38, %v1012_v24 }
 0x160   :  { %v592_v22 = vpop.f32.mrf.mxu2 }
 0x161   :  { %v593_v51 = vadd.f32 %v592_v22, %v5348_v63  ;;  %v1075_v63 = vand.u32 2147483648, %v5418_v57 }
 0x162   :  { %v633_v44 = vpop.f32.mrf.mxu3 }
 0x168   :  { %v860_v29 = vpop.f32.mrf.mxu2 }
 0x169   :  { %v885_v33 = vadd.f32 %v860_v29, %v334_v3  ;;  %v1047_v3 = vsub.f32 1.0, %v1046_v28  ;;  %v1066_v29 = vsub.f32 1.0, %v1065_v11 }
 0x16a   :  { %v880_v16 = vpop.f32.mrf.mxu3 }
 0x16b   :  { %v886_v52 = vadd.f32 %v880_v16, %v375_v47  ;;  %v1005_v16 = vadd.f32 %v3623_v56, %v1004_v53  ;;  %v634_v47 = vadd.f32 %v633_v44, %v5351_v9  ;;  %v990_v53 = vsel %vm5441_vm5, %v3621_v1, %v986_v48 }
 0x16c   :  { %v1067_v11 = vmul.f32 %v5431_v46, %v1066_v29  ;;  %v995_v20 = vsel %vm992_vm7, %v994_v32, %v990_v53  ;;  %v1048_v28 = vmul.f32 %v5429_v17, %v1047_v3  ;;  %v1056_v32 = vand.u32 2147483648, %v5416_v15 }
 0x16d   :  { %v3535_v42 = vmul.f32 -1.442695, %v886_v52  ;;  %v1010_v52 = vand.u32 2147483647, %v5407_v39  ;;  %v1009_v9 = vsel %vm5447_vm6, %v3623_v56, %v1005_v16  ;;  %v1073_v1 = vand.u32 2147483647, %v5418_v57 }
 0x16e   :  { %v1049_v22 = vadd.f32 %v5429_v17, %v1048_v28  ;;  %v1068_v48 = vadd.f32 %v5431_v46, %v1067_v11 }
 0x16f   :  { %3628 = vpow2.f32 %v3535_v42  ;;  %vm1011_vm8 = vcmp.eq.f32.partialorder %v1010_v52, 8.507059e+37  ;;  %vm1074_vm0 = vcmp.eq.f32.partialorder %v1073_v1, 8.507059e+37 }
 0x170   :  { %3630 = vtanh.f32 %v885_v33  ;;  %v951_v45 = vpop.f32.mrf.mxu2  ;;  %v1014_v59 = vsel %vm1011_vm8, %v1013_v55, %v1009_v9  ;;  %v1053_v54 = vsel %vm5467_vm13, %v5429_v17, %v1049_v22  ;;  %v1072_v3 = vsel %vm5472_vm14, %v5431_v46, %v1068_v48 }
 0x171   :  { %v976_v61 = vadd.f32 %v951_v45, %v593_v51  ;;  %v1054_v51 = vand.u32 2147483647, %v5416_v15  ;;  %v1036_v16 = vmul.f32 0.0, %v1014_v59  ;;  %v1057_v15 = vor.u32 1.1754944e-38, %v1056_v32 }
 0x172   :  { %v971_v42 = vpop.f32.mrf.mxu3 }
 0x173   :  { %v977_v39 = vadd.f32 %v971_v42, %v634_v47  ;;  %v1076_v47 = vor.u32 1.1754944e-38, %v1075_v63  ;;  %vm1055_vm15 = vcmp.eq.f32.partialorder %v1054_v51, 8.507059e+37 }
 0x174   :  { %v1058_v53 = vsel %vm1055_vm15, %v1057_v15, %v1053_v54  ;;  %v5500_v15 = vld [vmem:[#allocation11 + $0x1f0] sm:$0xff] }
 0x175   :  { %v3629_v44 = vpop.eup %3628  ;;  %v3538_v33 = vmul.f32 -1.442695, %v977_v39  ;;  %v1077_v39 = vsel %vm1074_vm0, %v1076_v47, %v1072_v3  ;;  %v5506_v3 = vld [vmem:[#allocation11 + $0x1c0] sm:$0xff] }
 0x176   :  { %v1020_v12 = vadd.f32 1.0, %v3629_v44  ;;  %v3631_v24 = vpop.eup %3630 }
 0x177   :  { %3632 = vpow2.f32 %v3538_v33  ;;  %v1037_v55 = vmul.f32 %v3631_v24, %v995_v20  ;;  %v1099_v20 = vmul.f32 0.0, %v1077_v39 }
 0x178   :  { %3634 = vrcp.f32 %v1020_v12  ;;  %v1032_v9 = vand.u32 2147483648, %v1020_v12  ;;  %v1030_v11 = vand.u32 2147483647, %v1020_v12  ;;  %vm1026_vm2 = vweird.f32 %v1020_v12 }
 0x179   :  { %3636 = vtanh.f32 %v976_v61  ;;  %v5476_v57 = vadd.f32 %v1037_v55, %v1036_v16  ;;  %v5494_v16 = vld [vmem:[#allocation11 + $0x1e0] sm:$0xff] }
 0x17a   :  { %v1033_v46 = vor.u32 1.1754944e-38, %v1032_v9  ;;  %vm1031_vm4 = vcmp.eq.f32.partialorder %v1030_v11, 8.507059e+37  ;;  %v5520_v9 = vld [vmem:[#allocation11 + $0x1a0] sm:$0xff]  ;;  %v5529_v11 = vld [vmem:[#allocation11 + $0x1b8] sm:$0xff] }
 0x17d   :  { %v3633_v52 = vpop.eup %3632 }
 0x17e   :  { %v3635_v61 = vpop.eup %3634  ;;  %v1083_v29 = vadd.f32 1.0, %v3633_v52  ;;  %v5497_v52 = vld [vmem:[#allocation11 + $0x1e8] sm:$0xff] }
 0x17f   :  { %v3637_v45 = vpop.eup %3636  ;;  %v1022_v42 = vmul.f32 %v3635_v61, %v1020_v12  ;;  %vm1027_vm1 = vweird.f32 %v3635_v61 }
 0x180   :  { %3638 = vrcp.f32 %v1083_v29  ;;  %v1100_v44 = vmul.f32 %v3637_v45, %v1058_v53  ;;  %vm1028_vm3 = vmor %vm1026_vm2, %vm1027_vm1  ;;  %v1095_v56 = vand.u32 2147483648, %v1083_v29  ;;  %v1093_v12 = vand.u32 2147483647, %v1083_v29  ;;  %v5515_v53 = vld [vmem:[#allocation11 + $0x1d8] sm:$0xff] }
 0x181   :  { %v1023_v59 = vsub.f32 1.0, %v1022_v42  ;;  %3640 = vtanh.f32 %v5476_v57  ;;  %vm1089_vm6 = vweird.f32 %v1083_v29 }
 0x182   :  { %v5485_v24 = vadd.f32 %v1100_v44, %v1099_v20  ;;  %v1096_v47 = vor.u32 1.1754944e-38, %v1095_v56  ;;  %vm1094_vm8 = vcmp.eq.f32.partialorder %v1093_v12, 8.507059e+37  ;;  %v5523_v44 = vld [vmem:[#allocation11 + $0x1a8] sm:$0xff]  ;;  %v5536_v20 = vld [vmem:[#allocation11 + $0x180] sm:$0xff]  ;;  %v5569_v12 = vld [vmem:[#allocation11 + $0x158] sm:$0xff] }
 0x183   :  { %v1024_v33 = vmul.f32 %v3635_v61, %v1023_v59  ;;  %v5512_v59 = vld [vmem:[#allocation11 + $0x1d0] sm:$0xff]  ;;  %v5563_v56 = vld [vmem:[#allocation11 + $0x148] sm:$0xff] }
 0x184   :  { %3642 = vtanh.f32 %v5485_v24 }
 0x185   :  { %v1025_v17 = vadd.f32 %v3635_v61, %v1024_v33  ;;  %v5526_v33 = vld [vmem:[#allocation11 + $0x1b0] sm:$0xff] }
 0x186   :  { %v3639_v28 = vpop.eup %3638 }
 0x187   :  { %v1085_v63 = vmul.f32 %v3639_v28, %v1083_v29  ;;  %v1029_v51 = vsel %vm1028_vm3, %v3635_v61, %v1025_v17  ;;  %v3641_v32 = vpop.eup %3640  ;;  %vm1090_vm5 = vweird.f32 %v3639_v28  ;;  %v5503_v61 = vld [vmem:[#allocation11 + $0x1f8] sm:$0xff]  ;;  %v5509_v29 = vld [vmem:[#allocation11 + $0x1c8] sm:$0xff] }
 0x188   :  { %v1034_v1 = vsel %vm1031_vm4, %v1033_v46, %v1029_v51  ;;  %vm1091_vm7 = vmor %vm1089_vm6, %vm1090_vm5  ;;  %v5539_v17 = vld [vmem:[#allocation11 + $0x188] sm:$0xff]  ;;  %v5545_v46 = vld [vmem:[#allocation11 + $0x198] sm:$0xff] }
 0x189   :  { %v1086_v55 = vsub.f32 1.0, %v1085_v63  ;;  %v5487_v22 = vmul.f32 %v3641_v32, %v1034_v1  ;;  %v5548_v63 = vld [vmem:[#allocation11 + $0x160] sm:$0xff]  ;;  %v5551_v51 = vld [vmem:[#allocation11 + $0x168] sm:$0xff]  ;;  %v5554_v32 = vld [vmem:[#allocation11 + $0x170] sm:$0xff] }
 0x18a   :  { %v3643_v45 = vpop.eup %3642  ;;  %v5557_v1 = vld [vmem:[#allocation11 + $0x178] sm:$0xff] }
 0x18b   :  { %8004 = vst [vmem:[#allocation67_spill] sm:$0xff] %v5487_v22  ;;  %v1087_v48 = vmul.f32 %v3639_v28, %v1086_v55  ;;  %1130 = vmatmul.f32.vlgmr.msra.gmra.mxu0 %v5487_v22  ;;  %1150 = vmatmul.f32.vlgmr.msra.gmra.mxu1 %v5487_v22  ;;  %v5560_v55 = vld [vmem:[#allocation11 + $0x140] sm:$0xff] }
 0x18c   :  { %1170 = vmatmul.f32.vlgmr.msrb.gmra.mxu2 %v5487_v22  ;;  %1190 = vmatmul.f32.vlgmr.msrb.gmra.mxu3 %v5487_v22  ;;  %v5590_v22 = vld [vmem:[#allocation11 + $0x110] sm:$0xff] }
 0x18d   :  { %v1088_v49 = vadd.f32 %v3639_v28, %v1087_v48  ;;  %1426 = vmatpush.msra.mxu0 %v5494_v16  ;;  %1446 = vmatpush.msra.mxu1 %v5497_v52  ;;  %v5566_v48 = vld [vmem:[#allocation11 + $0x150] sm:$0xff]  ;;  %8010 = vst [vmem:[#allocation75_spill] sm:$0xff] %v5590_v22 }
 0x18e   :  { %1466 = vmatpush.msrb.mxu2 %v5500_v15  ;;  %1486 = vmatpush.msrb.mxu3 %v5503_v61 }
 0x18f   :  { %v1092_v54 = vsel %vm1091_vm7, %v3639_v28, %v1088_v49  ;;  %1427 = vmatpush.msra.mxu0 %v5506_v3  ;;  %1447 = vmatpush.msra.mxu1 %v5509_v29  ;;  %v5542_v28 = vld [vmem:[#allocation11 + $0x190] sm:$0xff]  ;;  %v5572_v49 = vld [vmem:[#allocation11 + $0x120] sm:$0xff] }
 0x190   :  { %v1097_v42 = vsel %vm1094_vm8, %v1096_v47, %v1092_v54  ;;  %1467 = vmatpush.msrb.mxu2 %v5512_v59  ;;  %1487 = vmatpush.msrb.mxu3 %v5515_v53  ;;  %v5575_v47 = vld [vmem:[#allocation11 + $0x128] sm:$0xff]  ;;  %v5578_v54 = vld [vmem:[#allocation11 + $0x130] sm:$0xff] }
 0x191   :  { %v5518_v39 = vmul.f32 %v3643_v45, %v1097_v42  ;;  %1428 = vmatpush.msra.mxu0 %v5520_v9  ;;  %1448 = vmatpush.msra.mxu1 %v5523_v44  ;;  %8006 = vst [vmem:[#allocation69_spill] sm:$0xff] %v5578_v54  ;;  %v5581_v45 = vld [vmem:[#allocation11 + $0x138] sm:$0xff]  ;;  %v5584_v42 = vld [vmem:[#allocation11 + $0x100] sm:$0xff] }
 0x192   :  { %1468 = vmatpush.msrb.mxu2 %v5526_v33  ;;  %1488 = vmatpush.msrb.mxu3 %v5529_v11  ;;  %8007 = vst [vmem:[#allocation72_spill] sm:$0xff] %v5581_v45 }
 0x193   :  { %8005 = vst [vmem:[#allocation68_spill] sm:$0xff] %v5518_v39  ;;  %1221 = vmatmul.f32.vlgmr.msrb.gmra.mxu0 %v5518_v39  ;;  %1241 = vmatmul.f32.vlgmr.msrb.gmra.mxu1 %v5518_v39 }
 0x194   :  { %1261 = vmatmul.f32.vlgmr.msra.gmra.mxu2 %v5518_v39  ;;  %1281 = vmatmul.f32.vlgmr.msra.gmra.mxu3 %v5518_v39  ;;  %8008 = vst [vmem:[#allocation74_spill] sm:$0xff] %v5584_v42  ;;  %v5587_v39 = vld [vmem:[#allocation11 + $0x108] sm:$0xff] }
 0x195   :  { %1429 = vmatpush.msra.mxu0 %v5536_v20  ;;  %1449 = vmatpush.msra.mxu1 %v5539_v17  ;;  %8009 = vst [vmem:[#allocation73_spill] sm:$0xff] %v5587_v39 }
 0x196   :  { %1469 = vmatpush.msrb.mxu2 %v5542_v28  ;;  %1489 = vmatpush.msrb.mxu3 %v5545_v46 }
 0x197   :  { %1430 = vmatpush.msra.mxu0 %v5548_v63  ;;  %1450 = vmatpush.msra.mxu1 %v5551_v51 }
 0x198   :  { %1470 = vmatpush.msrb.mxu2 %v5554_v32  ;;  %1490 = vmatpush.msrb.mxu3 %v5557_v1 }
 0x199   :  { %1431 = vmatpush.msra.mxu0 %v5560_v55  ;;  %1451 = vmatpush.msra.mxu1 %v5563_v56 }
 0x19a   :  { %1471 = vmatpush.msrb.mxu2 %v5566_v48  ;;  %1491 = vmatpush.msrb.mxu3 %v5569_v12 }
 0x19b   :  { %1432 = vmatpush.msra.mxu0 %v5572_v49  ;;  %1452 = vmatpush.msra.mxu1 %v5575_v47 }
 0x19c   :  { %1472 = vmatpush.msrb.mxu2 %v5578_v54  ;;  %1492 = vmatpush.msrb.mxu3 %v5581_v45  ;;  %v5596_v54 = vld [vmem:[#allocation11 + $0xe0] sm:$0xff]  ;;  %v5599_v45 = vld [vmem:[#allocation11 + $0xe8] sm:$0xff] }
 0x19d   :  { %1433 = vmatpush.msra.mxu0 %v5584_v42  ;;  %1453 = vmatpush.msra.mxu1 %v5587_v39  ;;  %8012 = vst [vmem:[#allocation83_spill] sm:$0xff] %v5596_v54  ;;  %v5602_v42 = vld [vmem:[#allocation11 + $0xf0] sm:$0xff]  ;;  %v5605_v39 = vld [vmem:[#allocation11 + $0xf8] sm:$0xff] }
 0x19e   :  { %1473 = vmatpush.msrb.mxu2 %v5590_v22  ;;  %1493 = vmatpush.msrb.mxu3 %v5593_v23  ;;  %8013 = vst [vmem:[#allocation90_spill] sm:$0xff] %v5599_v45  ;;  %v5608_v22 = vld [vmem:[#allocation11 + $0xc0] sm:$0xff]  ;;  %v5611_v23 = vld [vmem:[#allocation11 + $0xc8] sm:$0xff] }
 0x19f   :  { %1434 = vmatpush.msra.mxu0 %v5596_v54  ;;  %1454 = vmatpush.msra.mxu1 %v5599_v45  ;;  %8014 = vst [vmem:[#allocation91_spill] sm:$0xff] %v5602_v42  ;;  %v5614_v54 = vld [vmem:[#allocation11 + $0xd0] sm:$0xff]  ;;  %v5617_v45 = vld [vmem:[#allocation11 + $0xd8] sm:$0xff] }
 0x1a0   :  { %1474 = vmatpush.msrb.mxu2 %v5602_v42  ;;  %8015 = vst [vmem:[#allocation92_spill] sm:$0xff] %v5605_v39  ;;  %1494 = vmatpush.msrb.mxu3 %v5605_v39  ;;  %v5620_v42 = vld [vmem:[#allocation11 + $0xa0] sm:$0xff]  ;;  %v5623_v39 = vld [vmem:[#allocation11 + $0xa8] sm:$0xff] }
 0x1a1   :  { %8016 = vst [vmem:[#allocation93_spill] sm:$0xff] %v5608_v22  ;;  %1435 = vmatpush.msra.mxu0 %v5608_v22  ;;  %1455 = vmatpush.msra.mxu1 %v5611_v23  ;;  %v5626_v22 = vld [vmem:[#allocation11 + $0xb0] sm:$0xff] }
 0x1a2   :  { %8017 = vst [vmem:[#allocation94_spill] sm:$0xff] %v5611_v23  ;;  %1475 = vmatpush.msrb.mxu2 %v5614_v54  ;;  %1495 = vmatpush.msrb.mxu3 %v5617_v45  ;;  %v5629_v23 = vld [vmem:[#allocation11 + $0xb8] sm:$0xff] }
 0x1a3   :  { %8018 = vst [vmem:[#allocation95_spill] sm:$0xff] %v5614_v54  ;;  %1436 = vmatpush.msra.mxu0 %v5620_v42  ;;  %1456 = vmatpush.msra.mxu1 %v5623_v39  ;;  %v5632_v54 = vld [vmem:[#allocation11 + $0x80] sm:$0xff] }
 0x1a4   :  { %8019 = vst [vmem:[#allocation96_spill] sm:$0xff] %v5617_v45  ;;  %1476 = vmatpush.msrb.mxu2 %v5626_v22  ;;  %1496 = vmatpush.msrb.mxu3 %v5629_v23  ;;  %v5635_v45 = vld [vmem:[#allocation11 + $0x88] sm:$0xff] }
 0x1a5   :  { %8020 = vst [vmem:[#allocation97_spill] sm:$0xff] %v5620_v42  ;;  %1437 = vmatpush.msra.mxu0 %v5632_v54  ;;  %1457 = vmatpush.msra.mxu1 %v5635_v45  ;;  %v5638_v42 = vld [vmem:[#allocation11 + $0x90] sm:$0xff] }
 0x1a6   :  { %8021 = vst [vmem:[#allocation98_spill] sm:$0xff] %v5623_v39  ;;  %1477 = vmatpush.msrb.mxu2 %v5638_v42  ;;  %v5641_v39 = vld [vmem:[#allocation11 + $0x98] sm:$0xff] }
 0x1a7   :  { %8022 = vst [vmem:[#allocation99_spill] sm:$0xff] %v5626_v22  ;;  %1497 = vmatpush.msrb.mxu3 %v5641_v39  ;;  %v5644_v22 = vld [vmem:[#allocation11 + $0x60] sm:$0xff] }
 0x1a8   :  { %8023 = vst [vmem:[#allocation100_spill] sm:$0xff] %v5629_v23  ;;  %1438 = vmatpush.msra.mxu0 %v5644_v22  ;;  %v5647_v23 = vld [vmem:[#allocation11 + $0x68] sm:$0xff] }
 0x1a9   :  { %8024 = vst [vmem:[#allocation101_spill] sm:$0xff] %v5632_v54  ;;  %1458 = vmatpush.msra.mxu1 %v5647_v23  ;;  %v5650_v54 = vld [vmem:[#allocation11 + $0x70] sm:$0xff] }
 0x1aa   :  { %8025 = vst [vmem:[#allocation102_spill] sm:$0xff] %v5635_v45  ;;  %1478 = vmatpush.msrb.mxu2 %v5650_v54  ;;  %v5653_v45 = vld [vmem:[#allocation11 + $0x78] sm:$0xff] }
 0x1ab   :  { %8026 = vst [vmem:[#allocation103_spill] sm:$0xff] %v5638_v42  ;;  %1498 = vmatpush.msrb.mxu3 %v5653_v45  ;;  %v5656_v42 = vld [vmem:[#allocation11 + $0x40] sm:$0xff] }
 0x1ac   :  { %8027 = vst [vmem:[#allocation104_spill] sm:$0xff] %v5641_v39  ;;  %1439 = vmatpush.msra.mxu0 %v5656_v42  ;;  %v5659_v39 = vld [vmem:[#allocation11 + $0x48] sm:$0xff] }
 0x1ad   :  { %8028 = vst [vmem:[#allocation105_spill] sm:$0xff] %v5644_v22  ;;  %1459 = vmatpush.msra.mxu1 %v5659_v39  ;;  %v5662_v22 = vld [vmem:[#allocation11 + $0x50] sm:$0xff] }
 0x1ae   :  { %8029 = vst [vmem:[#allocation106_spill] sm:$0xff] %v5647_v23  ;;  %1479 = vmatpush.msrb.mxu2 %v5662_v22  ;;  %v5665_v23 = vld [vmem:[#allocation11 + $0x58] sm:$0xff] }
 0x1af   :  { %8030 = vst [vmem:[#allocation107_spill] sm:$0xff] %v5650_v54  ;;  %1499 = vmatpush.msrb.mxu3 %v5665_v23  ;;  %v5668_v54 = vld [vmem:[#allocation11 + $0x20] sm:$0xff] }
 0x1b0   :  { %8031 = vst [vmem:[#allocation108_spill] sm:$0xff] %v5653_v45  ;;  %1440 = vmatpush.msra.mxu0 %v5668_v54  ;;  %v5671_v45 = vld [vmem:[#allocation11 + $0x28] sm:$0xff] }
 0x1b1   :  { %8032 = vst [vmem:[#allocation109_spill] sm:$0xff] %v5656_v42  ;;  %1460 = vmatpush.msra.mxu1 %v5671_v45  ;;  %v5674_v42 = vld [vmem:[#allocation11 + $0x30] sm:$0xff] }
 0x1b2   :  { %8033 = vst [vmem:[#allocation110_spill] sm:$0xff] %v5659_v39  ;;  %1480 = vmatpush.msrb.mxu2 %v5674_v42  ;;  %v5677_v39 = vld [vmem:[#allocation11 + $0x38] sm:$0xff] }
 0x1b3   :  { %8034 = vst [vmem:[#allocation111_spill] sm:$0xff] %v5662_v22  ;;  %1500 = vmatpush.msrb.mxu3 %v5677_v39  ;;  %v5680_v22 = vld [vmem:[#allocation11] sm:$0xff] }
 0x1b4   :  { %8035 = vst [vmem:[#allocation112_spill] sm:$0xff] %v5665_v23  ;;  %1441 = vmatpush.msra.mxu0 %v5680_v22  ;;  %v5683_v23 = vld [vmem:[#allocation11 + $0x8] sm:$0xff] }
 0x1b5   :  { %8036 = vst [vmem:[#allocation113_spill] sm:$0xff] %v5668_v54  ;;  %1461 = vmatpush.msra.mxu1 %v5683_v23  ;;  %v5686_v54 = vld [vmem:[#allocation11 + $0x10] sm:$0xff] }
 0x1b6   :  { %8037 = vst [vmem:[#allocation114_spill] sm:$0xff] %v5671_v45  ;;  %1481 = vmatpush.msrb.mxu2 %v5686_v54  ;;  %v5689_v45 = vld [vmem:[#allocation11 + $0x18] sm:$0xff] }
 0x1b7   :  { %8038 = vst [vmem:[#allocation115_spill] sm:$0xff] %v5674_v42  ;;  %1501 = vmatpush.msrb.mxu3 %v5689_v45  ;;  %v5692_v42 = vld [vmem:[#allocation15 + $0x1e0] sm:$0xff] }
 0x1b8   :  { %8039 = vst [vmem:[#allocation116_spill] sm:$0xff] %v5677_v39  ;;  %1517 = vmatpush.msrb.mxu0 %v5692_v42  ;;  %v5695_v39 = vld [vmem:[#allocation15 + $0x1e8] sm:$0xff] }
 0x1b9   :  { %8040 = vst [vmem:[#allocation117_spill] sm:$0xff] %v5680_v22  ;;  %1537 = vmatpush.msrb.mxu1 %v5695_v39  ;;  %v5698_v22 = vld [vmem:[#allocation15 + $0x1f0] sm:$0xff] }
 0x1ba   :  { %8041 = vst [vmem:[#allocation118_spill] sm:$0xff] %v5683_v23  ;;  %1557 = vmatpush.msra.mxu2 %v5698_v22  ;;  %v5701_v23 = vld [vmem:[#allocation15 + $0x1f8] sm:$0xff] }
 0x1bb   :  { %8042 = vst [vmem:[#allocation119_spill] sm:$0xff] %v5686_v54  ;;  %1577 = vmatpush.msra.mxu3 %v5701_v23  ;;  %v5704_v54 = vld [vmem:[#allocation15 + $0x1c0] sm:$0xff] }
 0x1bc   :  { %8043 = vst [vmem:[#allocation120_spill] sm:$0xff] %v5689_v45  ;;  %1518 = vmatpush.msrb.mxu0 %v5704_v54  ;;  %v5707_v45 = vld [vmem:[#allocation15 + $0x1c8] sm:$0xff] }
 0x1bd   :  { %8044 = vst [vmem:[#allocation121_spill] sm:$0xff] %v5692_v42  ;;  %1538 = vmatpush.msrb.mxu1 %v5707_v45  ;;  %v5710_v42 = vld [vmem:[#allocation15 + $0x1d0] sm:$0xff] }
 0x1be   :  { %8045 = vst [vmem:[#allocation122_spill] sm:$0xff] %v5695_v39  ;;  %1558 = vmatpush.msra.mxu2 %v5710_v42  ;;  %v5713_v39 = vld [vmem:[#allocation15 + $0x1d8] sm:$0xff] }
 0x1bf   :  { %8046 = vst [vmem:[#allocation123_spill] sm:$0xff] %v5698_v22  ;;  %1578 = vmatpush.msra.mxu3 %v5713_v39  ;;  %v5716_v22 = vld [vmem:[#allocation15 + $0x1a0] sm:$0xff] }
 0x1c0   :  { %8047 = vst [vmem:[#allocation124_spill] sm:$0xff] %v5701_v23  ;;  %1519 = vmatpush.msrb.mxu0 %v5716_v22  ;;  %v5719_v23 = vld [vmem:[#allocation15 + $0x1a8] sm:$0xff] }
 0x1c1   :  { %8048 = vst [vmem:[#allocation125_spill] sm:$0xff] %v5704_v54  ;;  %1539 = vmatpush.msrb.mxu1 %v5719_v23  ;;  %v5722_v54 = vld [vmem:[#allocation15 + $0x1b0] sm:$0xff] }
 0x1c2   :  { %8049 = vst [vmem:[#allocation126_spill] sm:$0xff] %v5707_v45  ;;  %1559 = vmatpush.msra.mxu2 %v5722_v54  ;;  %v5725_v45 = vld [vmem:[#allocation15 + $0x1b8] sm:$0xff] }
 0x1c3   :  { %8050 = vst [vmem:[#allocation127_spill] sm:$0xff] %v5710_v42  ;;  %1579 = vmatpush.msra.mxu3 %v5725_v45  ;;  %v5728_v42 = vld [vmem:[#allocation15 + $0x180] sm:$0xff] }
 0x1c4   :  { %8051 = vst [vmem:[#allocation128_spill] sm:$0xff] %v5713_v39  ;;  %1520 = vmatpush.msrb.mxu0 %v5728_v42  ;;  %v5731_v39 = vld [vmem:[#allocation15 + $0x188] sm:$0xff] }
 0x1c5   :  { %8052 = vst [vmem:[#allocation129_spill] sm:$0xff] %v5716_v22  ;;  %1540 = vmatpush.msrb.mxu1 %v5731_v39  ;;  %v5734_v22 = vld [vmem:[#allocation15 + $0x190] sm:$0xff] }
 0x1c6   :  { %8053 = vst [vmem:[#allocation130_spill] sm:$0xff] %v5719_v23  ;;  %1560 = vmatpush.msra.mxu2 %v5734_v22  ;;  %v5737_v23 = vld [vmem:[#allocation15 + $0x198] sm:$0xff] }
 0x1c7   :  { %8054 = vst [vmem:[#allocation131_spill] sm:$0xff] %v5722_v54  ;;  %1580 = vmatpush.msra.mxu3 %v5737_v23  ;;  %v5740_v54 = vld [vmem:[#allocation15 + $0x160] sm:$0xff] }
 0x1c8   :  { %8055 = vst [vmem:[#allocation132_spill] sm:$0xff] %v5725_v45  ;;  %1521 = vmatpush.msrb.mxu0 %v5740_v54  ;;  %v5743_v45 = vld [vmem:[#allocation15 + $0x168] sm:$0xff] }
 0x1c9   :  { %8056 = vst [vmem:[#allocation133_spill] sm:$0xff] %v5728_v42  ;;  %1541 = vmatpush.msrb.mxu1 %v5743_v45  ;;  %v5746_v42 = vld [vmem:[#allocation15 + $0x170] sm:$0xff] }
 0x1ca   :  { %8057 = vst [vmem:[#allocation134_spill] sm:$0xff] %v5731_v39  ;;  %1561 = vmatpush.msra.mxu2 %v5746_v42  ;;  %v5749_v39 = vld [vmem:[#allocation15 + $0x178] sm:$0xff] }
 0x1cb   :  { %8058 = vst [vmem:[#allocation135_spill] sm:$0xff] %v5734_v22  ;;  %1581 = vmatpush.msra.mxu3 %v5749_v39  ;;  %v5752_v22 = vld [vmem:[#allocation15 + $0x140] sm:$0xff] }
 0x1cc   :  { %8059 = vst [vmem:[#allocation136_spill] sm:$0xff] %v5737_v23  ;;  %1522 = vmatpush.msrb.mxu0 %v5752_v22  ;;  %v5755_v23 = vld [vmem:[#allocation15 + $0x148] sm:$0xff] }
 0x1cd   :  { %8060 = vst [vmem:[#allocation137_spill] sm:$0xff] %v5740_v54  ;;  %1542 = vmatpush.msrb.mxu1 %v5755_v23  ;;  %v5758_v54 = vld [vmem:[#allocation15 + $0x150] sm:$0xff] }
 0x1ce   :  { %8061 = vst [vmem:[#allocation138_spill] sm:$0xff] %v5743_v45  ;;  %1562 = vmatpush.msra.mxu2 %v5758_v54  ;;  %v5761_v45 = vld [vmem:[#allocation15 + $0x158] sm:$0xff] }
 0x1cf   :  { %8062 = vst [vmem:[#allocation139_spill] sm:$0xff] %v5746_v42  ;;  %1582 = vmatpush.msra.mxu3 %v5761_v45  ;;  %v5764_v42 = vld [vmem:[#allocation15 + $0x120] sm:$0xff] }
 0x1d0   :  { %8063 = vst [vmem:[#allocation140_spill] sm:$0xff] %v5749_v39  ;;  %1523 = vmatpush.msrb.mxu0 %v5764_v42  ;;  %v5767_v39 = vld [vmem:[#allocation15 + $0x128] sm:$0xff] }
 0x1d1   :  { %8064 = vst [vmem:[#allocation141_spill] sm:$0xff] %v5752_v22  ;;  %1543 = vmatpush.msrb.mxu1 %v5767_v39  ;;  %v5770_v22 = vld [vmem:[#allocation15 + $0x130] sm:$0xff] }
 0x1d2   :  { %8065 = vst [vmem:[#allocation142_spill] sm:$0xff] %v5755_v23  ;;  %1563 = vmatpush.msra.mxu2 %v5770_v22  ;;  %v5773_v23 = vld [vmem:[#allocation15 + $0x138] sm:$0xff] }
 0x1d3   :  { %8066 = vst [vmem:[#allocation143_spill] sm:$0xff] %v5758_v54  ;;  %1583 = vmatpush.msra.mxu3 %v5773_v23  ;;  %v5776_v54 = vld [vmem:[#allocation15 + $0x100] sm:$0xff] }
 0x1d4   :  { %8067 = vst [vmem:[#allocation144_spill] sm:$0xff] %v5761_v45  ;;  %1524 = vmatpush.msrb.mxu0 %v5776_v54  ;;  %v5779_v45 = vld [vmem:[#allocation15 + $0x108] sm:$0xff] }
 0x1d5   :  { %8068 = vst [vmem:[#allocation145_spill] sm:$0xff] %v5764_v42  ;;  %1544 = vmatpush.msrb.mxu1 %v5779_v45  ;;  %v5782_v42 = vld [vmem:[#allocation15 + $0x110] sm:$0xff] }
 0x1d6   :  { %8069 = vst [vmem:[#allocation146_spill] sm:$0xff] %v5767_v39  ;;  %1564 = vmatpush.msra.mxu2 %v5782_v42  ;;  %v5785_v39 = vld [vmem:[#allocation15 + $0x118] sm:$0xff] }
 0x1d7   :  { %8070 = vst [vmem:[#allocation147_spill] sm:$0xff] %v5770_v22  ;;  %1584 = vmatpush.msra.mxu3 %v5785_v39  ;;  %v5788_v22 = vld [vmem:[#allocation15 + $0xe0] sm:$0xff] }
 0x1d8   :  { %8071 = vst [vmem:[#allocation148_spill] sm:$0xff] %v5773_v23  ;;  %1525 = vmatpush.msrb.mxu0 %v5788_v22  ;;  %v5791_v23 = vld [vmem:[#allocation15 + $0xe8] sm:$0xff]  ;;  %1565 = vmatpush.msra.mxu2 %v7968_v40 }
 0x1d9   :  { %8072 = vst [vmem:[#allocation149_spill] sm:$0xff] %v5779_v45  ;;  %1545 = vmatpush.msrb.mxu1 %v5791_v23  ;;  %1585 = vmatpush.msra.mxu3 %v5079_v21  ;;  %v5796_v45 = vld [vmem:[#allocation15 + $0xc0] sm:$0xff]  ;;  %v5815_v40 = vld [vmem:[#allocation15 + $0x88] sm:$0xff] }
 0x1da   :  { %8073 = vst [vmem:[#allocation150_spill] sm:$0xff] %v5782_v42  ;;  %1526 = vmatpush.msrb.mxu0 %v5796_v45  ;;  %v5799_v42 = vld [vmem:[#allocation15 + $0xc8] sm:$0xff]  ;;  %1566 = vmatpush.msra.mxu2 %v5087_v62  ;;  %v5812_v21 = vld [vmem:[#allocation15 + $0x80] sm:$0xff] }
 0x1db   :  { %8074 = vst [vmem:[#allocation151_spill] sm:$0xff] %v5788_v22  ;;  %1546 = vmatpush.msrb.mxu1 %v5799_v42  ;;  %1586 = vmatpush.msra.mxu3 %v5089_v0  ;;  %v5804_v22 = vld [vmem:[#allocation15 + $0xa0] sm:$0xff]  ;;  %v5823_v0 = vld [vmem:[#allocation15 + $0x68] sm:$0xff] }
 0x1dc   :  { %8075 = vst [vmem:[#allocation152_spill] sm:$0xff] %v5791_v23  ;;  %1527 = vmatpush.msrb.mxu0 %v5804_v22  ;;  %v5807_v23 = vld [vmem:[#allocation15 + $0xa8] sm:$0xff]  ;;  %1567 = vmatpush.msra.mxu2 %v5096_v2  ;;  %v5820_v62 = vld [vmem:[#allocation15 + $0x60] sm:$0xff] }
 0x1dd   :  { %1547 = vmatpush.msrb.mxu1 %v5807_v23  ;;  %1587 = vmatpush.msra.mxu3 %v5098_v4  ;;  %8076 = vst [vmem:[#allocation153_spill] sm:$0xff] %v5820_v62  ;;  %v5828_v2 = vld [vmem:[#allocation15 + $0x40] sm:$0xff]  ;;  %v5831_v4 = vld [vmem:[#allocation15 + $0x48] sm:$0xff] }
 0x1de   :  { %1528 = vmatpush.msrb.mxu0 %v5812_v21  ;;  %1568 = vmatpush.msra.mxu2 %v5105_v7  ;;  %8077 = vst [vmem:[#allocation154_spill] sm:$0xff] %v5823_v0  ;;  %v5839_v7 = vld [vmem:[#allocation15 + $0x28] sm:$0xff] }
 0x1df   :  { %1548 = vmatpush.msrb.mxu1 %v5815_v40  ;;  %1588 = vmatpush.msra.mxu3 %v5107_v60  ;;  %8078 = vst [vmem:[#allocation155_spill] sm:$0xff] %v5828_v2  ;;  %v5836_v60 = vld [vmem:[#allocation15 + $0x20] sm:$0xff] }
 0x1e0   :  { %1529 = vmatpush.msrb.mxu0 %v5820_v62  ;;  %1569 = vmatpush.msra.mxu2 %v7973_v36  ;;  %8079 = vst [vmem:[#allocation156_spill] sm:$0xff] %v5831_v4  ;;  %v5847_v36 = vld [vmem:[#allocation15 + $0x8] sm:$0xff] }
 0x1e1   :  { %1549 = vmatpush.msrb.mxu1 %v5823_v0  ;;  %1589 = vmatpush.msra.mxu3 %v5117_v31  ;;  %8080 = vst [vmem:[#allocation157_spill] sm:$0xff] %v5836_v60  ;;  %v5844_v31 = vld [vmem:[#allocation15] sm:$0xff] }
 0x1e2   :  { %1530 = vmatpush.msrb.mxu0 %v5828_v2  ;;  %1570 = vmatpush.msra.mxu2 %v5125_v6  ;;  %8081 = vst [vmem:[#allocation158_spill] sm:$0xff] %v5839_v7  ;;  %v255_v6 = vadd.f32 %v5199_v13, %v5375_v41 }
 0x1e3   :  { %1550 = vmatpush.msrb.mxu1 %v5831_v4  ;;  %1590 = vmatpush.msra.mxu3 %v5127_v8  ;;  %8082 = vst [vmem:[#allocation159_spill] sm:$0xff] %v5844_v31  ;;  %v296_v8 = vadd.f32 %v5205_v25, %v5377_v35 }
 0x1e4   :  { %1531 = vmatpush.msrb.mxu0 %v5836_v60  ;;  %1571 = vmatpush.msra.mxu2 %v5134_v10  ;;  %8083 = vst [vmem:[#allocation160_spill] sm:$0xff] %v5847_v36 }
 0x1e5   :  { %1551 = vmatpush.msrb.mxu1 %v5839_v7  ;;  %1591 = vmatpush.msra.mxu3 %v5136_v14 }
 0x1e6   :  { %1532 = vmatpush.msrb.mxu0 %v5844_v31  ;;  %1572 = vmatpush.msra.mxu2 %v5143_v19  ;;  %v549_v19 = vadd.f32 %v5361_v30, %v5394_v38 }
 0x1e7   :  { %1552 = vmatpush.msrb.mxu1 %v5847_v36  ;;  %1592 = vmatpush.msra.mxu3 %v5145_v5  ;;  %v378_v36 = vadd.f32 %v5231_v37, %v5422_v34  ;;  %v508_v5 = vadd.f32 %v5359_v43, %v5389_v26  ;;  %v337_v43 = vadd.f32 %v5223_v58, %v5425_v18 }
 0x208   :  { %v1131_v10 = vpop.f32.mrf.mxu0  ;;  %v1151_v14 = vpop.f32.mrf.mxu1 }
 0x209   :  { %v1194_v7 = vadd.f32 %v1131_v10, %v255_v6  ;;  %v1195_v60 = vadd.f32 %v1151_v14, %v296_v8 }
 0x20b   :  { %v3539_v4 = vmul.f32 -1.442695, %v1194_v7  ;;  %v3540_v31 = vmul.f32 -1.442695, %v1195_v60 }
 0x20d   :  { %3644 = vpow2.f32 %v3539_v4 }
 0x20e   :  { %3646 = vpow2.f32 %v3540_v31 }
 0x20f   :  { %v1191_v13 = vpop.f32.mrf.mxu3  ;;  %v1171_v14 = vpop.f32.mrf.mxu2 }
 0x210   :  { %v1197_v41 = vadd.f32 %v1191_v13, %v378_v36  ;;  %v1222_v25 = vpop.f32.mrf.mxu0  ;;  %v1242_v35 = vpop.f32.mrf.mxu1  ;;  %v1196_v36 = vadd.f32 %v1171_v14, %v337_v43 }
 0x211   :  { %v1285_v2 = vadd.f32 %v1222_v25, %v508_v5  ;;  %v1286_v6 = vadd.f32 %v1242_v35, %v549_v19 }
 0x212   :  { %v3541_v8 = vmul.f32 -1.442695, %v1197_v41 }
 0x213   :  { %v3645_v7 = vpop.eup %3644  ;;  %v3542_v60 = vmul.f32 -1.442695, %v1285_v2  ;;  %v3543_v37 = vmul.f32 -1.442695, %v1286_v6 }
 0x214   :  { %v3647_v4 = vpop.eup %3646  ;;  %v1292_v10 = vadd.f32 1.0, %v3645_v7  ;;  %3648 = vpow2.f32 %v3541_v8 }
 0x215   :  { %v1311_v31 = vadd.f32 1.0, %v3647_v4  ;;  %3650 = vpow2.f32 %v3542_v60 }
 0x216   :  { %3652 = vrcp.f32 %v1292_v10  ;;  %v1304_v14 = vand.u32 2147483648, %v1292_v10  ;;  %vm1298_vm12 = vweird.f32 %v1292_v10 }
 0x217   :  { %3654 = vrcp.f32 %v1311_v31  ;;  %v1282_v30 = vpop.f32.mrf.mxu3  ;;  %v1262_v60 = vpop.f32.mrf.mxu2  ;;  %vm1317_vm11 = vweird.f32 %v1311_v31 }
 0x218   :  { %3656 = vpow2.f32 %v3543_v37  ;;  %v1288_v35 = vadd.f32 %v1282_v30, %v5414_v27  ;;  %v1302_v27 = vand.u32 2147483647, %v1292_v10  ;;  %v1323_v30 = vand.u32 2147483648, %v1311_v31 }
 0x219   :  { %3658 = vtanh.f32 %v1196_v36  ;;  %v1321_v36 = vand.u32 2147483647, %v1311_v31  ;;  %v1305_v26 = vor.u32 1.1754944e-38, %v1304_v14 }
 0x21a   :  { %v3649_v41 = vpop.eup %3648  ;;  %v3544_v25 = vmul.f32 -1.442695, %v1288_v35  ;;  %v1287_v35 = vadd.f32 %v1262_v60, %v5410_v50  ;;  %vm1303_vm13 = vcmp.eq.f32.partialorder %v1302_v27, 8.507059e+37 }
 0x21b   :  { %v3651_v5 = vpop.eup %3650  ;;  %v5865_v2 = vadd.f32 1.0, %v3649_v41  ;;  %vm1322_vm0 = vcmp.eq.f32.partialorder %v1321_v36, 8.507059e+37 }
 0x21c   :  { %v3653_v19 = vpop.eup %3652  ;;  %v5867_v13 = vadd.f32 1.0, %v3651_v5 }
 0x21d   :  { %v3655_v6 = vpop.eup %3654  ;;  %v1294_v8 = vmul.f32 %v3653_v19, %v1292_v10  ;;  %3660 = vrcp.f32 %v5865_v2  ;;  %vm1299_vm9 = vweird.f32 %v3653_v19  ;;  %v1343_v36 = vand.u32 2147483648, %v5865_v2 }
 0x21e   :  { %v3657_v58 = vpop.eup %3656  ;;  %v1313_v7 = vmul.f32 %v3655_v6, %v1311_v31  ;;  %3662 = vrcp.f32 %v5867_v13  ;;  %vm1318_vm10 = vweird.f32 %v3655_v6  ;;  %vm1300_vm14 = vmor %vm1298_vm12, %vm1299_vm9  ;;  %v1367_v10 = vand.u32 2147483648, %v5867_v13 }
 0x21f   :  { %v1295_v4 = vsub.f32 1.0, %v1294_v8  ;;  %v5871_v37 = vadd.f32 1.0, %v3657_v58  ;;  %3664 = vpow2.f32 %v3544_v25  ;;  %v3659_v5 = vpop.eup %3658  ;;  %vm1319_vm15 = vmor %vm1317_vm11, %vm1318_vm10  ;;  %vm1361_vm2 = vweird.f32 %v5867_v13 }
 0x220   :  { %v1314_v43 = vsub.f32 1.0, %v1313_v7  ;;  %v1324_v7 = vor.u32 1.1754944e-38, %v1323_v30  ;;  %vm1337_vm6 = vweird.f32 %v5865_v2 }
 0x221   :  { %v1296_v41 = vmul.f32 %v3653_v19, %v1295_v4  ;;  %3666 = vrcp.f32 %v5871_v37  ;;  %vm1380_vm9 = vweird.f32 %v5871_v37 }
 0x222   :  { %v1315_v18 = vmul.f32 %v3655_v6, %v1314_v43  ;;  %3668 = vtanh.f32 %v1287_v35 }
 0x223   :  { %v5875_v38 = vpop.eup %3660  ;;  %v1297_v8 = vadd.f32 %v3653_v19, %v1296_v41 }
 0x224   :  { %v3663_v58 = vpop.eup %3662  ;;  %v1316_v25 = vadd.f32 %v3655_v6, %v1315_v18  ;;  %v1333_v4 = vmul.f32 %v5875_v38, %v5865_v2  ;;  %vm1338_vm3 = vweird.f32 %v5875_v38 }
 0x225   :  { %v1301_v34 = vsel %vm1300_vm14, %v3653_v19, %v1297_v8  ;;  %v1357_v50 = vmul.f32 %v3663_v58, %v5867_v13  ;;  %v3665_v60 = vpop.eup %3664  ;;  %vm1362_vm1 = vweird.f32 %v3663_v58  ;;  %vm5900_vm8 = vmor %vm1337_vm6, %vm1338_vm3 }
 0x226   :  { %v1306_v43 = vsel %vm1303_vm13, %v1305_v26, %v1301_v34  ;;  %v1320_v31 = vsel %vm1319_vm15, %v3655_v6, %v1316_v25  ;;  %v1334_v41 = vsub.f32 1.0, %v1333_v4  ;;  %v5881_v18 = vadd.f32 1.0, %v3665_v60  ;;  %vm1363_vm5 = vmor %vm1361_vm2, %vm1362_vm1  ;;  %v8117_v60 = vld [vmem:[#allocation112_spill] sm:$0xff] }
 0x227   :  { %v3667_v27 = vpop.eup %3666  ;;  %v1325_v30 = vsel %vm1322_vm0, %v1324_v7, %v1320_v31  ;;  %v1348_v0 = vmul.f32 %v3659_v5, %v1306_v43  ;;  %v1358_v14 = vsub.f32 1.0, %v1357_v50  ;;  %v1365_v26 = vand.u32 2147483647, %v5867_v13 }
 0x228   :  { %v1347_v62 = vmul.f32 %v1325_v30, %v5476_v57  ;;  %v1335_v19 = vmul.f32 %v5875_v38, %v1334_v41  ;;  %v1376_v35 = vmul.f32 %v3667_v27, %v5871_v37  ;;  %3670 = vrcp.f32 %v5881_v18  ;;  %v3669_v57 = vpop.eup %3668 }
 0x229   :  { %v1359_v8 = vmul.f32 %v3663_v58, %v1358_v14  ;;  %v1386_v5 = vand.u32 2147483648, %v5871_v37  ;;  %v1368_v25 = vor.u32 1.1754944e-38, %v1367_v10  ;;  %vm1381_vm4 = vweird.f32 %v3667_v27 }
 0x22a   :  { %v5889_v34 = vadd.f32 %v1348_v0, %v1347_v62  ;;  %v1377_v6 = vsub.f32 1.0, %v1376_v35  ;;  %v1336_v4 = vadd.f32 %v5875_v38, %v1335_v19  ;;  %v1384_v62 = vand.u32 2147483647, %v5871_v37  ;;  %vm1382_vm10 = vmor %vm1380_vm9, %vm1381_vm4 }
 0x22b   :  { %v1360_v7 = vadd.f32 %v3663_v58, %v1359_v8  ;;  %vm1366_vm7 = vcmp.eq.f32.partialorder %v1365_v26, 8.507059e+37  ;;  %v1341_v13 = vand.u32 2147483647, %v5865_v2  ;;  %v1387_v10 = vor.u32 1.1754944e-38, %v1386_v5 }
 0x22c   :  { %3672 = vtanh.f32 %v5889_v34  ;;  %v1378_v50 = vmul.f32 %v3667_v27, %v1377_v6  ;;  %v1340_v14 = vsel %vm5900_vm8, %v5875_v38, %v1336_v4  ;;  %vm1385_vm11 = vcmp.eq.f32.partialorder %v1384_v62, 8.507059e+37  ;;  %v8112_v4 = vld [vmem:[#allocation107_spill] sm:$0xff]  ;;  %v8114_v62 = vld [vmem:[#allocation109_spill] sm:$0xff] }
 0x22d   :  { %v1364_v0 = vsel %vm1363_vm5, %v3663_v58, %v1360_v7  ;;  %v1344_v58 = vor.u32 1.1754944e-38, %v1343_v36  ;;  %vm1342_vm12 = vcmp.eq.f32.partialorder %v1341_v13, 8.507059e+37  ;;  %v1406_v38 = vand.u32 2147483648, %v5881_v18  ;;  %v8116_v13 = vld [vmem:[#allocation111_spill] sm:$0xff] }
 0x22e   :  { %v1369_v43 = vsel %vm1366_vm7, %v1368_v25, %v1364_v0  ;;  %v1379_v31 = vadd.f32 %v3667_v27, %v1378_v50  ;;  %v3671_v41 = vpop.eup %3670  ;;  %vm1400_vm14 = vweird.f32 %v5881_v18  ;;  %v8113_v50 = vld [vmem:[#allocation108_spill] sm:$0xff]  ;;  %v8115_v0 = vld [vmem:[#allocation110_spill] sm:$0xff] }
 0x22f   :  { %v1411_v30 = vmul.f32 %v3669_v57, %v1369_v43  ;;  %v1396_v2 = vmul.f32 %v3671_v41, %v5881_v18  ;;  %v1345_v6 = vsel %vm1342_vm12, %v1344_v58, %v1340_v14  ;;  %vm1401_vm13 = vweird.f32 %v3671_v41  ;;  %v8118_v43 = vld [vmem:[#allocation113_spill] sm:$0xff]  ;;  %v8123_v14 = vld [vmem:[#allocation118_spill] sm:$0xff]  ;;  %v8124_v58 = vld [vmem:[#allocation119_spill] sm:$0xff] }
 0x230   :  { %v1383_v19 = vsel %vm1382_vm10, %v3667_v27, %v1379_v31  ;;  %v1404_v27 = vand.u32 2147483647, %v5881_v18  ;;  %vm1402_vm15 = vmor %vm1400_vm14, %vm1401_vm13  ;;  %v1407_v25 = vor.u32 1.1754944e-38, %v1406_v38  ;;  %v8111_v18 = vld [vmem:[#allocation106_spill] sm:$0xff]  ;;  %v8133_v38 = vld [vmem:[#allocation128_spill] sm:$0xff] }
 0x231   :  { %v1388_v35 = vsel %vm1385_vm11, %v1387_v10, %v1383_v19  ;;  %v1397_v26 = vsub.f32 1.0, %v1396_v2  ;;  %v8119_v31 = vld [vmem:[#allocation114_spill] sm:$0xff]  ;;  %v8121_v10 = vld [vmem:[#allocation116_spill] sm:$0xff]  ;;  %v8126_v2 = vld [vmem:[#allocation121_spill] sm:$0xff] }
 0x232   :  { %v3673_v8 = vpop.eup %3672  ;;  %v1410_v37 = vmul.f32 %v1388_v35, %v5485_v24  ;;  %vm1405_vm0 = vcmp.eq.f32.partialorder %v1404_v27, 8.507059e+37  ;;  %v8125_v19 = vld [vmem:[#allocation120_spill] sm:$0xff]  ;;  %v8127_v35 = vld [vmem:[#allocation122_spill] sm:$0xff] }
 0x233   :  { %v5910_v7 = vmul.f32 %v3673_v8, %v1345_v6  ;;  %v1398_v57 = vmul.f32 %v3671_v41, %v1397_v26  ;;  %v8128_v8 = vld [vmem:[#allocation123_spill] sm:$0xff]  ;;  %v8130_v26 = vld [vmem:[#allocation125_spill] sm:$0xff]  ;;  %v8131_v6 = vld [vmem:[#allocation126_spill] sm:$0xff] }
 0x234   :  { %v5912_v5 = vadd.f32 %v1411_v30, %v1410_v37  ;;  %v8122_v30 = vld [vmem:[#allocation117_spill] sm:$0xff]  ;;  %v8129_v37 = vld [vmem:[#allocation124_spill] sm:$0xff]  ;;  %v8135_v27 = vld [vmem:[#allocation130_spill] sm:$0xff] }
 0x235   :  { %8086 = vst [vmem:[#allocation161_spill] sm:$0xff] %v5910_v7  ;;  %1442 = vmatmul.f32.vlgmr.msra.gmra.mxu0 %v5910_v7  ;;  %1462 = vmatmul.f32.vlgmr.msra.gmra.mxu1 %v5910_v7  ;;  %v1399_v24 = vadd.f32 %v3671_v41, %v1398_v57  ;;  %v8132_v57 = vld [vmem:[#allocation127_spill] sm:$0xff] }
 0x236   :  { %3674 = vtanh.f32 %v5912_v5  ;;  %1482 = vmatmul.f32.vlgmr.msrb.gmra.mxu2 %v5910_v7  ;;  %1502 = vmatmul.f32.vlgmr.msrb.gmra.mxu3 %v5910_v7  ;;  %v6298_v7 = vld [vmem:[#allocation11 + $0xd8] sm:$0xff] }
 0x237   :  { %1738 = vmatpush.msra.mxu0 %v5494_v16  ;;  %1758 = vmatpush.msra.mxu1 %v5497_v52  ;;  %v1403_v36 = vsel %vm1402_vm15, %v3671_v41, %v1399_v24  ;;  %v8120_v41 = vld [vmem:[#allocation115_spill] sm:$0xff]  ;;  %v8134_v24 = vld [vmem:[#allocation129_spill] sm:$0xff] }
 0x238   :  { %1778 = vmatpush.msrb.mxu2 %v5500_v15  ;;  %1798 = vmatpush.msrb.mxu3 %v5503_v61  ;;  %v1408_v52 = vsel %vm1405_vm0, %v1407_v25, %v1403_v36  ;;  %v8088_v61 = vld [vmem:[#allocation69_spill] sm:$0xff]  ;;  %v8136_v36 = vld [vmem:[#allocation131_spill] sm:$0xff]  ;;  %v8137_v25 = vld [vmem:[#allocation132_spill] sm:$0xff] }
 0x239   :  { %1739 = vmatpush.msra.mxu0 %v5506_v3  ;;  %1759 = vmatpush.msra.mxu1 %v5509_v29  ;;  %v8089_v3 = vld [vmem:[#allocation72_spill] sm:$0xff]  ;;  %v8090_v29 = vld [vmem:[#allocation74_spill] sm:$0xff] }
 0x23a   :  { %1779 = vmatpush.msrb.mxu2 %v5512_v59  ;;  %1799 = vmatpush.msrb.mxu3 %v5515_v53  ;;  %v8091_v59 = vld [vmem:[#allocation73_spill] sm:$0xff]  ;;  %v8092_v53 = vld [vmem:[#allocation75_spill] sm:$0xff] }
 0x23b   :  { %1740 = vmatpush.msra.mxu0 %v5520_v9  ;;  %1760 = vmatpush.msra.mxu1 %v5523_v44  ;;  %v8093_v9 = vld [vmem:[#allocation80_spill] sm:$0xff]  ;;  %v8094_v44 = vld [vmem:[#allocation83_spill] sm:$0xff] }
 0x23c   :  { %v3675_v16 = vpop.eup %3674  ;;  %1780 = vmatpush.msrb.mxu2 %v5526_v33  ;;  %1800 = vmatpush.msrb.mxu3 %v5529_v11  ;;  %v8095_v33 = vld [vmem:[#allocation90_spill] sm:$0xff]  ;;  %v8096_v11 = vld [vmem:[#allocation91_spill] sm:$0xff] }
 0x23d   :  { %v5934_v15 = vmul.f32 %v3675_v16, %v1408_v52  ;;  %1741 = vmatpush.msra.mxu0 %v5536_v20  ;;  %1761 = vmatpush.msra.mxu1 %v5539_v17  ;;  %v8097_v20 = vld [vmem:[#allocation92_spill] sm:$0xff]  ;;  %v8098_v17 = vld [vmem:[#allocation93_spill] sm:$0xff]  ;;  %v8139_v52 = vld [vmem:[#allocation134_spill] sm:$0xff]  ;;  %8192 = vst [vmem:[#allocation91_spill] sm:$0xff] %v6298_v7 }
 0x23e   :  { %1781 = vmatpush.msrb.mxu2 %v5542_v28  ;;  %1801 = vmatpush.msrb.mxu3 %v5545_v46  ;;  %v8099_v28 = vld [vmem:[#allocation94_spill] sm:$0xff]  ;;  %v8100_v46 = vld [vmem:[#allocation95_spill] sm:$0xff]  ;;  %v8138_v16 = vld [vmem:[#allocation133_spill] sm:$0xff] }
 0x23f   :  { %8087 = vst [vmem:[#allocation162_spill] sm:$0xff] %v5934_v15  ;;  %1533 = vmatmul.f32.vlgmr.msrb.gmra.mxu0 %v5934_v15  ;;  %1553 = vmatmul.f32.vlgmr.msrb.gmra.mxu1 %v5934_v15 }
 0x240   :  { %1573 = vmatmul.f32.vlgmr.msra.gmra.mxu2 %v5934_v15  ;;  %1593 = vmatmul.f32.vlgmr.msra.gmra.mxu3 %v5934_v15  ;;  %v6289_v15 = vld [vmem:[#allocation11 + $0xc0] sm:$0xff] }
 0x241   :  { %1742 = vmatpush.msra.mxu0 %v5548_v63  ;;  %1762 = vmatpush.msra.mxu1 %v5551_v51  ;;  %v8101_v63 = vld [vmem:[#allocation96_spill] sm:$0xff]  ;;  %v8102_v51 = vld [vmem:[#allocation97_spill] sm:$0xff]  ;;  %8189 = vst [vmem:[#allocation80_spill] sm:$0xff] %v6289_v15 }
 0x242   :  { %1782 = vmatpush.msrb.mxu2 %v5554_v32  ;;  %1802 = vmatpush.msrb.mxu3 %v5557_v1  ;;  %v8103_v32 = vld [vmem:[#allocation98_spill] sm:$0xff]  ;;  %v8104_v1 = vld [vmem:[#allocation99_spill] sm:$0xff] }
 0x243   :  { %1743 = vmatpush.msra.mxu0 %v5560_v55  ;;  %1763 = vmatpush.msra.mxu1 %v5563_v56  ;;  %v8105_v55 = vld [vmem:[#allocation100_spill] sm:$0xff]  ;;  %v8106_v56 = vld [vmem:[#allocation101_spill] sm:$0xff] }
 0x244   :  { %1783 = vmatpush.msrb.mxu2 %v5566_v48  ;;  %1803 = vmatpush.msrb.mxu3 %v5569_v12  ;;  %v8107_v48 = vld [vmem:[#allocation102_spill] sm:$0xff]  ;;  %v8108_v12 = vld [vmem:[#allocation103_spill] sm:$0xff] }
 0x245   :  { %1744 = vmatpush.msra.mxu0 %v5572_v49  ;;  %1764 = vmatpush.msra.mxu1 %v5575_v47  ;;  %v8109_v49 = vld [vmem:[#allocation104_spill] sm:$0xff]  ;;  %v8110_v47 = vld [vmem:[#allocation105_spill] sm:$0xff] }
 0x246   :  { %1784 = vmatpush.msrb.mxu2 %v8088_v61  ;;  %1804 = vmatpush.msrb.mxu3 %v8089_v3  ;;  %v8140_v61 = vld [vmem:[#allocation135_spill] sm:$0xff]  ;;  %v8141_v3 = vld [vmem:[#allocation136_spill] sm:$0xff] }
 0x247   :  { %1745 = vmatpush.msra.mxu0 %v8090_v29  ;;  %1765 = vmatpush.msra.mxu1 %v8091_v59  ;;  %v8142_v29 = vld [vmem:[#allocation137_spill] sm:$0xff]  ;;  %v8143_v59 = vld [vmem:[#allocation138_spill] sm:$0xff] }
 0x248   :  { %1785 = vmatpush.msrb.mxu2 %v8092_v53  ;;  %1805 = vmatpush.msrb.mxu3 %v8093_v9  ;;  %v8144_v53 = vld [vmem:[#allocation139_spill] sm:$0xff]  ;;  %v8145_v9 = vld [vmem:[#allocation140_spill] sm:$0xff] }
 0x249   :  { %1746 = vmatpush.msra.mxu0 %v8094_v44  ;;  %1766 = vmatpush.msra.mxu1 %v8095_v33  ;;  %v8146_v44 = vld [vmem:[#allocation141_spill] sm:$0xff]  ;;  %v8147_v33 = vld [vmem:[#allocation142_spill] sm:$0xff] }
 0x24a   :  { %1786 = vmatpush.msrb.mxu2 %v8096_v11  ;;  %1806 = vmatpush.msrb.mxu3 %v8097_v20  ;;  %v8148_v11 = vld [vmem:[#allocation143_spill] sm:$0xff]  ;;  %v8149_v20 = vld [vmem:[#allocation144_spill] sm:$0xff] }
 0x24b   :  { %1747 = vmatpush.msra.mxu0 %v8098_v17  ;;  %1767 = vmatpush.msra.mxu1 %v8099_v28  ;;  %v8150_v17 = vld [vmem:[#allocation145_spill] sm:$0xff]  ;;  %v8151_v28 = vld [vmem:[#allocation146_spill] sm:$0xff] }
 0x24c   :  { %1787 = vmatpush.msrb.mxu2 %v8100_v46  ;;  %1807 = vmatpush.msrb.mxu3 %v8101_v63  ;;  %v8152_v46 = vld [vmem:[#allocation147_spill] sm:$0xff]  ;;  %v8153_v63 = vld [vmem:[#allocation148_spill] sm:$0xff] }
 0x24d   :  { %1748 = vmatpush.msra.mxu0 %v8102_v51  ;;  %1768 = vmatpush.msra.mxu1 %v8103_v32  ;;  %v8154_v51 = vld [vmem:[#allocation149_spill] sm:$0xff]  ;;  %v8155_v32 = vld [vmem:[#allocation150_spill] sm:$0xff] }
 0x24e   :  { %1788 = vmatpush.msrb.mxu2 %v8104_v1  ;;  %1808 = vmatpush.msrb.mxu3 %v8105_v55  ;;  %v8156_v1 = vld [vmem:[#allocation151_spill] sm:$0xff]  ;;  %v8157_v55 = vld [vmem:[#allocation152_spill] sm:$0xff] }
 0x24f   :  { %1749 = vmatpush.msra.mxu0 %v8106_v56  ;;  %1769 = vmatpush.msra.mxu1 %v8107_v48  ;;  %v6026_v56 = vld [vmem:[#allocation15 + $0xf0] sm:$0xff]  ;;  %v6029_v48 = vld [vmem:[#allocation15 + $0xf8] sm:$0xff] }
 0x250   :  { %1789 = vmatpush.msrb.mxu2 %v8108_v12  ;;  %1809 = vmatpush.msrb.mxu3 %v8109_v49  ;;  %v6042_v12 = vld [vmem:[#allocation15 + $0xb0] sm:$0xff]  ;;  %v6045_v49 = vld [vmem:[#allocation15 + $0xb8] sm:$0xff] }
 0x251   :  { %1750 = vmatpush.msra.mxu0 %v8110_v47  ;;  %1770 = vmatpush.msra.mxu1 %v8111_v18  ;;  %v6058_v47 = vld [vmem:[#allocation15 + $0x70] sm:$0xff]  ;;  %v6061_v18 = vld [vmem:[#allocation15 + $0x78] sm:$0xff] }
 0x252   :  { %1790 = vmatpush.msrb.mxu2 %v8112_v4  ;;  %1810 = vmatpush.msrb.mxu3 %v8113_v50  ;;  %v6066_v4 = vld [vmem:[#allocation15 + $0x50] sm:$0xff]  ;;  %v6069_v50 = vld [vmem:[#allocation15 + $0x58] sm:$0xff] }
 0x253   :  { %1751 = vmatpush.msra.mxu0 %v8114_v62  ;;  %1771 = vmatpush.msra.mxu1 %v8115_v0  ;;  %v8162_v62 = vld [vmem:[#allocation157_spill] sm:$0xff]  ;;  %v8163_v0 = vld [vmem:[#allocation158_spill] sm:$0xff] }
 0x254   :  { %1791 = vmatpush.msrb.mxu2 %v8116_v13  ;;  %1811 = vmatpush.msrb.mxu3 %v8117_v60  ;;  %v6074_v13 = vld [vmem:[#allocation15 + $0x30] sm:$0xff]  ;;  %v6077_v60 = vld [vmem:[#allocation15 + $0x38] sm:$0xff] }
 0x255   :  { %1752 = vmatpush.msra.mxu0 %v8118_v43  ;;  %1772 = vmatpush.msra.mxu1 %v8119_v31  ;;  %v8164_v43 = vld [vmem:[#allocation159_spill] sm:$0xff]  ;;  %v8165_v31 = vld [vmem:[#allocation160_spill] sm:$0xff] }
 0x256   :  { %1792 = vmatpush.msrb.mxu2 %v8120_v41  ;;  %1812 = vmatpush.msrb.mxu3 %v8121_v10  ;;  %v6082_v41 = vld [vmem:[#allocation15 + $0x10] sm:$0xff]  ;;  %v6085_v10 = vld [vmem:[#allocation15 + $0x18] sm:$0xff] }
 0x257   :  { %1753 = vmatpush.msra.mxu0 %v8122_v30  ;;  %1773 = vmatpush.msra.mxu1 %v8123_v14  ;;  %v8166_v30 = vld [vmem:[#allocation52_spill] sm:$0xff] }
 0x258   :  { %1793 = vmatpush.msrb.mxu2 %v8124_v58  ;;  %1813 = vmatpush.msrb.mxu3 %v8125_v19  ;;  %v8167_v14 = vld [vmem:[#allocation76_spill] sm:$0xff]  ;;  %v8168_v19 = vld [vmem:[#allocation55_spill] sm:$0xff] }
 0x259   :  { %1829 = vmatpush.msrb.mxu0 %v8126_v2  ;;  %1849 = vmatpush.msrb.mxu1 %v8127_v35  ;;  %v258_v58 = vadd.f32 %v8167_v14, %v8166_v30  ;;  %v8169_v2 = vld [vmem:[#allocation77_spill] sm:$0xff] }
 0x25a   :  { %1869 = vmatpush.msra.mxu2 %v8128_v8  ;;  %1889 = vmatpush.msra.mxu3 %v8129_v37  ;;  %v299_v35 = vadd.f32 %v8169_v2, %v8168_v19 }
 0x25b   :  { %1830 = vmatpush.msrb.mxu0 %v8130_v26  ;;  %1850 = vmatpush.msrb.mxu1 %v8131_v6 }
 0x25c   :  { %1870 = vmatpush.msra.mxu2 %v8132_v57  ;;  %1890 = vmatpush.msra.mxu3 %v8133_v38 }
 0x25d   :  { %1831 = vmatpush.msrb.mxu0 %v8134_v24  ;;  %1851 = vmatpush.msrb.mxu1 %v8135_v27  ;;  %v8170_v24 = vld [vmem:[#allocation63_spill] sm:$0xff]  ;;  %v8171_v27 = vld [vmem:[#allocation30_spill] sm:$0xff] }
 0x25e   :  { %1871 = vmatpush.msra.mxu2 %v8136_v36  ;;  %1891 = vmatpush.msra.mxu3 %v8137_v25  ;;  %v381_v36 = vadd.f32 %v8171_v27, %v8170_v24 }
 0x25f   :  { %1832 = vmatpush.msrb.mxu0 %v8138_v16  ;;  %1852 = vmatpush.msrb.mxu1 %v8139_v52  ;;  %v8172_v52 = vld [vmem:[#allocation56_spill] sm:$0xff] }
 0x260   :  { %1872 = vmatpush.msra.mxu2 %v8140_v61  ;;  %1892 = vmatpush.msra.mxu3 %v8141_v3  ;;  %v8173_v61 = vld [vmem:[#allocation54_spill] sm:$0xff] }
 0x261   :  { %1833 = vmatpush.msrb.mxu0 %v8142_v29  ;;  %1853 = vmatpush.msrb.mxu1 %v8143_v59  ;;  %v505_v3 = vadd.f32 %v8173_v61, %v8172_v52  ;;  %v8174_v29 = vld [vmem:[#allocation59_spill] sm:$0xff]  ;;  %v8175_v59 = vld [vmem:[#allocation44_spill] sm:$0xff] }
 0x262   :  { %1873 = vmatpush.msra.mxu2 %v8144_v53  ;;  %1893 = vmatpush.msra.mxu3 %v8145_v9  ;;  %v546_v53 = vadd.f32 %v8175_v59, %v8174_v29 }
 0x263   :  { %1834 = vmatpush.msrb.mxu0 %v8146_v44  ;;  %1854 = vmatpush.msrb.mxu1 %v8147_v33 }
 0x264   :  { %1874 = vmatpush.msra.mxu2 %v8148_v11  ;;  %1894 = vmatpush.msra.mxu3 %v8149_v20 }
 0x265   :  { %1835 = vmatpush.msrb.mxu0 %v8150_v17  ;;  %1855 = vmatpush.msrb.mxu1 %v8151_v28 }
 0x266   :  { %1875 = vmatpush.msra.mxu2 %v8152_v46  ;;  %1895 = vmatpush.msra.mxu3 %v8153_v63 }
 0x267   :  { %1836 = vmatpush.msrb.mxu0 %v5776_v54  ;;  %1856 = vmatpush.msrb.mxu1 %v8154_v51  ;;  %v6034_v54 = vld [vmem:[#allocation15 + $0xd0] sm:$0xff] }
 0x268   :  { %1876 = vmatpush.msra.mxu2 %v8155_v32  ;;  %1896 = vmatpush.msra.mxu3 %v5785_v39  ;;  %v6037_v39 = vld [vmem:[#allocation15 + $0xd8] sm:$0xff] }
 0x269   :  { %1837 = vmatpush.msrb.mxu0 %v8156_v1  ;;  %1857 = vmatpush.msrb.mxu1 %v8157_v55  ;;  %v8176_v55 = vld [vmem:[#allocation66_spill] sm:$0xff] }
 0x26a   :  { %1877 = vmatpush.msra.mxu2 %v6026_v56  ;;  %1897 = vmatpush.msra.mxu3 %v6029_v48 }
 0x26b   :  { %1838 = vmatpush.msrb.mxu0 %v5796_v45  ;;  %1858 = vmatpush.msrb.mxu1 %v5799_v42  ;;  %v6050_v45 = vld [vmem:[#allocation15 + $0x90] sm:$0xff]  ;;  %v6053_v42 = vld [vmem:[#allocation15 + $0x98] sm:$0xff] }
 0x26c   :  { %1878 = vmatpush.msra.mxu2 %v6034_v54  ;;  %1898 = vmatpush.msra.mxu3 %v6037_v39 }
 0x26d   :  { %1839 = vmatpush.msrb.mxu0 %v5804_v22  ;;  %1859 = vmatpush.msrb.mxu1 %v5807_v23  ;;  %v8158_v23 = vld [vmem:[#allocation153_spill] sm:$0xff]  ;;  %v8159_v22 = vld [vmem:[#allocation154_spill] sm:$0xff] }
 0x26e   :  { %1879 = vmatpush.msra.mxu2 %v6042_v12  ;;  %1899 = vmatpush.msra.mxu3 %v6045_v49 }
 0x26f   :  { %1840 = vmatpush.msrb.mxu0 %v5812_v21  ;;  %1860 = vmatpush.msrb.mxu1 %v5815_v40  ;;  %v8160_v21 = vld [vmem:[#allocation155_spill] sm:$0xff]  ;;  %v8161_v40 = vld [vmem:[#allocation156_spill] sm:$0xff] }
 0x270   :  { %1880 = vmatpush.msra.mxu2 %v6050_v45  ;;  %1900 = vmatpush.msra.mxu3 %v6053_v42 }
 0x271   :  { %1841 = vmatpush.msrb.mxu0 %v8158_v23  ;;  %1861 = vmatpush.msrb.mxu1 %v8159_v22  ;;  %v8177_v23 = vld [vmem:[#allocation27_spill] sm:$0xff] }
 0x272   :  { %1881 = vmatpush.msra.mxu2 %v6058_v47  ;;  %1901 = vmatpush.msra.mxu3 %v6061_v18  ;;  %v340_v22 = vadd.f32 %v8177_v23, %v8176_v55 }
 0x273   :  { %1842 = vmatpush.msrb.mxu0 %v8160_v21  ;;  %1862 = vmatpush.msrb.mxu1 %v8161_v40 }
 0x274   :  { %1882 = vmatpush.msra.mxu2 %v6066_v4  ;;  %1902 = vmatpush.msra.mxu3 %v6069_v50 }
 0x275   :  { %1843 = vmatpush.msrb.mxu0 %v8162_v62  ;;  %1863 = vmatpush.msrb.mxu1 %v8163_v0  ;;  %v8178_v62 = vld [vmem:[#allocation71_spill] sm:$0xff] }
 0x276   :  { %1883 = vmatpush.msra.mxu2 %v6074_v13  ;;  %1903 = vmatpush.msra.mxu3 %v6077_v60 }
 0x277   :  { %1844 = vmatpush.msrb.mxu0 %v8164_v43  ;;  %1864 = vmatpush.msrb.mxu1 %v8165_v31 }
 0x278   :  { %1884 = vmatpush.msra.mxu2 %v6082_v41  ;;  %1904 = vmatpush.msra.mxu3 %v6085_v10 }
 0x2b2   :  { %v1443_v8 = vpop.f32.mrf.mxu0  ;;  %v1463_v37 = vpop.f32.mrf.mxu1 }
 0x2b3   :  { %v1506_v26 = vadd.f32 %v1443_v8, %v258_v58  ;;  %v1507_v6 = vadd.f32 %v1463_v37, %v299_v35 }
 0x2b5   :  { %v3545_v57 = vmul.f32 -1.442695, %v1506_v26  ;;  %v3546_v38 = vmul.f32 -1.442695, %v1507_v6 }
 0x2b7   :  { %3676 = vpow2.f32 %v3545_v57 }
 0x2b8   :  { %3678 = vpow2.f32 %v3546_v38 }
 0x2b9   :  { %v1503_v25 = vpop.f32.mrf.mxu3  ;;  %v1483_v1 = vpop.f32.mrf.mxu2 }
 0x2ba   :  { %v1509_v16 = vadd.f32 %v1503_v25, %v381_v36  ;;  %v1508_v43 = vadd.f32 %v1483_v1, %v340_v22  ;;  %v8179_v1 = vld [vmem:[#allocation70_spill] sm:$0xff] }
 0x2bc   :  { %v3547_v9 = vmul.f32 -1.442695, %v1509_v16  ;;  %v1534_v44 = vpop.f32.mrf.mxu0  ;;  %v1554_v33 = vpop.f32.mrf.mxu1 }
 0x2bd   :  { %v3677_v11 = vpop.eup %3676  ;;  %v1597_v20 = vadd.f32 %v1534_v44, %v505_v3  ;;  %v1598_v17 = vadd.f32 %v1554_v33, %v546_v53 }
 0x2be   :  { %v3679_v28 = vpop.eup %3678  ;;  %v1604_v46 = vadd.f32 1.0, %v3677_v11  ;;  %3680 = vpow2.f32 %v3547_v9 }
 0x2bf   :  { %v1623_v63 = vadd.f32 1.0, %v3679_v28  ;;  %v3548_v51 = vmul.f32 -1.442695, %v1597_v20  ;;  %v3549_v32 = vmul.f32 -1.442695, %v1598_v17 }
 0x2c0   :  { %3682 = vrcp.f32 %v1604_v46  ;;  %v1614_v27 = vand.u32 2147483647, %v1604_v46  ;;  %v1616_v36 = vand.u32 2147483648, %v1604_v46  ;;  %vm1610_vm4 = vweird.f32 %v1604_v46 }
 0x2c1   :  { %3684 = vrcp.f32 %v1623_v63  ;;  %v1635_v16 = vand.u32 2147483648, %v1623_v63  ;;  %v1633_v59 = vand.u32 2147483647, %v1623_v63  ;;  %vm1629_vm3 = vweird.f32 %v1623_v63 }
 0x2c2   :  { %3686 = vpow2.f32 %v3548_v51  ;;  %vm1615_vm6 = vcmp.eq.f32.partialorder %v1614_v27, 8.507059e+37  ;;  %v1617_v11 = vor.u32 1.1754944e-38, %v1616_v36 }
 0x2c3   :  { %3688 = vpow2.f32 %v3549_v32  ;;  %v1594_v21 = vpop.f32.mrf.mxu3  ;;  %v1574_v53 = vpop.f32.mrf.mxu2  ;;  %v1636_v51 = vor.u32 1.1754944e-38, %v1635_v16  ;;  %vm1634_vm8 = vcmp.eq.f32.partialorder %v1633_v59, 8.507059e+37 }
 0x2c4   :  { %v3681_v40 = vpop.eup %3680  ;;  %v1600_v0 = vadd.f32 %v1594_v21, %v8178_v62  ;;  %v1599_v23 = vadd.f32 %v1574_v53, %v8179_v1 }
 0x2c5   :  { %v6101_v31 = vadd.f32 1.0, %v3681_v40 }
 0x2c6   :  { %v3683_v14 = vpop.eup %3682  ;;  %v3550_v58 = vmul.f32 -1.442695, %v1600_v0 }
 0x2c7   :  { %v3685_v2 = vpop.eup %3684  ;;  %v1606_v35 = vmul.f32 %v3683_v14, %v1604_v46  ;;  %3690 = vrcp.f32 %v6101_v31  ;;  %vm1611_vm1 = vweird.f32 %v3683_v14  ;;  %vm1649_vm9 = vweird.f32 %v6101_v31 }
 0x2c8   :  { %v3687_v8 = vpop.eup %3686  ;;  %v1625_v37 = vmul.f32 %v3685_v2, %v1623_v63  ;;  %3692 = vpow2.f32 %v3550_v58  ;;  %vm1630_vm2 = vweird.f32 %v3685_v2  ;;  %vm1612_vm5 = vmor %vm1610_vm4, %vm1611_vm1  ;;  %v1653_v53 = vand.u32 2147483647, %v6101_v31 }
 0x2c9   :  { %v3689_v26 = vpop.eup %3688  ;;  %v1607_v6 = vsub.f32 1.0, %v1606_v35  ;;  %3694 = vtanh.f32 %v1508_v43  ;;  %v6104_v57 = vadd.f32 1.0, %v3687_v8  ;;  %vm1631_vm7 = vmor %vm1629_vm3, %vm1630_vm2 }
 0x2ca   :  { %v1626_v38 = vsub.f32 1.0, %v1625_v37  ;;  %v6106_v25 = vadd.f32 1.0, %v3689_v26  ;;  %v1655_v37 = vand.u32 2147483648, %v6101_v31  ;;  %vm1654_vm4 = vcmp.eq.f32.partialorder %v1653_v53, 8.507059e+37  ;;  %v6205_v53 = vld [vmem:[#allocation11 + $0x1b0] sm:$0xff] }
 0x2cb   :  { %v1608_v61 = vmul.f32 %v3683_v14, %v1607_v6  ;;  %3696 = vrcp.f32 %v6104_v57  ;;  %v1677_v6 = vand.u32 2147483647, %v6104_v57  ;;  %vm1673_vm14 = vweird.f32 %v6104_v57 }
 0x2cc   :  { %v1627_v3 = vmul.f32 %v3685_v2, %v1626_v38  ;;  %3698 = vrcp.f32 %v6106_v25  ;;  %v1698_v36 = vand.u32 2147483648, %v6106_v25  ;;  %v1696_v59 = vand.u32 2147483647, %v6106_v25 }
 0x2cd   :  { %v6110_v9 = vpop.eup %3690  ;;  %v1609_v44 = vadd.f32 %v3683_v14, %v1608_v61  ;;  %vm1692_vm15 = vweird.f32 %v6106_v25  ;;  %vm1678_vm2 = vcmp.eq.f32.partialorder %v1677_v6, 8.507059e+37  ;;  %v6274_v6 = vld [vmem:[#allocation11 + $0x118] sm:$0xff] }
 0x2ce   :  { %v3693_v33 = vpop.eup %3692  ;;  %v1628_v20 = vadd.f32 %v3685_v2, %v1627_v3  ;;  %v1645_v17 = vmul.f32 %v6110_v9, %v6101_v31  ;;  %vm1650_vm10 = vweird.f32 %v6110_v9  ;;  %vm1697_vm3 = vcmp.eq.f32.partialorder %v1696_v59, 8.507059e+37  ;;  %v6202_v59 = vld [vmem:[#allocation11 + $0x1a8] sm:$0xff] }
 0x2cf   :  { %v3695_v28 = vpop.eup %3694  ;;  %v1613_v32 = vsel %vm1612_vm5, %v3683_v14, %v1609_v44  ;;  %v6116_v22 = vadd.f32 1.0, %v3693_v33  ;;  %vm6139_vm13 = vmor %vm1649_vm9, %vm1650_vm10  ;;  %v1656_v33 = vor.u32 1.1754944e-38, %v1655_v37  ;;  %v6172_v37 = vld [vmem:[#allocation11 + $0x1f0] sm:$0xff] }
 0x2d0   :  { %v1618_v63 = vsel %vm1615_vm6, %v1617_v11, %v1613_v32  ;;  %v1632_v21 = vsel %vm1631_vm7, %v3685_v2, %v1628_v20  ;;  %v1646_v46 = vsub.f32 1.0, %v1645_v17  ;;  %v1699_v32 = vor.u32 1.1754944e-38, %v1698_v36  ;;  %v6196_v36 = vld [vmem:[#allocation11 + $0x1d8] sm:$0xff] }
 0x2d1   :  { %v3697_v40 = vpop.eup %3696  ;;  %v1637_v62 = vsel %vm1634_vm8, %v1636_v51, %v1632_v21  ;;  %v1660_v0 = vmul.f32 %v3695_v28, %v1618_v63  ;;  %3700 = vrcp.f32 %v6116_v22  ;;  %vm1712_vm6 = vweird.f32 %v6116_v22 }
 0x2d2   :  { %v3699_v43 = vpop.eup %3698  ;;  %v1659_v58 = vmul.f32 %v1637_v62, %v5889_v34  ;;  %v1647_v35 = vmul.f32 %v6110_v9, %v1646_v46  ;;  %v1669_v14 = vmul.f32 %v3697_v40, %v6104_v57  ;;  %3702 = vtanh.f32 %v1599_v23 }
 0x2d3   :  { %v1688_v8 = vmul.f32 %v3699_v43, %v6106_v25  ;;  %v1679_v34 = vand.u32 2147483648, %v6104_v57  ;;  %vm1674_vm11 = vweird.f32 %v3697_v40  ;;  %vm1693_vm12 = vweird.f32 %v3699_v43 }
 0x2d4   :  { %v6124_v2 = vadd.f32 %v1660_v0, %v1659_v58  ;;  %v1670_v26 = vsub.f32 1.0, %v1669_v14  ;;  %v1648_v27 = vadd.f32 %v6110_v9, %v1647_v35  ;;  %vm1675_vm0 = vmor %vm1673_vm14, %vm1674_vm11  ;;  %v6167_v14 = vld [vmem:[#allocation11 + $0x1e8] sm:$0xff] }
 0x2d5   :  { %v1689_v38 = vsub.f32 1.0, %v1688_v8  ;;  %v1680_v28 = vor.u32 1.1754944e-38, %v1679_v34  ;;  %vm1694_vm1 = vmor %vm1692_vm15, %vm1693_vm12  ;;  %v1716_v8 = vand.u32 2147483647, %v6116_v22  ;;  %v6187_v34 = vld [vmem:[#allocation11 + $0x1c8] sm:$0xff] }
 0x2d6   :  { %3704 = vtanh.f32 %v6124_v2  ;;  %v1671_v16 = vmul.f32 %v3697_v40, %v1670_v26  ;;  %v1652_v31 = vsel %vm6139_vm13, %v6110_v9, %v1648_v27  ;;  %v6175_v26 = vld [vmem:[#allocation11 + $0x1f8] sm:$0xff]  ;;  %v6193_v27 = vld [vmem:[#allocation11 + $0x1d0] sm:$0xff] }
 0x2d7   :  { %v6133_v61 = vpop.eup %3700  ;;  %v1690_v3 = vmul.f32 %v3699_v43, %v1689_v38  ;;  %v1657_v0 = vsel %vm1654_vm4, %v1656_v33, %v1652_v31  ;;  %v6184_v38 = vld [vmem:[#allocation11 + $0x1c0] sm:$0xff]  ;;  %vm1717_vm8 = vcmp.eq.f32.partialorder %v1716_v8, 8.507059e+37  ;;  %v6271_v8 = vld [vmem:[#allocation11 + $0x110] sm:$0xff] }
 0x2d8   :  { %v1672_v11 = vadd.f32 %v3697_v40, %v1671_v16  ;;  %v1708_v20 = vmul.f32 %v6133_v61, %v6116_v22  ;;  %v3703_v17 = vpop.eup %3702  ;;  %vm1713_vm5 = vweird.f32 %v6133_v61  ;;  %v6225_v31 = vld [vmem:[#allocation11 + $0x160] sm:$0xff] }
 0x2d9   :  { %v1691_v51 = vadd.f32 %v3699_v43, %v1690_v3  ;;  %vm6180_vm7 = vmor %vm1712_vm6, %vm1713_vm5  ;;  %v6199_v3 = vld [vmem:[#allocation11 + $0x1a0] sm:$0xff] }
 0x2da   :  { %v1676_v1 = vsel %vm1675_vm0, %v3697_v40, %v1672_v11  ;;  %v1709_v23 = vsub.f32 1.0, %v1708_v20  ;;  %v6211_v11 = vld [vmem:[#allocation11 + $0x180] sm:$0xff]  ;;  %v6214_v20 = vld [vmem:[#allocation11 + $0x188] sm:$0xff] }
 0x2db   :  { %v1681_v63 = vsel %vm1678_vm2, %v1680_v28, %v1676_v1  ;;  %v1695_v57 = vsel %vm1694_vm1, %v3699_v43, %v1691_v51  ;;  %v6164_v43 = vld [vmem:[#allocation11 + $0x1e0] sm:$0xff]  ;;  %v6219_v28 = vld [vmem:[#allocation11 + $0x190] sm:$0xff]  ;;  %v6222_v51 = vld [vmem:[#allocation11 + $0x198] sm:$0xff] }
 0x2dc   :  { %v3705_v21 = vpop.eup %3704  ;;  %v1700_v46 = vsel %vm1697_vm3, %v1699_v32, %v1695_v57  ;;  %v1723_v62 = vmul.f32 %v3703_v17, %v1681_v63  ;;  %v1710_v25 = vmul.f32 %v6133_v61, %v1709_v23  ;;  %v6228_v32 = vld [vmem:[#allocation11 + $0x168] sm:$0xff]  ;;  %v6235_v1 = vld [vmem:[#allocation11 + $0x170] sm:$0xff]  ;;  %v6238_v23 = vld [vmem:[#allocation11 + $0x178] sm:$0xff] }
 0x2dd   :  { %v1722_v58 = vmul.f32 %v1700_v46, %v5912_v5  ;;  %v6152_v35 = vmul.f32 %v3705_v21, %v1657_v0  ;;  %v1718_v5 = vand.u32 2147483648, %v6116_v22  ;;  %v6241_v63 = vld [vmem:[#allocation11 + $0x140] sm:$0xff]  ;;  %v6244_v57 = vld [vmem:[#allocation11 + $0x148] sm:$0xff]  ;;  %v6247_v21 = vld [vmem:[#allocation11 + $0x150] sm:$0xff] }
 0x2de   :  { %v1711_v40 = vadd.f32 %v6133_v61, %v1710_v25  ;;  %v6250_v46 = vld [vmem:[#allocation11 + $0x158] sm:$0xff]  ;;  %v6256_v25 = vld [vmem:[#allocation11 + $0x128] sm:$0xff]  ;;  %v6259_v0 = vld [vmem:[#allocation11 + $0x130] sm:$0xff] }
 0x2df   :  { %8182 = vst [vmem:[#allocation69_spill] sm:$0xff] %v6152_v35  ;;  %v6154_v9 = vadd.f32 %v1723_v62, %v1722_v58  ;;  %1754 = vmatmul.f32.vlgmr.msra.gmra.mxu0 %v6152_v35  ;;  %1774 = vmatmul.f32.vlgmr.msra.gmra.mxu1 %v6152_v35  ;;  %v1719_v16 = vor.u32 1.1754944e-38, %v1718_v5  ;;  %v6253_v62 = vld [vmem:[#allocation11 + $0x120] sm:$0xff]  ;;  %v6262_v58 = vld [vmem:[#allocation11 + $0x138] sm:$0xff]  ;;  %v6268_v5 = vld [vmem:[#allocation11 + $0x108] sm:$0xff] }
 0x2e0   :  { %1794 = vmatmul.f32.vlgmr.msrb.gmra.mxu2 %v6152_v35  ;;  %1814 = vmatmul.f32.vlgmr.msrb.gmra.mxu3 %v6152_v35  ;;  %v1715_v22 = vsel %vm6180_vm7, %v6133_v61, %v1711_v40  ;;  %v6208_v61 = vld [vmem:[#allocation11 + $0x1b8] sm:$0xff]  ;;  %v6265_v40 = vld [vmem:[#allocation11 + $0x100] sm:$0xff]  ;;  %v6295_v35 = vld [vmem:[#allocation11 + $0xd0] sm:$0xff] }
 0x2e1   :  { %3706 = vtanh.f32 %v6154_v9  ;;  %2049 = vmatpush.msra.mxu0 %v6164_v43  ;;  %2069 = vmatpush.msra.mxu1 %v6167_v14  ;;  %v1720_v33 = vsel %vm1717_vm8, %v1719_v16, %v1715_v22  ;;  %v6277_v22 = vld [vmem:[#allocation11 + $0xe0] sm:$0xff]  ;;  %v6280_v16 = vld [vmem:[#allocation11 + $0xe8] sm:$0xff]  ;;  %8191 = vst [vmem:[#allocation90_spill] sm:$0xff] %v6295_v35 }
 0x2e2   :  { %2089 = vmatpush.msrb.mxu2 %v6172_v37  ;;  %2109 = vmatpush.msrb.mxu3 %v6175_v26  ;;  %8186 = vst [vmem:[#allocation74_spill] sm:$0xff] %v6280_v16 }
 0x2e3   :  { %2050 = vmatpush.msra.mxu0 %v6184_v38  ;;  %2070 = vmatpush.msra.mxu1 %v6187_v34 }
 0x2e4   :  { %2090 = vmatpush.msrb.mxu2 %v6193_v27  ;;  %2110 = vmatpush.msrb.mxu3 %v6196_v36 }
 0x2e5   :  { %2051 = vmatpush.msra.mxu0 %v6199_v3  ;;  %2071 = vmatpush.msra.mxu1 %v6202_v59 }
 0x2e6   :  { %2091 = vmatpush.msrb.mxu2 %v6205_v53  ;;  %2111 = vmatpush.msrb.mxu3 %v6208_v61 }
 0x2e7   :  { %v3707_v44 = vpop.eup %3706  ;;  %2052 = vmatpush.msra.mxu0 %v6211_v11  ;;  %2072 = vmatpush.msra.mxu1 %v6214_v20 }
 0x2e8   :  { %v6217_v17 = vmul.f32 %v3707_v44, %v1720_v33  ;;  %2092 = vmatpush.msrb.mxu2 %v6219_v28  ;;  %2112 = vmatpush.msrb.mxu3 %v6222_v51  ;;  %v6283_v44 = vld [vmem:[#allocation11 + $0xf0] sm:$0xff]  ;;  %v6286_v33 = vld [vmem:[#allocation11 + $0xf8] sm:$0xff] }
 0x2e9   :  { %2053 = vmatpush.msra.mxu0 %v6225_v31  ;;  %2073 = vmatpush.msra.mxu1 %v6228_v32  ;;  %8187 = vst [vmem:[#allocation73_spill] sm:$0xff] %v6283_v44 }
 0x2ea   :  { %8185 = vst [vmem:[#allocation72_spill] sm:$0xff] %v6217_v17  ;;  %1845 = vmatmul.f32.vlgmr.msrb.gmra.mxu0 %v6217_v17  ;;  %1865 = vmatmul.f32.vlgmr.msrb.gmra.mxu1 %v6217_v17 }
 0x2eb   :  { %1885 = vmatmul.f32.vlgmr.msra.gmra.mxu2 %v6217_v17  ;;  %1905 = vmatmul.f32.vlgmr.msra.gmra.mxu3 %v6217_v17  ;;  %8188 = vst [vmem:[#allocation75_spill] sm:$0xff] %v6286_v33  ;;  %v6292_v17 = vld [vmem:[#allocation11 + $0xc8] sm:$0xff] }
 0x2ec   :  { %2093 = vmatpush.msrb.mxu2 %v6235_v1  ;;  %2113 = vmatpush.msrb.mxu3 %v6238_v23  ;;  %8190 = vst [vmem:[#allocation83_spill] sm:$0xff] %v6292_v17 }
 0x2ed   :  { %2054 = vmatpush.msra.mxu0 %v6241_v63  ;;  %2074 = vmatpush.msra.mxu1 %v6244_v57 }
 0x2ee   :  { %2094 = vmatpush.msrb.mxu2 %v6247_v21  ;;  %2114 = vmatpush.msrb.mxu3 %v6250_v46 }
 0x2ef   :  { %2055 = vmatpush.msra.mxu0 %v6253_v62  ;;  %2075 = vmatpush.msra.mxu1 %v6256_v25 }
 0x2f0   :  { %2095 = vmatpush.msrb.mxu2 %v6259_v0  ;;  %2115 = vmatpush.msrb.mxu3 %v6262_v58 }
 0x2f1   :  { %2056 = vmatpush.msra.mxu0 %v6265_v40  ;;  %2076 = vmatpush.msra.mxu1 %v6268_v5 }
 0x2f2   :  { %2096 = vmatpush.msrb.mxu2 %v6271_v8  ;;  %2116 = vmatpush.msrb.mxu3 %v6274_v6 }
 0x2f3   :  { %2057 = vmatpush.msra.mxu0 %v6277_v22  ;;  %2077 = vmatpush.msra.mxu1 %v6280_v16 }
 0x2f4   :  { %2097 = vmatpush.msrb.mxu2 %v6283_v44  ;;  %2117 = vmatpush.msrb.mxu3 %v6286_v33  ;;  %v6301_v44 = vld [vmem:[#allocation11 + $0xa0] sm:$0xff]  ;;  %v6304_v33 = vld [vmem:[#allocation11 + $0xa8] sm:$0xff] }
 0x2f5   :  { %2058 = vmatpush.msra.mxu0 %v6289_v15  ;;  %2078 = vmatpush.msra.mxu1 %v6292_v17  ;;  %8193 = vst [vmem:[#allocation92_spill] sm:$0xff] %v6301_v44  ;;  %v6307_v15 = vld [vmem:[#allocation11 + $0xb0] sm:$0xff]  ;;  %v6310_v17 = vld [vmem:[#allocation11 + $0xb8] sm:$0xff] }
 0x2f6   :  { %2098 = vmatpush.msrb.mxu2 %v6295_v35  ;;  %2118 = vmatpush.msrb.mxu3 %v6298_v7  ;;  %8194 = vst [vmem:[#allocation93_spill] sm:$0xff] %v6304_v33  ;;  %v6313_v35 = vld [vmem:[#allocation11 + $0x80] sm:$0xff]  ;;  %v6316_v7 = vld [vmem:[#allocation11 + $0x88] sm:$0xff] }
 0x2f7   :  { %2059 = vmatpush.msra.mxu0 %v6301_v44  ;;  %2079 = vmatpush.msra.mxu1 %v6304_v33  ;;  %8195 = vst [vmem:[#allocation94_spill] sm:$0xff] %v6307_v15  ;;  %v6319_v44 = vld [vmem:[#allocation11 + $0x90] sm:$0xff]  ;;  %v6322_v33 = vld [vmem:[#allocation11 + $0x98] sm:$0xff] }
 0x2f8   :  { %2099 = vmatpush.msrb.mxu2 %v6307_v15  ;;  %8196 = vst [vmem:[#allocation95_spill] sm:$0xff] %v6310_v17  ;;  %2119 = vmatpush.msrb.mxu3 %v6310_v17  ;;  %v6325_v15 = vld [vmem:[#allocation11 + $0x60] sm:$0xff]  ;;  %v6328_v17 = vld [vmem:[#allocation11 + $0x68] sm:$0xff] }
 0x2f9   :  { %8197 = vst [vmem:[#allocation96_spill] sm:$0xff] %v6313_v35  ;;  %2060 = vmatpush.msra.mxu0 %v6313_v35  ;;  %2080 = vmatpush.msra.mxu1 %v6316_v7  ;;  %v6331_v35 = vld [vmem:[#allocation11 + $0x70] sm:$0xff] }
 0x2fa   :  { %8198 = vst [vmem:[#allocation97_spill] sm:$0xff] %v6316_v7  ;;  %2100 = vmatpush.msrb.mxu2 %v6319_v44  ;;  %2120 = vmatpush.msrb.mxu3 %v6322_v33  ;;  %v6334_v7 = vld [vmem:[#allocation11 + $0x78] sm:$0xff] }
 0x2fb   :  { %8199 = vst [vmem:[#allocation98_spill] sm:$0xff] %v6319_v44  ;;  %2061 = vmatpush.msra.mxu0 %v6325_v15  ;;  %2081 = vmatpush.msra.mxu1 %v6328_v17  ;;  %v6337_v44 = vld [vmem:[#allocation11 + $0x40] sm:$0xff] }
 0x2fc   :  { %8200 = vst [vmem:[#allocation99_spill] sm:$0xff] %v6322_v33  ;;  %2101 = vmatpush.msrb.mxu2 %v6331_v35  ;;  %2121 = vmatpush.msrb.mxu3 %v6334_v7  ;;  %v6340_v33 = vld [vmem:[#allocation11 + $0x48] sm:$0xff] }
 0x2fd   :  { %8201 = vst [vmem:[#allocation100_spill] sm:$0xff] %v6325_v15  ;;  %2062 = vmatpush.msra.mxu0 %v6337_v44  ;;  %2082 = vmatpush.msra.mxu1 %v6340_v33  ;;  %v6343_v15 = vld [vmem:[#allocation11 + $0x50] sm:$0xff] }
 0x2fe   :  { %8202 = vst [vmem:[#allocation101_spill] sm:$0xff] %v6328_v17  ;;  %2102 = vmatpush.msrb.mxu2 %v6343_v15  ;;  %v6346_v17 = vld [vmem:[#allocation11 + $0x58] sm:$0xff] }
 0x2ff   :  { %8203 = vst [vmem:[#allocation102_spill] sm:$0xff] %v6331_v35  ;;  %2122 = vmatpush.msrb.mxu3 %v6346_v17  ;;  %v6349_v35 = vld [vmem:[#allocation11 + $0x20] sm:$0xff] }
 0x300   :  { %8204 = vst [vmem:[#allocation103_spill] sm:$0xff] %v6334_v7  ;;  %2063 = vmatpush.msra.mxu0 %v6349_v35  ;;  %v6352_v7 = vld [vmem:[#allocation11 + $0x28] sm:$0xff] }
 0x301   :  { %8205 = vst [vmem:[#allocation104_spill] sm:$0xff] %v6337_v44  ;;  %2083 = vmatpush.msra.mxu1 %v6352_v7  ;;  %v6355_v44 = vld [vmem:[#allocation11 + $0x30] sm:$0xff] }
 0x302   :  { %8206 = vst [vmem:[#allocation105_spill] sm:$0xff] %v6340_v33  ;;  %2103 = vmatpush.msrb.mxu2 %v6355_v44  ;;  %v6358_v33 = vld [vmem:[#allocation11 + $0x38] sm:$0xff] }
 0x303   :  { %8207 = vst [vmem:[#allocation106_spill] sm:$0xff] %v6343_v15  ;;  %2123 = vmatpush.msrb.mxu3 %v6358_v33  ;;  %v6361_v15 = vld [vmem:[#allocation11] sm:$0xff] }
 0x304   :  { %8208 = vst [vmem:[#allocation107_spill] sm:$0xff] %v6346_v17  ;;  %2064 = vmatpush.msra.mxu0 %v6361_v15  ;;  %v6364_v17 = vld [vmem:[#allocation11 + $0x8] sm:$0xff] }
 0x305   :  { %8209 = vst [vmem:[#allocation108_spill] sm:$0xff] %v6349_v35  ;;  %2084 = vmatpush.msra.mxu1 %v6364_v17  ;;  %v6367_v35 = vld [vmem:[#allocation11 + $0x10] sm:$0xff] }
 0x306   :  { %8210 = vst [vmem:[#allocation109_spill] sm:$0xff] %v6352_v7  ;;  %2104 = vmatpush.msrb.mxu2 %v6367_v35  ;;  %v6370_v7 = vld [vmem:[#allocation11 + $0x18] sm:$0xff] }
 0x307   :  { %8211 = vst [vmem:[#allocation110_spill] sm:$0xff] %v6355_v44  ;;  %2124 = vmatpush.msrb.mxu3 %v6370_v7  ;;  %v6373_v44 = vld [vmem:[#allocation15 + $0x1e0] sm:$0xff] }
 0x308   :  { %8212 = vst [vmem:[#allocation111_spill] sm:$0xff] %v6358_v33  ;;  %2139 = vmatpush.msrb.mxu0 %v6373_v44  ;;  %v6376_v33 = vld [vmem:[#allocation15 + $0x1e8] sm:$0xff] }
 0x309   :  { %8213 = vst [vmem:[#allocation112_spill] sm:$0xff] %v6361_v15  ;;  %2159 = vmatpush.msrb.mxu1 %v6376_v33  ;;  %v6379_v15 = vld [vmem:[#allocation15 + $0x1f0] sm:$0xff] }
 0x30a   :  { %8214 = vst [vmem:[#allocation113_spill] sm:$0xff] %v6364_v17  ;;  %2179 = vmatpush.msra.mxu2 %v6379_v15  ;;  %v6382_v17 = vld [vmem:[#allocation15 + $0x1f8] sm:$0xff] }
 0x30b   :  { %8215 = vst [vmem:[#allocation114_spill] sm:$0xff] %v6367_v35  ;;  %2199 = vmatpush.msra.mxu3 %v6382_v17  ;;  %v6385_v35 = vld [vmem:[#allocation15 + $0x1c0] sm:$0xff] }
 0x30c   :  { %8216 = vst [vmem:[#allocation115_spill] sm:$0xff] %v6370_v7  ;;  %2140 = vmatpush.msrb.mxu0 %v6385_v35  ;;  %v6388_v7 = vld [vmem:[#allocation15 + $0x1c8] sm:$0xff] }
 0x30d   :  { %8217 = vst [vmem:[#allocation116_spill] sm:$0xff] %v6373_v44  ;;  %2160 = vmatpush.msrb.mxu1 %v6388_v7  ;;  %v6391_v44 = vld [vmem:[#allocation15 + $0x1d0] sm:$0xff] }
 0x30e   :  { %8218 = vst [vmem:[#allocation117_spill] sm:$0xff] %v6376_v33  ;;  %2180 = vmatpush.msra.mxu2 %v6391_v44  ;;  %v6394_v33 = vld [vmem:[#allocation15 + $0x1d8] sm:$0xff] }
 0x30f   :  { %8219 = vst [vmem:[#allocation118_spill] sm:$0xff] %v6379_v15  ;;  %2200 = vmatpush.msra.mxu3 %v6394_v33  ;;  %v6397_v15 = vld [vmem:[#allocation15 + $0x1a0] sm:$0xff] }
 0x310   :  { %8220 = vst [vmem:[#allocation119_spill] sm:$0xff] %v6382_v17  ;;  %2141 = vmatpush.msrb.mxu0 %v6397_v15  ;;  %v6400_v17 = vld [vmem:[#allocation15 + $0x1a8] sm:$0xff] }
 0x311   :  { %8221 = vst [vmem:[#allocation120_spill] sm:$0xff] %v6385_v35  ;;  %2161 = vmatpush.msrb.mxu1 %v6400_v17  ;;  %v6403_v35 = vld [vmem:[#allocation15 + $0x1b0] sm:$0xff] }
 0x312   :  { %8222 = vst [vmem:[#allocation121_spill] sm:$0xff] %v6388_v7  ;;  %2181 = vmatpush.msra.mxu2 %v6403_v35  ;;  %v6406_v7 = vld [vmem:[#allocation15 + $0x1b8] sm:$0xff] }
 0x313   :  { %8223 = vst [vmem:[#allocation122_spill] sm:$0xff] %v6391_v44  ;;  %2201 = vmatpush.msra.mxu3 %v6406_v7  ;;  %v6409_v44 = vld [vmem:[#allocation15 + $0x180] sm:$0xff] }
 0x314   :  { %8224 = vst [vmem:[#allocation123_spill] sm:$0xff] %v6394_v33  ;;  %2142 = vmatpush.msrb.mxu0 %v6409_v44  ;;  %v6412_v33 = vld [vmem:[#allocation15 + $0x188] sm:$0xff] }
 0x315   :  { %8225 = vst [vmem:[#allocation124_spill] sm:$0xff] %v6397_v15  ;;  %2162 = vmatpush.msrb.mxu1 %v6412_v33  ;;  %v6415_v15 = vld [vmem:[#allocation15 + $0x190] sm:$0xff] }
 0x316   :  { %8226 = vst [vmem:[#allocation125_spill] sm:$0xff] %v6400_v17  ;;  %2182 = vmatpush.msra.mxu2 %v6415_v15  ;;  %v6418_v17 = vld [vmem:[#allocation15 + $0x198] sm:$0xff] }
 0x317   :  { %8227 = vst [vmem:[#allocation126_spill] sm:$0xff] %v6403_v35  ;;  %2202 = vmatpush.msra.mxu3 %v6418_v17  ;;  %v6421_v35 = vld [vmem:[#allocation15 + $0x160] sm:$0xff] }
 0x318   :  { %8228 = vst [vmem:[#allocation127_spill] sm:$0xff] %v6406_v7  ;;  %2143 = vmatpush.msrb.mxu0 %v6421_v35  ;;  %v6424_v7 = vld [vmem:[#allocation15 + $0x168] sm:$0xff] }
 0x319   :  { %8229 = vst [vmem:[#allocation128_spill] sm:$0xff] %v6409_v44  ;;  %2163 = vmatpush.msrb.mxu1 %v6424_v7  ;;  %v6427_v44 = vld [vmem:[#allocation15 + $0x170] sm:$0xff] }
 0x31a   :  { %8230 = vst [vmem:[#allocation129_spill] sm:$0xff] %v6412_v33  ;;  %2183 = vmatpush.msra.mxu2 %v6427_v44  ;;  %v6430_v33 = vld [vmem:[#allocation15 + $0x178] sm:$0xff] }
 0x31b   :  { %8231 = vst [vmem:[#allocation130_spill] sm:$0xff] %v6415_v15  ;;  %2203 = vmatpush.msra.mxu3 %v6430_v33  ;;  %v6433_v15 = vld [vmem:[#allocation15 + $0x140] sm:$0xff] }
 0x31c   :  { %8232 = vst [vmem:[#allocation131_spill] sm:$0xff] %v6418_v17  ;;  %2144 = vmatpush.msrb.mxu0 %v6433_v15  ;;  %v6436_v17 = vld [vmem:[#allocation15 + $0x148] sm:$0xff] }
 0x31d   :  { %8233 = vst [vmem:[#allocation132_spill] sm:$0xff] %v6421_v35  ;;  %2164 = vmatpush.msrb.mxu1 %v6436_v17  ;;  %v6439_v35 = vld [vmem:[#allocation15 + $0x150] sm:$0xff] }
 0x31e   :  { %8234 = vst [vmem:[#allocation133_spill] sm:$0xff] %v6424_v7  ;;  %2184 = vmatpush.msra.mxu2 %v6439_v35  ;;  %v6442_v7 = vld [vmem:[#allocation15 + $0x158] sm:$0xff] }
 0x31f   :  { %8235 = vst [vmem:[#allocation134_spill] sm:$0xff] %v6427_v44  ;;  %2204 = vmatpush.msra.mxu3 %v6442_v7  ;;  %v6445_v44 = vld [vmem:[#allocation15 + $0x120] sm:$0xff] }
 0x320   :  { %8236 = vst [vmem:[#allocation135_spill] sm:$0xff] %v6430_v33  ;;  %2145 = vmatpush.msrb.mxu0 %v6445_v44  ;;  %v6448_v33 = vld [vmem:[#allocation15 + $0x128] sm:$0xff] }
 0x321   :  { %8237 = vst [vmem:[#allocation136_spill] sm:$0xff] %v6433_v15  ;;  %2165 = vmatpush.msrb.mxu1 %v6448_v33  ;;  %v6451_v15 = vld [vmem:[#allocation15 + $0x130] sm:$0xff] }
 0x322   :  { %8238 = vst [vmem:[#allocation137_spill] sm:$0xff] %v6436_v17  ;;  %2185 = vmatpush.msra.mxu2 %v6451_v15  ;;  %v6454_v17 = vld [vmem:[#allocation15 + $0x138] sm:$0xff] }
 0x323   :  { %8239 = vst [vmem:[#allocation138_spill] sm:$0xff] %v6439_v35  ;;  %2205 = vmatpush.msra.mxu3 %v6454_v17  ;;  %v6457_v35 = vld [vmem:[#allocation15 + $0x100] sm:$0xff] }
 0x324   :  { %8240 = vst [vmem:[#allocation139_spill] sm:$0xff] %v6442_v7  ;;  %2146 = vmatpush.msrb.mxu0 %v6457_v35  ;;  %v6460_v7 = vld [vmem:[#allocation15 + $0x108] sm:$0xff] }
 0x325   :  { %8241 = vst [vmem:[#allocation140_spill] sm:$0xff] %v6445_v44  ;;  %2166 = vmatpush.msrb.mxu1 %v6460_v7  ;;  %v6463_v44 = vld [vmem:[#allocation15 + $0x110] sm:$0xff] }
 0x326   :  { %8242 = vst [vmem:[#allocation141_spill] sm:$0xff] %v6448_v33  ;;  %2186 = vmatpush.msra.mxu2 %v6463_v44  ;;  %v6466_v33 = vld [vmem:[#allocation15 + $0x118] sm:$0xff] }
 0x327   :  { %8243 = vst [vmem:[#allocation142_spill] sm:$0xff] %v6451_v15  ;;  %2206 = vmatpush.msra.mxu3 %v6466_v33  ;;  %v6469_v15 = vld [vmem:[#allocation15 + $0xe0] sm:$0xff] }
 0x328   :  { %8244 = vst [vmem:[#allocation143_spill] sm:$0xff] %v6454_v17  ;;  %2147 = vmatpush.msrb.mxu0 %v6469_v15  ;;  %v6472_v17 = vld [vmem:[#allocation15 + $0xe8] sm:$0xff]  ;;  %2187 = vmatpush.msra.mxu2 %v6026_v56  ;;  %v6493_v56 = vld [vmem:[#allocation15 + $0x80] sm:$0xff] }
 0x329   :  { %8245 = vst [vmem:[#allocation144_spill] sm:$0xff] %v6457_v35  ;;  %2167 = vmatpush.msrb.mxu1 %v6472_v17  ;;  %2207 = vmatpush.msra.mxu3 %v6029_v48  ;;  %v6496_v48 = vld [vmem:[#allocation15 + $0x88] sm:$0xff]  ;;  %v8272_v35 = vld [vmem:[#allocation58_spill] sm:$0xff] }
 0x32a   :  { %8246 = vst [vmem:[#allocation145_spill] sm:$0xff] %v6460_v7  ;;  %v6477_v7 = vld [vmem:[#allocation15 + $0xc0] sm:$0xff]  ;;  %2188 = vmatpush.msra.mxu2 %v6034_v54 }
 0x32b   :  { %8247 = vst [vmem:[#allocation146_spill] sm:$0xff] %v6463_v44  ;;  %2148 = vmatpush.msrb.mxu0 %v6477_v7  ;;  %v6480_v44 = vld [vmem:[#allocation15 + $0xc8] sm:$0xff]  ;;  %2208 = vmatpush.msra.mxu3 %v6037_v39  ;;  %v6501_v54 = vld [vmem:[#allocation15 + $0x60] sm:$0xff] }
 0x32c   :  { %8248 = vst [vmem:[#allocation147_spill] sm:$0xff] %v6466_v33  ;;  %2168 = vmatpush.msrb.mxu1 %v6480_v44  ;;  %2189 = vmatpush.msra.mxu2 %v6042_v12  ;;  %v6504_v39 = vld [vmem:[#allocation15 + $0x68] sm:$0xff]  ;;  %v6509_v12 = vld [vmem:[#allocation15 + $0x40] sm:$0xff] }
 0x32d   :  { %8249 = vst [vmem:[#allocation148_spill] sm:$0xff] %v6469_v15  ;;  %v6485_v15 = vld [vmem:[#allocation15 + $0xa0] sm:$0xff]  ;;  %2209 = vmatpush.msra.mxu3 %v6045_v49  ;;  %v6512_v49 = vld [vmem:[#allocation15 + $0x48] sm:$0xff] }
 0x32e   :  { %8250 = vst [vmem:[#allocation149_spill] sm:$0xff] %v6472_v17  ;;  %2149 = vmatpush.msrb.mxu0 %v6485_v15  ;;  %v6488_v17 = vld [vmem:[#allocation15 + $0xa8] sm:$0xff]  ;;  %2190 = vmatpush.msra.mxu2 %v6050_v45  ;;  %v6517_v45 = vld [vmem:[#allocation15 + $0x20] sm:$0xff] }
 0x32f   :  { %8251 = vst [vmem:[#allocation150_spill] sm:$0xff] %v6477_v7  ;;  %2169 = vmatpush.msrb.mxu1 %v6488_v17  ;;  %2210 = vmatpush.msra.mxu3 %v6053_v42  ;;  %v6520_v42 = vld [vmem:[#allocation15 + $0x28] sm:$0xff] }
 0x330   :  { %8252 = vst [vmem:[#allocation151_spill] sm:$0xff] %v6480_v44  ;;  %2150 = vmatpush.msrb.mxu0 %v6493_v56  ;;  %2191 = vmatpush.msra.mxu2 %v6058_v47  ;;  %v6525_v47 = vld [vmem:[#allocation15] sm:$0xff] }
 0x331   :  { %8253 = vst [vmem:[#allocation152_spill] sm:$0xff] %v6485_v15  ;;  %2170 = vmatpush.msrb.mxu1 %v6496_v48  ;;  %2211 = vmatpush.msra.mxu3 %v6061_v18  ;;  %v6528_v18 = vld [vmem:[#allocation15 + $0x8] sm:$0xff] }
 0x332   :  { %8254 = vst [vmem:[#allocation153_spill] sm:$0xff] %v6488_v17  ;;  %2151 = vmatpush.msrb.mxu0 %v6501_v54  ;;  %2192 = vmatpush.msra.mxu2 %v6066_v4  ;;  %v8265_v4 = vld [vmem:[#allocation78_spill] sm:$0xff] }
 0x333   :  { %8255 = vst [vmem:[#allocation154_spill] sm:$0xff] %v6493_v56  ;;  %2171 = vmatpush.msrb.mxu1 %v6504_v39  ;;  %2212 = vmatpush.msra.mxu3 %v6069_v50  ;;  %v261_v50 = vadd.f32 %v8265_v4, %v8166_v30  ;;  %v8269_v4 = vld [vmem:[#allocation41_spill] sm:$0xff] }
 0x334   :  { %8256 = vst [vmem:[#allocation155_spill] sm:$0xff] %v6496_v48  ;;  %2152 = vmatpush.msrb.mxu0 %v6509_v12  ;;  %2193 = vmatpush.msra.mxu2 %v6074_v13  ;;  %v543_v30 = vadd.f32 %v8269_v4, %v8174_v29 }
 0x335   :  { %8257 = vst [vmem:[#allocation156_spill] sm:$0xff] %v6501_v54  ;;  %2172 = vmatpush.msrb.mxu1 %v6512_v49  ;;  %2213 = vmatpush.msra.mxu3 %v6077_v60  ;;  %v8267_v54 = vld [vmem:[#allocation31_spill] sm:$0xff] }
 0x336   :  { %8258 = vst [vmem:[#allocation157_spill] sm:$0xff] %v6504_v39  ;;  %2153 = vmatpush.msrb.mxu0 %v6517_v45  ;;  %2194 = vmatpush.msra.mxu2 %v6082_v41 }
 0x337   :  { %8259 = vst [vmem:[#allocation158_spill] sm:$0xff] %v6509_v12  ;;  %2173 = vmatpush.msrb.mxu1 %v6520_v42  ;;  %2214 = vmatpush.msra.mxu3 %v6085_v10  ;;  %v8268_v10 = vld [vmem:[#allocation49_spill] sm:$0xff] }
 0x338   :  { %8260 = vst [vmem:[#allocation159_spill] sm:$0xff] %v6512_v49  ;;  %2154 = vmatpush.msrb.mxu0 %v6525_v47  ;;  %v502_v56 = vadd.f32 %v8268_v10, %v8172_v52 }
 0x339   :  { %8261 = vst [vmem:[#allocation160_spill] sm:$0xff] %v6517_v45  ;;  %2174 = vmatpush.msrb.mxu1 %v6528_v18 }
 0x33a   :  { %8262 = vst [vmem:[#allocation76_spill] sm:$0xff] %v6520_v42  ;;  %v8266_v42 = vld [vmem:[#allocation79_spill] sm:$0xff] }
 0x33b   :  { %8263 = vst [vmem:[#allocation77_spill] sm:$0xff] %v6525_v47  ;;  %v302_v13 = vadd.f32 %v8266_v42, %v8168_v19 }
 0x33c   :  { %8264 = vst [vmem:[#allocation30_spill] sm:$0xff] %v6528_v18  ;;  %v384_v18 = vadd.f32 %v8267_v54, %v8170_v24 }
 0x35c   :  { %v1755_v45 = vpop.f32.mrf.mxu0  ;;  %v1775_v60 = vpop.f32.mrf.mxu1 }
 0x35d   :  { %v1818_v49 = vadd.f32 %v1755_v45, %v261_v50  ;;  %v1819_v12 = vadd.f32 %v1775_v60, %v302_v13  ;;  %v8270_v60 = vld [vmem:[#allocation28_spill] sm:$0xff] }
 0x35f   :  { %v3551_v39 = vmul.f32 -1.442695, %v1818_v49  ;;  %v3552_v47 = vmul.f32 -1.442695, %v1819_v12 }
 0x361   :  { %3708 = vpow2.f32 %v3551_v39 }
 0x362   :  { %3710 = vpow2.f32 %v3552_v47 }
 0x363   :  { %v1815_v41 = vpop.f32.mrf.mxu3  ;;  %v1795_v54 = vpop.f32.mrf.mxu2 }
 0x364   :  { %v1821_v48 = vadd.f32 %v1815_v41, %v384_v18  ;;  %v343_v41 = vadd.f32 %v8270_v60, %v8176_v55 }
 0x366   :  { %v3553_v42 = vmul.f32 -1.442695, %v1821_v48  ;;  %v1820_v4 = vadd.f32 %v1795_v54, %v343_v41 }
 0x367   :  { %v3709_v19 = vpop.eup %3708  ;;  %v1846_v17 = vpop.f32.mrf.mxu0 }
 0x368   :  { %v1866_v45 = vpop.f32.mrf.mxu1  ;;  %v3711_v50 = vpop.eup %3710  ;;  %v1916_v49 = vadd.f32 1.0, %v3709_v19  ;;  %3712 = vpow2.f32 %v3553_v42  ;;  %v1909_v39 = vadd.f32 %v1846_v17, %v502_v56  ;;  %v8271_v19 = vld [vmem:[#allocation62_spill] sm:$0xff] }
 0x369   :  { %v1910_v12 = vadd.f32 %v1866_v45, %v543_v30  ;;  %v1935_v13 = vadd.f32 1.0, %v3711_v50 }
 0x36a   :  { %3714 = vrcp.f32 %v1916_v49  ;;  %v3554_v47 = vmul.f32 -1.442695, %v1909_v39  ;;  %v1928_v52 = vand.u32 2147483648, %v1916_v49  ;;  %vm1922_vm12 = vweird.f32 %v1916_v49 }
 0x36b   :  { %3716 = vrcp.f32 %v1935_v13  ;;  %v3555_v18 = vmul.f32 -1.442695, %v1910_v12  ;;  %v1947_v55 = vand.u32 2147483648, %v1935_v13  ;;  %vm1941_vm11 = vweird.f32 %v1935_v13 }
 0x36c   :  { %3718 = vpow2.f32 %v3554_v47  ;;  %v1926_v47 = vand.u32 2147483647, %v1916_v49 }
 0x36d   :  { %3720 = vpow2.f32 %v3555_v18 }
 0x36e   :  { %v3713_v10 = vpop.eup %3712  ;;  %v1906_v48 = vpop.f32.mrf.mxu3  ;;  %vm1927_vm15 = vcmp.eq.f32.partialorder %v1926_v47, 8.507059e+37 }
 0x36f   :  { %v6545_v29 = vadd.f32 1.0, %v3713_v10  ;;  %v1912_v42 = vadd.f32 %v1906_v48, %v8271_v19  ;;  %v1945_v48 = vand.u32 2147483647, %v1935_v13 }
 0x370   :  { %v3715_v17 = vpop.eup %3714 }
 0x371   :  { %v3717_v30 = vpop.eup %3716  ;;  %v1918_v56 = vmul.f32 %v3715_v17, %v1916_v49  ;;  %3722 = vrcp.f32 %v6545_v29  ;;  %v3556_v39 = vmul.f32 -1.442695, %v1912_v42  ;;  %vm1923_vm9 = vweird.f32 %v3715_v17  ;;  %v1886_v49 = vpop.f32.mrf.mxu2 }
 0x372   :  { %v1937_v45 = vmul.f32 %v3717_v30, %v1935_v13  ;;  %3724 = vtanh.f32 %v1820_v4  ;;  %v3719_v12 = vpop.eup %3718  ;;  %vm1942_vm10 = vweird.f32 %v3717_v30  ;;  %vm1924_vm13 = vmor %vm1922_vm12, %vm1923_vm9  ;;  %v1929_v42 = vor.u32 1.1754944e-38, %v1928_v52 }
 0x373   :  { %v1919_v50 = vsub.f32 1.0, %v1918_v56  ;;  %v3721_v54 = vpop.eup %3720  ;;  %v6549_v18 = vadd.f32 1.0, %v3719_v12  ;;  %3726 = vpow2.f32 %v3556_v39  ;;  %vm1943_vm14 = vmor %vm1941_vm11, %vm1942_vm10  ;;  %v1948_v39 = vor.u32 1.1754944e-38, %v1947_v55 }
 0x374   :  { %v1938_v60 = vsub.f32 1.0, %v1937_v45  ;;  %v6551_v19 = vadd.f32 1.0, %v3721_v54  ;;  %vm1946_vm0 = vcmp.eq.f32.partialorder %v1945_v48, 8.507059e+37  ;;  %v1911_v16 = vadd.f32 %v1886_v49, %v8272_v35 }
 0x375   :  { %v1920_v41 = vmul.f32 %v3715_v17, %v1919_v50  ;;  %3728 = vrcp.f32 %v6549_v18  ;;  %vm1961_vm1 = vweird.f32 %v6545_v29  ;;  %vm1985_vm7 = vweird.f32 %v6549_v18 }
 0x376   :  { %v1939_v10 = vmul.f32 %v3717_v30, %v1938_v60  ;;  %3730 = vrcp.f32 %v6551_v19  ;;  %vm2004_vm6 = vweird.f32 %v6551_v19 }
 0x377   :  { %v6553_v24 = vpop.eup %3722  ;;  %v1921_v4 = vadd.f32 %v3715_v17, %v1920_v41 }
 0x378   :  { %v1940_v56 = vadd.f32 %v3717_v30, %v1939_v10  ;;  %v1957_v45 = vmul.f32 %v6553_v24, %v6545_v29  ;;  %v3725_v50 = vpop.eup %3724  ;;  %vm1962_vm2 = vweird.f32 %v6553_v24 }
 0x379   :  { %v1925_v12 = vsel %vm1924_vm13, %v3715_v17, %v1921_v4  ;;  %v3727_v41 = vpop.eup %3726  ;;  %v1989_v4 = vand.u32 2147483647, %v6549_v18  ;;  %vm6577_vm3 = vmor %vm1961_vm1, %vm1962_vm2 }
 0x37a   :  { %v1930_v60 = vsel %vm1927_vm15, %v1929_v42, %v1925_v12  ;;  %v1944_v54 = vsel %vm1943_vm14, %v3717_v30, %v1940_v56  ;;  %v1958_v13 = vsub.f32 1.0, %v1957_v45  ;;  %v6561_v7 = vadd.f32 1.0, %v3727_v41  ;;  %v8306_v56 = vld [vmem:[#allocation114_spill] sm:$0xff] }
 0x37b   :  { %v1949_v15 = vsel %vm1946_vm0, %v1948_v39, %v1944_v54  ;;  %v1972_v44 = vmul.f32 %v3725_v50, %v1930_v60  ;;  %v3729_v33 = vpop.eup %3728  ;;  %v1991_v42 = vand.u32 2147483648, %v6549_v18  ;;  %v2010_v45 = vand.u32 2147483648, %v6551_v19 }
 0x37c   :  { %v1971_v52 = vmul.f32 %v1949_v15, %v6124_v2  ;;  %v1959_v10 = vmul.f32 %v6553_v24, %v1958_v13  ;;  %v3731_v55 = vpop.eup %3730  ;;  %v1981_v30 = vmul.f32 %v3729_v33, %v6549_v18  ;;  %3732 = vrcp.f32 %v6561_v7 }
 0x37d   :  { %v1967_v15 = vand.u32 2147483648, %v6545_v29  ;;  %v2000_v2 = vmul.f32 %v3731_v55, %v6551_v19  ;;  %vm1986_vm4 = vweird.f32 %v3729_v33  ;;  %v2008_v39 = vand.u32 2147483647, %v6551_v19 }
 0x37e   :  { %v6564_v17 = vadd.f32 %v1972_v44, %v1971_v52  ;;  %v1982_v47 = vsub.f32 1.0, %v1981_v30  ;;  %v1960_v35 = vadd.f32 %v6553_v24, %v1959_v10  ;;  %v1965_v44 = vand.u32 2147483647, %v6545_v29  ;;  %vm1987_vm9 = vmor %vm1985_vm7, %vm1986_vm4 }
 0x37f   :  { %v2001_v48 = vsub.f32 1.0, %v2000_v2  ;;  %v1968_v12 = vor.u32 1.1754944e-38, %v1967_v15  ;;  %vm2005_vm5 = vweird.f32 %v3731_v55  ;;  %vm1990_vm10 = vcmp.eq.f32.partialorder %v1989_v4, 8.507059e+37 }
 0x380   :  { %3734 = vtanh.f32 %v6564_v17  ;;  %v1983_v50 = vmul.f32 %v3729_v33, %v1982_v47  ;;  %v1964_v29 = vsel %vm6577_vm3, %v6553_v24, %v1960_v35  ;;  %vm1966_vm8 = vcmp.eq.f32.partialorder %v1965_v44, 8.507059e+37  ;;  %vm2006_vm11 = vmor %vm2004_vm6, %vm2005_vm5 }
 0x381   :  { %3736 = vtanh.f32 %v1911_v16  ;;  %v2002_v60 = vmul.f32 %v3731_v55, %v2001_v48  ;;  %v1992_v13 = vor.u32 1.1754944e-38, %v1991_v42  ;;  %v2011_v10 = vor.u32 1.1754944e-38, %v2010_v45  ;;  %v8305_v42 = vld [vmem:[#allocation113_spill] sm:$0xff]  ;;  %v8307_v45 = vld [vmem:[#allocation115_spill] sm:$0xff] }
 0x382   :  { %v3733_v54 = vpop.eup %3732  ;;  %v1984_v16 = vadd.f32 %v3729_v33, %v1983_v50  ;;  %vm2009_vm12 = vcmp.eq.f32.partialorder %v2008_v39, 8.507059e+37  ;;  %v1969_v15 = vsel %vm1966_vm8, %v1968_v12, %v1964_v29  ;;  %vm2024_vm14 = vweird.f32 %v6561_v7  ;;  %v8308_v50 = vld [vmem:[#allocation116_spill] sm:$0xff]  ;;  %v8309_v39 = vld [vmem:[#allocation117_spill] sm:$0xff]  ;;  %v8310_v12 = vld [vmem:[#allocation118_spill] sm:$0xff] }
 0x383   :  { %v2003_v49 = vadd.f32 %v3731_v55, %v2002_v60  ;;  %v2020_v41 = vmul.f32 %v3733_v54, %v6561_v7  ;;  %vm2025_vm13 = vweird.f32 %v3733_v54  ;;  %v8311_v60 = vld [vmem:[#allocation119_spill] sm:$0xff]  ;;  %v8312_v29 = vld [vmem:[#allocation120_spill] sm:$0xff] }
 0x384   :  { %v1988_v30 = vsel %vm1987_vm9, %v3729_v33, %v1984_v16  ;;  %vm2026_vm15 = vmor %vm2024_vm14, %vm2025_vm13  ;;  %v8314_v16 = vld [vmem:[#allocation122_spill] sm:$0xff] }
 0x385   :  { %v1993_v2 = vsel %vm1990_vm10, %v1992_v13, %v1988_v30  ;;  %v2007_v47 = vsel %vm2006_vm11, %v3731_v55, %v2003_v49  ;;  %v2021_v19 = vsub.f32 1.0, %v2020_v41  ;;  %v8315_v13 = vld [vmem:[#allocation123_spill] sm:$0xff]  ;;  %v8316_v49 = vld [vmem:[#allocation124_spill] sm:$0xff]  ;;  %v8317_v41 = vld [vmem:[#allocation125_spill] sm:$0xff] }
 0x386   :  { %v3735_v52 = vpop.eup %3734  ;;  %v2012_v18 = vsel %vm2009_vm12, %v2011_v10, %v2007_v47  ;;  %v8319_v10 = vld [vmem:[#allocation127_spill] sm:$0xff]  ;;  %v8320_v30 = vld [vmem:[#allocation128_spill] sm:$0xff] }
 0x387   :  { %v3737_v24 = vpop.eup %3736  ;;  %v6589_v35 = vmul.f32 %v3735_v52, %v1969_v15  ;;  %v2034_v48 = vmul.f32 %v2012_v18, %v6154_v9  ;;  %v2022_v4 = vmul.f32 %v3733_v54, %v2021_v19  ;;  %v2030_v9 = vand.u32 2147483648, %v6561_v7  ;;  %v8318_v52 = vld [vmem:[#allocation126_spill] sm:$0xff]  ;;  %v8321_v15 = vld [vmem:[#allocation129_spill] sm:$0xff]  ;;  %v8324_v47 = vld [vmem:[#allocation132_spill] sm:$0xff] }
 0x388   :  { %v2035_v44 = vmul.f32 %v3737_v24, %v1993_v2  ;;  %v8322_v24 = vld [vmem:[#allocation130_spill] sm:$0xff]  ;;  %v8323_v2 = vld [vmem:[#allocation131_spill] sm:$0xff]  ;;  %v8325_v19 = vld [vmem:[#allocation133_spill] sm:$0xff] }
 0x389   :  { %8275 = vst [vmem:[#allocation54_spill] sm:$0xff] %v6589_v35  ;;  %2065 = vmatmul.f32.vlgmr.msra.gmra.mxu0 %v6589_v35  ;;  %2085 = vmatmul.f32.vlgmr.msra.gmra.mxu1 %v6589_v35  ;;  %v2023_v55 = vadd.f32 %v3733_v54, %v2022_v4  ;;  %v8326_v18 = vld [vmem:[#allocation134_spill] sm:$0xff]  ;;  %v8329_v4 = vld [vmem:[#allocation137_spill] sm:$0xff] }
 0x38a   :  { %2105 = vmatmul.f32.vlgmr.msrb.gmra.mxu2 %v6589_v35  ;;  %2125 = vmatmul.f32.vlgmr.msrb.gmra.mxu3 %v6589_v35  ;;  %v6596_v33 = vadd.f32 %v2035_v44, %v2034_v48  ;;  %v8327_v44 = vld [vmem:[#allocation135_spill] sm:$0xff]  ;;  %v8328_v48 = vld [vmem:[#allocation136_spill] sm:$0xff]  ;;  %v6968_v35 = vld [vmem:[#allocation11 + $0xd8] sm:$0xff] }
 0x38b   :  { %2359 = vmatpush.msra.mxu0 %v6164_v43  ;;  %2379 = vmatpush.msra.mxu1 %v6167_v14  ;;  %v2028_v43 = vand.u32 2147483647, %v6561_v7  ;;  %v2027_v14 = vsel %vm2026_vm15, %v3733_v54, %v2023_v55  ;;  %v8313_v54 = vld [vmem:[#allocation121_spill] sm:$0xff]  ;;  %v8330_v55 = vld [vmem:[#allocation138_spill] sm:$0xff]  ;;  %8381 = vst [vmem:[#allocation41_spill] sm:$0xff] %v6968_v35 }
 0x38c   :  { %2399 = vmatpush.msrb.mxu2 %v6172_v37  ;;  %2419 = vmatpush.msrb.mxu3 %v6175_v26  ;;  %3738 = vtanh.f32 %v6596_v33  ;;  %v2031_v37 = vor.u32 1.1754944e-38, %v2030_v9  ;;  %v8331_v9 = vld [vmem:[#allocation139_spill] sm:$0xff] }
 0x38d   :  { %2360 = vmatpush.msra.mxu0 %v6184_v38  ;;  %2380 = vmatpush.msra.mxu1 %v6187_v34  ;;  %vm2029_vm0 = vcmp.eq.f32.partialorder %v2028_v43, 8.507059e+37  ;;  %v8277_v34 = vld [vmem:[#allocation74_spill] sm:$0xff]  ;;  %v8332_v43 = vld [vmem:[#allocation140_spill] sm:$0xff] }
 0x38e   :  { %2400 = vmatpush.msrb.mxu2 %v6193_v27  ;;  %2420 = vmatpush.msrb.mxu3 %v6196_v36  ;;  %v2032_v26 = vsel %vm2029_vm0, %v2031_v37, %v2027_v14  ;;  %v8278_v27 = vld [vmem:[#allocation73_spill] sm:$0xff]  ;;  %v8279_v36 = vld [vmem:[#allocation75_spill] sm:$0xff]  ;;  %v8334_v37 = vld [vmem:[#allocation142_spill] sm:$0xff] }
 0x38f   :  { %2361 = vmatpush.msra.mxu0 %v6199_v3  ;;  %2381 = vmatpush.msra.mxu1 %v6202_v59  ;;  %v8280_v3 = vld [vmem:[#allocation80_spill] sm:$0xff]  ;;  %v8281_v59 = vld [vmem:[#allocation83_spill] sm:$0xff]  ;;  %v8333_v14 = vld [vmem:[#allocation141_spill] sm:$0xff] }
 0x390   :  { %2401 = vmatpush.msrb.mxu2 %v6205_v53  ;;  %2421 = vmatpush.msrb.mxu3 %v6208_v61  ;;  %v8282_v53 = vld [vmem:[#allocation90_spill] sm:$0xff]  ;;  %v8283_v61 = vld [vmem:[#allocation91_spill] sm:$0xff] }
 0x391   :  { %2362 = vmatpush.msra.mxu0 %v6211_v11  ;;  %2382 = vmatpush.msra.mxu1 %v6214_v20  ;;  %v8284_v11 = vld [vmem:[#allocation92_spill] sm:$0xff]  ;;  %v8285_v20 = vld [vmem:[#allocation93_spill] sm:$0xff] }
 0x392   :  { %2402 = vmatpush.msrb.mxu2 %v6219_v28  ;;  %2422 = vmatpush.msrb.mxu3 %v6222_v51  ;;  %v3739_v7 = vpop.eup %3738  ;;  %v8286_v28 = vld [vmem:[#allocation94_spill] sm:$0xff]  ;;  %v8287_v51 = vld [vmem:[#allocation95_spill] sm:$0xff] }
 0x393   :  { %2363 = vmatpush.msra.mxu0 %v6225_v31  ;;  %2383 = vmatpush.msra.mxu1 %v6228_v32  ;;  %v6620_v38 = vmul.f32 %v3739_v7, %v2032_v26  ;;  %v8288_v31 = vld [vmem:[#allocation96_spill] sm:$0xff]  ;;  %v8289_v32 = vld [vmem:[#allocation97_spill] sm:$0xff]  ;;  %v8335_v7 = vld [vmem:[#allocation143_spill] sm:$0xff] }
 0x394   :  { %2403 = vmatpush.msrb.mxu2 %v6235_v1  ;;  %2423 = vmatpush.msrb.mxu3 %v6238_v23  ;;  %v8290_v1 = vld [vmem:[#allocation98_spill] sm:$0xff]  ;;  %v8291_v23 = vld [vmem:[#allocation99_spill] sm:$0xff]  ;;  %v8336_v26 = vld [vmem:[#allocation144_spill] sm:$0xff] }
 0x395   :  { %8276 = vst [vmem:[#allocation44_spill] sm:$0xff] %v6620_v38  ;;  %2364 = vmatpush.msra.mxu0 %v6241_v63  ;;  %2384 = vmatpush.msra.mxu1 %v6244_v57  ;;  %v8292_v63 = vld [vmem:[#allocation100_spill] sm:$0xff]  ;;  %v8293_v57 = vld [vmem:[#allocation101_spill] sm:$0xff] }
 0x396   :  { %2155 = vmatmul.f32.vlgmr.msrb.gmra.mxu0 %v6620_v38  ;;  %2175 = vmatmul.f32.vlgmr.msrb.gmra.mxu1 %v6620_v38 }
 0x397   :  { %2195 = vmatmul.f32.vlgmr.msra.gmra.mxu2 %v6620_v38  ;;  %2215 = vmatmul.f32.vlgmr.msra.gmra.mxu3 %v6620_v38  ;;  %v6959_v38 = vld [vmem:[#allocation11 + $0xc0] sm:$0xff] }
 0x398   :  { %2404 = vmatpush.msrb.mxu2 %v6247_v21  ;;  %2424 = vmatpush.msrb.mxu3 %v6250_v46  ;;  %v8294_v21 = vld [vmem:[#allocation102_spill] sm:$0xff]  ;;  %v8295_v46 = vld [vmem:[#allocation103_spill] sm:$0xff]  ;;  %8378 = vst [vmem:[#allocation79_spill] sm:$0xff] %v6959_v38 }
 0x399   :  { %2365 = vmatpush.msra.mxu0 %v6253_v62  ;;  %2385 = vmatpush.msra.mxu1 %v6256_v25  ;;  %v8296_v62 = vld [vmem:[#allocation104_spill] sm:$0xff]  ;;  %v8297_v25 = vld [vmem:[#allocation105_spill] sm:$0xff] }
 0x39a   :  { %2405 = vmatpush.msrb.mxu2 %v6259_v0  ;;  %2425 = vmatpush.msrb.mxu3 %v6262_v58  ;;  %v8298_v0 = vld [vmem:[#allocation106_spill] sm:$0xff]  ;;  %v8299_v58 = vld [vmem:[#allocation107_spill] sm:$0xff] }
 0x39b   :  { %2366 = vmatpush.msra.mxu0 %v6265_v40  ;;  %2386 = vmatpush.msra.mxu1 %v6268_v5  ;;  %v8300_v40 = vld [vmem:[#allocation108_spill] sm:$0xff]  ;;  %v8301_v5 = vld [vmem:[#allocation109_spill] sm:$0xff] }
 0x39c   :  { %2406 = vmatpush.msrb.mxu2 %v6271_v8  ;;  %2426 = vmatpush.msrb.mxu3 %v6274_v6  ;;  %v8302_v8 = vld [vmem:[#allocation110_spill] sm:$0xff]  ;;  %v8303_v6 = vld [vmem:[#allocation111_spill] sm:$0xff] }
 0x39d   :  { %2367 = vmatpush.msra.mxu0 %v6277_v22  ;;  %2387 = vmatpush.msra.mxu1 %v8277_v34  ;;  %v8304_v22 = vld [vmem:[#allocation112_spill] sm:$0xff]  ;;  %v8337_v34 = vld [vmem:[#allocation145_spill] sm:$0xff] }
 0x39e   :  { %2407 = vmatpush.msrb.mxu2 %v8278_v27  ;;  %2427 = vmatpush.msrb.mxu3 %v8279_v36  ;;  %v8338_v27 = vld [vmem:[#allocation146_spill] sm:$0xff]  ;;  %v8339_v36 = vld [vmem:[#allocation147_spill] sm:$0xff] }
 0x39f   :  { %2368 = vmatpush.msra.mxu0 %v8280_v3  ;;  %2388 = vmatpush.msra.mxu1 %v8281_v59  ;;  %v8340_v3 = vld [vmem:[#allocation148_spill] sm:$0xff]  ;;  %v8341_v59 = vld [vmem:[#allocation149_spill] sm:$0xff] }
 0x3a0   :  { %2408 = vmatpush.msrb.mxu2 %v8282_v53  ;;  %2428 = vmatpush.msrb.mxu3 %v8283_v61  ;;  %v6706_v53 = vld [vmem:[#allocation15 + $0xf0] sm:$0xff]  ;;  %v6709_v61 = vld [vmem:[#allocation15 + $0xf8] sm:$0xff] }
 0x3a1   :  { %2369 = vmatpush.msra.mxu0 %v8284_v11  ;;  %2389 = vmatpush.msra.mxu1 %v8285_v20  ;;  %v8342_v11 = vld [vmem:[#allocation150_spill] sm:$0xff]  ;;  %v8343_v20 = vld [vmem:[#allocation151_spill] sm:$0xff] }
 0x3a2   :  { %2409 = vmatpush.msrb.mxu2 %v8286_v28  ;;  %2429 = vmatpush.msrb.mxu3 %v8287_v51  ;;  %v6714_v28 = vld [vmem:[#allocation15 + $0xd0] sm:$0xff]  ;;  %v6717_v51 = vld [vmem:[#allocation15 + $0xd8] sm:$0xff] }
 0x3a3   :  { %2370 = vmatpush.msra.mxu0 %v8288_v31  ;;  %2390 = vmatpush.msra.mxu1 %v8289_v32  ;;  %v8344_v31 = vld [vmem:[#allocation152_spill] sm:$0xff]  ;;  %v8345_v32 = vld [vmem:[#allocation153_spill] sm:$0xff] }
 0x3a4   :  { %2410 = vmatpush.msrb.mxu2 %v8290_v1  ;;  %2430 = vmatpush.msrb.mxu3 %v8291_v23  ;;  %v6722_v1 = vld [vmem:[#allocation15 + $0xb0] sm:$0xff]  ;;  %v6725_v23 = vld [vmem:[#allocation15 + $0xb8] sm:$0xff] }
 0x3a5   :  { %2371 = vmatpush.msra.mxu0 %v8292_v63  ;;  %2391 = vmatpush.msra.mxu1 %v8293_v57  ;;  %v8346_v63 = vld [vmem:[#allocation154_spill] sm:$0xff]  ;;  %v8347_v57 = vld [vmem:[#allocation155_spill] sm:$0xff] }
 0x3a6   :  { %2411 = vmatpush.msrb.mxu2 %v8294_v21  ;;  %2431 = vmatpush.msrb.mxu3 %v8295_v46  ;;  %v6730_v21 = vld [vmem:[#allocation15 + $0x90] sm:$0xff]  ;;  %v6733_v46 = vld [vmem:[#allocation15 + $0x98] sm:$0xff] }
 0x3a7   :  { %2372 = vmatpush.msra.mxu0 %v8296_v62  ;;  %2392 = vmatpush.msra.mxu1 %v8297_v25  ;;  %v8348_v62 = vld [vmem:[#allocation156_spill] sm:$0xff]  ;;  %v8349_v25 = vld [vmem:[#allocation157_spill] sm:$0xff] }
 0x3a8   :  { %2412 = vmatpush.msrb.mxu2 %v8298_v0  ;;  %2432 = vmatpush.msrb.mxu3 %v8299_v58  ;;  %v6738_v0 = vld [vmem:[#allocation15 + $0x70] sm:$0xff]  ;;  %v6741_v58 = vld [vmem:[#allocation15 + $0x78] sm:$0xff] }
 0x3a9   :  { %2373 = vmatpush.msra.mxu0 %v8300_v40  ;;  %2393 = vmatpush.msra.mxu1 %v8301_v5  ;;  %v8350_v40 = vld [vmem:[#allocation158_spill] sm:$0xff]  ;;  %v8351_v5 = vld [vmem:[#allocation159_spill] sm:$0xff] }
 0x3aa   :  { %2413 = vmatpush.msrb.mxu2 %v8302_v8  ;;  %2433 = vmatpush.msrb.mxu3 %v8303_v6  ;;  %v6746_v8 = vld [vmem:[#allocation15 + $0x50] sm:$0xff]  ;;  %v6749_v6 = vld [vmem:[#allocation15 + $0x58] sm:$0xff] }
 0x3ab   :  { %2374 = vmatpush.msra.mxu0 %v8304_v22  ;;  %2394 = vmatpush.msra.mxu1 %v8305_v42  ;;  %v8352_v22 = vld [vmem:[#allocation160_spill] sm:$0xff] }
 0x3ac   :  { %2414 = vmatpush.msrb.mxu2 %v8306_v56  ;;  %2434 = vmatpush.msrb.mxu3 %v8307_v45  ;;  %v8353_v42 = vld [vmem:[#allocation76_spill] sm:$0xff]  ;;  %v6754_v56 = vld [vmem:[#allocation15 + $0x30] sm:$0xff]  ;;  %v6757_v45 = vld [vmem:[#allocation15 + $0x38] sm:$0xff] }
 0x3ad   :  { %2449 = vmatpush.msrb.mxu0 %v8308_v50  ;;  %2469 = vmatpush.msrb.mxu1 %v8309_v39  ;;  %v8354_v50 = vld [vmem:[#allocation77_spill] sm:$0xff]  ;;  %v8355_v39 = vld [vmem:[#allocation30_spill] sm:$0xff] }
 0x3ae   :  { %2489 = vmatpush.msra.mxu2 %v8310_v12  ;;  %2509 = vmatpush.msra.mxu3 %v8311_v60  ;;  %v6762_v12 = vld [vmem:[#allocation15 + $0x10] sm:$0xff]  ;;  %v6765_v60 = vld [vmem:[#allocation15 + $0x18] sm:$0xff] }
 0x3af   :  { %2450 = vmatpush.msrb.mxu0 %v8312_v29  ;;  %2470 = vmatpush.msrb.mxu1 %v8313_v54  ;;  %v8356_v29 = vld [vmem:[#allocation52_spill] sm:$0xff]  ;;  %v8357_v54 = vld [vmem:[#allocation81_spill] sm:$0xff] }
 0x3b0   :  { %2490 = vmatpush.msra.mxu2 %v8314_v16  ;;  %2510 = vmatpush.msra.mxu3 %v8315_v13  ;;  %v264_v16 = vadd.f32 %v8357_v54, %v8356_v29  ;;  %v8358_v13 = vld [vmem:[#allocation55_spill] sm:$0xff] }
 0x3b1   :  { %2451 = vmatpush.msrb.mxu0 %v8316_v49  ;;  %2471 = vmatpush.msrb.mxu1 %v8317_v41  ;;  %v8359_v49 = vld [vmem:[#allocation82_spill] sm:$0xff] }
 0x3b2   :  { %2491 = vmatpush.msra.mxu2 %v8318_v52  ;;  %2511 = vmatpush.msra.mxu3 %v8319_v10  ;;  %v305_v41 = vadd.f32 %v8359_v49, %v8358_v13 }
 0x3b3   :  { %2452 = vmatpush.msrb.mxu0 %v8320_v30  ;;  %2472 = vmatpush.msrb.mxu1 %v8321_v15 }
 0x3b4   :  { %2492 = vmatpush.msra.mxu2 %v8322_v24  ;;  %2512 = vmatpush.msra.mxu3 %v8323_v2 }
 0x3b5   :  { %2453 = vmatpush.msrb.mxu0 %v8324_v47  ;;  %2473 = vmatpush.msrb.mxu1 %v8325_v19  ;;  %v8360_v47 = vld [vmem:[#allocation63_spill] sm:$0xff]  ;;  %v8361_v19 = vld [vmem:[#allocation32_spill] sm:$0xff] }
 0x3b6   :  { %2493 = vmatpush.msra.mxu2 %v8326_v18  ;;  %2513 = vmatpush.msra.mxu3 %v8327_v44  ;;  %v387_v18 = vadd.f32 %v8361_v19, %v8360_v47 }
 0x3b7   :  { %2454 = vmatpush.msrb.mxu0 %v8328_v48  ;;  %2474 = vmatpush.msrb.mxu1 %v8329_v4 }
 0x3b8   :  { %2494 = vmatpush.msra.mxu2 %v8330_v55  ;;  %2514 = vmatpush.msra.mxu3 %v8331_v9 }
 0x3b9   :  { %2455 = vmatpush.msrb.mxu0 %v8332_v43  ;;  %2475 = vmatpush.msrb.mxu1 %v8333_v14 }
 0x3ba   :  { %2495 = vmatpush.msra.mxu2 %v8334_v37  ;;  %2515 = vmatpush.msra.mxu3 %v8335_v7 }
 0x3bb   :  { %2456 = vmatpush.msrb.mxu0 %v8336_v26  ;;  %2476 = vmatpush.msrb.mxu1 %v8337_v34  ;;  %v8362_v26 = vld [vmem:[#allocation56_spill] sm:$0xff] }
 0x3bc   :  { %2496 = vmatpush.msra.mxu2 %v8338_v27  ;;  %2516 = vmatpush.msra.mxu3 %v8339_v36  ;;  %v8363_v34 = vld [vmem:[#allocation36_spill] sm:$0xff]  ;;  %v8364_v36 = vld [vmem:[#allocation59_spill] sm:$0xff] }
 0x3bd   :  { %2457 = vmatpush.msrb.mxu0 %v8340_v3  ;;  %2477 = vmatpush.msrb.mxu1 %v8341_v59  ;;  %v499_v27 = vadd.f32 %v8363_v34, %v8362_v26  ;;  %v8365_v3 = vld [vmem:[#allocation46_spill] sm:$0xff] }
 0x3be   :  { %2497 = vmatpush.msra.mxu2 %v6706_v53  ;;  %2517 = vmatpush.msra.mxu3 %v6709_v61  ;;  %v540_v59 = vadd.f32 %v8365_v3, %v8364_v36 }
 0x3bf   :  { %2458 = vmatpush.msrb.mxu0 %v8342_v11  ;;  %2478 = vmatpush.msrb.mxu1 %v8343_v20 }
 0x3c0   :  { %2498 = vmatpush.msra.mxu2 %v6714_v28  ;;  %2518 = vmatpush.msra.mxu3 %v6717_v51 }
 0x3c1   :  { %2459 = vmatpush.msrb.mxu0 %v8344_v31  ;;  %2479 = vmatpush.msrb.mxu1 %v8345_v32 }
 0x3c2   :  { %2499 = vmatpush.msra.mxu2 %v6722_v1  ;;  %2519 = vmatpush.msra.mxu3 %v6725_v23 }
 0x3c3   :  { %2460 = vmatpush.msrb.mxu0 %v8346_v63  ;;  %2480 = vmatpush.msrb.mxu1 %v8347_v57  ;;  %v8366_v63 = vld [vmem:[#allocation66_spill] sm:$0xff]  ;;  %v8367_v57 = vld [vmem:[#allocation33_spill] sm:$0xff] }
 0x3c4   :  { %2500 = vmatpush.msra.mxu2 %v6730_v21  ;;  %2520 = vmatpush.msra.mxu3 %v6733_v46 }
 0x3c5   :  { %2461 = vmatpush.msrb.mxu0 %v8348_v62  ;;  %2481 = vmatpush.msrb.mxu1 %v8349_v25  ;;  %v346_v62 = vadd.f32 %v8367_v57, %v8366_v63 }
 0x3c6   :  { %2501 = vmatpush.msra.mxu2 %v6738_v0  ;;  %2521 = vmatpush.msra.mxu3 %v6741_v58 }
 0x3c7   :  { %2462 = vmatpush.msrb.mxu0 %v8350_v40  ;;  %2482 = vmatpush.msrb.mxu1 %v8351_v5 }
 0x3c8   :  { %2502 = vmatpush.msra.mxu2 %v6746_v8  ;;  %2522 = vmatpush.msra.mxu3 %v6749_v6 }
 0x3c9   :  { %2463 = vmatpush.msrb.mxu0 %v8352_v22  ;;  %2483 = vmatpush.msrb.mxu1 %v8353_v42 }
 0x3ca   :  { %2503 = vmatpush.msra.mxu2 %v6754_v56  ;;  %2523 = vmatpush.msra.mxu3 %v6757_v45 }
 0x3cb   :  { %2464 = vmatpush.msrb.mxu0 %v8354_v50  ;;  %2484 = vmatpush.msrb.mxu1 %v8355_v39 }
 0x3cc   :  { %2504 = vmatpush.msra.mxu2 %v6762_v12  ;;  %2524 = vmatpush.msra.mxu3 %v6765_v60 }
 0x406   :  { %v2066_v52 = vpop.f32.mrf.mxu0  ;;  %v2086_v10 = vpop.f32.mrf.mxu1 }
 0x407   :  { %v2129_v30 = vadd.f32 %v2066_v52, %v264_v16  ;;  %v2130_v15 = vadd.f32 %v2086_v10, %v305_v41  ;;  %v8368_v41 = vld [vmem:[#allocation65_spill] sm:$0xff] }
 0x409   :  { %v3557_v24 = vmul.f32 -1.442695, %v2129_v30  ;;  %v3558_v2 = vmul.f32 -1.442695, %v2130_v15 }
 0x40b   :  { %3740 = vpow2.f32 %v3557_v24 }
 0x40c   :  { %3742 = vpow2.f32 %v3558_v2 }
 0x40d   :  { %v2126_v44 = vpop.f32.mrf.mxu3  ;;  %v2106_v31 = vpop.f32.mrf.mxu2 }
 0x40e   :  { %v2132_v48 = vadd.f32 %v2126_v44, %v387_v18  ;;  %v2131_v42 = vadd.f32 %v2106_v31, %v346_v62 }
 0x410   :  { %v3559_v4 = vmul.f32 -1.442695, %v2132_v48 }
 0x411   :  { %v3741_v55 = vpop.eup %3740 }
 0x412   :  { %v3743_v9 = vpop.eup %3742  ;;  %v2226_v43 = vadd.f32 1.0, %v3741_v55  ;;  %3744 = vpow2.f32 %v3559_v4 }
 0x413   :  { %v2245_v14 = vadd.f32 1.0, %v3743_v9  ;;  %v2156_v37 = vpop.f32.mrf.mxu0  ;;  %v2176_v7 = vpop.f32.mrf.mxu1 }
 0x414   :  { %3746 = vrcp.f32 %v2226_v43  ;;  %v2219_v11 = vadd.f32 %v2156_v37, %v499_v27  ;;  %v2220_v20 = vadd.f32 %v2176_v7, %v540_v59  ;;  %v2236_v30 = vand.u32 2147483647, %v2226_v43 }
 0x415   :  { %3748 = vrcp.f32 %v2245_v14  ;;  %v2238_v15 = vand.u32 2147483648, %v2226_v43  ;;  %v2257_v24 = vand.u32 2147483648, %v2245_v14  ;;  %vm2232_vm3 = vweird.f32 %v2226_v43 }
 0x416   :  { %v3560_v25 = vmul.f32 -1.442695, %v2219_v11  ;;  %v3561_v40 = vmul.f32 -1.442695, %v2220_v20  ;;  %v2255_v48 = vand.u32 2147483647, %v2245_v14  ;;  %vm2251_vm4 = vweird.f32 %v2245_v14 }
 0x417   :  { %vm2237_vm6 = vcmp.eq.f32.partialorder %v2236_v30, 8.507059e+37  ;;  %v2239_v7 = vor.u32 1.1754944e-38, %v2238_v15  ;;  %v2258_v3 = vor.u32 1.1754944e-38, %v2257_v24  ;;  %v6851_v30 = vld [vmem:[#allocation11 + $0x1d8] sm:$0xff] }
 0x418   :  { %v3745_v32 = vpop.eup %3744  ;;  %3750 = vpow2.f32 %v3560_v25  ;;  %vm2256_vm8 = vcmp.eq.f32.partialorder %v2255_v48, 8.507059e+37 }
 0x419   :  { %v6780_v5 = vadd.f32 1.0, %v3745_v32 }
 0x41a   :  { %v3747_v22 = vpop.eup %3746  ;;  %v2216_v50 = vpop.f32.mrf.mxu3 }
 0x41b   :  { %v3749_v39 = vpop.eup %3748  ;;  %v2228_v54 = vmul.f32 %v3747_v22, %v2226_v43  ;;  %3752 = vrcp.f32 %v6780_v5  ;;  %v2222_v52 = vadd.f32 %v2216_v50, %v8368_v41  ;;  %vm2233_vm1 = vweird.f32 %v3747_v22 }
 0x41c   :  { %v2247_v16 = vmul.f32 %v3749_v39, %v2245_v14  ;;  %3754 = vpow2.f32 %v3561_v40  ;;  %vm2252_vm2 = vweird.f32 %v3749_v39  ;;  %vm2234_vm5 = vmor %vm2232_vm3, %vm2233_vm1  ;;  %v2196_v40 = vpop.f32.mrf.mxu2  ;;  %vm2271_vm10 = vweird.f32 %v6780_v5 }
 0x41d   :  { %v2229_v49 = vsub.f32 1.0, %v2228_v54  ;;  %3756 = vtanh.f32 %v2131_v42  ;;  %v3562_v19 = vmul.f32 -1.442695, %v2222_v52  ;;  %vm2253_vm7 = vmor %vm2251_vm4, %vm2252_vm2 }
 0x41e   :  { %v2248_v10 = vsub.f32 1.0, %v2247_v16  ;;  %v3751_v18 = vpop.eup %3750  ;;  %v2277_v16 = vand.u32 2147483648, %v6780_v5 }
 0x41f   :  { %v2230_v2 = vmul.f32 %v3747_v22, %v2229_v49  ;;  %v6784_v9 = vadd.f32 1.0, %v3751_v18  ;;  %3758 = vpow2.f32 %v3562_v19 }
 0x420   :  { %v2249_v44 = vmul.f32 %v3749_v39, %v2248_v10 }
 0x421   :  { %v3753_v4 = vpop.eup %3752  ;;  %v2231_v55 = vadd.f32 %v3747_v22, %v2230_v2  ;;  %3760 = vrcp.f32 %v6784_v9  ;;  %v2278_v2 = vor.u32 1.1754944e-38, %v2277_v16  ;;  %v2301_v19 = vand.u32 2147483648, %v6784_v9 }
 0x422   :  { %v3755_v37 = vpop.eup %3754  ;;  %v2250_v34 = vadd.f32 %v3749_v39, %v2249_v44  ;;  %v2267_v27 = vmul.f32 %v3753_v4, %v6780_v5  ;;  %vm2272_vm9 = vweird.f32 %v3753_v4  ;;  %vm2295_vm13 = vweird.f32 %v6784_v9 }
 0x423   :  { %v2235_v59 = vsel %vm2234_vm5, %v3747_v22, %v2231_v55  ;;  %v6788_v43 = vadd.f32 1.0, %v3755_v37  ;;  %v3757_v11 = vpop.eup %3756  ;;  %vm6803_vm11 = vmor %vm2271_vm10, %vm2272_vm9  ;;  %v2299_v55 = vand.u32 2147483647, %v6784_v9 }
 0x424   :  { %v2240_v14 = vsel %vm2237_vm6, %v2239_v7, %v2235_v59  ;;  %v2254_v20 = vsel %vm2253_vm7, %v3749_v39, %v2250_v34  ;;  %v2268_v31 = vsub.f32 1.0, %v2267_v27  ;;  %v8369_v39 = vld [vmem:[#allocation64_spill] sm:$0xff] }
 0x425   :  { %v2259_v32 = vsel %vm2256_vm8, %v2258_v3, %v2254_v20  ;;  %v2282_v57 = vmul.f32 %v3757_v11, %v2240_v14  ;;  %3762 = vrcp.f32 %v6788_v43  ;;  %v3759_v42 = vpop.eup %3758  ;;  %v2221_v49 = vadd.f32 %v2196_v40, %v8369_v39 }
 0x426   :  { %v2281_v62 = vmul.f32 %v2259_v32, %v6564_v17  ;;  %v2269_v25 = vmul.f32 %v3753_v4, %v2268_v31  ;;  %v6794_v22 = vadd.f32 1.0, %v3759_v42  ;;  %v2275_v17 = vand.u32 2147483647, %v6780_v5  ;;  %v6826_v42 = vld [vmem:[#allocation11 + $0x1e0] sm:$0xff] }
 0x427   :  { %v3761_v54 = vpop.eup %3760  ;;  %v2320_v5 = vand.u32 2147483648, %v6788_v43  ;;  %v2318_v37 = vand.u32 2147483647, %v6788_v43  ;;  %vm2314_vm0 = vweird.f32 %v6788_v43  ;;  %vm2300_vm2 = vcmp.eq.f32.partialorder %v2299_v55, 8.507059e+37  ;;  %v6872_v55 = vld [vmem:[#allocation11 + $0x180] sm:$0xff] }
 0x428   :  { %v6792_v50 = vadd.f32 %v2282_v57, %v2281_v62  ;;  %v2270_v41 = vadd.f32 %v3753_v4, %v2269_v25  ;;  %v2291_v52 = vmul.f32 %v3761_v54, %v6784_v9  ;;  %vm2296_vm12 = vweird.f32 %v3761_v54 }
 0x429   :  { %vm2276_vm14 = vcmp.eq.f32.partialorder %v2275_v17, 8.507059e+37  ;;  %vm2297_vm1 = vmor %vm2295_vm13, %vm2296_vm12  ;;  %v2321_v32 = vor.u32 1.1754944e-38, %v2320_v5  ;;  %vm2319_vm4 = vcmp.eq.f32.partialorder %v2318_v37, 8.507059e+37  ;;  %vm2334_vm6 = vweird.f32 %v6794_v22  ;;  %v6875_v5 = vld [vmem:[#allocation11 + $0x188] sm:$0xff]  ;;  %v6944_v37 = vld [vmem:[#allocation11 + $0x118] sm:$0xff] }
 0x42a   :  { %3764 = vtanh.f32 %v6792_v50  ;;  %v2292_v15 = vsub.f32 1.0, %v2291_v52  ;;  %v2274_v18 = vsel %vm6803_vm11, %v3753_v4, %v2270_v41  ;;  %v2302_v4 = vor.u32 1.1754944e-38, %v2301_v19  ;;  %v6837_v41 = vld [vmem:[#allocation11 + $0x1f8] sm:$0xff]  ;;  %v6840_v52 = vld [vmem:[#allocation11 + $0x1c0] sm:$0xff] }
 0x42b   :  { %v3763_v10 = vpop.eup %3762  ;;  %3766 = vrcp.f32 %v6794_v22  ;;  %v2279_v3 = vsel %vm2276_vm14, %v2278_v2, %v2274_v18  ;;  %v6859_v2 = vld [vmem:[#allocation11 + $0x1a8] sm:$0xff]  ;;  %v2340_v19 = vand.u32 2147483648, %v6794_v22  ;;  %v6864_v18 = vld [vmem:[#allocation11 + $0x1b0] sm:$0xff] }
 0x42c   :  { %v2310_v24 = vmul.f32 %v3763_v10, %v6788_v43  ;;  %3768 = vtanh.f32 %v2221_v49  ;;  %v2293_v48 = vmul.f32 %v3761_v54, %v2292_v15  ;;  %vm2315_vm15 = vweird.f32 %v3763_v10  ;;  %v6834_v49 = vld [vmem:[#allocation11 + $0x1f0] sm:$0xff] }
 0x42d   :  { %vm2316_vm3 = vmor %vm2314_vm0, %vm2315_vm15 }
 0x42e   :  { %v2311_v44 = vsub.f32 1.0, %v2310_v24  ;;  %v2294_v27 = vadd.f32 %v3761_v54, %v2293_v48  ;;  %v6856_v24 = vld [vmem:[#allocation11 + $0x1a0] sm:$0xff]  ;;  %v2338_v48 = vand.u32 2147483647, %v6794_v22 }
 0x430   :  { %v3765_v7 = vpop.eup %3764  ;;  %v2312_v34 = vmul.f32 %v3763_v10, %v2311_v44  ;;  %v2298_v14 = vsel %vm2297_vm1, %v3761_v54, %v2294_v27  ;;  %v6829_v54 = vld [vmem:[#allocation11 + $0x1e8] sm:$0xff]  ;;  %v6867_v44 = vld [vmem:[#allocation11 + $0x1b8] sm:$0xff]  ;;  %v6893_v27 = vld [vmem:[#allocation11 + $0x160] sm:$0xff]  ;;  %vm2339_vm8 = vcmp.eq.f32.partialorder %v2338_v48, 8.507059e+37 }
 0x431   :  { %v6815_v59 = vpop.eup %3766  ;;  %v6818_v11 = vmul.f32 %v3765_v7, %v2279_v3  ;;  %v2303_v57 = vsel %vm2300_vm2, %v2302_v4, %v2298_v14  ;;  %v6884_v7 = vld [vmem:[#allocation11 + $0x190] sm:$0xff]  ;;  %v6896_v3 = vld [vmem:[#allocation11 + $0x168] sm:$0xff]  ;;  %v2341_v4 = vor.u32 1.1754944e-38, %v2340_v19 }
 0x432   :  { %v2313_v20 = vadd.f32 %v3763_v10, %v2312_v34  ;;  %v2330_v9 = vmul.f32 %v6815_v59, %v6794_v22  ;;  %v3769_v31 = vpop.eup %3768  ;;  %vm2335_vm5 = vweird.f32 %v6815_v59  ;;  %v6887_v34 = vld [vmem:[#allocation11 + $0x198] sm:$0xff]  ;;  %v6899_v14 = vld [vmem:[#allocation11 + $0x170] sm:$0xff]  ;;  %v6938_v19 = vld [vmem:[#allocation11 + $0x108] sm:$0xff] }
 0x433   :  { %8372 = vst [vmem:[#allocation27_spill] sm:$0xff] %v6818_v11  ;;  %2375 = vmatmul.f32.vlgmr.msra.gmra.mxu0 %v6818_v11  ;;  %2395 = vmatmul.f32.vlgmr.msra.gmra.mxu1 %v6818_v11  ;;  %v2345_v43 = vmul.f32 %v3769_v31, %v2303_v57  ;;  %vm6880_vm7 = vmor %vm2334_vm6, %vm2335_vm5  ;;  %v6911_v57 = vld [vmem:[#allocation11 + $0x150] sm:$0xff] }
 0x434   :  { %v2317_v62 = vsel %vm2316_vm3, %v3763_v10, %v2313_v20  ;;  %v2331_v25 = vsub.f32 1.0, %v2330_v9  ;;  %2415 = vmatmul.f32.vlgmr.msrb.gmra.mxu2 %v6818_v11  ;;  %2435 = vmatmul.f32.vlgmr.msrb.gmra.mxu3 %v6818_v11  ;;  %v6843_v10 = vld [vmem:[#allocation11 + $0x1c8] sm:$0xff]  ;;  %v6902_v20 = vld [vmem:[#allocation11 + $0x178] sm:$0xff]  ;;  %v6905_v9 = vld [vmem:[#allocation11 + $0x140] sm:$0xff] }
 0x435   :  { %v2322_v40 = vsel %vm2319_vm4, %v2321_v32, %v2317_v62  ;;  %2669 = vmatpush.msra.mxu0 %v6826_v42  ;;  %2689 = vmatpush.msra.mxu1 %v6829_v54  ;;  %v6914_v62 = vld [vmem:[#allocation11 + $0x158] sm:$0xff]  ;;  %v6941_v48 = vld [vmem:[#allocation11 + $0x110] sm:$0xff] }
 0x436   :  { %v2344_v16 = vmul.f32 %v2322_v40, %v6596_v33  ;;  %v2332_v39 = vmul.f32 %v6815_v59, %v2331_v25  ;;  %2709 = vmatpush.msrb.mxu2 %v6834_v49  ;;  %2729 = vmatpush.msrb.mxu3 %v6837_v41  ;;  %v6848_v33 = vld [vmem:[#allocation11 + $0x1d0] sm:$0xff]  ;;  %v6919_v25 = vld [vmem:[#allocation11 + $0x120] sm:$0xff]  ;;  %v6922_v40 = vld [vmem:[#allocation11 + $0x128] sm:$0xff] }
 0x437   :  { %2670 = vmatpush.msra.mxu0 %v6840_v52  ;;  %2690 = vmatpush.msra.mxu1 %v6843_v10  ;;  %v6965_v11 = vld [vmem:[#allocation11 + $0xd0] sm:$0xff] }
 0x438   :  { %v6846_v17 = vadd.f32 %v2345_v43, %v2344_v16  ;;  %2710 = vmatpush.msrb.mxu2 %v6848_v33  ;;  %2730 = vmatpush.msrb.mxu3 %v6851_v30  ;;  %v2333_v15 = vadd.f32 %v6815_v59, %v2332_v39  ;;  %v6925_v16 = vld [vmem:[#allocation11 + $0x130] sm:$0xff]  ;;  %v6928_v39 = vld [vmem:[#allocation11 + $0x138] sm:$0xff]  ;;  %8380 = vst [vmem:[#allocation49_spill] sm:$0xff] %v6965_v11 }
 0x439   :  { %2671 = vmatpush.msra.mxu0 %v6856_v24  ;;  %2691 = vmatpush.msra.mxu1 %v6859_v2 }
 0x43a   :  { %3770 = vtanh.f32 %v6846_v17  ;;  %2711 = vmatpush.msrb.mxu2 %v6864_v18  ;;  %2731 = vmatpush.msrb.mxu3 %v6867_v44  ;;  %v2337_v22 = vsel %vm6880_vm7, %v6815_v59, %v2333_v15  ;;  %v6908_v59 = vld [vmem:[#allocation11 + $0x148] sm:$0xff]  ;;  %v6935_v15 = vld [vmem:[#allocation11 + $0x100] sm:$0xff] }
 0x43b   :  { %2672 = vmatpush.msra.mxu0 %v6872_v55  ;;  %2692 = vmatpush.msra.mxu1 %v6875_v5  ;;  %v2342_v32 = vsel %vm2339_vm8, %v2341_v4, %v2337_v22  ;;  %v6947_v22 = vld [vmem:[#allocation11 + $0xe0] sm:$0xff]  ;;  %v6950_v4 = vld [vmem:[#allocation11 + $0xe8] sm:$0xff] }
 0x43c   :  { %2712 = vmatpush.msrb.mxu2 %v6884_v7  ;;  %2732 = vmatpush.msrb.mxu3 %v6887_v34 }
 0x43d   :  { %2673 = vmatpush.msra.mxu0 %v6893_v27  ;;  %2693 = vmatpush.msra.mxu1 %v6896_v3 }
 0x43e   :  { %2713 = vmatpush.msrb.mxu2 %v6899_v14  ;;  %2733 = vmatpush.msrb.mxu3 %v6902_v20 }
 0x43f   :  { %2674 = vmatpush.msra.mxu0 %v6905_v9  ;;  %2694 = vmatpush.msra.mxu1 %v6908_v59 }
 0x440   :  { %v3771_v31 = vpop.eup %3770  ;;  %2714 = vmatpush.msrb.mxu2 %v6911_v57  ;;  %2734 = vmatpush.msrb.mxu3 %v6914_v62 }
 0x441   :  { %v6917_v43 = vmul.f32 %v3771_v31, %v2342_v32  ;;  %2675 = vmatpush.msra.mxu0 %v6919_v25  ;;  %2695 = vmatpush.msra.mxu1 %v6922_v40  ;;  %v6953_v31 = vld [vmem:[#allocation11 + $0xf0] sm:$0xff]  ;;  %v6956_v32 = vld [vmem:[#allocation11 + $0xf8] sm:$0xff] }
 0x442   :  { %2715 = vmatpush.msrb.mxu2 %v6925_v16  ;;  %2735 = vmatpush.msrb.mxu3 %v6928_v39  ;;  %8376 = vst [vmem:[#allocation70_spill] sm:$0xff] %v6953_v31 }
 0x443   :  { %8375 = vst [vmem:[#allocation71_spill] sm:$0xff] %v6917_v43  ;;  %2465 = vmatmul.f32.vlgmr.msrb.gmra.mxu0 %v6917_v43  ;;  %2485 = vmatmul.f32.vlgmr.msrb.gmra.mxu1 %v6917_v43 }
 0x444   :  { %2505 = vmatmul.f32.vlgmr.msra.gmra.mxu2 %v6917_v43  ;;  %2525 = vmatmul.f32.vlgmr.msra.gmra.mxu3 %v6917_v43  ;;  %8377 = vst [vmem:[#allocation78_spill] sm:$0xff] %v6956_v32  ;;  %v6962_v43 = vld [vmem:[#allocation11 + $0xc8] sm:$0xff] }
 0x445   :  { %2676 = vmatpush.msra.mxu0 %v6935_v15  ;;  %2696 = vmatpush.msra.mxu1 %v6938_v19  ;;  %8379 = vst [vmem:[#allocation31_spill] sm:$0xff] %v6962_v43 }
 0x446   :  { %2716 = vmatpush.msrb.mxu2 %v6941_v48  ;;  %2736 = vmatpush.msrb.mxu3 %v6944_v37 }
 0x447   :  { %2677 = vmatpush.msra.mxu0 %v6947_v22  ;;  %2697 = vmatpush.msra.mxu1 %v6950_v4 }
 0x448   :  { %2717 = vmatpush.msrb.mxu2 %v6953_v31  ;;  %2737 = vmatpush.msrb.mxu3 %v6956_v32  ;;  %v6971_v31 = vld [vmem:[#allocation11 + $0xa0] sm:$0xff]  ;;  %v6974_v32 = vld [vmem:[#allocation11 + $0xa8] sm:$0xff] }
 0x449   :  { %2678 = vmatpush.msra.mxu0 %v6959_v38  ;;  %2698 = vmatpush.msra.mxu1 %v6962_v43  ;;  %8382 = vst [vmem:[#allocation28_spill] sm:$0xff] %v6971_v31  ;;  %v6977_v38 = vld [vmem:[#allocation11 + $0xb0] sm:$0xff]  ;;  %v6980_v43 = vld [vmem:[#allocation11 + $0xb8] sm:$0xff] }
 0x44a   :  { %2718 = vmatpush.msrb.mxu2 %v6965_v11  ;;  %2738 = vmatpush.msrb.mxu3 %v6968_v35  ;;  %8383 = vst [vmem:[#allocation62_spill] sm:$0xff] %v6974_v32  ;;  %v6983_v11 = vld [vmem:[#allocation11 + $0x80] sm:$0xff]  ;;  %v6986_v35 = vld [vmem:[#allocation11 + $0x88] sm:$0xff] }
 0x44b   :  { %2679 = vmatpush.msra.mxu0 %v6971_v31  ;;  %2699 = vmatpush.msra.mxu1 %v6974_v32  ;;  %8384 = vst [vmem:[#allocation58_spill] sm:$0xff] %v6977_v38  ;;  %v6989_v31 = vld [vmem:[#allocation11 + $0x90] sm:$0xff]  ;;  %v6992_v32 = vld [vmem:[#allocation11 + $0x98] sm:$0xff] }
 0x44c   :  { %2719 = vmatpush.msrb.mxu2 %v6977_v38  ;;  %8385 = vst [vmem:[#allocation74_spill] sm:$0xff] %v6980_v43  ;;  %2739 = vmatpush.msrb.mxu3 %v6980_v43  ;;  %v6995_v38 = vld [vmem:[#allocation11 + $0x60] sm:$0xff]  ;;  %v6998_v43 = vld [vmem:[#allocation11 + $0x68] sm:$0xff] }
 0x44d   :  { %8386 = vst [vmem:[#allocation73_spill] sm:$0xff] %v6983_v11  ;;  %2680 = vmatpush.msra.mxu0 %v6983_v11  ;;  %2700 = vmatpush.msra.mxu1 %v6986_v35  ;;  %v7001_v11 = vld [vmem:[#allocation11 + $0x70] sm:$0xff] }
 0x44e   :  { %8387 = vst [vmem:[#allocation75_spill] sm:$0xff] %v6986_v35  ;;  %2720 = vmatpush.msrb.mxu2 %v6989_v31  ;;  %2740 = vmatpush.msrb.mxu3 %v6992_v32  ;;  %v7004_v35 = vld [vmem:[#allocation11 + $0x78] sm:$0xff] }
 0x44f   :  { %8388 = vst [vmem:[#allocation80_spill] sm:$0xff] %v6989_v31  ;;  %2681 = vmatpush.msra.mxu0 %v6995_v38  ;;  %2701 = vmatpush.msra.mxu1 %v6998_v43  ;;  %v7007_v31 = vld [vmem:[#allocation11 + $0x40] sm:$0xff] }
 0x450   :  { %8389 = vst [vmem:[#allocation83_spill] sm:$0xff] %v6992_v32  ;;  %2721 = vmatpush.msrb.mxu2 %v7001_v11  ;;  %2741 = vmatpush.msrb.mxu3 %v7004_v35  ;;  %v7010_v32 = vld [vmem:[#allocation11 + $0x48] sm:$0xff] }
 0x451   :  { %8390 = vst [vmem:[#allocation90_spill] sm:$0xff] %v6995_v38  ;;  %2682 = vmatpush.msra.mxu0 %v7007_v31  ;;  %2702 = vmatpush.msra.mxu1 %v7010_v32  ;;  %v7013_v38 = vld [vmem:[#allocation11 + $0x50] sm:$0xff] }
 0x452   :  { %8391 = vst [vmem:[#allocation91_spill] sm:$0xff] %v6998_v43  ;;  %2722 = vmatpush.msrb.mxu2 %v7013_v38  ;;  %v7016_v43 = vld [vmem:[#allocation11 + $0x58] sm:$0xff] }
 0x453   :  { %8392 = vst [vmem:[#allocation92_spill] sm:$0xff] %v7001_v11  ;;  %2742 = vmatpush.msrb.mxu3 %v7016_v43  ;;  %v7019_v11 = vld [vmem:[#allocation11 + $0x20] sm:$0xff] }
 0x454   :  { %8393 = vst [vmem:[#allocation93_spill] sm:$0xff] %v7004_v35  ;;  %2683 = vmatpush.msra.mxu0 %v7019_v11  ;;  %v7022_v35 = vld [vmem:[#allocation11 + $0x28] sm:$0xff] }
 0x455   :  { %8394 = vst [vmem:[#allocation94_spill] sm:$0xff] %v7007_v31  ;;  %2703 = vmatpush.msra.mxu1 %v7022_v35  ;;  %v7025_v31 = vld [vmem:[#allocation11 + $0x30] sm:$0xff] }
 0x456   :  { %8395 = vst [vmem:[#allocation95_spill] sm:$0xff] %v7010_v32  ;;  %2723 = vmatpush.msrb.mxu2 %v7025_v31  ;;  %v7028_v32 = vld [vmem:[#allocation11 + $0x38] sm:$0xff] }
 0x457   :  { %8396 = vst [vmem:[#allocation96_spill] sm:$0xff] %v7013_v38  ;;  %2743 = vmatpush.msrb.mxu3 %v7028_v32  ;;  %v7031_v38 = vld [vmem:[#allocation11] sm:$0xff] }
 0x458   :  { %8397 = vst [vmem:[#allocation97_spill] sm:$0xff] %v7016_v43  ;;  %2684 = vmatpush.msra.mxu0 %v7031_v38  ;;  %v7034_v43 = vld [vmem:[#allocation11 + $0x8] sm:$0xff] }
 0x459   :  { %8398 = vst [vmem:[#allocation98_spill] sm:$0xff] %v7019_v11  ;;  %2704 = vmatpush.msra.mxu1 %v7034_v43  ;;  %v7037_v11 = vld [vmem:[#allocation11 + $0x10] sm:$0xff] }
 0x45a   :  { %8399 = vst [vmem:[#allocation99_spill] sm:$0xff] %v7022_v35  ;;  %2724 = vmatpush.msrb.mxu2 %v7037_v11  ;;  %v7040_v35 = vld [vmem:[#allocation11 + $0x18] sm:$0xff] }
 0x45b   :  { %8400 = vst [vmem:[#allocation100_spill] sm:$0xff] %v7025_v31  ;;  %2744 = vmatpush.msrb.mxu3 %v7040_v35  ;;  %v7043_v31 = vld [vmem:[#allocation15 + $0x1e0] sm:$0xff] }
 0x45c   :  { %8401 = vst [vmem:[#allocation101_spill] sm:$0xff] %v7028_v32  ;;  %2759 = vmatpush.msrb.mxu0 %v7043_v31  ;;  %v7046_v32 = vld [vmem:[#allocation15 + $0x1e8] sm:$0xff] }
 0x45d   :  { %8402 = vst [vmem:[#allocation102_spill] sm:$0xff] %v7031_v38  ;;  %2779 = vmatpush.msrb.mxu1 %v7046_v32  ;;  %v7049_v38 = vld [vmem:[#allocation15 + $0x1f0] sm:$0xff] }
 0x45e   :  { %8403 = vst [vmem:[#allocation103_spill] sm:$0xff] %v7034_v43  ;;  %2799 = vmatpush.msra.mxu2 %v7049_v38  ;;  %v7052_v43 = vld [vmem:[#allocation15 + $0x1f8] sm:$0xff] }
 0x45f   :  { %8404 = vst [vmem:[#allocation104_spill] sm:$0xff] %v7037_v11  ;;  %2819 = vmatpush.msra.mxu3 %v7052_v43  ;;  %v7055_v11 = vld [vmem:[#allocation15 + $0x1c0] sm:$0xff] }
 0x460   :  { %8405 = vst [vmem:[#allocation105_spill] sm:$0xff] %v7040_v35  ;;  %2760 = vmatpush.msrb.mxu0 %v7055_v11  ;;  %v7058_v35 = vld [vmem:[#allocation15 + $0x1c8] sm:$0xff] }
 0x461   :  { %8406 = vst [vmem:[#allocation106_spill] sm:$0xff] %v7043_v31  ;;  %2780 = vmatpush.msrb.mxu1 %v7058_v35  ;;  %v7061_v31 = vld [vmem:[#allocation15 + $0x1d0] sm:$0xff] }
 0x462   :  { %8407 = vst [vmem:[#allocation107_spill] sm:$0xff] %v7046_v32  ;;  %2800 = vmatpush.msra.mxu2 %v7061_v31  ;;  %v7064_v32 = vld [vmem:[#allocation15 + $0x1d8] sm:$0xff] }
 0x463   :  { %8408 = vst [vmem:[#allocation108_spill] sm:$0xff] %v7049_v38  ;;  %2820 = vmatpush.msra.mxu3 %v7064_v32  ;;  %v7067_v38 = vld [vmem:[#allocation15 + $0x1a0] sm:$0xff] }
 0x464   :  { %8409 = vst [vmem:[#allocation109_spill] sm:$0xff] %v7052_v43  ;;  %2761 = vmatpush.msrb.mxu0 %v7067_v38  ;;  %v7070_v43 = vld [vmem:[#allocation15 + $0x1a8] sm:$0xff] }
 0x465   :  { %8410 = vst [vmem:[#allocation110_spill] sm:$0xff] %v7055_v11  ;;  %2781 = vmatpush.msrb.mxu1 %v7070_v43  ;;  %v7073_v11 = vld [vmem:[#allocation15 + $0x1b0] sm:$0xff] }
 0x466   :  { %8411 = vst [vmem:[#allocation111_spill] sm:$0xff] %v7058_v35  ;;  %2801 = vmatpush.msra.mxu2 %v7073_v11  ;;  %v7076_v35 = vld [vmem:[#allocation15 + $0x1b8] sm:$0xff] }
 0x467   :  { %8412 = vst [vmem:[#allocation112_spill] sm:$0xff] %v7061_v31  ;;  %2821 = vmatpush.msra.mxu3 %v7076_v35  ;;  %v7079_v31 = vld [vmem:[#allocation15 + $0x180] sm:$0xff] }
 0x468   :  { %8413 = vst [vmem:[#allocation113_spill] sm:$0xff] %v7064_v32  ;;  %2762 = vmatpush.msrb.mxu0 %v7079_v31  ;;  %v7082_v32 = vld [vmem:[#allocation15 + $0x188] sm:$0xff] }
 0x469   :  { %8414 = vst [vmem:[#allocation114_spill] sm:$0xff] %v7067_v38  ;;  %2782 = vmatpush.msrb.mxu1 %v7082_v32  ;;  %v7085_v38 = vld [vmem:[#allocation15 + $0x190] sm:$0xff] }
 0x46a   :  { %8415 = vst [vmem:[#allocation115_spill] sm:$0xff] %v7070_v43  ;;  %2802 = vmatpush.msra.mxu2 %v7085_v38  ;;  %v7088_v43 = vld [vmem:[#allocation15 + $0x198] sm:$0xff] }
 0x46b   :  { %8416 = vst [vmem:[#allocation116_spill] sm:$0xff] %v7073_v11  ;;  %2822 = vmatpush.msra.mxu3 %v7088_v43  ;;  %v7091_v11 = vld [vmem:[#allocation15 + $0x160] sm:$0xff] }
 0x46c   :  { %8417 = vst [vmem:[#allocation117_spill] sm:$0xff] %v7076_v35  ;;  %2763 = vmatpush.msrb.mxu0 %v7091_v11  ;;  %v7094_v35 = vld [vmem:[#allocation15 + $0x168] sm:$0xff] }
 0x46d   :  { %8418 = vst [vmem:[#allocation118_spill] sm:$0xff] %v7079_v31  ;;  %2783 = vmatpush.msrb.mxu1 %v7094_v35  ;;  %v7097_v31 = vld [vmem:[#allocation15 + $0x170] sm:$0xff] }
 0x46e   :  { %8419 = vst [vmem:[#allocation119_spill] sm:$0xff] %v7082_v32  ;;  %2803 = vmatpush.msra.mxu2 %v7097_v31  ;;  %v7100_v32 = vld [vmem:[#allocation15 + $0x178] sm:$0xff] }
 0x46f   :  { %8420 = vst [vmem:[#allocation120_spill] sm:$0xff] %v7085_v38  ;;  %2823 = vmatpush.msra.mxu3 %v7100_v32  ;;  %v7103_v38 = vld [vmem:[#allocation15 + $0x140] sm:$0xff] }
 0x470   :  { %8421 = vst [vmem:[#allocation121_spill] sm:$0xff] %v7088_v43  ;;  %2764 = vmatpush.msrb.mxu0 %v7103_v38  ;;  %v7106_v43 = vld [vmem:[#allocation15 + $0x148] sm:$0xff] }
 0x471   :  { %8422 = vst [vmem:[#allocation122_spill] sm:$0xff] %v7091_v11  ;;  %2784 = vmatpush.msrb.mxu1 %v7106_v43  ;;  %v7109_v11 = vld [vmem:[#allocation15 + $0x150] sm:$0xff] }
 0x472   :  { %8423 = vst [vmem:[#allocation123_spill] sm:$0xff] %v7094_v35  ;;  %2804 = vmatpush.msra.mxu2 %v7109_v11  ;;  %v7112_v35 = vld [vmem:[#allocation15 + $0x158] sm:$0xff] }
 0x473   :  { %8424 = vst [vmem:[#allocation124_spill] sm:$0xff] %v7097_v31  ;;  %2824 = vmatpush.msra.mxu3 %v7112_v35  ;;  %v7115_v31 = vld [vmem:[#allocation15 + $0x120] sm:$0xff] }
 0x474   :  { %8425 = vst [vmem:[#allocation125_spill] sm:$0xff] %v7100_v32  ;;  %2765 = vmatpush.msrb.mxu0 %v7115_v31  ;;  %v7118_v32 = vld [vmem:[#allocation15 + $0x128] sm:$0xff] }
 0x475   :  { %8426 = vst [vmem:[#allocation126_spill] sm:$0xff] %v7103_v38  ;;  %2785 = vmatpush.msrb.mxu1 %v7118_v32  ;;  %v7121_v38 = vld [vmem:[#allocation15 + $0x130] sm:$0xff] }
 0x476   :  { %8427 = vst [vmem:[#allocation127_spill] sm:$0xff] %v7106_v43  ;;  %2805 = vmatpush.msra.mxu2 %v7121_v38  ;;  %v7124_v43 = vld [vmem:[#allocation15 + $0x138] sm:$0xff] }
 0x477   :  { %8428 = vst [vmem:[#allocation128_spill] sm:$0xff] %v7109_v11  ;;  %2825 = vmatpush.msra.mxu3 %v7124_v43  ;;  %v7127_v11 = vld [vmem:[#allocation15 + $0x100] sm:$0xff] }
 0x478   :  { %8429 = vst [vmem:[#allocation129_spill] sm:$0xff] %v7112_v35  ;;  %2766 = vmatpush.msrb.mxu0 %v7127_v11  ;;  %v7130_v35 = vld [vmem:[#allocation15 + $0x108] sm:$0xff] }
 0x479   :  { %8430 = vst [vmem:[#allocation130_spill] sm:$0xff] %v7115_v31  ;;  %2786 = vmatpush.msrb.mxu1 %v7130_v35  ;;  %v7133_v31 = vld [vmem:[#allocation15 + $0x110] sm:$0xff] }
 0x47a   :  { %8431 = vst [vmem:[#allocation131_spill] sm:$0xff] %v7118_v32  ;;  %2806 = vmatpush.msra.mxu2 %v7133_v31  ;;  %v7136_v32 = vld [vmem:[#allocation15 + $0x118] sm:$0xff] }
 0x47b   :  { %8432 = vst [vmem:[#allocation132_spill] sm:$0xff] %v7121_v38  ;;  %2826 = vmatpush.msra.mxu3 %v7136_v32  ;;  %v7139_v38 = vld [vmem:[#allocation15 + $0xe0] sm:$0xff] }
 0x47c   :  { %8433 = vst [vmem:[#allocation133_spill] sm:$0xff] %v7124_v43  ;;  %2767 = vmatpush.msrb.mxu0 %v7139_v38  ;;  %v7142_v43 = vld [vmem:[#allocation15 + $0xe8] sm:$0xff]  ;;  %2807 = vmatpush.msra.mxu2 %v6706_v53  ;;  %v7163_v53 = vld [vmem:[#allocation15 + $0x80] sm:$0xff] }
 0x47d   :  { %8434 = vst [vmem:[#allocation134_spill] sm:$0xff] %v7127_v11  ;;  %2787 = vmatpush.msrb.mxu1 %v7142_v43  ;;  %2827 = vmatpush.msra.mxu3 %v6709_v61  ;;  %v7147_v11 = vld [vmem:[#allocation15 + $0xc0] sm:$0xff]  ;;  %v7166_v61 = vld [vmem:[#allocation15 + $0x88] sm:$0xff] }
 0x47e   :  { %8435 = vst [vmem:[#allocation135_spill] sm:$0xff] %v7133_v31  ;;  %2768 = vmatpush.msrb.mxu0 %v7147_v11  ;;  %v7150_v31 = vld [vmem:[#allocation15 + $0xc8] sm:$0xff]  ;;  %2808 = vmatpush.msra.mxu2 %v6714_v28  ;;  %v7171_v28 = vld [vmem:[#allocation15 + $0x60] sm:$0xff] }
 0x47f   :  { %8436 = vst [vmem:[#allocation136_spill] sm:$0xff] %v7136_v32  ;;  %2788 = vmatpush.msrb.mxu1 %v7150_v31  ;;  %2828 = vmatpush.msra.mxu3 %v6717_v51  ;;  %v7158_v32 = vld [vmem:[#allocation15 + $0xa8] sm:$0xff] }
 0x480   :  { %8437 = vst [vmem:[#allocation137_spill] sm:$0xff] %v7139_v38  ;;  %v7155_v38 = vld [vmem:[#allocation15 + $0xa0] sm:$0xff]  ;;  %2809 = vmatpush.msra.mxu2 %v6722_v1  ;;  %v7174_v51 = vld [vmem:[#allocation15 + $0x68] sm:$0xff] }
 0x481   :  { %8438 = vst [vmem:[#allocation138_spill] sm:$0xff] %v7142_v43  ;;  %2769 = vmatpush.msrb.mxu0 %v7155_v38  ;;  %2789 = vmatpush.msrb.mxu1 %v7158_v32  ;;  %v7179_v1 = vld [vmem:[#allocation15 + $0x40] sm:$0xff] }
 0x482   :  { %8439 = vst [vmem:[#allocation139_spill] sm:$0xff] %v7147_v11  ;;  %2829 = vmatpush.msra.mxu3 %v6725_v23  ;;  %2810 = vmatpush.msra.mxu2 %v6730_v21  ;;  %v7182_v23 = vld [vmem:[#allocation15 + $0x48] sm:$0xff]  ;;  %v7187_v21 = vld [vmem:[#allocation15 + $0x20] sm:$0xff] }
 0x483   :  { %8440 = vst [vmem:[#allocation140_spill] sm:$0xff] %v7150_v31  ;;  %2770 = vmatpush.msrb.mxu0 %v7163_v53  ;;  %2790 = vmatpush.msrb.mxu1 %v7166_v61 }
 0x484   :  { %8441 = vst [vmem:[#allocation141_spill] sm:$0xff] %v7155_v38  ;;  %2830 = vmatpush.msra.mxu3 %v6733_v46  ;;  %2811 = vmatpush.msra.mxu2 %v6738_v0  ;;  %v7190_v46 = vld [vmem:[#allocation15 + $0x28] sm:$0xff]  ;;  %v7195_v0 = vld [vmem:[#allocation15] sm:$0xff] }
 0x485   :  { %8442 = vst [vmem:[#allocation142_spill] sm:$0xff] %v7158_v32  ;;  %2771 = vmatpush.msrb.mxu0 %v7171_v28  ;;  %2791 = vmatpush.msrb.mxu1 %v7174_v51 }
 0x486   :  { %8443 = vst [vmem:[#allocation143_spill] sm:$0xff] %v7163_v53  ;;  %2831 = vmatpush.msra.mxu3 %v6741_v58  ;;  %2812 = vmatpush.msra.mxu2 %v6746_v8  ;;  %v7198_v58 = vld [vmem:[#allocation15 + $0x8] sm:$0xff]  ;;  %v8455_v53 = vld [vmem:[#allocation37_spill] sm:$0xff] }
 0x487   :  { %8444 = vst [vmem:[#allocation144_spill] sm:$0xff] %v7166_v61  ;;  %2772 = vmatpush.msrb.mxu0 %v7179_v1  ;;  %2792 = vmatpush.msrb.mxu1 %v7182_v23  ;;  %v8453_v8 = vld [vmem:[#allocation84_spill] sm:$0xff] }
 0x488   :  { %8445 = vst [vmem:[#allocation145_spill] sm:$0xff] %v7171_v28  ;;  %2832 = vmatpush.msra.mxu3 %v6749_v6  ;;  %2813 = vmatpush.msra.mxu2 %v6754_v56  ;;  %v267_v6 = vadd.f32 %v8453_v8, %v8356_v29 }
 0x489   :  { %8446 = vst [vmem:[#allocation146_spill] sm:$0xff] %v7174_v51  ;;  %2773 = vmatpush.msrb.mxu0 %v7187_v21  ;;  %2793 = vmatpush.msrb.mxu1 %v7190_v46 }
 0x48a   :  { %8447 = vst [vmem:[#allocation147_spill] sm:$0xff] %v7179_v1  ;;  %2833 = vmatpush.msra.mxu3 %v6757_v45  ;;  %2814 = vmatpush.msra.mxu2 %v6762_v12 }
 0x48b   :  { %8448 = vst [vmem:[#allocation148_spill] sm:$0xff] %v7182_v23  ;;  %2774 = vmatpush.msrb.mxu0 %v7195_v0  ;;  %2794 = vmatpush.msrb.mxu1 %v7198_v58 }
 0x48c   :  { %8449 = vst [vmem:[#allocation149_spill] sm:$0xff] %v7187_v21  ;;  %2834 = vmatpush.msra.mxu3 %v6765_v60  ;;  %v8454_v21 = vld [vmem:[#allocation85_spill] sm:$0xff] }
 0x48d   :  { %8450 = vst [vmem:[#allocation150_spill] sm:$0xff] %v7190_v46  ;;  %v308_v56 = vadd.f32 %v8454_v21, %v8358_v13  ;;  %v8456_v21 = vld [vmem:[#allocation42_spill] sm:$0xff] }
 0x48e   :  { %8451 = vst [vmem:[#allocation151_spill] sm:$0xff] %v7195_v0 }
 0x48f   :  { %8452 = vst [vmem:[#allocation152_spill] sm:$0xff] %v7198_v58  ;;  %v390_v58 = vadd.f32 %v8455_v53, %v8360_v47 }
 0x4b0   :  { %v2376_v1 = vpop.f32.mrf.mxu0  ;;  %v2396_v45 = vpop.f32.mrf.mxu1 }
 0x4b1   :  { %v2439_v46 = vadd.f32 %v2376_v1, %v267_v6  ;;  %v2440_v28 = vadd.f32 %v2396_v45, %v308_v56  ;;  %v496_v1 = vadd.f32 %v8456_v21, %v8362_v26 }
 0x4b3   :  { %v3563_v23 = vmul.f32 -1.442695, %v2439_v46  ;;  %v3564_v0 = vmul.f32 -1.442695, %v2440_v28  ;;  %v8457_v46 = vld [vmem:[#allocation29_spill] sm:$0xff] }
 0x4b4   :  { %v537_v28 = vadd.f32 %v8457_v46, %v8364_v36 }
 0x4b5   :  { %3772 = vpow2.f32 %v3563_v23 }
 0x4b6   :  { %3774 = vpow2.f32 %v3564_v0 }
 0x4b7   :  { %v2436_v12 = vpop.f32.mrf.mxu3  ;;  %v2416_v53 = vpop.f32.mrf.mxu2 }
 0x4b8   :  { %v2442_v51 = vadd.f32 %v2436_v12, %v390_v58 }
 0x4ba   :  { %v3565_v60 = vmul.f32 -1.442695, %v2442_v51  ;;  %v8458_v51 = vld [vmem:[#allocation45_spill] sm:$0xff] }
 0x4bb   :  { %v3773_v38 = vpop.eup %3772  ;;  %v349_v45 = vadd.f32 %v8458_v51, %v8366_v63 }
 0x4bc   :  { %v3775_v61 = vpop.eup %3774  ;;  %v2536_v8 = vadd.f32 1.0, %v3773_v38  ;;  %3776 = vpow2.f32 %v3565_v60 }
 0x4bd   :  { %v2555_v29 = vadd.f32 1.0, %v3775_v61  ;;  %v2441_v47 = vadd.f32 %v2416_v53, %v349_v45 }
 0x4be   :  { %3778 = vrcp.f32 %v2536_v8  ;;  %v2546_v13 = vand.u32 2147483647, %v2536_v8  ;;  %vm2542_vm12 = vweird.f32 %v2536_v8 }
 0x4bf   :  { %3780 = vrcp.f32 %v2555_v29  ;;  %v2567_v51 = vand.u32 2147483648, %v2555_v29  ;;  %vm2561_vm11 = vweird.f32 %v2555_v29 }
 0x4c0   :  { %v2466_v23 = vpop.f32.mrf.mxu0  ;;  %v2486_v6 = vpop.f32.mrf.mxu1  ;;  %vm2547_vm13 = vcmp.eq.f32.partialorder %v2546_v13, 8.507059e+37 }
 0x4c1   :  { %v2529_v0 = vadd.f32 %v2466_v23, %v496_v1  ;;  %v2530_v56 = vadd.f32 %v2486_v6, %v537_v28  ;;  %v2548_v23 = vand.u32 2147483648, %v2536_v8  ;;  %v8459_v6 = vld [vmem:[#allocation61_spill] sm:$0xff] }
 0x4c2   :  { %v3777_v58 = vpop.eup %3776 }
 0x4c3   :  { %v7215_v38 = vadd.f32 1.0, %v3777_v58  ;;  %v3566_v61 = vmul.f32 -1.442695, %v2529_v0  ;;  %v3567_v12 = vmul.f32 -1.442695, %v2530_v56 }
 0x4c4   :  { %v3779_v60 = vpop.eup %3778  ;;  %v2565_v56 = vand.u32 2147483647, %v2555_v29 }
 0x4c5   :  { %v3781_v21 = vpop.eup %3780  ;;  %v2538_v26 = vmul.f32 %v3779_v60, %v2536_v8  ;;  %3782 = vrcp.f32 %v7215_v38  ;;  %vm2543_vm9 = vweird.f32 %v3779_v60  ;;  %vm2581_vm2 = vweird.f32 %v7215_v38 }
 0x4c6   :  { %v2557_v46 = vmul.f32 %v3781_v21, %v2555_v29  ;;  %3784 = vpow2.f32 %v3566_v61  ;;  %vm2562_vm10 = vweird.f32 %v3781_v21  ;;  %vm2544_vm14 = vmor %vm2542_vm12, %vm2543_vm9  ;;  %v2549_v61 = vor.u32 1.1754944e-38, %v2548_v23 }
 0x4c7   :  { %v2539_v36 = vsub.f32 1.0, %v2538_v26  ;;  %3786 = vpow2.f32 %v3567_v12  ;;  %v2526_v1 = vpop.f32.mrf.mxu3  ;;  %vm2563_vm15 = vmor %vm2561_vm11, %vm2562_vm10  ;;  %vm2566_vm0 = vcmp.eq.f32.partialorder %v2565_v56, 8.507059e+37  ;;  %v2506_v43 = vpop.f32.mrf.mxu2 }
 0x4c8   :  { %v2558_v28 = vsub.f32 1.0, %v2557_v46  ;;  %3788 = vtanh.f32 %v2441_v47  ;;  %v2532_v58 = vadd.f32 %v2526_v1, %v8459_v6 }
 0x4c9   :  { %v2540_v0 = vmul.f32 %v3779_v60, %v2539_v36  ;;  %v2568_v36 = vor.u32 1.1754944e-38, %v2567_v51 }
 0x4ca   :  { %v2559_v53 = vmul.f32 %v3781_v21, %v2558_v28  ;;  %v3568_v45 = vmul.f32 -1.442695, %v2532_v58 }
 0x4cb   :  { %v3783_v63 = vpop.eup %3782  ;;  %v2541_v11 = vadd.f32 %v3779_v60, %v2540_v0 }
 0x4cc   :  { %v3785_v26 = vpop.eup %3784  ;;  %v2560_v12 = vadd.f32 %v3781_v21, %v2559_v53  ;;  %v2577_v47 = vmul.f32 %v3783_v63, %v7215_v38  ;;  %3790 = vpow2.f32 %v3568_v45  ;;  %vm2582_vm1 = vweird.f32 %v3783_v63 }
 0x4cd   :  { %v3787_v46 = vpop.eup %3786  ;;  %v2545_v1 = vsel %vm2544_vm14, %v3779_v60, %v2541_v11  ;;  %v2599_v28 = vadd.f32 1.0, %v3785_v26  ;;  %v2587_v60 = vand.u32 2147483648, %v7215_v38  ;;  %vm7230_vm3 = vmor %vm2581_vm2, %vm2582_vm1 }
 0x4ce   :  { %v3789_v6 = vpop.eup %3788  ;;  %v2550_v58 = vsel %vm2547_vm13, %v2549_v61, %v2545_v1  ;;  %v2564_v32 = vsel %vm2563_vm15, %v3781_v21, %v2560_v12  ;;  %v2578_v29 = vsub.f32 1.0, %v2577_v47  ;;  %v2618_v0 = vadd.f32 1.0, %v3787_v46 }
 0x4cf   :  { %v2569_v8 = vsel %vm2566_vm0, %v2568_v36, %v2564_v32  ;;  %v2592_v13 = vmul.f32 %v3789_v6, %v2550_v58  ;;  %3792 = vrcp.f32 %v2599_v28  ;;  %v2585_v32 = vand.u32 2147483647, %v7215_v38 }
 0x4d0   :  { %v2591_v23 = vmul.f32 %v2569_v8, %v6792_v50  ;;  %v2579_v53 = vmul.f32 %v3783_v63, %v2578_v29  ;;  %3794 = vrcp.f32 %v2618_v0  ;;  %v8460_v50 = vld [vmem:[#allocation60_spill] sm:$0xff]  ;;  %v2588_v46 = vor.u32 1.1754944e-38, %v2587_v60 }
 0x4d1   :  { %v2531_v56 = vadd.f32 %v2506_v43, %v8460_v50  ;;  %vm2586_vm4 = vcmp.eq.f32.partialorder %v2585_v32, 8.507059e+37  ;;  %v2630_v6 = vand.u32 2147483648, %v2618_v0  ;;  %v2611_v38 = vand.u32 2147483648, %v2599_v28 }
 0x4d2   :  { %v3791_v31 = vpop.eup %3790  ;;  %v7221_v45 = vadd.f32 %v2592_v13, %v2591_v23  ;;  %v2580_v11 = vadd.f32 %v3783_v63, %v2579_v53  ;;  %v2609_v29 = vand.u32 2147483647, %v2599_v28  ;;  %v2628_v23 = vand.u32 2147483647, %v2618_v0 }
 0x4d3   :  { %v7225_v21 = vadd.f32 1.0, %v3791_v31  ;;  %vm2605_vm7 = vweird.f32 %v2599_v28  ;;  %vm2624_vm8 = vweird.f32 %v2618_v0 }
 0x4d4   :  { %3796 = vtanh.f32 %v7221_v45  ;;  %v2584_v31 = vsel %vm7230_vm3, %v3783_v63, %v2580_v11  ;;  %v2612_v11 = vor.u32 1.1754944e-38, %v2611_v38  ;;  %vm2610_vm11 = vcmp.eq.f32.partialorder %v2609_v29, 8.507059e+37  ;;  %v8493_v38 = vld [vmem:[#allocation111_spill] sm:$0xff]  ;;  %v8496_v29 = vld [vmem:[#allocation108_spill] sm:$0xff] }
 0x4d5   :  { %v3793_v51 = vpop.eup %3792  ;;  %3798 = vrcp.f32 %v7225_v21  ;;  %v2589_v8 = vsel %vm2586_vm4, %v2588_v46, %v2584_v31  ;;  %vm2629_vm12 = vcmp.eq.f32.partialorder %v2628_v23, 8.507059e+37  ;;  %vm2644_vm14 = vweird.f32 %v7225_v21  ;;  %v8499_v23 = vld [vmem:[#allocation110_spill] sm:$0xff] }
 0x4d6   :  { %v3795_v26 = vpop.eup %3794  ;;  %v2601_v12 = vmul.f32 %v3793_v51, %v2599_v28  ;;  %3800 = vtanh.f32 %v2531_v56  ;;  %vm2606_vm5 = vweird.f32 %v3793_v51  ;;  %v2631_v56 = vor.u32 1.1754944e-38, %v2630_v6  ;;  %v8492_v6 = vld [vmem:[#allocation104_spill] sm:$0xff] }
 0x4d7   :  { %v2620_v47 = vmul.f32 %v3795_v26, %v2618_v0  ;;  %vm2625_vm6 = vweird.f32 %v3795_v26  ;;  %vm2607_vm9 = vmor %vm2605_vm7, %vm2606_vm5 }
 0x4d8   :  { %v2602_v36 = vsub.f32 1.0, %v2601_v12  ;;  %vm2626_vm10 = vmor %vm2624_vm8, %vm2625_vm6 }
 0x4d9   :  { %v2621_v1 = vsub.f32 1.0, %v2620_v47 }
 0x4da   :  { %v3797_v43 = vpop.eup %3796  ;;  %v2603_v58 = vmul.f32 %v3793_v51, %v2602_v36 }
 0x4db   :  { %v2622_v13 = vmul.f32 %v3795_v26, %v2621_v1  ;;  %v7237_v53 = vmul.f32 %v3797_v43, %v2589_v8  ;;  %v7239_v50 = vpop.eup %3798  ;;  %v8491_v1 = vld [vmem:[#allocation102_spill] sm:$0xff]  ;;  %v8494_v43 = vld [vmem:[#allocation105_spill] sm:$0xff]  ;;  %v8497_v8 = vld [vmem:[#allocation115_spill] sm:$0xff] }
 0x4dc   :  { %v2604_v63 = vadd.f32 %v3793_v51, %v2603_v58  ;;  %v2640_v32 = vmul.f32 %v7239_v50, %v7225_v21  ;;  %v3801_v28 = vpop.eup %3800  ;;  %vm2645_vm13 = vweird.f32 %v7239_v50  ;;  %v8495_v58 = vld [vmem:[#allocation106_spill] sm:$0xff] }
 0x4dd   :  { %v2623_v60 = vadd.f32 %v3795_v26, %v2622_v13  ;;  %2685 = vmatmul.f32.vlgmr.msra.gmra.mxu0 %v7237_v53  ;;  %2705 = vmatmul.f32.vlgmr.msra.gmra.mxu1 %v7237_v53  ;;  %vm2646_vm15 = vmor %vm2644_vm14, %vm2645_vm13  ;;  %v8498_v13 = vld [vmem:[#allocation109_spill] sm:$0xff] }
 0x4de   :  { %v2608_v61 = vsel %vm2607_vm9, %v3793_v51, %v2604_v63  ;;  %2725 = vmatmul.f32.vlgmr.msrb.gmra.mxu2 %v7237_v53  ;;  %2745 = vmatmul.f32.vlgmr.msrb.gmra.mxu3 %v7237_v53  ;;  %v2641_v47 = vsub.f32 1.0, %v2640_v32  ;;  %v8501_v63 = vld [vmem:[#allocation119_spill] sm:$0xff]  ;;  %v8504_v32 = vld [vmem:[#allocation116_spill] sm:$0xff] }
 0x4df   :  { %v2613_v0 = vsel %vm2610_vm11, %v2612_v11, %v2608_v61  ;;  %v2627_v12 = vsel %vm2626_vm10, %v3795_v26, %v2623_v60  ;;  %2999 = vmatpush.msra.mxu1 %v6829_v54  ;;  %2979 = vmatpush.msra.mxu0 %v6826_v42  ;;  %v8490_v26 = vld [vmem:[#allocation101_spill] sm:$0xff]  ;;  %v8503_v60 = vld [vmem:[#allocation114_spill] sm:$0xff] }
 0x4e0   :  { %v2632_v31 = vsel %vm2629_vm12, %v2631_v56, %v2627_v12  ;;  %v2655_v46 = vmul.f32 %v3801_v28, %v2613_v0  ;;  %3019 = vmatpush.msrb.mxu2 %v6834_v49  ;;  %3039 = vmatpush.msrb.mxu3 %v6837_v41  ;;  %v2642_v36 = vmul.f32 %v7239_v50, %v2641_v47  ;;  %v2650_v49 = vand.u32 2147483648, %v7225_v21  ;;  %v8502_v11 = vld [vmem:[#allocation113_spill] sm:$0xff]  ;;  %v8505_v56 = vld [vmem:[#allocation123_spill] sm:$0xff]  ;;  %v8507_v28 = vld [vmem:[#allocation118_spill] sm:$0xff] }
 0x4e1   :  { %v2654_v51 = vmul.f32 %v2632_v31, %v6846_v17  ;;  %3000 = vmatpush.msra.mxu1 %v6843_v10  ;;  %2980 = vmatpush.msra.mxu0 %v6840_v52  ;;  %v2648_v41 = vand.u32 2147483647, %v7225_v21  ;;  %v8489_v21 = vld [vmem:[#allocation107_spill] sm:$0xff]  ;;  %v8506_v61 = vld [vmem:[#allocation117_spill] sm:$0xff]  ;;  %v8508_v0 = vld [vmem:[#allocation120_spill] sm:$0xff] }
 0x4e2   :  { %3020 = vmatpush.msrb.mxu2 %v6848_v33  ;;  %3040 = vmatpush.msrb.mxu3 %v6851_v30  ;;  %v2643_v42 = vadd.f32 %v7239_v50, %v2642_v36  ;;  %v2651_v10 = vor.u32 1.1754944e-38, %v2650_v49  ;;  %v8509_v12 = vld [vmem:[#allocation127_spill] sm:$0xff]  ;;  %v8510_v47 = vld [vmem:[#allocation121_spill] sm:$0xff]  ;;  %v8511_v31 = vld [vmem:[#allocation122_spill] sm:$0xff] }
 0x4e3   :  { %v7257_v54 = vadd.f32 %v2655_v46, %v2654_v51  ;;  %3001 = vmatpush.msra.mxu1 %v6859_v2  ;;  %2981 = vmatpush.msra.mxu0 %v6856_v24  ;;  %vm2649_vm0 = vcmp.eq.f32.partialorder %v2648_v41, 8.507059e+37  ;;  %v8463_v24 = vld [vmem:[#allocation31_spill] sm:$0xff]  ;;  %v8464_v2 = vld [vmem:[#allocation70_spill] sm:$0xff]  ;;  %v8512_v46 = vld [vmem:[#allocation124_spill] sm:$0xff] }
 0x4e4   :  { %3021 = vmatpush.msrb.mxu2 %v6864_v18  ;;  %3041 = vmatpush.msrb.mxu3 %v6867_v44  ;;  %v2647_v52 = vsel %vm2646_vm15, %v7239_v50, %v2643_v42  ;;  %v8465_v18 = vld [vmem:[#allocation78_spill] sm:$0xff]  ;;  %v8466_v44 = vld [vmem:[#allocation79_spill] sm:$0xff]  ;;  %v8500_v50 = vld [vmem:[#allocation112_spill] sm:$0xff] }
 0x4e5   :  { %3802 = vtanh.f32 %v7257_v54  ;;  %3002 = vmatpush.msra.mxu1 %v6875_v5  ;;  %2982 = vmatpush.msra.mxu0 %v6872_v55  ;;  %v2652_v33 = vsel %vm2649_vm0, %v2651_v10, %v2647_v52  ;;  %v8467_v55 = vld [vmem:[#allocation62_spill] sm:$0xff]  ;;  %v8468_v5 = vld [vmem:[#allocation49_spill] sm:$0xff]  ;;  %v8513_v51 = vld [vmem:[#allocation131_spill] sm:$0xff] }
 0x4e6   :  { %3022 = vmatpush.msrb.mxu2 %v6884_v7  ;;  %3042 = vmatpush.msrb.mxu3 %v6887_v34  ;;  %v8469_v7 = vld [vmem:[#allocation41_spill] sm:$0xff]  ;;  %v8470_v34 = vld [vmem:[#allocation28_spill] sm:$0xff]  ;;  %v8515_v42 = vld [vmem:[#allocation126_spill] sm:$0xff] }
 0x4e7   :  { %3003 = vmatpush.msra.mxu1 %v6896_v3  ;;  %2983 = vmatpush.msra.mxu0 %v6893_v27  ;;  %v8471_v27 = vld [vmem:[#allocation75_spill] sm:$0xff]  ;;  %v8472_v3 = vld [vmem:[#allocation58_spill] sm:$0xff]  ;;  %v8514_v36 = vld [vmem:[#allocation125_spill] sm:$0xff] }
 0x4e8   :  { %3023 = vmatpush.msrb.mxu2 %v6899_v14  ;;  %3043 = vmatpush.msrb.mxu3 %v6902_v20  ;;  %v8473_v14 = vld [vmem:[#allocation74_spill] sm:$0xff]  ;;  %v8474_v20 = vld [vmem:[#allocation73_spill] sm:$0xff]  ;;  %v8516_v49 = vld [vmem:[#allocation128_spill] sm:$0xff] }
 0x4e9   :  { %3004 = vmatpush.msra.mxu1 %v6908_v59  ;;  %2984 = vmatpush.msra.mxu0 %v6905_v9  ;;  %v8475_v9 = vld [vmem:[#allocation91_spill] sm:$0xff]  ;;  %v8476_v59 = vld [vmem:[#allocation80_spill] sm:$0xff]  ;;  %v8517_v41 = vld [vmem:[#allocation129_spill] sm:$0xff] }
 0x4ea   :  { %3024 = vmatpush.msrb.mxu2 %v6911_v57  ;;  %3044 = vmatpush.msrb.mxu3 %v6914_v62  ;;  %v8477_v57 = vld [vmem:[#allocation83_spill] sm:$0xff]  ;;  %v8478_v62 = vld [vmem:[#allocation90_spill] sm:$0xff]  ;;  %v8519_v10 = vld [vmem:[#allocation132_spill] sm:$0xff] }
 0x4eb   :  { %v3803_v17 = vpop.eup %3802  ;;  %3005 = vmatpush.msra.mxu1 %v6922_v40  ;;  %2985 = vmatpush.msra.mxu0 %v6919_v25  ;;  %v8479_v25 = vld [vmem:[#allocation95_spill] sm:$0xff]  ;;  %v8480_v40 = vld [vmem:[#allocation92_spill] sm:$0xff]  ;;  %v8518_v52 = vld [vmem:[#allocation130_spill] sm:$0xff] }
 0x4ec   :  { %v7284_v30 = vmul.f32 %v3803_v17, %v2652_v33  ;;  %3025 = vmatpush.msrb.mxu2 %v6925_v16  ;;  %3045 = vmatpush.msrb.mxu3 %v6928_v39  ;;  %v8481_v16 = vld [vmem:[#allocation93_spill] sm:$0xff]  ;;  %v8482_v39 = vld [vmem:[#allocation94_spill] sm:$0xff] }
 0x4ed   :  { %3006 = vmatpush.msra.mxu1 %v6938_v19  ;;  %2986 = vmatpush.msra.mxu0 %v6935_v15  ;;  %v8483_v15 = vld [vmem:[#allocation99_spill] sm:$0xff]  ;;  %v8484_v19 = vld [vmem:[#allocation96_spill] sm:$0xff]  ;;  %v8520_v17 = vld [vmem:[#allocation138_spill] sm:$0xff] }
 0x4ee   :  { %2775 = vmatmul.f32.vlgmr.msrb.gmra.mxu0 %v7284_v30  ;;  %2795 = vmatmul.f32.vlgmr.msrb.gmra.mxu1 %v7284_v30  ;;  %v8521_v33 = vld [vmem:[#allocation133_spill] sm:$0xff] }
 0x4ef   :  { %2815 = vmatmul.f32.vlgmr.msra.gmra.mxu2 %v7284_v30  ;;  %2835 = vmatmul.f32.vlgmr.msra.gmra.mxu3 %v7284_v30 }
 0x4f0   :  { %3007 = vmatpush.msra.mxu1 %v6950_v4  ;;  %3026 = vmatpush.msrb.mxu2 %v6941_v48  ;;  %v8485_v48 = vld [vmem:[#allocation97_spill] sm:$0xff]  ;;  %v8488_v4 = vld [vmem:[#allocation100_spill] sm:$0xff] }
 0x4f1   :  { %3046 = vmatpush.msrb.mxu3 %v6944_v37  ;;  %2987 = vmatpush.msra.mxu0 %v6947_v22  ;;  %v8486_v37 = vld [vmem:[#allocation98_spill] sm:$0xff]  ;;  %v8487_v22 = vld [vmem:[#allocation103_spill] sm:$0xff] }
 0x4f2   :  { %3008 = vmatpush.msra.mxu1 %v8463_v24  ;;  %3027 = vmatpush.msrb.mxu2 %v8464_v2  ;;  %v8522_v24 = vld [vmem:[#allocation134_spill] sm:$0xff]  ;;  %v8523_v2 = vld [vmem:[#allocation135_spill] sm:$0xff] }
 0x4f3   :  { %3047 = vmatpush.msrb.mxu3 %v8465_v18  ;;  %2988 = vmatpush.msra.mxu0 %v8466_v44  ;;  %v8524_v18 = vld [vmem:[#allocation140_spill] sm:$0xff] }
 0x4f4   :  { %3009 = vmatpush.msra.mxu1 %v8467_v55  ;;  %3028 = vmatpush.msrb.mxu2 %v8468_v5  ;;  %v8525_v44 = vld [vmem:[#allocation136_spill] sm:$0xff]  ;;  %v8526_v55 = vld [vmem:[#allocation137_spill] sm:$0xff]  ;;  %v8527_v5 = vld [vmem:[#allocation142_spill] sm:$0xff] }
 0x4f5   :  { %3048 = vmatpush.msrb.mxu3 %v8469_v7  ;;  %2989 = vmatpush.msra.mxu0 %v8470_v34  ;;  %v4237_v7 = vld [vmem:[#allocation15 + $0xf8] sm:$0xff]  ;;  %v8528_v34 = vld [vmem:[#allocation139_spill] sm:$0xff] }
 0x4f6   :  { %3010 = vmatpush.msra.mxu1 %v8471_v27  ;;  %3029 = vmatpush.msrb.mxu2 %v8472_v3  ;;  %v4238_v27 = vld [vmem:[#allocation15 + $0xd0] sm:$0xff]  ;;  %v8529_v3 = vld [vmem:[#allocation144_spill] sm:$0xff] }
 0x4f7   :  { %3049 = vmatpush.msrb.mxu3 %v8473_v14  ;;  %2990 = vmatpush.msra.mxu0 %v8474_v20  ;;  %v4239_v14 = vld [vmem:[#allocation15 + $0xd8] sm:$0xff]  ;;  %v8530_v20 = vld [vmem:[#allocation141_spill] sm:$0xff] }
 0x4f8   :  { %3011 = vmatpush.msra.mxu1 %v8475_v9  ;;  %3030 = vmatpush.msrb.mxu2 %v8476_v59  ;;  %v4240_v9 = vld [vmem:[#allocation15 + $0xb0] sm:$0xff]  ;;  %v8531_v59 = vld [vmem:[#allocation146_spill] sm:$0xff] }
 0x4f9   :  { %3050 = vmatpush.msrb.mxu3 %v8477_v57  ;;  %2991 = vmatpush.msra.mxu0 %v8478_v62  ;;  %v4241_v57 = vld [vmem:[#allocation15 + $0xb8] sm:$0xff]  ;;  %v8532_v62 = vld [vmem:[#allocation143_spill] sm:$0xff] }
 0x4fa   :  { %3012 = vmatpush.msra.mxu1 %v8479_v25  ;;  %3031 = vmatpush.msrb.mxu2 %v8480_v40  ;;  %v4242_v25 = vld [vmem:[#allocation15 + $0x90] sm:$0xff]  ;;  %v8533_v40 = vld [vmem:[#allocation148_spill] sm:$0xff] }
 0x4fb   :  { %3051 = vmatpush.msrb.mxu3 %v8481_v16  ;;  %2992 = vmatpush.msra.mxu0 %v8482_v39  ;;  %v4243_v16 = vld [vmem:[#allocation15 + $0x98] sm:$0xff]  ;;  %v8534_v39 = vld [vmem:[#allocation145_spill] sm:$0xff] }
 0x4fc   :  { %3013 = vmatpush.msra.mxu1 %v8483_v15  ;;  %3032 = vmatpush.msrb.mxu2 %v8484_v19  ;;  %v4244_v15 = vld [vmem:[#allocation15 + $0x70] sm:$0xff]  ;;  %v8535_v19 = vld [vmem:[#allocation150_spill] sm:$0xff] }
 0x4fd   :  { %3052 = vmatpush.msrb.mxu3 %v8485_v48  ;;  %2993 = vmatpush.msra.mxu0 %v8486_v37  ;;  %v4245_v48 = vld [vmem:[#allocation15 + $0x78] sm:$0xff]  ;;  %v8536_v37 = vld [vmem:[#allocation147_spill] sm:$0xff] }
 0x4fe   :  { %3014 = vmatpush.msra.mxu1 %v8487_v22  ;;  %3033 = vmatpush.msrb.mxu2 %v8488_v4  ;;  %v4246_v22 = vld [vmem:[#allocation15 + $0x50] sm:$0xff]  ;;  %v8537_v4 = vld [vmem:[#allocation152_spill] sm:$0xff] }
 0x4ff   :  { %3053 = vmatpush.msrb.mxu3 %v8490_v26  ;;  %2994 = vmatpush.msra.mxu0 %v8491_v1  ;;  %v8538_v26 = vld [vmem:[#allocation149_spill] sm:$0xff] }
 0x500   :  { %3089 = vmatpush.msrb.mxu1 %v8489_v21  ;;  %3034 = vmatpush.msrb.mxu2 %v8492_v6  ;;  %v4247_v21 = vld [vmem:[#allocation15 + $0x58] sm:$0xff]  ;;  %v4248_v1 = vld [vmem:[#allocation15 + $0x30] sm:$0xff] }
 0x501   :  { %3054 = vmatpush.msrb.mxu3 %v8494_v43  ;;  %3069 = vmatpush.msrb.mxu0 %v8495_v58  ;;  %v4249_v6 = vld [vmem:[#allocation15 + $0x38] sm:$0xff]  ;;  %v4250_v43 = vld [vmem:[#allocation15 + $0x10] sm:$0xff] }
 0x502   :  { %3090 = vmatpush.msrb.mxu1 %v8493_v38  ;;  %3109 = vmatpush.msra.mxu2 %v8496_v29  ;;  %v8539_v38 = vld [vmem:[#allocation151_spill] sm:$0xff]  ;;  %v4251_v58 = vld [vmem:[#allocation15 + $0x18] sm:$0xff]  ;;  %v8540_v29 = vld [vmem:[#allocation52_spill] sm:$0xff] }
 0x503   :  { %3129 = vmatpush.msra.mxu3 %v8498_v13  ;;  %3070 = vmatpush.msrb.mxu0 %v8499_v23  ;;  %v8542_v23 = vld [vmem:[#allocation55_spill] sm:$0xff] }
 0x504   :  { %3091 = vmatpush.msrb.mxu1 %v8497_v8  ;;  %3110 = vmatpush.msra.mxu2 %v8500_v50  ;;  %v8541_v8 = vld [vmem:[#allocation86_spill] sm:$0xff]  ;;  %v8543_v50 = vld [vmem:[#allocation87_spill] sm:$0xff] }
 0x505   :  { %3130 = vmatpush.msra.mxu3 %v8502_v11  ;;  %3071 = vmatpush.msrb.mxu0 %v8503_v60  ;;  %v270_v13 = vadd.f32 %v8541_v8, %v8540_v29 }
 0x506   :  { %3092 = vmatpush.msrb.mxu1 %v8501_v63  ;;  %3111 = vmatpush.msra.mxu2 %v8504_v32  ;;  %v311_v63 = vadd.f32 %v8543_v50, %v8542_v23 }
 0x507   :  { %3131 = vmatpush.msra.mxu3 %v8506_v61  ;;  %3072 = vmatpush.msrb.mxu0 %v8507_v28 }
 0x508   :  { %3093 = vmatpush.msrb.mxu1 %v8505_v56  ;;  %3112 = vmatpush.msra.mxu2 %v8508_v0  ;;  %v8544_v0 = vld [vmem:[#allocation63_spill] sm:$0xff] }
 0x509   :  { %3132 = vmatpush.msra.mxu3 %v8510_v47  ;;  %3073 = vmatpush.msrb.mxu0 %v8511_v31 }
 0x50a   :  { %3094 = vmatpush.msrb.mxu1 %v8509_v12  ;;  %3113 = vmatpush.msra.mxu2 %v8512_v46  ;;  %v8545_v12 = vld [vmem:[#allocation50_spill] sm:$0xff] }
 0x50b   :  { %3133 = vmatpush.msra.mxu3 %v8514_v36  ;;  %3074 = vmatpush.msrb.mxu0 %v8515_v42  ;;  %v393_v47 = vadd.f32 %v8545_v12, %v8544_v0 }
 0x50c   :  { %3095 = vmatpush.msrb.mxu1 %v8513_v51  ;;  %3114 = vmatpush.msra.mxu2 %v8516_v49 }
 0x50d   :  { %3134 = vmatpush.msra.mxu3 %v8517_v41  ;;  %3075 = vmatpush.msrb.mxu0 %v8518_v52  ;;  %v8546_v52 = vld [vmem:[#allocation56_spill] sm:$0xff] }
 0x50e   :  { %3096 = vmatpush.msrb.mxu1 %v7130_v35  ;;  %3115 = vmatpush.msra.mxu2 %v8519_v10  ;;  %v4236_v35 = vld [vmem:[#allocation15 + $0xf0] sm:$0xff]  ;;  %v8547_v10 = vld [vmem:[#allocation38_spill] sm:$0xff] }
 0x50f   :  { %3135 = vmatpush.msra.mxu3 %v8521_v33  ;;  %3076 = vmatpush.msrb.mxu0 %v8522_v24  ;;  %v8548_v33 = vld [vmem:[#allocation59_spill] sm:$0xff] }
 0x510   :  { %3097 = vmatpush.msrb.mxu1 %v8520_v17  ;;  %3116 = vmatpush.msra.mxu2 %v8523_v2  ;;  %v493_v17 = vadd.f32 %v8547_v10, %v8546_v52  ;;  %v8549_v24 = vld [vmem:[#allocation39_spill] sm:$0xff] }
 0x511   :  { %3136 = vmatpush.msra.mxu3 %v8525_v44  ;;  %3077 = vmatpush.msrb.mxu0 %v8526_v55  ;;  %v534_v2 = vadd.f32 %v8549_v24, %v8548_v33 }
 0x512   :  { %3098 = vmatpush.msrb.mxu1 %v8524_v18  ;;  %3117 = vmatpush.msra.mxu2 %v4236_v35 }
 0x513   :  { %3137 = vmatpush.msra.mxu3 %v4237_v7  ;;  %3078 = vmatpush.msrb.mxu0 %v8528_v34  ;;  %v8551_v7 = vld [vmem:[#allocation40_spill] sm:$0xff] }
 0x514   :  { %3099 = vmatpush.msrb.mxu1 %v8527_v5  ;;  %3118 = vmatpush.msra.mxu2 %v4238_v27  ;;  %v8550_v5 = vld [vmem:[#allocation66_spill] sm:$0xff] }
 0x515   :  { %3138 = vmatpush.msra.mxu3 %v4239_v14  ;;  %3079 = vmatpush.msrb.mxu0 %v8530_v20  ;;  %v352_v34 = vadd.f32 %v8551_v7, %v8550_v5 }
 0x516   :  { %3100 = vmatpush.msrb.mxu1 %v8529_v3  ;;  %3119 = vmatpush.msra.mxu2 %v4240_v9 }
 0x517   :  { %3139 = vmatpush.msra.mxu3 %v4241_v57  ;;  %3080 = vmatpush.msrb.mxu0 %v8532_v62 }
 0x518   :  { %3101 = vmatpush.msrb.mxu1 %v8531_v59  ;;  %3120 = vmatpush.msra.mxu2 %v4242_v25 }
 0x519   :  { %3140 = vmatpush.msra.mxu3 %v4243_v16  ;;  %3081 = vmatpush.msrb.mxu0 %v8534_v39 }
 0x51a   :  { %3102 = vmatpush.msrb.mxu1 %v8533_v40  ;;  %3121 = vmatpush.msra.mxu2 %v4244_v15 }
 0x51b   :  { %3141 = vmatpush.msra.mxu3 %v4245_v48  ;;  %3082 = vmatpush.msrb.mxu0 %v8536_v37 }
 0x51c   :  { %3103 = vmatpush.msrb.mxu1 %v8535_v19  ;;  %3122 = vmatpush.msra.mxu2 %v4246_v22 }
 0x51d   :  { %3142 = vmatpush.msra.mxu3 %v4247_v21  ;;  %3083 = vmatpush.msrb.mxu0 %v8538_v26  ;;  %v8552_v21 = vld [vmem:[#allocation51_spill] sm:$0xff] }
 0x51e   :  { %3104 = vmatpush.msrb.mxu1 %v8537_v4  ;;  %3123 = vmatpush.msra.mxu2 %v4248_v1 }
 0x51f   :  { %3143 = vmatpush.msra.mxu3 %v4249_v6  ;;  %3084 = vmatpush.msrb.mxu0 %v8539_v38 }
 0x520   :  { %3124 = vmatpush.msra.mxu2 %v4250_v43 }
 0x521   :  { %3144 = vmatpush.msra.mxu3 %v4251_v58 }
 0x55a   :  { %v2686_v11 = vpop.f32.mrf.mxu0  ;;  %v2706_v60 = vpop.f32.mrf.mxu1 }
 0x55b   :  { %v2749_v32 = vadd.f32 %v2686_v11, %v270_v13  ;;  %v2750_v56 = vadd.f32 %v2706_v60, %v311_v63 }
 0x55d   :  { %v3569_v61 = vmul.f32 -1.442695, %v2749_v32  ;;  %v3570_v28 = vmul.f32 -1.442695, %v2750_v56 }
 0x55f   :  { %3804 = vpow2.f32 %v3569_v61 }
 0x560   :  { %3806 = vpow2.f32 %v3570_v28 }
 0x561   :  { %v2746_v31 = vpop.f32.mrf.mxu3  ;;  %v2726_v18 = vpop.f32.mrf.mxu2 }
 0x562   :  { %v2752_v46 = vadd.f32 %v2746_v31, %v393_v47  ;;  %v2751_v9 = vadd.f32 %v2726_v18, %v352_v34 }
 0x564   :  { %v3571_v51 = vmul.f32 -1.442695, %v2752_v46 }
 0x565   :  { %v3805_v36 = vpop.eup %3804 }
 0x566   :  { %v3807_v42 = vpop.eup %3806  ;;  %v2846_v49 = vadd.f32 1.0, %v3805_v36  ;;  %3808 = vpow2.f32 %v3571_v51 }
 0x567   :  { %v2865_v41 = vadd.f32 1.0, %v3807_v42 }
 0x568   :  { %3810 = vrcp.f32 %v2846_v49  ;;  %v2856_v39 = vand.u32 2147483647, %v2846_v49  ;;  %v2858_v48 = vand.u32 2147483648, %v2846_v49  ;;  %vm2852_vm3 = vweird.f32 %v2846_v49 }
 0x569   :  { %3812 = vrcp.f32 %v2865_v41  ;;  %v2877_v19 = vand.u32 2147483648, %v2865_v41  ;;  %v2875_v4 = vand.u32 2147483647, %v2865_v41  ;;  %vm2871_vm4 = vweird.f32 %v2865_v41 }
 0x56a   :  { %vm2857_vm5 = vcmp.eq.f32.partialorder %v2856_v39, 8.507059e+37  ;;  %v2859_v13 = vor.u32 1.1754944e-38, %v2858_v48 }
 0x56b   :  { %v2776_v44 = vpop.f32.mrf.mxu0  ;;  %v2796_v55 = vpop.f32.mrf.mxu1  ;;  %v2878_v8 = vor.u32 1.1754944e-38, %v2877_v19  ;;  %vm2876_vm8 = vcmp.eq.f32.partialorder %v2875_v4, 8.507059e+37 }
 0x56c   :  { %v3809_v35 = vpop.eup %3808  ;;  %v2839_v27 = vadd.f32 %v2776_v44, %v493_v17  ;;  %v2840_v3 = vadd.f32 %v2796_v55, %v534_v2 }
 0x56d   :  { %v7388_v14 = vadd.f32 1.0, %v3809_v35  ;;  %v3290_v35 = vld [vmem:[#allocation17] sm:$0xff] }
 0x56e   :  { %v3811_v20 = vpop.eup %3810  ;;  %v3572_v59 = vmul.f32 -1.442695, %v2839_v27  ;;  %v3573_v57 = vmul.f32 -1.442695, %v2840_v3 }
 0x56f   :  { %v3813_v62 = vpop.eup %3812  ;;  %v2848_v25 = vmul.f32 %v3811_v20, %v2846_v49  ;;  %3814 = vrcp.f32 %v7388_v14  ;;  %vm2853_vm1 = vweird.f32 %v3811_v20  ;;  %v2897_v17 = vand.u32 2147483648, %v7388_v14 }
 0x570   :  { %v2867_v40 = vmul.f32 %v3813_v62, %v2865_v41  ;;  %3816 = vpow2.f32 %v3572_v59  ;;  %vm2872_vm2 = vweird.f32 %v3813_v62  ;;  %vm2854_vm6 = vmor %vm2852_vm3, %vm2853_vm1  ;;  %v2895_v2 = vand.u32 2147483647, %v7388_v14 }
 0x571   :  { %v2849_v16 = vsub.f32 1.0, %v2848_v25  ;;  %3818 = vpow2.f32 %v3573_v57  ;;  %vm2873_vm7 = vmor %vm2871_vm4, %vm2872_vm2  ;;  %vm2891_vm10 = vweird.f32 %v7388_v14  ;;  %v2898_v3 = vor.u32 1.1754944e-38, %v2897_v17  ;;  %v3297_v17 = vld [vmem:[#allocation17 + $0x38] sm:$0xff] }
 0x572   :  { %v2868_v15 = vsub.f32 1.0, %v2867_v40  ;;  %3820 = vtanh.f32 %v2751_v9  ;;  %v2836_v37 = vpop.f32.mrf.mxu3  ;;  %v2816_v49 = vpop.f32.mrf.mxu2  ;;  %vm2896_vm12 = vcmp.eq.f32.partialorder %v2895_v2, 8.507059e+37  ;;  %v3295_v2 = vld [vmem:[#allocation17 + $0x28] sm:$0xff] }
 0x573   :  { %v2850_v22 = vmul.f32 %v3811_v20, %v2849_v16  ;;  %v2842_v26 = vadd.f32 %v2836_v37, %v8552_v21  ;;  %v3305_v37 = vld [vmem:[#allocation17 + $0x78] sm:$0xff] }
 0x574   :  { %v2869_v1 = vmul.f32 %v3813_v62, %v2868_v15 }
 0x575   :  { %v3815_v6 = vpop.eup %3814  ;;  %v2851_v38 = vadd.f32 %v3811_v20, %v2850_v22  ;;  %v3574_v43 = vmul.f32 -1.442695, %v2842_v26 }
 0x576   :  { %v3817_v58 = vpop.eup %3816  ;;  %v2870_v50 = vadd.f32 %v3813_v62, %v2869_v1  ;;  %v2887_v63 = vmul.f32 %v3815_v6, %v7388_v14  ;;  %vm2892_vm9 = vweird.f32 %v3815_v6 }
 0x577   :  { %v3819_v11 = vpop.eup %3818  ;;  %v2855_v60 = vsel %vm2854_vm6, %v3811_v20, %v2851_v38  ;;  %v2909_v32 = vadd.f32 1.0, %v3817_v58  ;;  %3822 = vpow2.f32 %v3574_v43  ;;  %vm7406_vm11 = vmor %vm2891_vm10, %vm2892_vm9 }
 0x578   :  { %v3821_v56 = vpop.eup %3820  ;;  %v2860_v61 = vsel %vm2857_vm5, %v2859_v13, %v2855_v60  ;;  %v2874_v28 = vsel %vm2873_vm7, %v3813_v62, %v2870_v50  ;;  %v2888_v12 = vsub.f32 1.0, %v2887_v63  ;;  %v7393_v47 = vadd.f32 1.0, %v3819_v11  ;;  %v3303_v63 = vld [vmem:[#allocation17 + $0x68] sm:$0xff] }
 0x579   :  { %v2879_v31 = vsel %vm2876_vm8, %v2878_v8, %v2874_v28  ;;  %v2902_v46 = vmul.f32 %v3821_v56, %v2860_v61  ;;  %3824 = vrcp.f32 %v2909_v32  ;;  %v2921_v59 = vand.u32 2147483648, %v2909_v32  ;;  %v3301_v28 = vld [vmem:[#allocation17 + $0x58] sm:$0xff] }
 0x57a   :  { %v2901_v51 = vmul.f32 %v2879_v31, %v7221_v45  ;;  %v2889_v36 = vmul.f32 %v3815_v6, %v2888_v12  ;;  %3826 = vrcp.f32 %v7393_v47  ;;  %v8553_v45 = vld [vmem:[#allocation48_spill] sm:$0xff]  ;;  %v2940_v14 = vand.u32 2147483648, %v7393_v47  ;;  %v3300_v31 = vld [vmem:[#allocation17 + $0x50] sm:$0xff] }
 0x57b   :  { %v2841_v44 = vadd.f32 %v2816_v49, %v8553_v45  ;;  %v2919_v25 = vand.u32 2147483647, %v2909_v32  ;;  %v2938_v39 = vand.u32 2147483647, %v7393_v47  ;;  %vm2915_vm15 = vweird.f32 %v2909_v32  ;;  %v3293_v45 = vld [vmem:[#allocation17 + $0x18] sm:$0xff] }
 0x57c   :  { %v7397_v42 = vadd.f32 %v2902_v46, %v2901_v51  ;;  %v2890_v10 = vadd.f32 %v3815_v6, %v2889_v36  ;;  %vm2934_vm0 = vweird.f32 %v7393_v47  ;;  %v2922_v22 = vor.u32 1.1754944e-38, %v2921_v59  ;;  %v3299_v46 = vld [vmem:[#allocation17 + $0x48] sm:$0xff]  ;;  %v3298_v36 = vld [vmem:[#allocation17 + $0x40] sm:$0xff]  ;;  %v8562_v59 = vld [vmem:[#allocation89_spill] sm:$0xff] }
 0x57d   :  { %v3823_v41 = vpop.eup %3822  ;;  %v2941_v26 = vor.u32 1.1754944e-38, %v2940_v14  ;;  %vm2920_vm3 = vcmp.eq.f32.partialorder %v2919_v25, 8.507059e+37  ;;  %vm2939_vm4 = vcmp.eq.f32.partialorder %v2938_v39, 8.507059e+37 }
 0x57e   :  { %3828 = vtanh.f32 %v7397_v42  ;;  %v7401_v24 = vadd.f32 1.0, %v3823_v41  ;;  %v2894_v27 = vsel %vm7406_vm11, %v3815_v6, %v2890_v10  ;;  %v3304_v6 = vld [vmem:[#allocation17 + $0x70] sm:$0xff] }
 0x57f   :  { %v3825_v18 = vpop.eup %3824  ;;  %v2899_v40 = vsel %vm2896_vm12, %v2898_v3, %v2894_v27  ;;  %v8558_v27 = vld [vmem:[#allocation69_spill] sm:$0xff]  ;;  %v8559_v3 = vld [vmem:[#allocation54_spill] sm:$0xff] }
 0x580   :  { %v3827_v55 = vpop.eup %3826  ;;  %v2911_v7 = vmul.f32 %v3825_v18, %v2909_v32  ;;  %3830 = vrcp.f32 %v7401_v24  ;;  %vm2916_vm13 = vweird.f32 %v3825_v18  ;;  %v3302_v32 = vld [vmem:[#allocation17 + $0x60] sm:$0xff]  ;;  %v2960_v12 = vand.u32 2147483648, %v7401_v24 }
 0x581   :  { %v2930_v34 = vmul.f32 %v3827_v55, %v7393_v47  ;;  %3832 = vtanh.f32 %v2841_v44  ;;  %vm2935_vm14 = vweird.f32 %v3827_v55  ;;  %vm2917_vm1 = vmor %vm2915_vm15, %vm2916_vm13  ;;  %vm2954_vm6 = vweird.f32 %v7401_v24  ;;  %v3292_v44 = vld [vmem:[#allocation17 + $0x10] sm:$0xff] }
 0x582   :  { %v2912_v20 = vsub.f32 1.0, %v2911_v7  ;;  %vm2936_vm2 = vmor %vm2934_vm0, %vm2935_vm14  ;;  %v2958_v47 = vand.u32 2147483647, %v7401_v24  ;;  %v2961_v51 = vor.u32 1.1754944e-38, %v2960_v12  ;;  %v8556_v7 = vld [vmem:[#allocation67_spill] sm:$0xff]  ;;  %v3320_v12 = vld [vmem:[#allocation18 + $0x30] sm:$0xff] }
 0x583   :  { %v2931_v9 = vsub.f32 1.0, %v2930_v34  ;;  %v8557_v34 = vld [vmem:[#allocation161_spill] sm:$0xff] }
 0x584   :  { %v3829_v57 = vpop.eup %3828  ;;  %v2913_v62 = vmul.f32 %v3825_v18, %v2912_v20  ;;  %vm2959_vm8 = vcmp.eq.f32.partialorder %v2958_v47, 8.507059e+37  ;;  %v8560_v20 = vld [vmem:[#allocation27_spill] sm:$0xff] }
 0x585   :  { %v2932_v16 = vmul.f32 %v3827_v55, %v2931_v9  ;;  %v7416_v15 = vmul.f32 %v3829_v57, %v2899_v40  ;;  %v8561_v9 = vld [vmem:[#allocation88_spill] sm:$0xff]  ;;  %v314_v57 = vadd.f32 %v8562_v59, %v8542_v23 }
 0x586   :  { %v3831_v19 = vpop.eup %3830  ;;  %v2914_v48 = vadd.f32 %v3825_v18, %v2913_v62  ;;  %v273_v14 = vadd.f32 %v8561_v9, %v8540_v29  ;;  %v3329_v62 = vld [vmem:[#allocation18 + $0x78] sm:$0xff] }
 0x587   :  { %v2933_v4 = vadd.f32 %v3827_v55, %v2932_v16  ;;  %v2950_v21 = vmul.f32 %v3831_v19, %v7401_v24  ;;  %2995 = vmatmul.f32.vlgmr.msra.gmra.mxu0 %v7416_v15  ;;  %3015 = vmatmul.f32.vlgmr.msra.gmra.mxu1 %v7416_v15  ;;  %v3833_v38 = vpop.eup %3832  ;;  %vm2955_vm5 = vweird.f32 %v3831_v19  ;;  %v3296_v24 = vld [vmem:[#allocation17 + $0x30] sm:$0xff] }
 0x588   :  { %v2918_v1 = vsel %vm2917_vm1, %v3825_v18, %v2914_v48  ;;  %3035 = vmatmul.f32.vlgmr.msrb.gmra.mxu2 %v7416_v15  ;;  %3055 = vmatmul.f32.vlgmr.msrb.gmra.mxu3 %v7416_v15  ;;  %vm2956_vm7 = vmor %vm2954_vm6, %vm2955_vm5  ;;  %v3294_v18 = vld [vmem:[#allocation17 + $0x20] sm:$0xff] }
 0x589   :  { %v2923_v43 = vsel %vm2920_vm3, %v2922_v22, %v2918_v1  ;;  %v2937_v58 = vsel %vm2936_vm2, %v3827_v55, %v2933_v4  ;;  %v2951_v8 = vsub.f32 1.0, %v2950_v21  ;;  %3371 = vmatpush.msra.mxu1 %v3305_v37  ;;  %v3291_v55 = vld [vmem:[#allocation17 + $0x8] sm:$0xff]  ;;  %3330 = vmatpush.msra.mxu0 %v3329_v62  ;;  %v3325_v4 = vld [vmem:[#allocation18 + $0x58] sm:$0xff] }
 0x58a   :  { %v2942_v13 = vsel %vm2939_vm4, %v2941_v26, %v2937_v58  ;;  %v2965_v50 = vmul.f32 %v3833_v38, %v2923_v43  ;;  %v3327_v22 = vld [vmem:[#allocation18 + $0x68] sm:$0xff]  ;;  %v3324_v26 = vld [vmem:[#allocation18 + $0x50] sm:$0xff] }
 0x58b   :  { %v2964_v11 = vmul.f32 %v2942_v13, %v7257_v54  ;;  %v2952_v60 = vmul.f32 %v3831_v19, %v2951_v8  ;;  %3372 = vmatpush.msra.mxu1 %v3304_v6  ;;  %v3323_v38 = vld [vmem:[#allocation18 + $0x48] sm:$0xff]  ;;  %v3322_v13 = vld [vmem:[#allocation18 + $0x40] sm:$0xff] }
 0x58d   :  { %v7425_v56 = vadd.f32 %v2965_v50, %v2964_v11  ;;  %3373 = vmatpush.msra.mxu1 %v3303_v63  ;;  %v2953_v61 = vadd.f32 %v3831_v19, %v2952_v60  ;;  %v8564_v50 = vld [vmem:[#allocation34_spill] sm:$0xff]  ;;  %v8565_v11 = vld [vmem:[#allocation35_spill] sm:$0xff] }
 0x58e   :  { %v490_v63 = vadd.f32 %v8564_v50, %v8546_v52  ;;  %v531_v60 = vadd.f32 %v8565_v11, %v8548_v33 }
 0x58f   :  { %3834 = vtanh.f32 %v7425_v56  ;;  %3374 = vmatpush.msra.mxu1 %v3302_v32  ;;  %v2957_v54 = vsel %vm2956_vm7, %v3831_v19, %v2953_v61  ;;  %v3328_v19 = vld [vmem:[#allocation18 + $0x70] sm:$0xff] }
 0x590   :  { %v2962_v41 = vsel %vm2959_vm8, %v2961_v51, %v2957_v54  ;;  %3331 = vmatpush.msra.mxu0 %v3328_v19  ;;  %v3314_v19 = vld [vmem:[#allocation18] sm:$0xff] }
 0x591   :  { %3375 = vmatpush.msra.mxu1 %v3301_v28 }
 0x592   :  { %3332 = vmatpush.msra.mxu0 %v3327_v22 }
 0x593   :  { %3376 = vmatpush.msra.mxu1 %v3300_v31  ;;  %v8566_v31 = vld [vmem:[#allocation43_spill] sm:$0xff] }
 0x594   :  { %v355_v54 = vadd.f32 %v8566_v31, %v8550_v5 }
 0x595   :  { %v3835_v49 = vpop.eup %3834  ;;  %3377 = vmatpush.msra.mxu1 %v3299_v46 }
 0x596   :  { %v7431_v10 = vmul.f32 %v3835_v49, %v2962_v41  ;;  %v3319_v49 = vld [vmem:[#allocation18 + $0x28] sm:$0xff] }
 0x597   :  { %3378 = vmatpush.msra.mxu1 %v3298_v36 }
 0x598   :  { %3085 = vmatmul.f32.vlgmr.msrb.gmra.mxu0 %v7431_v10  ;;  %3105 = vmatmul.f32.vlgmr.msrb.gmra.mxu1 %v7431_v10 }
 0x599   :  { %3125 = vmatmul.f32.vlgmr.msra.gmra.mxu2 %v7431_v10  ;;  %3145 = vmatmul.f32.vlgmr.msra.gmra.mxu3 %v7431_v10 }
 0x59a   :  { %3379 = vmatpush.msra.mxu1 %v3297_v17 }
 0x59c   :  { %3380 = vmatpush.msra.mxu1 %v3296_v24 }
 0x59e   :  { %3381 = vmatpush.msra.mxu1 %v3295_v2 }
 0x5a0   :  { %3382 = vmatpush.msra.mxu1 %v3294_v18  ;;  %v3318_v18 = vld [vmem:[#allocation18 + $0x20] sm:$0xff] }
 0x5a2   :  { %3383 = vmatpush.msra.mxu1 %v3293_v45  ;;  %v3317_v45 = vld [vmem:[#allocation18 + $0x18] sm:$0xff] }
 0x5a4   :  { %3384 = vmatpush.msra.mxu1 %v3292_v44 }
 0x5a6   :  { %3385 = vmatpush.msra.mxu1 %v3291_v55 }
 0x5a8   :  { %3386 = vmatpush.msra.mxu1 %v3290_v35  ;;  %v3316_v35 = vld [vmem:[#allocation18 + $0x10] sm:$0xff] }
 0x5a9   :  { %3387 = vmatmul.f32.vlgmr.msra.gmra.mxu1 %v8556_v7 }
 0x5b1   :  { %3390 = vmatmul.f32.gmra.mxu1 %v8557_v34 }
 0x5b9   :  { %3393 = vmatmul.f32.gmra.mxu1 %v8558_v27 }
 0x5c1   :  { %3396 = vmatmul.f32.gmra.mxu1 %v8559_v3 }
 0x5c9   :  { %3399 = vmatmul.f32.gmra.mxu1 %v8560_v20 }
 0x5d1   :  { %3402 = vmatmul.f32.gmra.mxu1 %v7237_v53  ;;  %v3326_v53 = vld [vmem:[#allocation18 + $0x60] sm:$0xff] }
 0x5d2   :  { %3333 = vmatpush.msra.mxu0 %v3326_v53 }
 0x5d4   :  { %3334 = vmatpush.msra.mxu0 %v3325_v4 }
 0x5d6   :  { %3335 = vmatpush.msra.mxu0 %v3324_v26 }
 0x5d8   :  { %3336 = vmatpush.msra.mxu0 %v3323_v38 }
 0x5d9   :  { %3405 = vmatmul.f32.gmra.mxu1 %v7416_v15  ;;  %v8563_v15 = vld [vmem:[#allocation53_spill] sm:$0xff] }
 0x5da   :  { %v396_v29 = vadd.f32 %v8563_v15, %v8544_v0  ;;  %3337 = vmatpush.msra.mxu0 %v3322_v13  ;;  %v3321_v0 = vld [vmem:[#allocation18 + $0x38] sm:$0xff] }
 0x5dc   :  { %3338 = vmatpush.msra.mxu0 %v3321_v0 }
 0x5de   :  { %3339 = vmatpush.msra.mxu0 %v3320_v12  ;;  %v8570_v12 = vld [vmem:[#allocation47_spill] sm:$0xff] }
 0x5e0   :  { %3340 = vmatpush.msra.mxu0 %v3319_v49 }
 0x5e2   :  { %3341 = vmatpush.msra.mxu0 %v3318_v18 }
 0x5e4   :  { %3342 = vmatpush.msra.mxu0 %v3317_v45 }
 0x5e6   :  { %3343 = vmatpush.msra.mxu0 %v3316_v35 }
 0x604   :  { %v2996_v25 = vpop.f32.mrf.mxu0  ;;  %v3016_v40 = vpop.f32.mrf.mxu1 }
 0x605   :  { %v3059_v16 = vadd.f32 %v2996_v25, %v273_v14  ;;  %v3060_v39 = vadd.f32 %v3016_v40, %v314_v57  ;;  %v8567_v14 = vld [vmem:[#allocation57_spill] sm:$0xff]  ;;  %v3315_v57 = vld [vmem:[#allocation18 + $0x8] sm:$0xff] }
 0x606   :  { %3344 = vmatpush.msra.mxu0 %v3315_v57 }
 0x607   :  { %v3575_v48 = vmul.f32 -1.442695, %v3059_v16  ;;  %v3576_v37 = vmul.f32 -1.442695, %v3060_v39 }
 0x608   :  { %3345 = vmatpush.msra.mxu0 %v3314_v19 }
 0x609   :  { %3836 = vpow2.f32 %v3575_v48 }
 0x60a   :  { %3838 = vpow2.f32 %v3576_v37 }
 0x60b   :  { %v3056_v23 = vpop.f32.mrf.mxu3  ;;  %v3036_v32 = vpop.f32.mrf.mxu2 }
 0x60c   :  { %v3062_v21 = vadd.f32 %v3056_v23, %v396_v29  ;;  %v3061_v52 = vadd.f32 %v3036_v32, %v355_v54 }
 0x60e   :  { %v3577_v1 = vmul.f32 -1.442695, %v3062_v21 }
 0x60f   :  { %v3837_v6 = vpop.eup %3836 }
 0x610   :  { %v3839_v43 = vpop.eup %3838  ;;  %v7450_v58 = vadd.f32 1.0, %v3837_v6  ;;  %3840 = vpow2.f32 %v3577_v1 }
 0x611   :  { %v7452_v8 = vadd.f32 1.0, %v3839_v43 }
 0x612   :  { %3842 = vrcp.f32 %v7450_v58  ;;  %v3166_v55 = vand.u32 2147483647, %v7450_v58  ;;  %v3168_v27 = vand.u32 2147483648, %v7450_v58  ;;  %vm3162_vm11 = vweird.f32 %v7450_v58 }
 0x613   :  { %3844 = vrcp.f32 %v7452_v8  ;;  %v3187_v34 = vand.u32 2147483648, %v7452_v8  ;;  %v3185_v9 = vand.u32 2147483647, %v7452_v8  ;;  %vm3181_vm12 = vweird.f32 %v7452_v8 }
 0x614   :  { %vm7474_vm13 = vcmp.eq.f32.partialorder %v3166_v55, 8.507059e+37  ;;  %v3169_v22 = vor.u32 1.1754944e-38, %v3168_v27 }
 0x615   :  { %v3086_v61 = vpop.f32.mrf.mxu0  ;;  %v3106_v28 = vpop.f32.mrf.mxu1  ;;  %v3188_v37 = vor.u32 1.1754944e-38, %v3187_v34  ;;  %vm3186_vm0 = vcmp.eq.f32.partialorder %v3185_v9, 8.507059e+37 }
 0x616   :  { %v3841_v47 = vpop.eup %3840  ;;  %v3149_v46 = vadd.f32 %v3086_v61, %v490_v63  ;;  %v3150_v51 = vadd.f32 %v3106_v28, %v531_v60 }
 0x617   :  { %v7462_v36 = vadd.f32 1.0, %v3841_v47 }
 0x618   :  { %v3843_v41 = vpop.eup %3842  ;;  %v3578_v17 = vmul.f32 -1.442695, %v3149_v46  ;;  %v3579_v24 = vmul.f32 -1.442695, %v3150_v51 }
 0x619   :  { %v3845_v33 = vpop.eup %3844  ;;  %v3158_v2 = vmul.f32 %v3843_v41, %v7450_v58  ;;  %3846 = vrcp.f32 %v7462_v36  ;;  %vm3163_vm9 = vweird.f32 %v3843_v41  ;;  %v3205_v32 = vand.u32 2147483647, %v7462_v36 }
 0x61a   :  { %v3177_v5 = vmul.f32 %v3845_v33, %v7452_v8  ;;  %3848 = vpow2.f32 %v3578_v17  ;;  %vm3182_vm10 = vweird.f32 %v3845_v33  ;;  %vm3164_vm14 = vmor %vm3162_vm11, %vm3163_vm9  ;;  %v3207_v61 = vand.u32 2147483648, %v7462_v36 }
 0x61b   :  { %v3159_v44 = vsub.f32 1.0, %v3158_v2  ;;  %3850 = vpow2.f32 %v3579_v24  ;;  %vm3183_vm15 = vmor %vm3181_vm12, %vm3182_vm10  ;;  %vm3201_vm2 = vweird.f32 %v7462_v36  ;;  %vm3206_vm4 = vcmp.eq.f32.partialorder %v3205_v32, 8.507059e+37 }
 0x61c   :  { %v3178_v7 = vsub.f32 1.0, %v3177_v5  ;;  %3852 = vtanh.f32 %v3061_v52  ;;  %v3146_v3 = vpop.f32.mrf.mxu3  ;;  %v3126_v50 = vpop.f32.mrf.mxu2  ;;  %v3208_v49 = vor.u32 1.1754944e-38, %v3207_v61 }
 0x61d   :  { %v3160_v20 = vmul.f32 %v3843_v41, %v3159_v44  ;;  %v3152_v59 = vadd.f32 %v3146_v3, %v8567_v14  ;;  %v3151_v47 = vadd.f32 %v3126_v50, %v8570_v12 }
 0x61e   :  { %v3179_v62 = vmul.f32 %v3845_v33, %v3178_v7 }
 0x61f   :  { %v3847_v25 = vpop.eup %3846  ;;  %v3161_v40 = vadd.f32 %v3843_v41, %v3160_v20  ;;  %v3580_v39 = vmul.f32 -1.442695, %v3152_v59 }
 0x620   :  { %v3849_v48 = vpop.eup %3848  ;;  %v3180_v53 = vadd.f32 %v3845_v33, %v3179_v62  ;;  %v3197_v15 = vmul.f32 %v3847_v25, %v7462_v36  ;;  %vm3202_vm1 = vweird.f32 %v3847_v25 }
 0x621   :  { %v3851_v29 = vpop.eup %3850  ;;  %v3165_v23 = vsel %vm3164_vm14, %v3843_v41, %v3161_v40  ;;  %v3219_v4 = vadd.f32 1.0, %v3849_v48  ;;  %3854 = vpow2.f32 %v3580_v39  ;;  %vm3203_vm3 = vmor %vm3201_vm2, %vm3202_vm1 }
 0x622   :  { %v3853_v21 = vpop.eup %3852  ;;  %v3170_v26 = vsel %vm7474_vm13, %v3169_v22, %v3165_v23  ;;  %v3184_v1 = vsel %vm3183_vm15, %v3845_v33, %v3180_v53  ;;  %v3238_v6 = vadd.f32 1.0, %v3851_v29  ;;  %v3198_v38 = vsub.f32 1.0, %v3197_v15  ;;  %v8572_v23 = vld [vmem:[#allocation44_spill] sm:$0xff] }
 0x623   :  { %v3189_v43 = vsel %vm3186_vm0, %v3188_v37, %v3184_v1  ;;  %v3212_v58 = vmul.f32 %v3853_v21, %v3170_v26  ;;  %3856 = vrcp.f32 %v3219_v4  ;;  %v3231_v17 = vand.u32 2147483648, %v3219_v4  ;;  %v8574_v21 = vld [vmem:[#allocation162_spill] sm:$0xff]  ;;  %v8575_v26 = vld [vmem:[#allocation68_spill] sm:$0xff] }
 0x624   :  { %v3211_v8 = vmul.f32 %v3189_v43, %v7397_v42  ;;  %3858 = vrcp.f32 %v3238_v6  ;;  %v3199_v13 = vmul.f32 %v3847_v25, %v3198_v38  ;;  %v3250_v52 = vand.u32 2147483648, %v3238_v6  ;;  %v3611_v38 = vld [vmem:[%s7514_s9] ss:$0 sm:$0xff]  ;;  %s4493_s9 = smov [#allocation20]  }
 0x625   :  { %v3229_v2 = vand.u32 2147483647, %v3219_v4  ;;  %v3248_v36 = vand.u32 2147483647, %v3238_v6  ;;  %vm3225_vm7 = vweird.f32 %v3219_v4  ;;  %vm3244_vm8 = vweird.f32 %v3238_v6  ;;  %s3436_s30 = sshll.u32 %s4493_s9, 4  ;;  %s3437_s30 = int_to_ptr.vmem [resolvable:$true] %s3436_s30 }
 0x626   :  { %v3213_v0 = vadd.f32 %v3212_v58, %v3211_v8  ;;  %v3200_v11 = vadd.f32 %v3847_v25, %v3199_v13  ;;  %v3232_v35 = vor.u32 1.1754944e-38, %v3231_v17  ;;  %v3251_v27 = vor.u32 1.1754944e-38, %v3250_v52  ;;  %v3388_v1 = vpop.f32.mrf.mxu1 }
 0x627   :  { %v3855_v63 = vpop.eup %3854  ;;  %vm3230_vm11 = vcmp.eq.f32.partialorder %v3229_v2, 8.507059e+37  ;;  %vm3249_vm12 = vcmp.eq.f32.partialorder %v3248_v36, 8.507059e+37 }
 0x628   :  { %3860 = vtanh.f32 %v3213_v0  ;;  %v3258_v60 = vadd.f32 1.0, %v3855_v63  ;;  %v3204_v46 = vsel %vm3203_vm3, %v3847_v25, %v3200_v11 }
 0x629   :  { %v3857_v28 = vpop.eup %3856  ;;  %v3209_v18 = vsel %vm3206_vm4, %v3208_v49, %v3204_v46 }
 0x62a   :  { %v3859_v31 = vpop.eup %3858  ;;  %v3221_v42 = vmul.f32 %v3857_v28, %v3219_v4  ;;  %3862 = vrcp.f32 %v3258_v60  ;;  %vm3226_vm5 = vweird.f32 %v3857_v28  ;;  %v3270_v19 = vand.u32 2147483648, %v3258_v60  ;;  %v8573_v4 = vld [vmem:[#allocation72_spill] sm:$0xff] }
 0x62b   :  { %v3240_v54 = vmul.f32 %v3859_v31, %v3238_v6  ;;  %3864 = vtanh.f32 %v3151_v47  ;;  %vm3245_vm6 = vweird.f32 %v3859_v31  ;;  %vm3227_vm9 = vmor %vm3225_vm7, %vm3226_vm5  ;;  %vm3264_vm14 = vweird.f32 %v3258_v60 }
 0x62c   :  { %v3222_v51 = vsub.f32 1.0, %v3221_v42  ;;  %vm3246_vm10 = vmor %vm3244_vm8, %vm3245_vm6  ;;  %v3268_v48 = vand.u32 2147483647, %v3258_v60  ;;  %v3271_v22 = vor.u32 1.1754944e-38, %v3270_v19 }
 0x62d   :  { %v3241_v41 = vsub.f32 1.0, %v3240_v54 }
 0x62e   :  { %v3861_v24 = vpop.eup %3860  ;;  %v3223_v33 = vmul.f32 %v3857_v28, %v3222_v51  ;;  %vm3269_vm0 = vcmp.eq.f32.partialorder %v3268_v48, 8.507059e+37  ;;  %v3391_v6 = vpop.f32.mrf.mxu1 }
 0x62f   :  { %v3242_v45 = vmul.f32 %v3859_v31, %v3241_v41  ;;  %v3215_v5 = vmul.f32 %v3861_v24, %v3209_v18 }
 0x630   :  { %v3863_v44 = vpop.eup %3862  ;;  %v3224_v55 = vadd.f32 %v3857_v28, %v3223_v33 }
 0x631   :  { %v3243_v7 = vadd.f32 %v3859_v31, %v3242_v45  ;;  %v3260_v34 = vmul.f32 %v3863_v44, %v3258_v60  ;;  %3408 = vmatmul.f32.gmra.mxu1 %v3215_v5  ;;  %v3865_v20 = vpop.eup %3864  ;;  %vm3265_vm13 = vweird.f32 %v3863_v44 }
 0x632   :  { %v3228_v3 = vsel %vm3227_vm9, %v3857_v28, %v3224_v55  ;;  %vm3266_vm15 = vmor %vm3264_vm14, %vm3265_vm13 }
 0x633   :  { %v3233_v9 = vsel %vm3230_vm11, %v3232_v35, %v3228_v3  ;;  %v3247_v14 = vsel %vm3246_vm10, %v3859_v31, %v3243_v7  ;;  %v3261_v59 = vsub.f32 1.0, %v3260_v34 }
 0x634   :  { %v3252_v57 = vsel %vm3249_vm12, %v3251_v27, %v3247_v14  ;;  %v3275_v62 = vmul.f32 %v3865_v20, %v3233_v9 }
 0x635   :  { %v3274_v25 = vmul.f32 %v3252_v57, %v7425_v56  ;;  %v3262_v40 = vmul.f32 %v3863_v44, %v3261_v59  ;;  %v8571_v56 = vld [vmem:[#allocation71_spill] sm:$0xff] }
 0x637   :  { %v3276_v16 = vadd.f32 %v3275_v62, %v3274_v25  ;;  %v3263_v39 = vadd.f32 %v3863_v44, %v3262_v40 }
 0x639   :  { %3866 = vtanh.f32 %v3276_v16  ;;  %v3267_v37 = vsel %vm3266_vm15, %v3863_v44, %v3263_v39 }
 0x63a   :  { %v3272_v15 = vsel %vm3269_vm0, %v3271_v22, %v3267_v37 }
 0x63f   :  { %v3867_v53 = vpop.eup %3866 }
 0x640   :  { %v3278_v29 = vmul.f32 %v3867_v53, %v3272_v15 }
 0x642   :  { %3346 = vmatmul.f32.vlgmr.msra.gmra.mxu0 %v3278_v29 }
 0x64a   :  { %3349 = vmatmul.f32.gmra.mxu0 %v7431_v10 }
 0x652   :  { %3352 = vmatmul.f32.gmra.mxu0 %v7284_v30  ;;  %v3394_v30 = vpop.f32.mrf.mxu1 }
 0x65a   :  { %3355 = vmatmul.f32.gmra.mxu0 %v8571_v56  ;;  %v3397_v11 = vpop.f32.mrf.mxu1 }
 0x662   :  { %3358 = vmatmul.f32.gmra.mxu0 %v8572_v23  ;;  %v3400_v12 = vpop.f32.mrf.mxu1 }
 0x66a   :  { %3361 = vmatmul.f32.gmra.mxu0 %v8573_v4  ;;  %v3403_v54 = vpop.f32.mrf.mxu1 }
 0x672   :  { %3364 = vmatmul.f32.gmra.mxu0 %v8574_v21  ;;  %v3406_v41 = vpop.f32.mrf.mxu1 }
 0x67a   :  { %3367 = vmatmul.f32.gmra.mxu0 %v8575_v26 }
 0x6ae   :  { %v3409_v33 = vpop.f32.mrf.mxu1 }
 0x6bf   :  { %v3347_v43 = vpop.f32.mrf.mxu0 }
 0x6c0   :  { %v3389_v10 = vadd.f32 %v3388_v1, %v3347_v43 }
 0x6c2   :  { %v3416_v58 = vadd.f32 %v3611_v38, %v3389_v10 }
 0x6c4   :  { %3424 = vst [vmem:[#allocation20] sm:$0xff] %v3416_v58 }
 0x6c7   :  { %v3350_v8 = vpop.f32.mrf.mxu0 }
 0x6c8   :  { %v3392_v13 = vadd.f32 %v3391_v6, %v3350_v8 }
 0x6ca   :  { %v3417_v0 = vadd.f32 %v3611_v38, %v3392_v13 }
 0x6cc   :  { %3425 = vst [vmem:[#allocation20 + $0x8] sm:$0xff] %v3417_v0 }
 0x6cf   :  { %v3353_v50 = vpop.f32.mrf.mxu0 }
 0x6d0   :  { %v3395_v63 = vadd.f32 %v3394_v30, %v3353_v50 }
 0x6d2   :  { %v3418_v60 = vadd.f32 %v3611_v38, %v3395_v63 }
 0x6d4   :  { %3426 = vst [vmem:[#allocation20 + $0x10] sm:$0xff] %v3418_v60 }
 0x6d7   :  { %v3356_v32 = vpop.f32.mrf.mxu0 }
 0x6d8   :  { %v3398_v61 = vadd.f32 %v3397_v11, %v3356_v32 }
 0x6da   :  { %v3419_v28 = vadd.f32 %v3611_v38, %v3398_v61 }
 0x6dc   :  { %3427 = vst [vmem:[#allocation20 + $0x18] sm:$0xff] %v3419_v28 }
 0x6df   :  { %v3359_v47 = vpop.f32.mrf.mxu0 }
 0x6e0   :  { %v3401_v31 = vadd.f32 %v3400_v12, %v3359_v47 }
 0x6e2   :  { %v3420_v42 = vadd.f32 %v3611_v38, %v3401_v31 }
 0x6e4   :  { %3428 = vst [vmem:[#allocation20 + $0x20] sm:$0xff] %v3420_v42 }
 0x6e7   :  { %v3362_v46 = vpop.f32.mrf.mxu0 }
 0x6e8   :  { %v3404_v51 = vadd.f32 %v3403_v54, %v3362_v46 }
 0x6ea   :  { %v3421_v49 = vadd.f32 %v3611_v38, %v3404_v51 }
 0x6ec   :  { %3429 = vst [vmem:[#allocation20 + $0x28] sm:$0xff] %v3421_v49 }
 0x6ef   :  { %v3365_v52 = vpop.f32.mrf.mxu0 }
 0x6f0   :  { %v3407_v17 = vadd.f32 %v3406_v41, %v3365_v52 }
 0x6f2   :  { %v3422_v24 = vadd.f32 %v3611_v38, %v3407_v17 }
 0x6f4   :  { %3430 = vst [vmem:[#allocation20 + $0x30] sm:$0xff] %v3422_v24 }
 0x6f7   :  { %v3368_v2 = vpop.f32.mrf.mxu0 }
 0x6f8   :  { %v3410_v18 = vadd.f32 %v3409_v33, %v3368_v2 }
 0x6fa   :  { %v3423_v45 = vadd.f32 %v3611_v38, %v3410_v18 }
 0x6fc   :  { %3431 = vst [vmem:[#allocation20 + $0x38] sm:$0xff] %v3423_v45 }
 0x6fd   :  { %3444 = dma.vmem_to_hbm [thread:$0]  %s3437_s30, 1024, %s3439_s14, [#allocation8], %s4486_s13, %s4486_s13, %s4487_s5  }
 0x6fe   :  { %4478 = dma.done.wait [#allocation8], 1024  }
 0x6ff   :  { %4479 = vsyncadd [#allocation8], 4294966272 }
 0x700   :  { %3449 = vsyncpa [#allocation7], 1 }
 0x701   :  { %3450 = vsyncpa [#allocation10], 1 }
 0x702   :  { %3451 = vsyncpa [#allocation13], 1 }
 0x703   :  { %3452 = vsyncpa [#allocation16], 1 }
 0x704   :  { %3453 = vsyncpa [#allocation19], 1 }
 0x705   :  { %3454 = vsyncpa [#allocation8], 1 }

</bundles_post_ra>
